<compile_context>
chip_gen: v7x
topology: tpu7x:2x2x1
jax: 0.10.0
libtpu: 0.0.40
codegen_flags: <defaults>
</compile_context>

<pallas_src>
import functools

import jax
import jax.numpy as jnp
from jax.experimental import pallas as pl
from jax.experimental.pallas import tpu as pltpu

BN_EPS = 1e-5


def _round_up(x, m):
    return (x + m - 1) // m * m


# --------------------------- fused Pallas kernel ---------------------------

def _make_fused_kernel(n_seg, tap_offsets, guard, sp_l):
    """relu(bn2(conv3x3(relu(bn1(conv1x1(concat(segments))))))), one sample/step.

    Ref order: [mask, seg_0..seg_{n-1}, w1_0..w1_{n-1}, shift1, w2_taps,
                shift2, out, hbuf(scratch)].
    """

    def kernel(*refs):
        mask_ref = refs[0]
        seg_refs = refs[1:1 + n_seg]
        w1_refs = refs[1 + n_seg:1 + 2 * n_seg]
        shift1_ref, w2_ref, shift2_ref, o_ref, hbuf_ref = refs[1 + 2 * n_seg:]

        # -- 1x1x1 conv over the dense concatenation: accumulate per-segment
        #    matmuls (bf16 x bf16 -> f32), BN scale already folded into w1.
        acc1 = jnp.dot(w1_refs[0][...], seg_refs[0][...],
                       preferred_element_type=jnp.float32)
        for s in range(1, n_seg):
            acc1 = acc1 + jnp.dot(w1_refs[s][...], seg_refs[s][...],
                                  preferred_element_type=jnp.float32)
        # BN shift + ReLU; the mask zeroes the padding ring so `h` is exactly
        # the zero-padded input the 3x3x3 conv expects.
        h = jnp.maximum(acc1 + shift1_ref[...], 0.0) * mask_ref[...]

        # -- stage h in a guarded VMEM buffer: [zeros | h | zeros]
        c1 = h.shape[0]
        zeros_g = jnp.zeros((c1, guard), jnp.float32)
        hbuf_ref[:, :guard] = zeros_g
        hbuf_ref[:, guard + sp_l:guard + sp_l + guard] = zeros_g
        hbuf_ref[:, guard:guard + sp_l] = h

        # -- 3x3x3 conv as 27 shifted-window matmuls (no im2col).
        acc2 = None
        for t, off in enumerate(tap_offsets):
            start = guard + off                      # static python int >= 0
            win = hbuf_ref[:, start:start + sp_l]    # (C1, SPL) f32
            part = jnp.dot(w2_ref[t], win, preferred_element_type=jnp.float32)
            acc2 = part if acc2 is None else acc2 + part

        y = jnp.maximum(acc2 + shift2_ref[...], 0.0) * mask_ref[...]
        o_ref[...] = y.astype(o_ref.dtype)

    return kernel


def fused_1x1_then_3x3(segments, w1_list, shift1, w2_taps, shift2, mask,
                       spatial):
    """One fused (1x1x1 conv+BN+ReLU) -> (3x3x3 conv+BN+ReLU) pass.

    segments : list of (N, C_i, SPL) bf16 activations (zero ring/tail kept).
    w1_list  : list of (C1, C_i) bf16 folded weights (one per concat segment).
    shift1   : (C1, 1) f32;  w2_taps: (27, C2, C1) f32;  shift2: (C2, 1) f32.
    mask     : (1, SPL) f32 interior mask.
    Returns (N, C2, SPL) bf16 with the zero ring/tail maintained.
    """
    n_seg = len(segments)
    N, _, sp_l = segments[0].shape
    D, H, W = spatial
    hp, wp = H + 2, W + 2
    guard = _round_up(hp * wp + wp + 1, 128)  # 128-aligned halo guard
    c1 = w1_list[0].shape[0]
    c2 = w2_taps.shape[1]
    # flat offset of tap (kd, kh, kw) relative to the output center
    tap_offsets = tuple((kd - 1) * hp * wp + (kh - 1) * wp + (kw - 1)
                        for kd in range(3) for kh in range(3)
                        for kw in range(3))

    kernel = _make_fused_kernel(n_seg, tap_offsets, guard, sp_l)

    in_specs = [pl.BlockSpec((1, sp_l), lambda n: (0, 0))]            # mask
    for seg in segments:
        in_specs.append(pl.BlockSpec((pl.Squeezed(), seg.shape[1], sp_l),
                                     lambda n: (n, 0, 0)))
    for w1 in w1_list:
        in_specs.append(pl.BlockSpec(w1.shape, lambda n: (0, 0)))
    in_specs.append(pl.BlockSpec((c1, 1), lambda n: (0, 0)))          # shift1
    in_specs.append(pl.BlockSpec(w2_taps.shape, lambda n: (0, 0, 0)))  # w2
    in_specs.append(pl.BlockSpec((c2, 1), lambda n: (0, 0)))          # shift2

    out_spec = pl.BlockSpec((pl.Squeezed(), c2, sp_l), lambda n: (n, 0, 0))

    # TODO(synk): for very large volumes, tile D with halo DMA instead of
    # keeping one whole padded sample (all segments + hbuf) resident in VMEM.
    return pl.pallas_call(
        kernel,
        out_shape=jax.ShapeDtypeStruct((N, c2, sp_l), jnp.bfloat16),
        grid_spec=pltpu.PrefetchScalarGridSpec(
            num_scalar_prefetch=0,
            grid=(N,),
            in_specs=in_specs,
            out_specs=out_spec,
            scratch_shapes=[pltpu.VMEM((c1, sp_l + 2 * guard), jnp.float32)],
        ),
        compiler_params=pltpu.CompilerParams(
            dimension_semantics=("parallel",)),
    )(mask, *segments, *w1_list, shift1, w2_taps, shift2)


# --------------------------- params & BN folding ---------------------------

def _init_conv_bn(key, cin, cout, ksize):
    """Deterministic Conv3d(ksize) + BatchNorm3d params (PyTorch weight layout)."""
    kw_, kb, kg, kbt, km, kv = jax.random.split(key, 6)
    fan_in = cin * ksize ** 3
    w = jax.random.normal(kw_, (cout, cin, ksize, ksize, ksize),
                          jnp.float32) / jnp.sqrt(float(fan_in))
    b = 0.1 * jax.random.normal(kb, (cout,), jnp.float32)
    gamma = 1.0 + 0.1 * jax.random.normal(kg, (cout,), jnp.float32)
    beta = 0.1 * jax.random.normal(kbt, (cout,), jnp.float32)
    rmean = 0.1 * jax.random.normal(km, (cout,), jnp.float32)
    rvar = 1.0 + 0.1 * jax.random.uniform(kv, (cout,), jnp.float32)
    return dict(w=w, b=b, gamma=gamma, beta=beta, rmean=rmean, rvar=rvar)


def _fold_1x1(p):
    """conv1x1+BN -> (w (Cout,Cin) with BN scale folded, shift (Cout,1))."""
    scale = p["gamma"] / jnp.sqrt(p["rvar"] + BN_EPS)
    w = p["w"][:, :, 0, 0, 0] * scale[:, None]
    shift = (p["beta"] + (p["b"] - p["rmean"]) * scale)[:, None]
    return w, shift


def _fold_3x3(p):
    """conv3x3+BN -> (w_taps (27,Cout,Cin) with BN scale folded, shift)."""
    scale = p["gamma"] / jnp.sqrt(p["rvar"] + BN_EPS)
    w = p["w"] * scale[:, None, None, None, None]          # (Cout,Cin,3,3,3)
    w_taps = jnp.transpose(w, (2, 3, 4, 0, 1)).reshape(27, w.shape[0],
                                                       w.shape[1])
    shift = (p["beta"] + (p["b"] - p["rmean"]) * scale)[:, None]
    return w_taps, shift


def init_dense_unit_params(key, in_channels, out_channels, subunits=2):
    keys = jax.random.split(key, 2 * subunits + 2)
    layers = []
    for i in range(subunits):
        cin = in_channels + i * out_channels
        conv1 = _init_conv_bn(keys[2 * i], cin, out_channels, 1)
        conv2 = _init_conv_bn(keys[2 * i + 1], out_channels, out_channels, 3)
        layers.append((conv1, conv2))
    merge = _init_conv_bn(keys[-2], in_channels + subunits * out_channels,
                          out_channels, 1)
    transition = _init_conv_bn(keys[-1], out_channels, out_channels, 3)
    return dict(layers=layers, merge=merge, transition=transition)


# --------------------------------- forward ---------------------------------

def dense_unit_forward(x_ncdhw, params, strides=1):
    """DenseUnit forward (DenseBlock + TransitionLayer). NCDHW f32 in/out."""
    # TODO(synk): BatchNorm3d is evaluated in inference mode (folded running
    # stats); training-mode batch statistics are not computed in-kernel.
    N, _, D, H, W = x_ncdhw.shape
    dp, hp, wp = D + 2, H + 2, W + 2
    sp = dp * hp * wp
    sp_l = _round_up(sp, 128)
    spatial = (D, H, W)

    # interior mask over the padded + lane-padded flat spatial axis
    mask = jnp.pad(jnp.ones((D, H, W), jnp.float32), 1).reshape(-1)
    mask = jnp.pad(mask, (0, sp_l - sp)).reshape(1, sp_l)

    def to_flat(a):  # (N, C, D, H, W) f32 -> (N, C, SPL) bf16, zero ring/tail
        c = a.shape[1]
        a = jnp.pad(a, ((0, 0), (0, 0), (1, 1), (1, 1), (1, 1)))
        a = a.reshape(N, c, sp)
        return jnp.pad(a, ((0, 0), (0, 0), (0, sp_l - sp))).astype(jnp.bfloat16)

    def split_w1(w_full, segs):  # split folded 1x1 weight per concat segment
        out, off = [], 0
        for seg in segs:
            c = seg.shape[1]
            out.append(w_full[:, off:off + c].astype(jnp.bfloat16))
            off += c
        return out

    feats = [to_flat(x_ncdhw.astype(jnp.float32))]

    # DenseBlock: BottleneckLayers; the dense concat is handled as segments.
    for conv1, conv2 in params["layers"]:
        w1, s1 = _fold_1x1(conv1)
        w2, s2 = _fold_3x3(conv2)
        f = fused_1x1_then_3x3(feats, split_w1(w1, feats), s1, w2, s2, mask,
                               spatial)
        feats.append(f)

    # merge (1x1x1 conv+BN+ReLU) fused with the TransitionLayer 3x3x3 conv.
    wm, sm = _fold_1x1(params["merge"])
    wt, st = _fold_3x3(params["transition"])
    y = fused_1x1_then_3x3(feats, split_w1(wm, feats), sm, wt, st, mask,
                           spatial)

    # back to dense NCDHW, apply the transition stride, cast to f32
    cout = y.shape[1]
    y = y[:, :, :sp].reshape(N, cout, dp, hp, wp).astype(jnp.float32)
    y = y[:, :, 1:D + 1, 1:H + 1, 1:W + 1]
    if strides != 1:
        y = y[:, :, ::strides, ::strides, ::strides]
    return y


# ----------------------------------- demo -----------------------------------

if __name__ == "__main__":
    key = jax.random.PRNGKey(0)
    k_x, k_p = jax.random.split(key)

    in_channels, out_channels, subunits, strides = 4, 4, 2, 1
    N, D, H, W = 2, 8, 8, 8
    x = jax.random.normal(k_x, (N, in_channels, D, H, W), jnp.float32)

    params = init_dense_unit_params(k_p, in_channels, out_channels, subunits)

    fwd = jax.jit(functools.partial(dense_unit_forward, strides=strides))
    y = fwd(x, params)
    jax.block_until_ready(y)

    assert y.shape == (N, out_channels, D, H, W), y.shape
    assert bool(jnp.all(jnp.isfinite(y)))
    print("KERNEL_OK")
</pallas_src>

<mosaic_0001>
module attributes {stable_mosaic.version = 11 : i64} {
  func.func @kernel(%arg0: i32, %arg1: memref<1x1024xf32, #tpu.memory_space<vmem>>, %arg2: memref<1x4x1024xbf16, #tpu.memory_space<vmem>>, %arg3: memref<1x4x1024xbf16, #tpu.memory_space<vmem>>, %arg4: memref<4x4xbf16, #tpu.memory_space<vmem>>, %arg5: memref<4x4xbf16, #tpu.memory_space<vmem>>, %arg6: memref<4x1xf32, #tpu.memory_space<vmem>>, %arg7: memref<27x4x4xf32, #tpu.memory_space<vmem>>, %arg8: memref<4x1xf32, #tpu.memory_space<vmem>>, %arg9: memref<1x4x1024xbf16, #tpu.memory_space<vmem>>, %arg10: memref<4x1280xf32, #tpu.memory_space<vmem>>) attributes {dimension_semantics = [#tpu.dimension_semantics<parallel>], iteration_bounds = array<i64: 2>, scalar_prefetch = 0 : i64, scratch_operands = 1 : i64, tpu.core_type = #tpu.core_type<tc>, window_params = [{pipeline_mode = #tpu.pipeline_mode<synchronous>, transform_indices = @transform_0, window_bounds = array<i64: 1, 1024>}, {transform_indices = @transform_1, window_bounds = array<i64: 1, 4, 1024>}, {transform_indices = @transform_2, window_bounds = array<i64: 1, 4, 1024>}, {pipeline_mode = #tpu.pipeline_mode<synchronous>, transform_indices = @transform_3, window_bounds = array<i64: 4, 4>}, {pipeline_mode = #tpu.pipeline_mode<synchronous>, transform_indices = @transform_4, window_bounds = array<i64: 4, 4>}, {pipeline_mode = #tpu.pipeline_mode<synchronous>, transform_indices = @transform_5, window_bounds = array<i64: 4, 1>}, {pipeline_mode = #tpu.pipeline_mode<synchronous>, transform_indices = @transform_6, window_bounds = array<i64: 27, 4, 4>}, {pipeline_mode = #tpu.pipeline_mode<synchronous>, transform_indices = @transform_7, window_bounds = array<i64: 4, 1>}, {transform_indices = @transform_8, window_bounds = array<i64: 1, 4, 1024>}]} {
    %c0 = arith.constant 0 : index
    %c0_0 = arith.constant 0 : index
    %0 = vector.load %arg4[%c0, %c0_0] : memref<4x4xbf16, #tpu.memory_space<vmem>>, vector<4x4xbf16>
    %c0_1 = arith.constant 0 : index
    %c0_2 = arith.constant 0 : index
    %c0_3 = arith.constant 0 : index
    %1 = vector.load %arg2[%c0_1, %c0_2, %c0_3] : memref<1x4x1024xbf16, #tpu.memory_space<vmem>>, vector<1x4x1024xbf16>
    %2 = vector.shape_cast %1 : vector<1x4x1024xbf16> to vector<4x1024xbf16>
    %cst = arith.constant dense<0.000000e+00> : vector<4x1024xf32>
    %3 = tpu.matmul %0, %2, %cst {dimension_numbers = #tpu.dot_dimension_numbers<[1], [0], [0], [1], [0, 0, 1, 1], [], []>} : vector<4x4xbf16>, vector<4x1024xbf16>, vector<4x1024xf32> -> vector<4x1024xf32>
    %c0_4 = arith.constant 0 : index
    %c0_5 = arith.constant 0 : index
    %4 = vector.load %arg5[%c0_4, %c0_5] : memref<4x4xbf16, #tpu.memory_space<vmem>>, vector<4x4xbf16>
    %c0_6 = arith.constant 0 : index
    %c0_7 = arith.constant 0 : index
    %c0_8 = arith.constant 0 : index
    %5 = vector.load %arg3[%c0_6, %c0_7, %c0_8] : memref<1x4x1024xbf16, #tpu.memory_space<vmem>>, vector<1x4x1024xbf16>
    %6 = vector.shape_cast %5 : vector<1x4x1024xbf16> to vector<4x1024xbf16>
    %cst_9 = arith.constant dense<0.000000e+00> : vector<4x1024xf32>
    %7 = tpu.matmul %4, %6, %cst_9 {dimension_numbers = #tpu.dot_dimension_numbers<[1], [0], [0], [1], [0, 0, 1, 1], [], []>} : vector<4x4xbf16>, vector<4x1024xbf16>, vector<4x1024xf32> -> vector<4x1024xf32>
    %8 = arith.addf %3, %7 : vector<4x1024xf32>
    %c0_10 = arith.constant 0 : index
    %c0_11 = arith.constant 0 : index
    %9 = vector.load %arg6[%c0_10, %c0_11] : memref<4x1xf32, #tpu.memory_space<vmem>>, vector<4x1xf32>
    %10 = vector.broadcast %9 : vector<4x1xf32> to vector<4x1024xf32>
    %11 = arith.addf %8, %10 : vector<4x1024xf32>
    %cst_12 = arith.constant 0.000000e+00 : f32
    %12 = vector.broadcast %cst_12 : f32 to vector<4x1024xf32>
    %13 = arith.maximumf %11, %12 : vector<4x1024xf32>
    %c0_13 = arith.constant 0 : index
    %c0_14 = arith.constant 0 : index
    %14 = vector.load %arg1[%c0_13, %c0_14] : memref<1x1024xf32, #tpu.memory_space<vmem>>, vector<1x1024xf32>
    %15 = vector.broadcast %14 : vector<1x1024xf32> to vector<4x1024xf32>
    %16 = arith.mulf %13, %15 : vector<4x1024xf32>
    %cst_15 = arith.constant 0.000000e+00 : f32
    %17 = vector.broadcast %cst_15 : f32 to vector<4x128xf32>
    %c0_16 = arith.constant 0 : index
    %c0_17 = arith.constant 0 : index
    %18 = vector.load %arg10[%c0_16, %c0_17] : memref<4x1280xf32, #tpu.memory_space<vmem>>, vector<4x128xf32>
    tpu.vector_store %arg10[%c0_16, %c0_17], %17 {strides = array<i32>} : memref<4x1280xf32, #tpu.memory_space<vmem>>, vector<4x128xf32>,
    %c0_18 = arith.constant 0 : index
    %c1152 = arith.constant 1152 : index
    %19 = vector.load %arg10[%c0_18, %c1152] : memref<4x1280xf32, #tpu.memory_space<vmem>>, vector<4x128xf32>
    tpu.vector_store %arg10[%c0_18, %c1152], %17 {strides = array<i32>} : memref<4x1280xf32, #tpu.memory_space<vmem>>, vector<4x128xf32>,
    %c0_19 = arith.constant 0 : index
    %c128 = arith.constant 128 : index
    %20 = vector.load %arg10[%c0_19, %c128] : memref<4x1280xf32, #tpu.memory_space<vmem>>, vector<4x1024xf32>
    tpu.vector_store %arg10[%c0_19, %c128], %16 {strides = array<i32>} : memref<4x1280xf32, #tpu.memory_space<vmem>>, vector<4x1024xf32>,
    %c0_20 = arith.constant 0 : index
    %c17 = arith.constant 17 : index
    %21 = vector.load %arg10[%c0_20, %c17] : memref<4x1280xf32, #tpu.memory_space<vmem>>, vector<4x1024xf32>
    %c0_21 = arith.constant 0 : index
    %c0_22 = arith.constant 0 : index
    %c0_23 = arith.constant 0 : index
    %22 = vector.load %arg7[%c0_21, %c0_22, %c0_23] : memref<27x4x4xf32, #tpu.memory_space<vmem>>, vector<1x4x4xf32>
    %23 = vector.shape_cast %22 : vector<1x4x4xf32> to vector<4x4xf32>
    %cst_24 = arith.constant dense<0.000000e+00> : vector<4x1024xf32>
    %24 = tpu.matmul %23, %21, %cst_24 {dimension_numbers = #tpu.dot_dimension_numbers<[1], [0], [0], [1], [0, 0, 1, 1], [], []>} : vector<4x4xf32>, vector<4x1024xf32>, vector<4x1024xf32> -> vector<4x1024xf32>
    %c0_25 = arith.constant 0 : index
    %c18 = arith.constant 18 : index
    %25 = vector.load %arg10[%c0_25, %c18] : memref<4x1280xf32, #tpu.memory_space<vmem>>, vector<4x1024xf32>
    %c1 = arith.constant 1 : index
    %c0_26 = arith.constant 0 : index
    %c0_27 = arith.constant 0 : index
    %26 = vector.load %arg7[%c1, %c0_26, %c0_27] : memref<27x4x4xf32, #tpu.memory_space<vmem>>, vector<1x4x4xf32>
    %27 = vector.shape_cast %26 : vector<1x4x4xf32> to vector<4x4xf32>
    %cst_28 = arith.constant dense<0.000000e+00> : vector<4x1024xf32>
    %28 = tpu.matmul %27, %25, %cst_28 {dimension_numbers = #tpu.dot_dimension_numbers<[1], [0], [0], [1], [0, 0, 1, 1], [], []>} : vector<4x4xf32>, vector<4x1024xf32>, vector<4x1024xf32> -> vector<4x1024xf32>
    %29 = arith.addf %24, %28 : vector<4x1024xf32>
    %c0_29 = arith.constant 0 : index
    %c19 = arith.constant 19 : index
    %30 = vector.load %arg10[%c0_29, %c19] : memref<4x1280xf32, #tpu.memory_space<vmem>>, vector<4x1024xf32>
    %c2 = arith.constant 2 : index
    %c0_30 = arith.constant 0 : index
    %c0_31 = arith.constant 0 : index
    %31 = vector.load %arg7[%c2, %c0_30, %c0_31] : memref<27x4x4xf32, #tpu.memory_space<vmem>>, vector<1x4x4xf32>
    %32 = vector.shape_cast %31 : vector<1x4x4xf32> to vector<4x4xf32>
    %cst_32 = arith.constant dense<0.000000e+00> : vector<4x1024xf32>
    %33 = tpu.matmul %32, %30, %cst_32 {dimension_numbers = #tpu.dot_dimension_numbers<[1], [0], [0], [1], [0, 0, 1, 1], [], []>} : vector<4x4xf32>, vector<4x1024xf32>, vector<4x1024xf32> -> vector<4x1024xf32>
    %34 = arith.addf %29, %33 : vector<4x1024xf32>
    %c0_33 = arith.constant 0 : index
    %c27 = arith.constant 27 : index
    %35 = vector.load %arg10[%c0_33, %c27] : memref<4x1280xf32, #tpu.memory_space<vmem>>, vector<4x1024xf32>
    %c3 = arith.constant 3 : index
    %c0_34 = arith.constant 0 : index
    %c0_35 = arith.constant 0 : index
    %36 = vector.load %arg7[%c3, %c0_34, %c0_35] : memref<27x4x4xf32, #tpu.memory_space<vmem>>, vector<1x4x4xf32>
    %37 = vector.shape_cast %36 : vector<1x4x4xf32> to vector<4x4xf32>
    %cst_36 = arith.constant dense<0.000000e+00> : vector<4x1024xf32>
    %38 = tpu.matmul %37, %35, %cst_36 {dimension_numbers = #tpu.dot_dimension_numbers<[1], [0], [0], [1], [0, 0, 1, 1], [], []>} : vector<4x4xf32>, vector<4x1024xf32>, vector<4x1024xf32> -> vector<4x1024xf32>
    %39 = arith.addf %34, %38 : vector<4x1024xf32>
    %c0_37 = arith.constant 0 : index
    %c28 = arith.constant 28 : index
    %40 = vector.load %arg10[%c0_37, %c28] : memref<4x1280xf32, #tpu.memory_space<vmem>>, vector<4x1024xf32>
    %c4 = arith.constant 4 : index
    %c0_38 = arith.constant 0 : index
    %c0_39 = arith.constant 0 : index
    %41 = vector.load %arg7[%c4, %c0_38, %c0_39] : memref<27x4x4xf32, #tpu.memory_space<vmem>>, vector<1x4x4xf32>
    %42 = vector.shape_cast %41 : vector<1x4x4xf32> to vector<4x4xf32>
    %cst_40 = arith.constant dense<0.000000e+00> : vector<4x1024xf32>
    %43 = tpu.matmul %42, %40, %cst_40 {dimension_numbers = #tpu.dot_dimension_numbers<[1], [0], [0], [1], [0, 0, 1, 1], [], []>} : vector<4x4xf32>, vector<4x1024xf32>, vector<4x1024xf32> -> vector<4x1024xf32>
    %44 = arith.addf %39, %43 : vector<4x1024xf32>
    %c0_41 = arith.constant 0 : index
    %c29 = arith.constant 29 : index
    %45 = vector.load %arg10[%c0_41, %c29] : memref<4x1280xf32, #tpu.memory_space<vmem>>, vector<4x1024xf32>
    %c5 = arith.constant 5 : index
    %c0_42 = arith.constant 0 : index
    %c0_43 = arith.constant 0 : index
    %46 = vector.load %arg7[%c5, %c0_42, %c0_43] : memref<27x4x4xf32, #tpu.memory_space<vmem>>, vector<1x4x4xf32>
    %47 = vector.shape_cast %46 : vector<1x4x4xf32> to vector<4x4xf32>
    %cst_44 = arith.constant dense<0.000000e+00> : vector<4x1024xf32>
    %48 = tpu.matmul %47, %45, %cst_44 {dimension_numbers = #tpu.dot_dimension_numbers<[1], [0], [0], [1], [0, 0, 1, 1], [], []>} : vector<4x4xf32>, vector<4x1024xf32>, vector<4x1024xf32> -> vector<4x1024xf32>
    %49 = arith.addf %44, %48 : vector<4x1024xf32>
    %c0_45 = arith.constant 0 : index
    %c37 = arith.constant 37 : index
    %50 = vector.load %arg10[%c0_45, %c37] : memref<4x1280xf32, #tpu.memory_space<vmem>>, vector<4x1024xf32>
    %c6 = arith.constant 6 : index
    %c0_46 = arith.constant 0 : index
    %c0_47 = arith.constant 0 : index
    %51 = vector.load %arg7[%c6, %c0_46, %c0_47] : memref<27x4x4xf32, #tpu.memory_space<vmem>>, vector<1x4x4xf32>
    %52 = vector.shape_cast %51 : vector<1x4x4xf32> to vector<4x4xf32>
    %cst_48 = arith.constant dense<0.000000e+00> : vector<4x1024xf32>
    %53 = tpu.matmul %52, %50, %cst_48 {dimension_numbers = #tpu.dot_dimension_numbers<[1], [0], [0], [1], [0, 0, 1, 1], [], []>} : vector<4x4xf32>, vector<4x1024xf32>, vector<4x1024xf32> -> vector<4x1024xf32>
    %54 = arith.addf %49, %53 : vector<4x1024xf32>
    %c0_49 = arith.constant 0 : index
    %c38 = arith.constant 38 : index
    %55 = vector.load %arg10[%c0_49, %c38] : memref<4x1280xf32, #tpu.memory_space<vmem>>, vector<4x1024xf32>
    %c7 = arith.constant 7 : index
    %c0_50 = arith.constant 0 : index
    %c0_51 = arith.constant 0 : index
    %56 = vector.load %arg7[%c7, %c0_50, %c0_51] : memref<27x4x4xf32, #tpu.memory_space<vmem>>, vector<1x4x4xf32>
    %57 = vector.shape_cast %56 : vector<1x4x4xf32> to vector<4x4xf32>
    %cst_52 = arith.constant dense<0.000000e+00> : vector<4x1024xf32>
    %58 = tpu.matmul %57, %55, %cst_52 {dimension_numbers = #tpu.dot_dimension_numbers<[1], [0], [0], [1], [0, 0, 1, 1], [], []>} : vector<4x4xf32>, vector<4x1024xf32>, vector<4x1024xf32> -> vector<4x1024xf32>
    %59 = arith.addf %54, %58 : vector<4x1024xf32>
    %c0_53 = arith.constant 0 : index
    %c39 = arith.constant 39 : index
    %60 = vector.load %arg10[%c0_53, %c39] : memref<4x1280xf32, #tpu.memory_space<vmem>>, vector<4x1024xf32>
    %c8 = arith.constant 8 : index
    %c0_54 = arith.constant 0 : index
    %c0_55 = arith.constant 0 : index
    %61 = vector.load %arg7[%c8, %c0_54, %c0_55] : memref<27x4x4xf32, #tpu.memory_space<vmem>>, vector<1x4x4xf32>
    %62 = vector.shape_cast %61 : vector<1x4x4xf32> to vector<4x4xf32>
    %cst_56 = arith.constant dense<0.000000e+00> : vector<4x1024xf32>
    %63 = tpu.matmul %62, %60, %cst_56 {dimension_numbers = #tpu.dot_dimension_numbers<[1], [0], [0], [1], [0, 0, 1, 1], [], []>} : vector<4x4xf32>, vector<4x1024xf32>, vector<4x1024xf32> -> vector<4x1024xf32>
    %64 = arith.addf %59, %63 : vector<4x1024xf32>
    %c0_57 = arith.constant 0 : index
    %c117 = arith.constant 117 : index
    %65 = vector.load %arg10[%c0_57, %c117] : memref<4x1280xf32, #tpu.memory_space<vmem>>, vector<4x1024xf32>
    %c9 = arith.constant 9 : index
    %c0_58 = arith.constant 0 : index
    %c0_59 = arith.constant 0 : index
    %66 = vector.load %arg7[%c9, %c0_58, %c0_59] : memref<27x4x4xf32, #tpu.memory_space<vmem>>, vector<1x4x4xf32>
    %67 = vector.shape_cast %66 : vector<1x4x4xf32> to vector<4x4xf32>
    %cst_60 = arith.constant dense<0.000000e+00> : vector<4x1024xf32>
    %68 = tpu.matmul %67, %65, %cst_60 {dimension_numbers = #tpu.dot_dimension_numbers<[1], [0], [0], [1], [0, 0, 1, 1], [], []>} : vector<4x4xf32>, vector<4x1024xf32>, vector<4x1024xf32> -> vector<4x1024xf32>
    %69 = arith.addf %64, %68 : vector<4x1024xf32>
    %c0_61 = arith.constant 0 : index
    %c118 = arith.constant 118 : index
    %70 = vector.load %arg10[%c0_61, %c118] : memref<4x1280xf32, #tpu.memory_space<vmem>>, vector<4x1024xf32>
    %c10 = arith.constant 10 : index
    %c0_62 = arith.constant 0 : index
    %c0_63 = arith.constant 0 : index
    %71 = vector.load %arg7[%c10, %c0_62, %c0_63] : memref<27x4x4xf32, #tpu.memory_space<vmem>>, vector<1x4x4xf32>
    %72 = vector.shape_cast %71 : vector<1x4x4xf32> to vector<4x4xf32>
    %cst_64 = arith.constant dense<0.000000e+00> : vector<4x1024xf32>
    %73 = tpu.matmul %72, %70, %cst_64 {dimension_numbers = #tpu.dot_dimension_numbers<[1], [0], [0], [1], [0, 0, 1, 1], [], []>} : vector<4x4xf32>, vector<4x1024xf32>, vector<4x1024xf32> -> vector<4x1024xf32>
    %74 = arith.addf %69, %73 : vector<4x1024xf32>
    %c0_65 = arith.constant 0 : index
    %c119 = arith.constant 119 : index
    %75 = vector.load %arg10[%c0_65, %c119] : memref<4x1280xf32, #tpu.memory_space<vmem>>, vector<4x1024xf32>
    %c11 = arith.constant 11 : index
    %c0_66 = arith.constant 0 : index
    %c0_67 = arith.constant 0 : index
    %76 = vector.load %arg7[%c11, %c0_66, %c0_67] : memref<27x4x4xf32, #tpu.memory_space<vmem>>, vector<1x4x4xf32>
    %77 = vector.shape_cast %76 : vector<1x4x4xf32> to vector<4x4xf32>
    %cst_68 = arith.constant dense<0.000000e+00> : vector<4x1024xf32>
    %78 = tpu.matmul %77, %75, %cst_68 {dimension_numbers = #tpu.dot_dimension_numbers<[1], [0], [0], [1], [0, 0, 1, 1], [], []>} : vector<4x4xf32>, vector<4x1024xf32>, vector<4x1024xf32> -> vector<4x1024xf32>
    %79 = arith.addf %74, %78 : vector<4x1024xf32>
    %c0_69 = arith.constant 0 : index
    %c127 = arith.constant 127 : index
    %80 = vector.load %arg10[%c0_69, %c127] : memref<4x1280xf32, #tpu.memory_space<vmem>>, vector<4x1024xf32>
    %c12 = arith.constant 12 : index
    %c0_70 = arith.constant 0 : index
    %c0_71 = arith.constant 0 : index
    %81 = vector.load %arg7[%c12, %c0_70, %c0_71] : memref<27x4x4xf32, #tpu.memory_space<vmem>>, vector<1x4x4xf32>
    %82 = vector.shape_cast %81 : vector<1x4x4xf32> to vector<4x4xf32>
    %cst_72 = arith.constant dense<0.000000e+00> : vector<4x1024xf32>
    %83 = tpu.matmul %82, %80, %cst_72 {dimension_numbers = #tpu.dot_dimension_numbers<[1], [0], [0], [1], [0, 0, 1, 1], [], []>} : vector<4x4xf32>, vector<4x1024xf32>, vector<4x1024xf32> -> vector<4x1024xf32>
    %84 = arith.addf %79, %83 : vector<4x1024xf32>
    %c0_73 = arith.constant 0 : index
    %c128_74 = arith.constant 128 : index
    %85 = vector.load %arg10[%c0_73, %c128_74] : memref<4x1280xf32, #tpu.memory_space<vmem>>, vector<4x1024xf32>
    %c13 = arith.constant 13 : index
    %c0_75 = arith.constant 0 : index
    %c0_76 = arith.constant 0 : index
    %86 = vector.load %arg7[%c13, %c0_75, %c0_76] : memref<27x4x4xf32, #tpu.memory_space<vmem>>, vector<1x4x4xf32>
    %87 = vector.shape_cast %86 : vector<1x4x4xf32> to vector<4x4xf32>
    %cst_77 = arith.constant dense<0.000000e+00> : vector<4x1024xf32>
    %88 = tpu.matmul %87, %85, %cst_77 {dimension_numbers = #tpu.dot_dimension_numbers<[1], [0], [0], [1], [0, 0, 1, 1], [], []>} : vector<4x4xf32>, vector<4x1024xf32>, vector<4x1024xf32> -> vector<4x1024xf32>
    %89 = arith.addf %84, %88 : vector<4x1024xf32>
    %c0_78 = arith.constant 0 : index
    %c129 = arith.constant 129 : index
    %90 = vector.load %arg10[%c0_78, %c129] : memref<4x1280xf32, #tpu.memory_space<vmem>>, vector<4x1024xf32>
    %c14 = arith.constant 14 : index
    %c0_79 = arith.constant 0 : index
    %c0_80 = arith.constant 0 : index
    %91 = vector.load %arg7[%c14, %c0_79, %c0_80] : memref<27x4x4xf32, #tpu.memory_space<vmem>>, vector<1x4x4xf32>
    %92 = vector.shape_cast %91 : vector<1x4x4xf32> to vector<4x4xf32>
    %cst_81 = arith.constant dense<0.000000e+00> : vector<4x1024xf32>
    %93 = tpu.matmul %92, %90, %cst_81 {dimension_numbers = #tpu.dot_dimension_numbers<[1], [0], [0], [1], [0, 0, 1, 1], [], []>} : vector<4x4xf32>, vector<4x1024xf32>, vector<4x1024xf32> -> vector<4x1024xf32>
    %94 = arith.addf %89, %93 : vector<4x1024xf32>
    %c0_82 = arith.constant 0 : index
    %c137 = arith.constant 137 : index
    %95 = vector.load %arg10[%c0_82, %c137] : memref<4x1280xf32, #tpu.memory_space<vmem>>, vector<4x1024xf32>
    %c15 = arith.constant 15 : index
    %c0_83 = arith.constant 0 : index
    %c0_84 = arith.constant 0 : index
    %96 = vector.load %arg7[%c15, %c0_83, %c0_84] : memref<27x4x4xf32, #tpu.memory_space<vmem>>, vector<1x4x4xf32>
    %97 = vector.shape_cast %96 : vector<1x4x4xf32> to vector<4x4xf32>
    %cst_85 = arith.constant dense<0.000000e+00> : vector<4x1024xf32>
    %98 = tpu.matmul %97, %95, %cst_85 {dimension_numbers = #tpu.dot_dimension_numbers<[1], [0], [0], [1], [0, 0, 1, 1], [], []>} : vector<4x4xf32>, vector<4x1024xf32>, vector<4x1024xf32> -> vector<4x1024xf32>
    %99 = arith.addf %94, %98 : vector<4x1024xf32>
    %c0_86 = arith.constant 0 : index
    %c138 = arith.constant 138 : index
    %100 = vector.load %arg10[%c0_86, %c138] : memref<4x1280xf32, #tpu.memory_space<vmem>>, vector<4x1024xf32>
    %c16 = arith.constant 16 : index
    %c0_87 = arith.constant 0 : index
    %c0_88 = arith.constant 0 : index
    %101 = vector.load %arg7[%c16, %c0_87, %c0_88] : memref<27x4x4xf32, #tpu.memory_space<vmem>>, vector<1x4x4xf32>
    %102 = vector.shape_cast %101 : vector<1x4x4xf32> to vector<4x4xf32>
    %cst_89 = arith.constant dense<0.000000e+00> : vector<4x1024xf32>
    %103 = tpu.matmul %102, %100, %cst_89 {dimension_numbers = #tpu.dot_dimension_numbers<[1], [0], [0], [1], [0, 0, 1, 1], [], []>} : vector<4x4xf32>, vector<4x1024xf32>, vector<4x1024xf32> -> vector<4x1024xf32>
    %104 = arith.addf %99, %103 : vector<4x1024xf32>
    %c0_90 = arith.constant 0 : index
    %c139 = arith.constant 139 : index
    %105 = vector.load %arg10[%c0_90, %c139] : memref<4x1280xf32, #tpu.memory_space<vmem>>, vector<4x1024xf32>
    %c17_91 = arith.constant 17 : index
    %c0_92 = arith.constant 0 : index
    %c0_93 = arith.constant 0 : index
    %106 = vector.load %arg7[%c17_91, %c0_92, %c0_93] : memref<27x4x4xf32, #tpu.memory_space<vmem>>, vector<1x4x4xf32>
    %107 = vector.shape_cast %106 : vector<1x4x4xf32> to vector<4x4xf32>
    %cst_94 = arith.constant dense<0.000000e+00> : vector<4x1024xf32>
    %108 = tpu.matmul %107, %105, %cst_94 {dimension_numbers = #tpu.dot_dimension_numbers<[1], [0], [0], [1], [0, 0, 1, 1], [], []>} : vector<4x4xf32>, vector<4x1024xf32>, vector<4x1024xf32> -> vector<4x1024xf32>
    %109 = arith.addf %104, %108 : vector<4x1024xf32>
    %c0_95 = arith.constant 0 : index
    %c217 = arith.constant 217 : index
    %110 = vector.load %arg10[%c0_95, %c217] : memref<4x1280xf32, #tpu.memory_space<vmem>>, vector<4x1024xf32>
    %c18_96 = arith.constant 18 : index
    %c0_97 = arith.constant 0 : index
    %c0_98 = arith.constant 0 : index
    %111 = vector.load %arg7[%c18_96, %c0_97, %c0_98] : memref<27x4x4xf32, #tpu.memory_space<vmem>>, vector<1x4x4xf32>
    %112 = vector.shape_cast %111 : vector<1x4x4xf32> to vector<4x4xf32>
    %cst_99 = arith.constant dense<0.000000e+00> : vector<4x1024xf32>
    %113 = tpu.matmul %112, %110, %cst_99 {dimension_numbers = #tpu.dot_dimension_numbers<[1], [0], [0], [1], [0, 0, 1, 1], [], []>} : vector<4x4xf32>, vector<4x1024xf32>, vector<4x1024xf32> -> vector<4x1024xf32>
    %114 = arith.addf %109, %113 : vector<4x1024xf32>
    %c0_100 = arith.constant 0 : index
    %c218 = arith.constant 218 : index
    %115 = vector.load %arg10[%c0_100, %c218] : memref<4x1280xf32, #tpu.memory_space<vmem>>, vector<4x1024xf32>
    %c19_101 = arith.constant 19 : index
    %c0_102 = arith.constant 0 : index
    %c0_103 = arith.constant 0 : index
    %116 = vector.load %arg7[%c19_101, %c0_102, %c0_103] : memref<27x4x4xf32, #tpu.memory_space<vmem>>, vector<1x4x4xf32>
    %117 = vector.shape_cast %116 : vector<1x4x4xf32> to vector<4x4xf32>
    %cst_104 = arith.constant dense<0.000000e+00> : vector<4x1024xf32>
    %118 = tpu.matmul %117, %115, %cst_104 {dimension_numbers = #tpu.dot_dimension_numbers<[1], [0], [0], [1], [0, 0, 1, 1], [], []>} : vector<4x4xf32>, vector<4x1024xf32>, vector<4x1024xf32> -> vector<4x1024xf32>
    %119 = arith.addf %114, %118 : vector<4x1024xf32>
    %c0_105 = arith.constant 0 : index
    %c219 = arith.constant 219 : index
    %120 = vector.load %arg10[%c0_105, %c219] : memref<4x1280xf32, #tpu.memory_space<vmem>>, vector<4x1024xf32>
    %c20 = arith.constant 20 : index
    %c0_106 = arith.constant 0 : index
    %c0_107 = arith.constant 0 : index
    %121 = vector.load %arg7[%c20, %c0_106, %c0_107] : memref<27x4x4xf32, #tpu.memory_space<vmem>>, vector<1x4x4xf32>
    %122 = vector.shape_cast %121 : vector<1x4x4xf32> to vector<4x4xf32>
    %cst_108 = arith.constant dense<0.000000e+00> : vector<4x1024xf32>
    %123 = tpu.matmul %122, %120, %cst_108 {dimension_numbers = #tpu.dot_dimension_numbers<[1], [0], [0], [1], [0, 0, 1, 1], [], []>} : vector<4x4xf32>, vector<4x1024xf32>, vector<4x1024xf32> -> vector<4x1024xf32>
    %124 = arith.addf %119, %123 : vector<4x1024xf32>
    %c0_109 = arith.constant 0 : index
    %c227 = arith.constant 227 : index
    %125 = vector.load %arg10[%c0_109, %c227] : memref<4x1280xf32, #tpu.memory_space<vmem>>, vector<4x1024xf32>
    %c21 = arith.constant 21 : index
    %c0_110 = arith.constant 0 : index
    %c0_111 = arith.constant 0 : index
    %126 = vector.load %arg7[%c21, %c0_110, %c0_111] : memref<27x4x4xf32, #tpu.memory_space<vmem>>, vector<1x4x4xf32>
    %127 = vector.shape_cast %126 : vector<1x4x4xf32> to vector<4x4xf32>
    %cst_112 = arith.constant dense<0.000000e+00> : vector<4x1024xf32>
    %128 = tpu.matmul %127, %125, %cst_112 {dimension_numbers = #tpu.dot_dimension_numbers<[1], [0], [0], [1], [0, 0, 1, 1], [], []>} : vector<4x4xf32>, vector<4x1024xf32>, vector<4x1024xf32> -> vector<4x1024xf32>
    %129 = arith.addf %124, %128 : vector<4x1024xf32>
    %c0_113 = arith.constant 0 : index
    %c228 = arith.constant 228 : index
    %130 = vector.load %arg10[%c0_113, %c228] : memref<4x1280xf32, #tpu.memory_space<vmem>>, vector<4x1024xf32>
    %c22 = arith.constant 22 : index
    %c0_114 = arith.constant 0 : index
    %c0_115 = arith.constant 0 : index
    %131 = vector.load %arg7[%c22, %c0_114, %c0_115] : memref<27x4x4xf32, #tpu.memory_space<vmem>>, vector<1x4x4xf32>
    %132 = vector.shape_cast %131 : vector<1x4x4xf32> to vector<4x4xf32>
    %cst_116 = arith.constant dense<0.000000e+00> : vector<4x1024xf32>
    %133 = tpu.matmul %132, %130, %cst_116 {dimension_numbers = #tpu.dot_dimension_numbers<[1], [0], [0], [1], [0, 0, 1, 1], [], []>} : vector<4x4xf32>, vector<4x1024xf32>, vector<4x1024xf32> -> vector<4x1024xf32>
    %134 = arith.addf %129, %133 : vector<4x1024xf32>
    %c0_117 = arith.constant 0 : index
    %c229 = arith.constant 229 : index
    %135 = vector.load %arg10[%c0_117, %c229] : memref<4x1280xf32, #tpu.memory_space<vmem>>, vector<4x1024xf32>
    %c23 = arith.constant 23 : index
    %c0_118 = arith.constant 0 : index
    %c0_119 = arith.constant 0 : index
    %136 = vector.load %arg7[%c23, %c0_118, %c0_119] : memref<27x4x4xf32, #tpu.memory_space<vmem>>, vector<1x4x4xf32>
    %137 = vector.shape_cast %136 : vector<1x4x4xf32> to vector<4x4xf32>
    %cst_120 = arith.constant dense<0.000000e+00> : vector<4x1024xf32>
    %138 = tpu.matmul %137, %135, %cst_120 {dimension_numbers = #tpu.dot_dimension_numbers<[1], [0], [0], [1], [0, 0, 1, 1], [], []>} : vector<4x4xf32>, vector<4x1024xf32>, vector<4x1024xf32> -> vector<4x1024xf32>
    %139 = arith.addf %134, %138 : vector<4x1024xf32>
    %c0_121 = arith.constant 0 : index
    %c237 = arith.constant 237 : index
    %140 = vector.load %arg10[%c0_121, %c237] : memref<4x1280xf32, #tpu.memory_space<vmem>>, vector<4x1024xf32>
    %c24 = arith.constant 24 : index
    %c0_122 = arith.constant 0 : index
    %c0_123 = arith.constant 0 : index
    %141 = vector.load %arg7[%c24, %c0_122, %c0_123] : memref<27x4x4xf32, #tpu.memory_space<vmem>>, vector<1x4x4xf32>
    %142 = vector.shape_cast %141 : vector<1x4x4xf32> to vector<4x4xf32>
    %cst_124 = arith.constant dense<0.000000e+00> : vector<4x1024xf32>
    %143 = tpu.matmul %142, %140, %cst_124 {dimension_numbers = #tpu.dot_dimension_numbers<[1], [0], [0], [1], [0, 0, 1, 1], [], []>} : vector<4x4xf32>, vector<4x1024xf32>, vector<4x1024xf32> -> vector<4x1024xf32>
    %144 = arith.addf %139, %143 : vector<4x1024xf32>
    %c0_125 = arith.constant 0 : index
    %c238 = arith.constant 238 : index
    %145 = vector.load %arg10[%c0_125, %c238] : memref<4x1280xf32, #tpu.memory_space<vmem>>, vector<4x1024xf32>
    %c25 = arith.constant 25 : index
    %c0_126 = arith.constant 0 : index
    %c0_127 = arith.constant 0 : index
    %146 = vector.load %arg7[%c25, %c0_126, %c0_127] : memref<27x4x4xf32, #tpu.memory_space<vmem>>, vector<1x4x4xf32>
    %147 = vector.shape_cast %146 : vector<1x4x4xf32> to vector<4x4xf32>
    %cst_128 = arith.constant dense<0.000000e+00> : vector<4x1024xf32>
    %148 = tpu.matmul %147, %145, %cst_128 {dimension_numbers = #tpu.dot_dimension_numbers<[1], [0], [0], [1], [0, 0, 1, 1], [], []>} : vector<4x4xf32>, vector<4x1024xf32>, vector<4x1024xf32> -> vector<4x1024xf32>
    %149 = arith.addf %144, %148 : vector<4x1024xf32>
    %c0_129 = arith.constant 0 : index
    %c239 = arith.constant 239 : index
    %150 = vector.load %arg10[%c0_129, %c239] : memref<4x1280xf32, #tpu.memory_space<vmem>>, vector<4x1024xf32>
    %c26 = arith.constant 26 : index
    %c0_130 = arith.constant 0 : index
    %c0_131 = arith.constant 0 : index
    %151 = vector.load %arg7[%c26, %c0_130, %c0_131] : memref<27x4x4xf32, #tpu.memory_space<vmem>>, vector<1x4x4xf32>
    %152 = vector.shape_cast %151 : vector<1x4x4xf32> to vector<4x4xf32>
    %cst_132 = arith.constant dense<0.000000e+00> : vector<4x1024xf32>
    %153 = tpu.matmul %152, %150, %cst_132 {dimension_numbers = #tpu.dot_dimension_numbers<[1], [0], [0], [1], [0, 0, 1, 1], [], []>} : vector<4x4xf32>, vector<4x1024xf32>, vector<4x1024xf32> -> vector<4x1024xf32>
    %154 = arith.addf %149, %153 : vector<4x1024xf32>
    %c0_133 = arith.constant 0 : index
    %c0_134 = arith.constant 0 : index
    %155 = vector.load %arg8[%c0_133, %c0_134] : memref<4x1xf32, #tpu.memory_space<vmem>>, vector<4x1xf32>
    %156 = vector.broadcast %155 : vector<4x1xf32> to vector<4x1024xf32>
    %157 = arith.addf %154, %156 : vector<4x1024xf32>
    %cst_135 = arith.constant 0.000000e+00 : f32
    %158 = vector.broadcast %cst_135 : f32 to vector<4x1024xf32>
    %159 = arith.maximumf %157, %158 : vector<4x1024xf32>
    %c0_136 = arith.constant 0 : index
    %c0_137 = arith.constant 0 : index
    %160 = vector.load %arg1[%c0_136, %c0_137] : memref<1x1024xf32, #tpu.memory_space<vmem>>, vector<1x1024xf32>
    %161 = vector.broadcast %160 : vector<1x1024xf32> to vector<4x1024xf32>
    %162 = arith.mulf %159, %161 : vector<4x1024xf32>
    %163 = arith.truncf %162 : vector<4x1024xf32> to vector<4x1024xbf16>
    %c0_138 = arith.constant 0 : index
    %c0_139 = arith.constant 0 : index
    %c0_140 = arith.constant 0 : index
    %164 = vector.load %arg9[%c0_138, %c0_139, %c0_140] : memref<1x4x1024xbf16, #tpu.memory_space<vmem>>, vector<1x4x1024xbf16>
    %165 = vector.shape_cast %164 : vector<1x4x1024xbf16> to vector<4x1024xbf16>
    %166 = vector.shape_cast %163 : vector<4x1024xbf16> to vector<1x4x1024xbf16>
    tpu.vector_store %arg9[%c0_138, %c0_139, %c0_140], %166 {strides = array<i32>} : memref<1x4x1024xbf16, #tpu.memory_space<vmem>>, vector<1x4x1024xbf16>,
    return
  }
  func.func @transform_0(%arg0: i32) -> (i32, i32) {
    %c0_i32 = arith.constant 0 : i32
    %c0_i32_0 = arith.constant 0 : i32
    %c0_i32_1 = arith.constant 0 : i32
    return %c0_i32, %c0_i32_0 : i32, i32
  }
  func.func @transform_1(%arg0: i32) -> (i32, i32, i32) {
    %c0_i32 = arith.constant 0 : i32
    %c0_i32_0 = arith.constant 0 : i32
    %c0_i32_1 = arith.constant 0 : i32
    return %arg0, %c0_i32, %c0_i32_0 : i32, i32, i32
  }
  func.func @transform_2(%arg0: i32) -> (i32, i32, i32) {
    %c0_i32 = arith.constant 0 : i32
    %c0_i32_0 = arith.constant 0 : i32
    %c0_i32_1 = arith.constant 0 : i32
    return %arg0, %c0_i32, %c0_i32_0 : i32, i32, i32
  }
  func.func @transform_3(%arg0: i32) -> (i32, i32) {
    %c0_i32 = arith.constant 0 : i32
    %c0_i32_0 = arith.constant 0 : i32
    %c0_i32_1 = arith.constant 0 : i32
    return %c0_i32, %c0_i32_0 : i32, i32
  }
  func.func @transform_4(%arg0: i32) -> (i32, i32) {
    %c0_i32 = arith.constant 0 : i32
    %c0_i32_0 = arith.constant 0 : i32
    %c0_i32_1 = arith.constant 0 : i32
    return %c0_i32, %c0_i32_0 : i32, i32
  }
  func.func @transform_5(%arg0: i32) -> (i32, i32) {
    %c0_i32 = arith.constant 0 : i32
    %c0_i32_0 = arith.constant 0 : i32
    %c0_i32_1 = arith.constant 0 : i32
    return %c0_i32, %c0_i32_0 : i32, i32
  }
  func.func @transform_6(%arg0: i32) -> (i32, i32, i32) {
    %c0_i32 = arith.constant 0 : i32
    %c0_i32_0 = arith.constant 0 : i32
    %c0_i32_1 = arith.constant 0 : i32
    %c0_i32_2 = arith.constant 0 : i32
    return %c0_i32, %c0_i32_0, %c0_i32_1 : i32, i32, i32
  }
  func.func @transform_7(%arg0: i32) -> (i32, i32) {
    %c0_i32 = arith.constant 0 : i32
    %c0_i32_0 = arith.constant 0 : i32
    %c0_i32_1 = arith.constant 0 : i32
    return %c0_i32, %c0_i32_0 : i32, i32
  }
  func.func @transform_8(%arg0: i32) -> (i32, i32, i32) {
    %c0_i32 = arith.constant 0 : i32
    %c0_i32_0 = arith.constant 0 : i32
    %c0_i32_1 = arith.constant 0 : i32
    return %arg0, %c0_i32, %c0_i32_0 : i32, i32, i32
  }
}

module attributes {stable_mosaic.version = 11 : i64} {
  func.func @kernel(%arg0: i32, %arg1: memref<1x1024xf32, #tpu.memory_space<vmem>>, %arg2: memref<1x4x1024xbf16, #tpu.memory_space<vmem>>, %arg3: memref<4x4xbf16, #tpu.memory_space<vmem>>, %arg4: memref<4x1xf32, #tpu.memory_space<vmem>>, %arg5: memref<27x4x4xf32, #tpu.memory_space<vmem>>, %arg6: memref<4x1xf32, #tpu.memory_space<vmem>>, %arg7: memref<1x4x1024xbf16, #tpu.memory_space<vmem>>, %arg8: memref<4x1280xf32, #tpu.memory_space<vmem>>) attributes {dimension_semantics = [#tpu.dimension_semantics<parallel>], iteration_bounds = array<i64: 2>, scalar_prefetch = 0 : i64, scratch_operands = 1 : i64, tpu.core_type = #tpu.core_type<tc>, window_params = [{pipeline_mode = #tpu.pipeline_mode<synchronous>, transform_indices = @transform_0, window_bounds = array<i64: 1, 1024>}, {transform_indices = @transform_1, window_bounds = array<i64: 1, 4, 1024>}, {pipeline_mode = #tpu.pipeline_mode<synchronous>, transform_indices = @transform_2, window_bounds = array<i64: 4, 4>}, {pipeline_mode = #tpu.pipeline_mode<synchronous>, transform_indices = @transform_3, window_bounds = array<i64: 4, 1>}, {pipeline_mode = #tpu.pipeline_mode<synchronous>, transform_indices = @transform_4, window_bounds = array<i64: 27, 4, 4>}, {pipeline_mode = #tpu.pipeline_mode<synchronous>, transform_indices = @transform_5, window_bounds = array<i64: 4, 1>}, {transform_indices = @transform_6, window_bounds = array<i64: 1, 4, 1024>}]} {
    %c0 = arith.constant 0 : index
    %c0_0 = arith.constant 0 : index
    %0 = vector.load %arg3[%c0, %c0_0] : memref<4x4xbf16, #tpu.memory_space<vmem>>, vector<4x4xbf16>
    %c0_1 = arith.constant 0 : index
    %c0_2 = arith.constant 0 : index
    %c0_3 = arith.constant 0 : index
    %1 = vector.load %arg2[%c0_1, %c0_2, %c0_3] : memref<1x4x1024xbf16, #tpu.memory_space<vmem>>, vector<1x4x1024xbf16>
    %2 = vector.shape_cast %1 : vector<1x4x1024xbf16> to vector<4x1024xbf16>
    %cst = arith.constant dense<0.000000e+00> : vector<4x1024xf32>
    %3 = tpu.matmul %0, %2, %cst {dimension_numbers = #tpu.dot_dimension_numbers<[1], [0], [0], [1], [0, 0, 1, 1], [], []>} : vector<4x4xbf16>, vector<4x1024xbf16>, vector<4x1024xf32> -> vector<4x1024xf32>
    %c0_4 = arith.constant 0 : index
    %c0_5 = arith.constant 0 : index
    %4 = vector.load %arg4[%c0_4, %c0_5] : memref<4x1xf32, #tpu.memory_space<vmem>>, vector<4x1xf32>
    %5 = vector.broadcast %4 : vector<4x1xf32> to vector<4x1024xf32>
    %6 = arith.addf %3, %5 : vector<4x1024xf32>
    %cst_6 = arith.constant 0.000000e+00 : f32
    %7 = vector.broadcast %cst_6 : f32 to vector<4x1024xf32>
    %8 = arith.maximumf %6, %7 : vector<4x1024xf32>
    %c0_7 = arith.constant 0 : index
    %c0_8 = arith.constant 0 : index
    %9 = vector.load %arg1[%c0_7, %c0_8] : memref<1x1024xf32, #tpu.memory_space<vmem>>, vector<1x1024xf32>
    %10 = vector.broadcast %9 : vector<1x1024xf32> to vector<4x1024xf32>
    %11 = arith.mulf %8, %10 : vector<4x1024xf32>
    %cst_9 = arith.constant 0.000000e+00 : f32
    %12 = vector.broadcast %cst_9 : f32 to vector<4x128xf32>
    %c0_10 = arith.constant 0 : index
    %c0_11 = arith.constant 0 : index
    %13 = vector.load %arg8[%c0_10, %c0_11] : memref<4x1280xf32, #tpu.memory_space<vmem>>, vector<4x128xf32>
    tpu.vector_store %arg8[%c0_10, %c0_11], %12 {strides = array<i32>} : memref<4x1280xf32, #tpu.memory_space<vmem>>, vector<4x128xf32>,
    %c0_12 = arith.constant 0 : index
    %c1152 = arith.constant 1152 : index
    %14 = vector.load %arg8[%c0_12, %c1152] : memref<4x1280xf32, #tpu.memory_space<vmem>>, vector<4x128xf32>
    tpu.vector_store %arg8[%c0_12, %c1152], %12 {strides = array<i32>} : memref<4x1280xf32, #tpu.memory_space<vmem>>, vector<4x128xf32>,
    %c0_13 = arith.constant 0 : index
    %c128 = arith.constant 128 : index
    %15 = vector.load %arg8[%c0_13, %c128] : memref<4x1280xf32, #tpu.memory_space<vmem>>, vector<4x1024xf32>
    tpu.vector_store %arg8[%c0_13, %c128], %11 {strides = array<i32>} : memref<4x1280xf32, #tpu.memory_space<vmem>>, vector<4x1024xf32>,
    %c0_14 = arith.constant 0 : index
    %c17 = arith.constant 17 : index
    %16 = vector.load %arg8[%c0_14, %c17] : memref<4x1280xf32, #tpu.memory_space<vmem>>, vector<4x1024xf32>
    %c0_15 = arith.constant 0 : index
    %c0_16 = arith.constant 0 : index
    %c0_17 = arith.constant 0 : index
    %17 = vector.load %arg5[%c0_15, %c0_16, %c0_17] : memref<27x4x4xf32, #tpu.memory_space<vmem>>, vector<1x4x4xf32>
    %18 = vector.shape_cast %17 : vector<1x4x4xf32> to vector<4x4xf32>
    %cst_18 = arith.constant dense<0.000000e+00> : vector<4x1024xf32>
    %19 = tpu.matmul %18, %16, %cst_18 {dimension_numbers = #tpu.dot_dimension_numbers<[1], [0], [0], [1], [0, 0, 1, 1], [], []>} : vector<4x4xf32>, vector<4x1024xf32>, vector<4x1024xf32> -> vector<4x1024xf32>
    %c0_19 = arith.constant 0 : index
    %c18 = arith.constant 18 : index
    %20 = vector.load %arg8[%c0_19, %c18] : memref<4x1280xf32, #tpu.memory_space<vmem>>, vector<4x1024xf32>
    %c1 = arith.constant 1 : index
    %c0_20 = arith.constant 0 : index
    %c0_21 = arith.constant 0 : index
    %21 = vector.load %arg5[%c1, %c0_20, %c0_21] : memref<27x4x4xf32, #tpu.memory_space<vmem>>, vector<1x4x4xf32>
    %22 = vector.shape_cast %21 : vector<1x4x4xf32> to vector<4x4xf32>
    %cst_22 = arith.constant dense<0.000000e+00> : vector<4x1024xf32>
    %23 = tpu.matmul %22, %20, %cst_22 {dimension_numbers = #tpu.dot_dimension_numbers<[1], [0], [0], [1], [0, 0, 1, 1], [], []>} : vector<4x4xf32>, vector<4x1024xf32>, vector<4x1024xf32> -> vector<4x1024xf32>
    %24 = arith.addf %19, %23 : vector<4x1024xf32>
    %c0_23 = arith.constant 0 : index
    %c19 = arith.constant 19 : index
    %25 = vector.load %arg8[%c0_23, %c19] : memref<4x1280xf32, #tpu.memory_space<vmem>>, vector<4x1024xf32>
    %c2 = arith.constant 2 : index
    %c0_24 = arith.constant 0 : index
    %c0_25 = arith.constant 0 : index
    %26 = vector.load %arg5[%c2, %c0_24, %c0_25] : memref<27x4x4xf32, #tpu.memory_space<vmem>>, vector<1x4x4xf32>
    %27 = vector.shape_cast %26 : vector<1x4x4xf32> to vector<4x4xf32>
    %cst_26 = arith.constant dense<0.000000e+00> : vector<4x1024xf32>
    %28 = tpu.matmul %27, %25, %cst_26 {dimension_numbers = #tpu.dot_dimension_numbers<[1], [0], [0], [1], [0, 0, 1, 1], [], []>} : vector<4x4xf32>, vector<4x1024xf32>, vector<4x1024xf32> -> vector<4x1024xf32>
    %29 = arith.addf %24, %28 : vector<4x1024xf32>
    %c0_27 = arith.constant 0 : index
    %c27 = arith.constant 27 : index
    %30 = vector.load %arg8[%c0_27, %c27] : memref<4x1280xf32, #tpu.memory_space<vmem>>, vector<4x1024xf32>
    %c3 = arith.constant 3 : index
    %c0_28 = arith.constant 0 : index
    %c0_29 = arith.constant 0 : index
    %31 = vector.load %arg5[%c3, %c0_28, %c0_29] : memref<27x4x4xf32, #tpu.memory_space<vmem>>, vector<1x4x4xf32>
    %32 = vector.shape_cast %31 : vector<1x4x4xf32> to vector<4x4xf32>
    %cst_30 = arith.constant dense<0.000000e+00> : vector<4x1024xf32>
    %33 = tpu.matmul %32, %30, %cst_30 {dimension_numbers = #tpu.dot_dimension_numbers<[1], [0], [0], [1], [0, 0, 1, 1], [], []>} : vector<4x4xf32>, vector<4x1024xf32>, vector<4x1024xf32> -> vector<4x1024xf32>
    %34 = arith.addf %29, %33 : vector<4x1024xf32>
    %c0_31 = arith.constant 0 : index
    %c28 = arith.constant 28 : index
    %35 = vector.load %arg8[%c0_31, %c28] : memref<4x1280xf32, #tpu.memory_space<vmem>>, vector<4x1024xf32>
    %c4 = arith.constant 4 : index
    %c0_32 = arith.constant 0 : index
    %c0_33 = arith.constant 0 : index
    %36 = vector.load %arg5[%c4, %c0_32, %c0_33] : memref<27x4x4xf32, #tpu.memory_space<vmem>>, vector<1x4x4xf32>
    %37 = vector.shape_cast %36 : vector<1x4x4xf32> to vector<4x4xf32>
    %cst_34 = arith.constant dense<0.000000e+00> : vector<4x1024xf32>
    %38 = tpu.matmul %37, %35, %cst_34 {dimension_numbers = #tpu.dot_dimension_numbers<[1], [0], [0], [1], [0, 0, 1, 1], [], []>} : vector<4x4xf32>, vector<4x1024xf32>, vector<4x1024xf32> -> vector<4x1024xf32>
    %39 = arith.addf %34, %38 : vector<4x1024xf32>
    %c0_35 = arith.constant 0 : index
    %c29 = arith.constant 29 : index
    %40 = vector.load %arg8[%c0_35, %c29] : memref<4x1280xf32, #tpu.memory_space<vmem>>, vector<4x1024xf32>
    %c5 = arith.constant 5 : index
    %c0_36 = arith.constant 0 : index
    %c0_37 = arith.constant 0 : index
    %41 = vector.load %arg5[%c5, %c0_36, %c0_37] : memref<27x4x4xf32, #tpu.memory_space<vmem>>, vector<1x4x4xf32>
    %42 = vector.shape_cast %41 : vector<1x4x4xf32> to vector<4x4xf32>
    %cst_38 = arith.constant dense<0.000000e+00> : vector<4x1024xf32>
    %43 = tpu.matmul %42, %40, %cst_38 {dimension_numbers = #tpu.dot_dimension_numbers<[1], [0], [0], [1], [0, 0, 1, 1], [], []>} : vector<4x4xf32>, vector<4x1024xf32>, vector<4x1024xf32> -> vector<4x1024xf32>
    %44 = arith.addf %39, %43 : vector<4x1024xf32>
    %c0_39 = arith.constant 0 : index
    %c37 = arith.constant 37 : index
    %45 = vector.load %arg8[%c0_39, %c37] : memref<4x1280xf32, #tpu.memory_space<vmem>>, vector<4x1024xf32>
    %c6 = arith.constant 6 : index
    %c0_40 = arith.constant 0 : index
    %c0_41 = arith.constant 0 : index
    %46 = vector.load %arg5[%c6, %c0_40, %c0_41] : memref<27x4x4xf32, #tpu.memory_space<vmem>>, vector<1x4x4xf32>
    %47 = vector.shape_cast %46 : vector<1x4x4xf32> to vector<4x4xf32>
    %cst_42 = arith.constant dense<0.000000e+00> : vector<4x1024xf32>
    %48 = tpu.matmul %47, %45, %cst_42 {dimension_numbers = #tpu.dot_dimension_numbers<[1], [0], [0], [1], [0, 0, 1, 1], [], []>} : vector<4x4xf32>, vector<4x1024xf32>, vector<4x1024xf32> -> vector<4x1024xf32>
    %49 = arith.addf %44, %48 : vector<4x1024xf32>
    %c0_43 = arith.constant 0 : index
    %c38 = arith.constant 38 : index
    %50 = vector.load %arg8[%c0_43, %c38] : memref<4x1280xf32, #tpu.memory_space<vmem>>, vector<4x1024xf32>
    %c7 = arith.constant 7 : index
    %c0_44 = arith.constant 0 : index
    %c0_45 = arith.constant 0 : index
    %51 = vector.load %arg5[%c7, %c0_44, %c0_45] : memref<27x4x4xf32, #tpu.memory_space<vmem>>, vector<1x4x4xf32>
    %52 = vector.shape_cast %51 : vector<1x4x4xf32> to vector<4x4xf32>
    %cst_46 = arith.constant dense<0.000000e+00> : vector<4x1024xf32>
    %53 = tpu.matmul %52, %50, %cst_46 {dimension_numbers = #tpu.dot_dimension_numbers<[1], [0], [0], [1], [0, 0, 1, 1], [], []>} : vector<4x4xf32>, vector<4x1024xf32>, vector<4x1024xf32> -> vector<4x1024xf32>
    %54 = arith.addf %49, %53 : vector<4x1024xf32>
    %c0_47 = arith.constant 0 : index
    %c39 = arith.constant 39 : index
    %55 = vector.load %arg8[%c0_47, %c39] : memref<4x1280xf32, #tpu.memory_space<vmem>>, vector<4x1024xf32>
    %c8 = arith.constant 8 : index
    %c0_48 = arith.constant 0 : index
    %c0_49 = arith.constant 0 : index
    %56 = vector.load %arg5[%c8, %c0_48, %c0_49] : memref<27x4x4xf32, #tpu.memory_space<vmem>>, vector<1x4x4xf32>
    %57 = vector.shape_cast %56 : vector<1x4x4xf32> to vector<4x4xf32>
    %cst_50 = arith.constant dense<0.000000e+00> : vector<4x1024xf32>
    %58 = tpu.matmul %57, %55, %cst_50 {dimension_numbers = #tpu.dot_dimension_numbers<[1], [0], [0], [1], [0, 0, 1, 1], [], []>} : vector<4x4xf32>, vector<4x1024xf32>, vector<4x1024xf32> -> vector<4x1024xf32>
    %59 = arith.addf %54, %58 : vector<4x1024xf32>
    %c0_51 = arith.constant 0 : index
    %c117 = arith.constant 117 : index
    %60 = vector.load %arg8[%c0_51, %c117] : memref<4x1280xf32, #tpu.memory_space<vmem>>, vector<4x1024xf32>
    %c9 = arith.constant 9 : index
    %c0_52 = arith.constant 0 : index
    %c0_53 = arith.constant 0 : index
    %61 = vector.load %arg5[%c9, %c0_52, %c0_53] : memref<27x4x4xf32, #tpu.memory_space<vmem>>, vector<1x4x4xf32>
    %62 = vector.shape_cast %61 : vector<1x4x4xf32> to vector<4x4xf32>
    %cst_54 = arith.constant dense<0.000000e+00> : vector<4x1024xf32>
    %63 = tpu.matmul %62, %60, %cst_54 {dimension_numbers = #tpu.dot_dimension_numbers<[1], [0], [0], [1], [0, 0, 1, 1], [], []>} : vector<4x4xf32>, vector<4x1024xf32>, vector<4x1024xf32> -> vector<4x1024xf32>
    %64 = arith.addf %59, %63 : vector<4x1024xf32>
    %c0_55 = arith.constant 0 : index
    %c118 = arith.constant 118 : index
    %65 = vector.load %arg8[%c0_55, %c118] : memref<4x1280xf32, #tpu.memory_space<vmem>>, vector<4x1024xf32>
    %c10 = arith.constant 10 : index
    %c0_56 = arith.constant 0 : index
    %c0_57 = arith.constant 0 : index
    %66 = vector.load %arg5[%c10, %c0_56, %c0_57] : memref<27x4x4xf32, #tpu.memory_space<vmem>>, vector<1x4x4xf32>
    %67 = vector.shape_cast %66 : vector<1x4x4xf32> to vector<4x4xf32>
    %cst_58 = arith.constant dense<0.000000e+00> : vector<4x1024xf32>
    %68 = tpu.matmul %67, %65, %cst_58 {dimension_numbers = #tpu.dot_dimension_numbers<[1], [0], [0], [1], [0, 0, 1, 1], [], []>} : vector<4x4xf32>, vector<4x1024xf32>, vector<4x1024xf32> -> vector<4x1024xf32>
    %69 = arith.addf %64, %68 : vector<4x1024xf32>
    %c0_59 = arith.constant 0 : index
    %c119 = arith.constant 119 : index
    %70 = vector.load %arg8[%c0_59, %c119] : memref<4x1280xf32, #tpu.memory_space<vmem>>, vector<4x1024xf32>
    %c11 = arith.constant 11 : index
    %c0_60 = arith.constant 0 : index
    %c0_61 = arith.constant 0 : index
    %71 = vector.load %arg5[%c11, %c0_60, %c0_61] : memref<27x4x4xf32, #tpu.memory_space<vmem>>, vector<1x4x4xf32>
    %72 = vector.shape_cast %71 : vector<1x4x4xf32> to vector<4x4xf32>
    %cst_62 = arith.constant dense<0.000000e+00> : vector<4x1024xf32>
    %73 = tpu.matmul %72, %70, %cst_62 {dimension_numbers = #tpu.dot_dimension_numbers<[1], [0], [0], [1], [0, 0, 1, 1], [], []>} : vector<4x4xf32>, vector<4x1024xf32>, vector<4x1024xf32> -> vector<4x1024xf32>
    %74 = arith.addf %69, %73 : vector<4x1024xf32>
    %c0_63 = arith.constant 0 : index
    %c127 = arith.constant 127 : index
    %75 = vector.load %arg8[%c0_63, %c127] : memref<4x1280xf32, #tpu.memory_space<vmem>>, vector<4x1024xf32>
    %c12 = arith.constant 12 : index
    %c0_64 = arith.constant 0 : index
    %c0_65 = arith.constant 0 : index
    %76 = vector.load %arg5[%c12, %c0_64, %c0_65] : memref<27x4x4xf32, #tpu.memory_space<vmem>>, vector<1x4x4xf32>
    %77 = vector.shape_cast %76 : vector<1x4x4xf32> to vector<4x4xf32>
    %cst_66 = arith.constant dense<0.000000e+00> : vector<4x1024xf32>
    %78 = tpu.matmul %77, %75, %cst_66 {dimension_numbers = #tpu.dot_dimension_numbers<[1], [0], [0], [1], [0, 0, 1, 1], [], []>} : vector<4x4xf32>, vector<4x1024xf32>, vector<4x1024xf32> -> vector<4x1024xf32>
    %79 = arith.addf %74, %78 : vector<4x1024xf32>
    %c0_67 = arith.constant 0 : index
    %c128_68 = arith.constant 128 : index
    %80 = vector.load %arg8[%c0_67, %c128_68] : memref<4x1280xf32, #tpu.memory_space<vmem>>, vector<4x1024xf32>
    %c13 = arith.constant 13 : index
    %c0_69 = arith.constant 0 : index
    %c0_70 = arith.constant 0 : index
    %81 = vector.load %arg5[%c13, %c0_69, %c0_70] : memref<27x4x4xf32, #tpu.memory_space<vmem>>, vector<1x4x4xf32>
    %82 = vector.shape_cast %81 : vector<1x4x4xf32> to vector<4x4xf32>
    %cst_71 = arith.constant dense<0.000000e+00> : vector<4x1024xf32>
    %83 = tpu.matmul %82, %80, %cst_71 {dimension_numbers = #tpu.dot_dimension_numbers<[1], [0], [0], [1], [0, 0, 1, 1], [], []>} : vector<4x4xf32>, vector<4x1024xf32>, vector<4x1024xf32> -> vector<4x1024xf32>
    %84 = arith.addf %79, %83 : vector<4x1024xf32>
    %c0_72 = arith.constant 0 : index
    %c129 = arith.constant 129 : index
    %85 = vector.load %arg8[%c0_72, %c129] : memref<4x1280xf32, #tpu.memory_space<vmem>>, vector<4x1024xf32>
    %c14 = arith.constant 14 : index
    %c0_73 = arith.constant 0 : index
    %c0_74 = arith.constant 0 : index
    %86 = vector.load %arg5[%c14, %c0_73, %c0_74] : memref<27x4x4xf32, #tpu.memory_space<vmem>>, vector<1x4x4xf32>
    %87 = vector.shape_cast %86 : vector<1x4x4xf32> to vector<4x4xf32>
    %cst_75 = arith.constant dense<0.000000e+00> : vector<4x1024xf32>
    %88 = tpu.matmul %87, %85, %cst_75 {dimension_numbers = #tpu.dot_dimension_numbers<[1], [0], [0], [1], [0, 0, 1, 1], [], []>} : vector<4x4xf32>, vector<4x1024xf32>, vector<4x1024xf32> -> vector<4x1024xf32>
    %89 = arith.addf %84, %88 : vector<4x1024xf32>
    %c0_76 = arith.constant 0 : index
    %c137 = arith.constant 137 : index
    %90 = vector.load %arg8[%c0_76, %c137] : memref<4x1280xf32, #tpu.memory_space<vmem>>, vector<4x1024xf32>
    %c15 = arith.constant 15 : index
    %c0_77 = arith.constant 0 : index
    %c0_78 = arith.constant 0 : index
    %91 = vector.load %arg5[%c15, %c0_77, %c0_78] : memref<27x4x4xf32, #tpu.memory_space<vmem>>, vector<1x4x4xf32>
    %92 = vector.shape_cast %91 : vector<1x4x4xf32> to vector<4x4xf32>
    %cst_79 = arith.constant dense<0.000000e+00> : vector<4x1024xf32>
    %93 = tpu.matmul %92, %90, %cst_79 {dimension_numbers = #tpu.dot_dimension_numbers<[1], [0], [0], [1], [0, 0, 1, 1], [], []>} : vector<4x4xf32>, vector<4x1024xf32>, vector<4x1024xf32> -> vector<4x1024xf32>
    %94 = arith.addf %89, %93 : vector<4x1024xf32>
    %c0_80 = arith.constant 0 : index
    %c138 = arith.constant 138 : index
    %95 = vector.load %arg8[%c0_80, %c138] : memref<4x1280xf32, #tpu.memory_space<vmem>>, vector<4x1024xf32>
    %c16 = arith.constant 16 : index
    %c0_81 = arith.constant 0 : index
    %c0_82 = arith.constant 0 : index
    %96 = vector.load %arg5[%c16, %c0_81, %c0_82] : memref<27x4x4xf32, #tpu.memory_space<vmem>>, vector<1x4x4xf32>
    %97 = vector.shape_cast %96 : vector<1x4x4xf32> to vector<4x4xf32>
    %cst_83 = arith.constant dense<0.000000e+00> : vector<4x1024xf32>
    %98 = tpu.matmul %97, %95, %cst_83 {dimension_numbers = #tpu.dot_dimension_numbers<[1], [0], [0], [1], [0, 0, 1, 1], [], []>} : vector<4x4xf32>, vector<4x1024xf32>, vector<4x1024xf32> -> vector<4x1024xf32>
    %99 = arith.addf %94, %98 : vector<4x1024xf32>
    %c0_84 = arith.constant 0 : index
    %c139 = arith.constant 139 : index
    %100 = vector.load %arg8[%c0_84, %c139] : memref<4x1280xf32, #tpu.memory_space<vmem>>, vector<4x1024xf32>
    %c17_85 = arith.constant 17 : index
    %c0_86 = arith.constant 0 : index
    %c0_87 = arith.constant 0 : index
    %101 = vector.load %arg5[%c17_85, %c0_86, %c0_87] : memref<27x4x4xf32, #tpu.memory_space<vmem>>, vector<1x4x4xf32>
    %102 = vector.shape_cast %101 : vector<1x4x4xf32> to vector<4x4xf32>
    %cst_88 = arith.constant dense<0.000000e+00> : vector<4x1024xf32>
    %103 = tpu.matmul %102, %100, %cst_88 {dimension_numbers = #tpu.dot_dimension_numbers<[1], [0], [0], [1], [0, 0, 1, 1], [], []>} : vector<4x4xf32>, vector<4x1024xf32>, vector<4x1024xf32> -> vector<4x1024xf32>
    %104 = arith.addf %99, %103 : vector<4x1024xf32>
    %c0_89 = arith.constant 0 : index
    %c217 = arith.constant 217 : index
    %105 = vector.load %arg8[%c0_89, %c217] : memref<4x1280xf32, #tpu.memory_space<vmem>>, vector<4x1024xf32>
    %c18_90 = arith.constant 18 : index
    %c0_91 = arith.constant 0 : index
    %c0_92 = arith.constant 0 : index
    %106 = vector.load %arg5[%c18_90, %c0_91, %c0_92] : memref<27x4x4xf32, #tpu.memory_space<vmem>>, vector<1x4x4xf32>
    %107 = vector.shape_cast %106 : vector<1x4x4xf32> to vector<4x4xf32>
    %cst_93 = arith.constant dense<0.000000e+00> : vector<4x1024xf32>
    %108 = tpu.matmul %107, %105, %cst_93 {dimension_numbers = #tpu.dot_dimension_numbers<[1], [0], [0], [1], [0, 0, 1, 1], [], []>} : vector<4x4xf32>, vector<4x1024xf32>, vector<4x1024xf32> -> vector<4x1024xf32>
    %109 = arith.addf %104, %108 : vector<4x1024xf32>
    %c0_94 = arith.constant 0 : index
    %c218 = arith.constant 218 : index
    %110 = vector.load %arg8[%c0_94, %c218] : memref<4x1280xf32, #tpu.memory_space<vmem>>, vector<4x1024xf32>
    %c19_95 = arith.constant 19 : index
    %c0_96 = arith.constant 0 : index
    %c0_97 = arith.constant 0 : index
    %111 = vector.load %arg5[%c19_95, %c0_96, %c0_97] : memref<27x4x4xf32, #tpu.memory_space<vmem>>, vector<1x4x4xf32>
    %112 = vector.shape_cast %111 : vector<1x4x4xf32> to vector<4x4xf32>
    %cst_98 = arith.constant dense<0.000000e+00> : vector<4x1024xf32>
    %113 = tpu.matmul %112, %110, %cst_98 {dimension_numbers = #tpu.dot_dimension_numbers<[1], [0], [0], [1], [0, 0, 1, 1], [], []>} : vector<4x4xf32>, vector<4x1024xf32>, vector<4x1024xf32> -> vector<4x1024xf32>
    %114 = arith.addf %109, %113 : vector<4x1024xf32>
    %c0_99 = arith.constant 0 : index
    %c219 = arith.constant 219 : index
    %115 = vector.load %arg8[%c0_99, %c219] : memref<4x1280xf32, #tpu.memory_space<vmem>>, vector<4x1024xf32>
    %c20 = arith.constant 20 : index
    %c0_100 = arith.constant 0 : index
    %c0_101 = arith.constant 0 : index
    %116 = vector.load %arg5[%c20, %c0_100, %c0_101] : memref<27x4x4xf32, #tpu.memory_space<vmem>>, vector<1x4x4xf32>
    %117 = vector.shape_cast %116 : vector<1x4x4xf32> to vector<4x4xf32>
    %cst_102 = arith.constant dense<0.000000e+00> : vector<4x1024xf32>
    %118 = tpu.matmul %117, %115, %cst_102 {dimension_numbers = #tpu.dot_dimension_numbers<[1], [0], [0], [1], [0, 0, 1, 1], [], []>} : vector<4x4xf32>, vector<4x1024xf32>, vector<4x1024xf32> -> vector<4x1024xf32>
    %119 = arith.addf %114, %118 : vector<4x1024xf32>
    %c0_103 = arith.constant 0 : index
    %c227 = arith.constant 227 : index
    %120 = vector.load %arg8[%c0_103, %c227] : memref<4x1280xf32, #tpu.memory_space<vmem>>, vector<4x1024xf32>
    %c21 = arith.constant 21 : index
    %c0_104 = arith.constant 0 : index
    %c0_105 = arith.constant 0 : index
    %121 = vector.load %arg5[%c21, %c0_104, %c0_105] : memref<27x4x4xf32, #tpu.memory_space<vmem>>, vector<1x4x4xf32>
    %122 = vector.shape_cast %121 : vector<1x4x4xf32> to vector<4x4xf32>
    %cst_106 = arith.constant dense<0.000000e+00> : vector<4x1024xf32>
    %123 = tpu.matmul %122, %120, %cst_106 {dimension_numbers = #tpu.dot_dimension_numbers<[1], [0], [0], [1], [0, 0, 1, 1], [], []>} : vector<4x4xf32>, vector<4x1024xf32>, vector<4x1024xf32> -> vector<4x1024xf32>
    %124 = arith.addf %119, %123 : vector<4x1024xf32>
    %c0_107 = arith.constant 0 : index
    %c228 = arith.constant 228 : index
    %125 = vector.load %arg8[%c0_107, %c228] : memref<4x1280xf32, #tpu.memory_space<vmem>>, vector<4x1024xf32>
    %c22 = arith.constant 22 : index
    %c0_108 = arith.constant 0 : index
    %c0_109 = arith.constant 0 : index
    %126 = vector.load %arg5[%c22, %c0_108, %c0_109] : memref<27x4x4xf32, #tpu.memory_space<vmem>>, vector<1x4x4xf32>
    %127 = vector.shape_cast %126 : vector<1x4x4xf32> to vector<4x4xf32>
    %cst_110 = arith.constant dense<0.000000e+00> : vector<4x1024xf32>
    %128 = tpu.matmul %127, %125, %cst_110 {dimension_numbers = #tpu.dot_dimension_numbers<[1], [0], [0], [1], [0, 0, 1, 1], [], []>} : vector<4x4xf32>, vector<4x1024xf32>, vector<4x1024xf32> -> vector<4x1024xf32>
    %129 = arith.addf %124, %128 : vector<4x1024xf32>
    %c0_111 = arith.constant 0 : index
    %c229 = arith.constant 229 : index
    %130 = vector.load %arg8[%c0_111, %c229] : memref<4x1280xf32, #tpu.memory_space<vmem>>, vector<4x1024xf32>
    %c23 = arith.constant 23 : index
    %c0_112 = arith.constant 0 : index
    %c0_113 = arith.constant 0 : index
    %131 = vector.load %arg5[%c23, %c0_112, %c0_113] : memref<27x4x4xf32, #tpu.memory_space<vmem>>, vector<1x4x4xf32>
    %132 = vector.shape_cast %131 : vector<1x4x4xf32> to vector<4x4xf32>
    %cst_114 = arith.constant dense<0.000000e+00> : vector<4x1024xf32>
    %133 = tpu.matmul %132, %130, %cst_114 {dimension_numbers = #tpu.dot_dimension_numbers<[1], [0], [0], [1], [0, 0, 1, 1], [], []>} : vector<4x4xf32>, vector<4x1024xf32>, vector<4x1024xf32> -> vector<4x1024xf32>
    %134 = arith.addf %129, %133 : vector<4x1024xf32>
    %c0_115 = arith.constant 0 : index
    %c237 = arith.constant 237 : index
    %135 = vector.load %arg8[%c0_115, %c237] : memref<4x1280xf32, #tpu.memory_space<vmem>>, vector<4x1024xf32>
    %c24 = arith.constant 24 : index
    %c0_116 = arith.constant 0 : index
    %c0_117 = arith.constant 0 : index
    %136 = vector.load %arg5[%c24, %c0_116, %c0_117] : memref<27x4x4xf32, #tpu.memory_space<vmem>>, vector<1x4x4xf32>
    %137 = vector.shape_cast %136 : vector<1x4x4xf32> to vector<4x4xf32>
    %cst_118 = arith.constant dense<0.000000e+00> : vector<4x1024xf32>
    %138 = tpu.matmul %137, %135, %cst_118 {dimension_numbers = #tpu.dot_dimension_numbers<[1], [0], [0], [1], [0, 0, 1, 1], [], []>} : vector<4x4xf32>, vector<4x1024xf32>, vector<4x1024xf32> -> vector<4x1024xf32>
    %139 = arith.addf %134, %138 : vector<4x1024xf32>
    %c0_119 = arith.constant 0 : index
    %c238 = arith.constant 238 : index
    %140 = vector.load %arg8[%c0_119, %c238] : memref<4x1280xf32, #tpu.memory_space<vmem>>, vector<4x1024xf32>
    %c25 = arith.constant 25 : index
    %c0_120 = arith.constant 0 : index
    %c0_121 = arith.constant 0 : index
    %141 = vector.load %arg5[%c25, %c0_120, %c0_121] : memref<27x4x4xf32, #tpu.memory_space<vmem>>, vector<1x4x4xf32>
    %142 = vector.shape_cast %141 : vector<1x4x4xf32> to vector<4x4xf32>
    %cst_122 = arith.constant dense<0.000000e+00> : vector<4x1024xf32>
    %143 = tpu.matmul %142, %140, %cst_122 {dimension_numbers = #tpu.dot_dimension_numbers<[1], [0], [0], [1], [0, 0, 1, 1], [], []>} : vector<4x4xf32>, vector<4x1024xf32>, vector<4x1024xf32> -> vector<4x1024xf32>
    %144 = arith.addf %139, %143 : vector<4x1024xf32>
    %c0_123 = arith.constant 0 : index
    %c239 = arith.constant 239 : index
    %145 = vector.load %arg8[%c0_123, %c239] : memref<4x1280xf32, #tpu.memory_space<vmem>>, vector<4x1024xf32>
    %c26 = arith.constant 26 : index
    %c0_124 = arith.constant 0 : index
    %c0_125 = arith.constant 0 : index
    %146 = vector.load %arg5[%c26, %c0_124, %c0_125] : memref<27x4x4xf32, #tpu.memory_space<vmem>>, vector<1x4x4xf32>
    %147 = vector.shape_cast %146 : vector<1x4x4xf32> to vector<4x4xf32>
    %cst_126 = arith.constant dense<0.000000e+00> : vector<4x1024xf32>
    %148 = tpu.matmul %147, %145, %cst_126 {dimension_numbers = #tpu.dot_dimension_numbers<[1], [0], [0], [1], [0, 0, 1, 1], [], []>} : vector<4x4xf32>, vector<4x1024xf32>, vector<4x1024xf32> -> vector<4x1024xf32>
    %149 = arith.addf %144, %148 : vector<4x1024xf32>
    %c0_127 = arith.constant 0 : index
    %c0_128 = arith.constant 0 : index
    %150 = vector.load %arg6[%c0_127, %c0_128] : memref<4x1xf32, #tpu.memory_space<vmem>>, vector<4x1xf32>
    %151 = vector.broadcast %150 : vector<4x1xf32> to vector<4x1024xf32>
    %152 = arith.addf %149, %151 : vector<4x1024xf32>
    %cst_129 = arith.constant 0.000000e+00 : f32
    %153 = vector.broadcast %cst_129 : f32 to vector<4x1024xf32>
    %154 = arith.maximumf %152, %153 : vector<4x1024xf32>
    %c0_130 = arith.constant 0 : index
    %c0_131 = arith.constant 0 : index
    %155 = vector.load %arg1[%c0_130, %c0_131] : memref<1x1024xf32, #tpu.memory_space<vmem>>, vector<1x1024xf32>
    %156 = vector.broadcast %155 : vector<1x1024xf32> to vector<4x1024xf32>
    %157 = arith.mulf %154, %156 : vector<4x1024xf32>
    %158 = arith.truncf %157 : vector<4x1024xf32> to vector<4x1024xbf16>
    %c0_132 = arith.constant 0 : index
    %c0_133 = arith.constant 0 : index
    %c0_134 = arith.constant 0 : index
    %159 = vector.load %arg7[%c0_132, %c0_133, %c0_134] : memref<1x4x1024xbf16, #tpu.memory_space<vmem>>, vector<1x4x1024xbf16>
    %160 = vector.shape_cast %159 : vector<1x4x1024xbf16> to vector<4x1024xbf16>
    %161 = vector.shape_cast %158 : vector<4x1024xbf16> to vector<1x4x1024xbf16>
    tpu.vector_store %arg7[%c0_132, %c0_133, %c0_134], %161 {strides = array<i32>} : memref<1x4x1024xbf16, #tpu.memory_space<vmem>>, vector<1x4x1024xbf16>,
    return
  }
  func.func @transform_0(%arg0: i32) -> (i32, i32) {
    %c0_i32 = arith.constant 0 : i32
    %c0_i32_0 = arith.constant 0 : i32
    %c0_i32_1 = arith.constant 0 : i32
    return %c0_i32, %c0_i32_0 : i32, i32
  }
  func.func @transform_1(%arg0: i32) -> (i32, i32, i32) {
    %c0_i32 = arith.constant 0 : i32
    %c0_i32_0 = arith.constant 0 : i32
    %c0_i32_1 = arith.constant 0 : i32
    return %arg0, %c0_i32, %c0_i32_0 : i32, i32, i32
  }
  func.func @transform_2(%arg0: i32) -> (i32, i32) {
    %c0_i32 = arith.constant 0 : i32
    %c0_i32_0 = arith.constant 0 : i32
    %c0_i32_1 = arith.constant 0 : i32
    return %c0_i32, %c0_i32_0 : i32, i32
  }
  func.func @transform_3(%arg0: i32) -> (i32, i32) {
    %c0_i32 = arith.constant 0 : i32
    %c0_i32_0 = arith.constant 0 : i32
    %c0_i32_1 = arith.constant 0 : i32
    return %c0_i32, %c0_i32_0 : i32, i32
  }
  func.func @transform_4(%arg0: i32) -> (i32, i32, i32) {
    %c0_i32 = arith.constant 0 : i32
    %c0_i32_0 = arith.constant 0 : i32
    %c0_i32_1 = arith.constant 0 : i32
    %c0_i32_2 = arith.constant 0 : i32
    return %c0_i32, %c0_i32_0, %c0_i32_1 : i32, i32, i32
  }
  func.func @transform_5(%arg0: i32) -> (i32, i32) {
    %c0_i32 = arith.constant 0 : i32
    %c0_i32_0 = arith.constant 0 : i32
    %c0_i32_1 = arith.constant 0 : i32
    return %c0_i32, %c0_i32_0 : i32, i32
  }
  func.func @transform_6(%arg0: i32) -> (i32, i32, i32) {
    %c0_i32 = arith.constant 0 : i32
    %c0_i32_0 = arith.constant 0 : i32
    %c0_i32_1 = arith.constant 0 : i32
    return %arg0, %c0_i32, %c0_i32_0 : i32, i32, i32
  }
}

module attributes {stable_mosaic.version = 11 : i64} {
  func.func @kernel(%arg0: i32, %arg1: memref<1x1024xf32, #tpu.memory_space<vmem>>, %arg2: memref<1x4x1024xbf16, #tpu.memory_space<vmem>>, %arg3: memref<1x4x1024xbf16, #tpu.memory_space<vmem>>, %arg4: memref<1x4x1024xbf16, #tpu.memory_space<vmem>>, %arg5: memref<4x4xbf16, #tpu.memory_space<vmem>>, %arg6: memref<4x4xbf16, #tpu.memory_space<vmem>>, %arg7: memref<4x4xbf16, #tpu.memory_space<vmem>>, %arg8: memref<4x1xf32, #tpu.memory_space<vmem>>, %arg9: memref<27x4x4xf32, #tpu.memory_space<vmem>>, %arg10: memref<4x1xf32, #tpu.memory_space<vmem>>, %arg11: memref<1x4x1024xbf16, #tpu.memory_space<vmem>>, %arg12: memref<4x1280xf32, #tpu.memory_space<vmem>>) attributes {dimension_semantics = [#tpu.dimension_semantics<parallel>], iteration_bounds = array<i64: 2>, scalar_prefetch = 0 : i64, scratch_operands = 1 : i64, tpu.core_type = #tpu.core_type<tc>, window_params = [{pipeline_mode = #tpu.pipeline_mode<synchronous>, transform_indices = @transform_0, window_bounds = array<i64: 1, 1024>}, {transform_indices = @transform_1, window_bounds = array<i64: 1, 4, 1024>}, {transform_indices = @transform_2, window_bounds = array<i64: 1, 4, 1024>}, {transform_indices = @transform_3, window_bounds = array<i64: 1, 4, 1024>}, {pipeline_mode = #tpu.pipeline_mode<synchronous>, transform_indices = @transform_4, window_bounds = array<i64: 4, 4>}, {pipeline_mode = #tpu.pipeline_mode<synchronous>, transform_indices = @transform_5, window_bounds = array<i64: 4, 4>}, {pipeline_mode = #tpu.pipeline_mode<synchronous>, transform_indices = @transform_6, window_bounds = array<i64: 4, 4>}, {pipeline_mode = #tpu.pipeline_mode<synchronous>, transform_indices = @transform_7, window_bounds = array<i64: 4, 1>}, {pipeline_mode = #tpu.pipeline_mode<synchronous>, transform_indices = @transform_8, window_bounds = array<i64: 27, 4, 4>}, {pipeline_mode = #tpu.pipeline_mode<synchronous>, transform_indices = @transform_9, window_bounds = array<i64: 4, 1>}, {transform_indices = @transform_10, window_bounds = array<i64: 1, 4, 1024>}]} {
    %c0 = arith.constant 0 : index
    %c0_0 = arith.constant 0 : index
    %0 = vector.load %arg5[%c0, %c0_0] : memref<4x4xbf16, #tpu.memory_space<vmem>>, vector<4x4xbf16>
    %c0_1 = arith.constant 0 : index
    %c0_2 = arith.constant 0 : index
    %c0_3 = arith.constant 0 : index
    %1 = vector.load %arg2[%c0_1, %c0_2, %c0_3] : memref<1x4x1024xbf16, #tpu.memory_space<vmem>>, vector<1x4x1024xbf16>
    %2 = vector.shape_cast %1 : vector<1x4x1024xbf16> to vector<4x1024xbf16>
    %cst = arith.constant dense<0.000000e+00> : vector<4x1024xf32>
    %3 = tpu.matmul %0, %2, %cst {dimension_numbers = #tpu.dot_dimension_numbers<[1], [0], [0], [1], [0, 0, 1, 1], [], []>} : vector<4x4xbf16>, vector<4x1024xbf16>, vector<4x1024xf32> -> vector<4x1024xf32>
    %c0_4 = arith.constant 0 : index
    %c0_5 = arith.constant 0 : index
    %4 = vector.load %arg6[%c0_4, %c0_5] : memref<4x4xbf16, #tpu.memory_space<vmem>>, vector<4x4xbf16>
    %c0_6 = arith.constant 0 : index
    %c0_7 = arith.constant 0 : index
    %c0_8 = arith.constant 0 : index
    %5 = vector.load %arg3[%c0_6, %c0_7, %c0_8] : memref<1x4x1024xbf16, #tpu.memory_space<vmem>>, vector<1x4x1024xbf16>
    %6 = vector.shape_cast %5 : vector<1x4x1024xbf16> to vector<4x1024xbf16>
    %cst_9 = arith.constant dense<0.000000e+00> : vector<4x1024xf32>
    %7 = tpu.matmul %4, %6, %cst_9 {dimension_numbers = #tpu.dot_dimension_numbers<[1], [0], [0], [1], [0, 0, 1, 1], [], []>} : vector<4x4xbf16>, vector<4x1024xbf16>, vector<4x1024xf32> -> vector<4x1024xf32>
    %8 = arith.addf %3, %7 : vector<4x1024xf32>
    %c0_10 = arith.constant 0 : index
    %c0_11 = arith.constant 0 : index
    %9 = vector.load %arg7[%c0_10, %c0_11] : memref<4x4xbf16, #tpu.memory_space<vmem>>, vector<4x4xbf16>
    %c0_12 = arith.constant 0 : index
    %c0_13 = arith.constant 0 : index
    %c0_14 = arith.constant 0 : index
    %10 = vector.load %arg4[%c0_12, %c0_13, %c0_14] : memref<1x4x1024xbf16, #tpu.memory_space<vmem>>, vector<1x4x1024xbf16>
    %11 = vector.shape_cast %10 : vector<1x4x1024xbf16> to vector<4x1024xbf16>
    %cst_15 = arith.constant dense<0.000000e+00> : vector<4x1024xf32>
    %12 = tpu.matmul %9, %11, %cst_15 {dimension_numbers = #tpu.dot_dimension_numbers<[1], [0], [0], [1], [0, 0, 1, 1], [], []>} : vector<4x4xbf16>, vector<4x1024xbf16>, vector<4x1024xf32> -> vector<4x1024xf32>
    %13 = arith.addf %8, %12 : vector<4x1024xf32>
    %c0_16 = arith.constant 0 : index
    %c0_17 = arith.constant 0 : index
    %14 = vector.load %arg8[%c0_16, %c0_17] : memref<4x1xf32, #tpu.memory_space<vmem>>, vector<4x1xf32>
    %15 = vector.broadcast %14 : vector<4x1xf32> to vector<4x1024xf32>
    %16 = arith.addf %13, %15 : vector<4x1024xf32>
    %cst_18 = arith.constant 0.000000e+00 : f32
    %17 = vector.broadcast %cst_18 : f32 to vector<4x1024xf32>
    %18 = arith.maximumf %16, %17 : vector<4x1024xf32>
    %c0_19 = arith.constant 0 : index
    %c0_20 = arith.constant 0 : index
    %19 = vector.load %arg1[%c0_19, %c0_20] : memref<1x1024xf32, #tpu.memory_space<vmem>>, vector<1x1024xf32>
    %20 = vector.broadcast %19 : vector<1x1024xf32> to vector<4x1024xf32>
    %21 = arith.mulf %18, %20 : vector<4x1024xf32>
    %cst_21 = arith.constant 0.000000e+00 : f32
    %22 = vector.broadcast %cst_21 : f32 to vector<4x128xf32>
    %c0_22 = arith.constant 0 : index
    %c0_23 = arith.constant 0 : index
    %23 = vector.load %arg12[%c0_22, %c0_23] : memref<4x1280xf32, #tpu.memory_space<vmem>>, vector<4x128xf32>
    tpu.vector_store %arg12[%c0_22, %c0_23], %22 {strides = array<i32>} : memref<4x1280xf32, #tpu.memory_space<vmem>>, vector<4x128xf32>,
    %c0_24 = arith.constant 0 : index
    %c1152 = arith.constant 1152 : index
    %24 = vector.load %arg12[%c0_24, %c1152] : memref<4x1280xf32, #tpu.memory_space<vmem>>, vector<4x128xf32>
    tpu.vector_store %arg12[%c0_24, %c1152], %22 {strides = array<i32>} : memref<4x1280xf32, #tpu.memory_space<vmem>>, vector<4x128xf32>,
    %c0_25 = arith.constant 0 : index
    %c128 = arith.constant 128 : index
    %25 = vector.load %arg12[%c0_25, %c128] : memref<4x1280xf32, #tpu.memory_space<vmem>>, vector<4x1024xf32>
    tpu.vector_store %arg12[%c0_25, %c128], %21 {strides = array<i32>} : memref<4x1280xf32, #tpu.memory_space<vmem>>, vector<4x1024xf32>,
    %c0_26 = arith.constant 0 : index
    %c17 = arith.constant 17 : index
    %26 = vector.load %arg12[%c0_26, %c17] : memref<4x1280xf32, #tpu.memory_space<vmem>>, vector<4x1024xf32>
    %c0_27 = arith.constant 0 : index
    %c0_28 = arith.constant 0 : index
    %c0_29 = arith.constant 0 : index
    %27 = vector.load %arg9[%c0_27, %c0_28, %c0_29] : memref<27x4x4xf32, #tpu.memory_space<vmem>>, vector<1x4x4xf32>
    %28 = vector.shape_cast %27 : vector<1x4x4xf32> to vector<4x4xf32>
    %cst_30 = arith.constant dense<0.000000e+00> : vector<4x1024xf32>
    %29 = tpu.matmul %28, %26, %cst_30 {dimension_numbers = #tpu.dot_dimension_numbers<[1], [0], [0], [1], [0, 0, 1, 1], [], []>} : vector<4x4xf32>, vector<4x1024xf32>, vector<4x1024xf32> -> vector<4x1024xf32>
    %c0_31 = arith.constant 0 : index
    %c18 = arith.constant 18 : index
    %30 = vector.load %arg12[%c0_31, %c18] : memref<4x1280xf32, #tpu.memory_space<vmem>>, vector<4x1024xf32>
    %c1 = arith.constant 1 : index
    %c0_32 = arith.constant 0 : index
    %c0_33 = arith.constant 0 : index
    %31 = vector.load %arg9[%c1, %c0_32, %c0_33] : memref<27x4x4xf32, #tpu.memory_space<vmem>>, vector<1x4x4xf32>
    %32 = vector.shape_cast %31 : vector<1x4x4xf32> to vector<4x4xf32>
    %cst_34 = arith.constant dense<0.000000e+00> : vector<4x1024xf32>
    %33 = tpu.matmul %32, %30, %cst_34 {dimension_numbers = #tpu.dot_dimension_numbers<[1], [0], [0], [1], [0, 0, 1, 1], [], []>} : vector<4x4xf32>, vector<4x1024xf32>, vector<4x1024xf32> -> vector<4x1024xf32>
    %34 = arith.addf %29, %33 : vector<4x1024xf32>
    %c0_35 = arith.constant 0 : index
    %c19 = arith.constant 19 : index
    %35 = vector.load %arg12[%c0_35, %c19] : memref<4x1280xf32, #tpu.memory_space<vmem>>, vector<4x1024xf32>
    %c2 = arith.constant 2 : index
    %c0_36 = arith.constant 0 : index
    %c0_37 = arith.constant 0 : index
    %36 = vector.load %arg9[%c2, %c0_36, %c0_37] : memref<27x4x4xf32, #tpu.memory_space<vmem>>, vector<1x4x4xf32>
    %37 = vector.shape_cast %36 : vector<1x4x4xf32> to vector<4x4xf32>
    %cst_38 = arith.constant dense<0.000000e+00> : vector<4x1024xf32>
    %38 = tpu.matmul %37, %35, %cst_38 {dimension_numbers = #tpu.dot_dimension_numbers<[1], [0], [0], [1], [0, 0, 1, 1], [], []>} : vector<4x4xf32>, vector<4x1024xf32>, vector<4x1024xf32> -> vector<4x1024xf32>
    %39 = arith.addf %34, %38 : vector<4x1024xf32>
    %c0_39 = arith.constant 0 : index
    %c27 = arith.constant 27 : index
    %40 = vector.load %arg12[%c0_39, %c27] : memref<4x1280xf32, #tpu.memory_space<vmem>>, vector<4x1024xf32>
    %c3 = arith.constant 3 : index
    %c0_40 = arith.constant 0 : index
    %c0_41 = arith.constant 0 : index
    %41 = vector.load %arg9[%c3, %c0_40, %c0_41] : memref<27x4x4xf32, #tpu.memory_space<vmem>>, vector<1x4x4xf32>
    %42 = vector.shape_cast %41 : vector<1x4x4xf32> to vector<4x4xf32>
    %cst_42 = arith.constant dense<0.000000e+00> : vector<4x1024xf32>
    %43 = tpu.matmul %42, %40, %cst_42 {dimension_numbers = #tpu.dot_dimension_numbers<[1], [0], [0], [1], [0, 0, 1, 1], [], []>} : vector<4x4xf32>, vector<4x1024xf32>, vector<4x1024xf32> -> vector<4x1024xf32>
    %44 = arith.addf %39, %43 : vector<4x1024xf32>
    %c0_43 = arith.constant 0 : index
    %c28 = arith.constant 28 : index
    %45 = vector.load %arg12[%c0_43, %c28] : memref<4x1280xf32, #tpu.memory_space<vmem>>, vector<4x1024xf32>
    %c4 = arith.constant 4 : index
    %c0_44 = arith.constant 0 : index
    %c0_45 = arith.constant 0 : index
    %46 = vector.load %arg9[%c4, %c0_44, %c0_45] : memref<27x4x4xf32, #tpu.memory_space<vmem>>, vector<1x4x4xf32>
    %47 = vector.shape_cast %46 : vector<1x4x4xf32> to vector<4x4xf32>
    %cst_46 = arith.constant dense<0.000000e+00> : vector<4x1024xf32>
    %48 = tpu.matmul %47, %45, %cst_46 {dimension_numbers = #tpu.dot_dimension_numbers<[1], [0], [0], [1], [0, 0, 1, 1], [], []>} : vector<4x4xf32>, vector<4x1024xf32>, vector<4x1024xf32> -> vector<4x1024xf32>
    %49 = arith.addf %44, %48 : vector<4x1024xf32>
    %c0_47 = arith.constant 0 : index
    %c29 = arith.constant 29 : index
    %50 = vector.load %arg12[%c0_47, %c29] : memref<4x1280xf32, #tpu.memory_space<vmem>>, vector<4x1024xf32>
    %c5 = arith.constant 5 : index
    %c0_48 = arith.constant 0 : index
    %c0_49 = arith.constant 0 : index
    %51 = vector.load %arg9[%c5, %c0_48, %c0_49] : memref<27x4x4xf32, #tpu.memory_space<vmem>>, vector<1x4x4xf32>
    %52 = vector.shape_cast %51 : vector<1x4x4xf32> to vector<4x4xf32>
    %cst_50 = arith.constant dense<0.000000e+00> : vector<4x1024xf32>
    %53 = tpu.matmul %52, %50, %cst_50 {dimension_numbers = #tpu.dot_dimension_numbers<[1], [0], [0], [1], [0, 0, 1, 1], [], []>} : vector<4x4xf32>, vector<4x1024xf32>, vector<4x1024xf32> -> vector<4x1024xf32>
    %54 = arith.addf %49, %53 : vector<4x1024xf32>
    %c0_51 = arith.constant 0 : index
    %c37 = arith.constant 37 : index
    %55 = vector.load %arg12[%c0_51, %c37] : memref<4x1280xf32, #tpu.memory_space<vmem>>, vector<4x1024xf32>
    %c6 = arith.constant 6 : index
    %c0_52 = arith.constant 0 : index
    %c0_53 = arith.constant 0 : index
    %56 = vector.load %arg9[%c6, %c0_52, %c0_53] : memref<27x4x4xf32, #tpu.memory_space<vmem>>, vector<1x4x4xf32>
    %57 = vector.shape_cast %56 : vector<1x4x4xf32> to vector<4x4xf32>
    %cst_54 = arith.constant dense<0.000000e+00> : vector<4x1024xf32>
    %58 = tpu.matmul %57, %55, %cst_54 {dimension_numbers = #tpu.dot_dimension_numbers<[1], [0], [0], [1], [0, 0, 1, 1], [], []>} : vector<4x4xf32>, vector<4x1024xf32>, vector<4x1024xf32> -> vector<4x1024xf32>
    %59 = arith.addf %54, %58 : vector<4x1024xf32>
    %c0_55 = arith.constant 0 : index
    %c38 = arith.constant 38 : index
    %60 = vector.load %arg12[%c0_55, %c38] : memref<4x1280xf32, #tpu.memory_space<vmem>>, vector<4x1024xf32>
    %c7 = arith.constant 7 : index
    %c0_56 = arith.constant 0 : index
    %c0_57 = arith.constant 0 : index
    %61 = vector.load %arg9[%c7, %c0_56, %c0_57] : memref<27x4x4xf32, #tpu.memory_space<vmem>>, vector<1x4x4xf32>
    %62 = vector.shape_cast %61 : vector<1x4x4xf32> to vector<4x4xf32>
    %cst_58 = arith.constant dense<0.000000e+00> : vector<4x1024xf32>
    %63 = tpu.matmul %62, %60, %cst_58 {dimension_numbers = #tpu.dot_dimension_numbers<[1], [0], [0], [1], [0, 0, 1, 1], [], []>} : vector<4x4xf32>, vector<4x1024xf32>, vector<4x1024xf32> -> vector<4x1024xf32>
    %64 = arith.addf %59, %63 : vector<4x1024xf32>
    %c0_59 = arith.constant 0 : index
    %c39 = arith.constant 39 : index
    %65 = vector.load %arg12[%c0_59, %c39] : memref<4x1280xf32, #tpu.memory_space<vmem>>, vector<4x1024xf32>
    %c8 = arith.constant 8 : index
    %c0_60 = arith.constant 0 : index
    %c0_61 = arith.constant 0 : index
    %66 = vector.load %arg9[%c8, %c0_60, %c0_61] : memref<27x4x4xf32, #tpu.memory_space<vmem>>, vector<1x4x4xf32>
    %67 = vector.shape_cast %66 : vector<1x4x4xf32> to vector<4x4xf32>
    %cst_62 = arith.constant dense<0.000000e+00> : vector<4x1024xf32>
    %68 = tpu.matmul %67, %65, %cst_62 {dimension_numbers = #tpu.dot_dimension_numbers<[1], [0], [0], [1], [0, 0, 1, 1], [], []>} : vector<4x4xf32>, vector<4x1024xf32>, vector<4x1024xf32> -> vector<4x1024xf32>
    %69 = arith.addf %64, %68 : vector<4x1024xf32>
    %c0_63 = arith.constant 0 : index
    %c117 = arith.constant 117 : index
    %70 = vector.load %arg12[%c0_63, %c117] : memref<4x1280xf32, #tpu.memory_space<vmem>>, vector<4x1024xf32>
    %c9 = arith.constant 9 : index
    %c0_64 = arith.constant 0 : index
    %c0_65 = arith.constant 0 : index
    %71 = vector.load %arg9[%c9, %c0_64, %c0_65] : memref<27x4x4xf32, #tpu.memory_space<vmem>>, vector<1x4x4xf32>
    %72 = vector.shape_cast %71 : vector<1x4x4xf32> to vector<4x4xf32>
    %cst_66 = arith.constant dense<0.000000e+00> : vector<4x1024xf32>
    %73 = tpu.matmul %72, %70, %cst_66 {dimension_numbers = #tpu.dot_dimension_numbers<[1], [0], [0], [1], [0, 0, 1, 1], [], []>} : vector<4x4xf32>, vector<4x1024xf32>, vector<4x1024xf32> -> vector<4x1024xf32>
    %74 = arith.addf %69, %73 : vector<4x1024xf32>
    %c0_67 = arith.constant 0 : index
    %c118 = arith.constant 118 : index
    %75 = vector.load %arg12[%c0_67, %c118] : memref<4x1280xf32, #tpu.memory_space<vmem>>, vector<4x1024xf32>
    %c10 = arith.constant 10 : index
    %c0_68 = arith.constant 0 : index
    %c0_69 = arith.constant 0 : index
    %76 = vector.load %arg9[%c10, %c0_68, %c0_69] : memref<27x4x4xf32, #tpu.memory_space<vmem>>, vector<1x4x4xf32>
    %77 = vector.shape_cast %76 : vector<1x4x4xf32> to vector<4x4xf32>
    %cst_70 = arith.constant dense<0.000000e+00> : vector<4x1024xf32>
    %78 = tpu.matmul %77, %75, %cst_70 {dimension_numbers = #tpu.dot_dimension_numbers<[1], [0], [0], [1], [0, 0, 1, 1], [], []>} : vector<4x4xf32>, vector<4x1024xf32>, vector<4x1024xf32> -> vector<4x1024xf32>
    %79 = arith.addf %74, %78 : vector<4x1024xf32>
    %c0_71 = arith.constant 0 : index
    %c119 = arith.constant 119 : index
    %80 = vector.load %arg12[%c0_71, %c119] : memref<4x1280xf32, #tpu.memory_space<vmem>>, vector<4x1024xf32>
    %c11 = arith.constant 11 : index
    %c0_72 = arith.constant 0 : index
    %c0_73 = arith.constant 0 : index
    %81 = vector.load %arg9[%c11, %c0_72, %c0_73] : memref<27x4x4xf32, #tpu.memory_space<vmem>>, vector<1x4x4xf32>
    %82 = vector.shape_cast %81 : vector<1x4x4xf32> to vector<4x4xf32>
    %cst_74 = arith.constant dense<0.000000e+00> : vector<4x1024xf32>
    %83 = tpu.matmul %82, %80, %cst_74 {dimension_numbers = #tpu.dot_dimension_numbers<[1], [0], [0], [1], [0, 0, 1, 1], [], []>} : vector<4x4xf32>, vector<4x1024xf32>, vector<4x1024xf32> -> vector<4x1024xf32>
    %84 = arith.addf %79, %83 : vector<4x1024xf32>
    %c0_75 = arith.constant 0 : index
    %c127 = arith.constant 127 : index
    %85 = vector.load %arg12[%c0_75, %c127] : memref<4x1280xf32, #tpu.memory_space<vmem>>, vector<4x1024xf32>
    %c12 = arith.constant 12 : index
    %c0_76 = arith.constant 0 : index
    %c0_77 = arith.constant 0 : index
    %86 = vector.load %arg9[%c12, %c0_76, %c0_77] : memref<27x4x4xf32, #tpu.memory_space<vmem>>, vector<1x4x4xf32>
    %87 = vector.shape_cast %86 : vector<1x4x4xf32> to vector<4x4xf32>
    %cst_78 = arith.constant dense<0.000000e+00> : vector<4x1024xf32>
    %88 = tpu.matmul %87, %85, %cst_78 {dimension_numbers = #tpu.dot_dimension_numbers<[1], [0], [0], [1], [0, 0, 1, 1], [], []>} : vector<4x4xf32>, vector<4x1024xf32>, vector<4x1024xf32> -> vector<4x1024xf32>
    %89 = arith.addf %84, %88 : vector<4x1024xf32>
    %c0_79 = arith.constant 0 : index
    %c128_80 = arith.constant 128 : index
    %90 = vector.load %arg12[%c0_79, %c128_80] : memref<4x1280xf32, #tpu.memory_space<vmem>>, vector<4x1024xf32>
    %c13 = arith.constant 13 : index
    %c0_81 = arith.constant 0 : index
    %c0_82 = arith.constant 0 : index
    %91 = vector.load %arg9[%c13, %c0_81, %c0_82] : memref<27x4x4xf32, #tpu.memory_space<vmem>>, vector<1x4x4xf32>
    %92 = vector.shape_cast %91 : vector<1x4x4xf32> to vector<4x4xf32>
    %cst_83 = arith.constant dense<0.000000e+00> : vector<4x1024xf32>
    %93 = tpu.matmul %92, %90, %cst_83 {dimension_numbers = #tpu.dot_dimension_numbers<[1], [0], [0], [1], [0, 0, 1, 1], [], []>} : vector<4x4xf32>, vector<4x1024xf32>, vector<4x1024xf32> -> vector<4x1024xf32>
    %94 = arith.addf %89, %93 : vector<4x1024xf32>
    %c0_84 = arith.constant 0 : index
    %c129 = arith.constant 129 : index
    %95 = vector.load %arg12[%c0_84, %c129] : memref<4x1280xf32, #tpu.memory_space<vmem>>, vector<4x1024xf32>
    %c14 = arith.constant 14 : index
    %c0_85 = arith.constant 0 : index
    %c0_86 = arith.constant 0 : index
    %96 = vector.load %arg9[%c14, %c0_85, %c0_86] : memref<27x4x4xf32, #tpu.memory_space<vmem>>, vector<1x4x4xf32>
    %97 = vector.shape_cast %96 : vector<1x4x4xf32> to vector<4x4xf32>
    %cst_87 = arith.constant dense<0.000000e+00> : vector<4x1024xf32>
    %98 = tpu.matmul %97, %95, %cst_87 {dimension_numbers = #tpu.dot_dimension_numbers<[1], [0], [0], [1], [0, 0, 1, 1], [], []>} : vector<4x4xf32>, vector<4x1024xf32>, vector<4x1024xf32> -> vector<4x1024xf32>
    %99 = arith.addf %94, %98 : vector<4x1024xf32>
    %c0_88 = arith.constant 0 : index
    %c137 = arith.constant 137 : index
    %100 = vector.load %arg12[%c0_88, %c137] : memref<4x1280xf32, #tpu.memory_space<vmem>>, vector<4x1024xf32>
    %c15 = arith.constant 15 : index
    %c0_89 = arith.constant 0 : index
    %c0_90 = arith.constant 0 : index
    %101 = vector.load %arg9[%c15, %c0_89, %c0_90] : memref<27x4x4xf32, #tpu.memory_space<vmem>>, vector<1x4x4xf32>
    %102 = vector.shape_cast %101 : vector<1x4x4xf32> to vector<4x4xf32>
    %cst_91 = arith.constant dense<0.000000e+00> : vector<4x1024xf32>
    %103 = tpu.matmul %102, %100, %cst_91 {dimension_numbers = #tpu.dot_dimension_numbers<[1], [0], [0], [1], [0, 0, 1, 1], [], []>} : vector<4x4xf32>, vector<4x1024xf32>, vector<4x1024xf32> -> vector<4x1024xf32>
    %104 = arith.addf %99, %103 : vector<4x1024xf32>
    %c0_92 = arith.constant 0 : index
    %c138 = arith.constant 138 : index
    %105 = vector.load %arg12[%c0_92, %c138] : memref<4x1280xf32, #tpu.memory_space<vmem>>, vector<4x1024xf32>
    %c16 = arith.constant 16 : index
    %c0_93 = arith.constant 0 : index
    %c0_94 = arith.constant 0 : index
    %106 = vector.load %arg9[%c16, %c0_93, %c0_94] : memref<27x4x4xf32, #tpu.memory_space<vmem>>, vector<1x4x4xf32>
    %107 = vector.shape_cast %106 : vector<1x4x4xf32> to vector<4x4xf32>
    %cst_95 = arith.constant dense<0.000000e+00> : vector<4x1024xf32>
    %108 = tpu.matmul %107, %105, %cst_95 {dimension_numbers = #tpu.dot_dimension_numbers<[1], [0], [0], [1], [0, 0, 1, 1], [], []>} : vector<4x4xf32>, vector<4x1024xf32>, vector<4x1024xf32> -> vector<4x1024xf32>
    %109 = arith.addf %104, %108 : vector<4x1024xf32>
    %c0_96 = arith.constant 0 : index
    %c139 = arith.constant 139 : index
    %110 = vector.load %arg12[%c0_96, %c139] : memref<4x1280xf32, #tpu.memory_space<vmem>>, vector<4x1024xf32>
    %c17_97 = arith.constant 17 : index
    %c0_98 = arith.constant 0 : index
    %c0_99 = arith.constant 0 : index
    %111 = vector.load %arg9[%c17_97, %c0_98, %c0_99] : memref<27x4x4xf32, #tpu.memory_space<vmem>>, vector<1x4x4xf32>
    %112 = vector.shape_cast %111 : vector<1x4x4xf32> to vector<4x4xf32>
    %cst_100 = arith.constant dense<0.000000e+00> : vector<4x1024xf32>
    %113 = tpu.matmul %112, %110, %cst_100 {dimension_numbers = #tpu.dot_dimension_numbers<[1], [0], [0], [1], [0, 0, 1, 1], [], []>} : vector<4x4xf32>, vector<4x1024xf32>, vector<4x1024xf32> -> vector<4x1024xf32>
    %114 = arith.addf %109, %113 : vector<4x1024xf32>
    %c0_101 = arith.constant 0 : index
    %c217 = arith.constant 217 : index
    %115 = vector.load %arg12[%c0_101, %c217] : memref<4x1280xf32, #tpu.memory_space<vmem>>, vector<4x1024xf32>
    %c18_102 = arith.constant 18 : index
    %c0_103 = arith.constant 0 : index
    %c0_104 = arith.constant 0 : index
    %116 = vector.load %arg9[%c18_102, %c0_103, %c0_104] : memref<27x4x4xf32, #tpu.memory_space<vmem>>, vector<1x4x4xf32>
    %117 = vector.shape_cast %116 : vector<1x4x4xf32> to vector<4x4xf32>
    %cst_105 = arith.constant dense<0.000000e+00> : vector<4x1024xf32>
    %118 = tpu.matmul %117, %115, %cst_105 {dimension_numbers = #tpu.dot_dimension_numbers<[1], [0], [0], [1], [0, 0, 1, 1], [], []>} : vector<4x4xf32>, vector<4x1024xf32>, vector<4x1024xf32> -> vector<4x1024xf32>
    %119 = arith.addf %114, %118 : vector<4x1024xf32>
    %c0_106 = arith.constant 0 : index
    %c218 = arith.constant 218 : index
    %120 = vector.load %arg12[%c0_106, %c218] : memref<4x1280xf32, #tpu.memory_space<vmem>>, vector<4x1024xf32>
    %c19_107 = arith.constant 19 : index
    %c0_108 = arith.constant 0 : index
    %c0_109 = arith.constant 0 : index
    %121 = vector.load %arg9[%c19_107, %c0_108, %c0_109] : memref<27x4x4xf32, #tpu.memory_space<vmem>>, vector<1x4x4xf32>
    %122 = vector.shape_cast %121 : vector<1x4x4xf32> to vector<4x4xf32>
    %cst_110 = arith.constant dense<0.000000e+00> : vector<4x1024xf32>
    %123 = tpu.matmul %122, %120, %cst_110 {dimension_numbers = #tpu.dot_dimension_numbers<[1], [0], [0], [1], [0, 0, 1, 1], [], []>} : vector<4x4xf32>, vector<4x1024xf32>, vector<4x1024xf32> -> vector<4x1024xf32>
    %124 = arith.addf %119, %123 : vector<4x1024xf32>
    %c0_111 = arith.constant 0 : index
    %c219 = arith.constant 219 : index
    %125 = vector.load %arg12[%c0_111, %c219] : memref<4x1280xf32, #tpu.memory_space<vmem>>, vector<4x1024xf32>
    %c20 = arith.constant 20 : index
    %c0_112 = arith.constant 0 : index
    %c0_113 = arith.constant 0 : index
    %126 = vector.load %arg9[%c20, %c0_112, %c0_113] : memref<27x4x4xf32, #tpu.memory_space<vmem>>, vector<1x4x4xf32>
    %127 = vector.shape_cast %126 : vector<1x4x4xf32> to vector<4x4xf32>
    %cst_114 = arith.constant dense<0.000000e+00> : vector<4x1024xf32>
    %128 = tpu.matmul %127, %125, %cst_114 {dimension_numbers = #tpu.dot_dimension_numbers<[1], [0], [0], [1], [0, 0, 1, 1], [], []>} : vector<4x4xf32>, vector<4x1024xf32>, vector<4x1024xf32> -> vector<4x1024xf32>
    %129 = arith.addf %124, %128 : vector<4x1024xf32>
    %c0_115 = arith.constant 0 : index
    %c227 = arith.constant 227 : index
    %130 = vector.load %arg12[%c0_115, %c227] : memref<4x1280xf32, #tpu.memory_space<vmem>>, vector<4x1024xf32>
    %c21 = arith.constant 21 : index
    %c0_116 = arith.constant 0 : index
    %c0_117 = arith.constant 0 : index
    %131 = vector.load %arg9[%c21, %c0_116, %c0_117] : memref<27x4x4xf32, #tpu.memory_space<vmem>>, vector<1x4x4xf32>
    %132 = vector.shape_cast %131 : vector<1x4x4xf32> to vector<4x4xf32>
    %cst_118 = arith.constant dense<0.000000e+00> : vector<4x1024xf32>
    %133 = tpu.matmul %132, %130, %cst_118 {dimension_numbers = #tpu.dot_dimension_numbers<[1], [0], [0], [1], [0, 0, 1, 1], [], []>} : vector<4x4xf32>, vector<4x1024xf32>, vector<4x1024xf32> -> vector<4x1024xf32>
    %134 = arith.addf %129, %133 : vector<4x1024xf32>
    %c0_119 = arith.constant 0 : index
    %c228 = arith.constant 228 : index
    %135 = vector.load %arg12[%c0_119, %c228] : memref<4x1280xf32, #tpu.memory_space<vmem>>, vector<4x1024xf32>
    %c22 = arith.constant 22 : index
    %c0_120 = arith.constant 0 : index
    %c0_121 = arith.constant 0 : index
    %136 = vector.load %arg9[%c22, %c0_120, %c0_121] : memref<27x4x4xf32, #tpu.memory_space<vmem>>, vector<1x4x4xf32>
    %137 = vector.shape_cast %136 : vector<1x4x4xf32> to vector<4x4xf32>
    %cst_122 = arith.constant dense<0.000000e+00> : vector<4x1024xf32>
    %138 = tpu.matmul %137, %135, %cst_122 {dimension_numbers = #tpu.dot_dimension_numbers<[1], [0], [0], [1], [0, 0, 1, 1], [], []>} : vector<4x4xf32>, vector<4x1024xf32>, vector<4x1024xf32> -> vector<4x1024xf32>
    %139 = arith.addf %134, %138 : vector<4x1024xf32>
    %c0_123 = arith.constant 0 : index
    %c229 = arith.constant 229 : index
    %140 = vector.load %arg12[%c0_123, %c229] : memref<4x1280xf32, #tpu.memory_space<vmem>>, vector<4x1024xf32>
    %c23 = arith.constant 23 : index
    %c0_124 = arith.constant 0 : index
    %c0_125 = arith.constant 0 : index
    %141 = vector.load %arg9[%c23, %c0_124, %c0_125] : memref<27x4x4xf32, #tpu.memory_space<vmem>>, vector<1x4x4xf32>
    %142 = vector.shape_cast %141 : vector<1x4x4xf32> to vector<4x4xf32>
    %cst_126 = arith.constant dense<0.000000e+00> : vector<4x1024xf32>
    %143 = tpu.matmul %142, %140, %cst_126 {dimension_numbers = #tpu.dot_dimension_numbers<[1], [0], [0], [1], [0, 0, 1, 1], [], []>} : vector<4x4xf32>, vector<4x1024xf32>, vector<4x1024xf32> -> vector<4x1024xf32>
    %144 = arith.addf %139, %143 : vector<4x1024xf32>
    %c0_127 = arith.constant 0 : index
    %c237 = arith.constant 237 : index
    %145 = vector.load %arg12[%c0_127, %c237] : memref<4x1280xf32, #tpu.memory_space<vmem>>, vector<4x1024xf32>
    %c24 = arith.constant 24 : index
    %c0_128 = arith.constant 0 : index
    %c0_129 = arith.constant 0 : index
    %146 = vector.load %arg9[%c24, %c0_128, %c0_129] : memref<27x4x4xf32, #tpu.memory_space<vmem>>, vector<1x4x4xf32>
    %147 = vector.shape_cast %146 : vector<1x4x4xf32> to vector<4x4xf32>
    %cst_130 = arith.constant dense<0.000000e+00> : vector<4x1024xf32>
    %148 = tpu.matmul %147, %145, %cst_130 {dimension_numbers = #tpu.dot_dimension_numbers<[1], [0], [0], [1], [0, 0, 1, 1], [], []>} : vector<4x4xf32>, vector<4x1024xf32>, vector<4x1024xf32> -> vector<4x1024xf32>
    %149 = arith.addf %144, %148 : vector<4x1024xf32>
    %c0_131 = arith.constant 0 : index
    %c238 = arith.constant 238 : index
    %150 = vector.load %arg12[%c0_131, %c238] : memref<4x1280xf32, #tpu.memory_space<vmem>>, vector<4x1024xf32>
    %c25 = arith.constant 25 : index
    %c0_132 = arith.constant 0 : index
    %c0_133 = arith.constant 0 : index
    %151 = vector.load %arg9[%c25, %c0_132, %c0_133] : memref<27x4x4xf32, #tpu.memory_space<vmem>>, vector<1x4x4xf32>
    %152 = vector.shape_cast %151 : vector<1x4x4xf32> to vector<4x4xf32>
    %cst_134 = arith.constant dense<0.000000e+00> : vector<4x1024xf32>
    %153 = tpu.matmul %152, %150, %cst_134 {dimension_numbers = #tpu.dot_dimension_numbers<[1], [0], [0], [1], [0, 0, 1, 1], [], []>} : vector<4x4xf32>, vector<4x1024xf32>, vector<4x1024xf32> -> vector<4x1024xf32>
    %154 = arith.addf %149, %153 : vector<4x1024xf32>
    %c0_135 = arith.constant 0 : index
    %c239 = arith.constant 239 : index
    %155 = vector.load %arg12[%c0_135, %c239] : memref<4x1280xf32, #tpu.memory_space<vmem>>, vector<4x1024xf32>
    %c26 = arith.constant 26 : index
    %c0_136 = arith.constant 0 : index
    %c0_137 = arith.constant 0 : index
    %156 = vector.load %arg9[%c26, %c0_136, %c0_137] : memref<27x4x4xf32, #tpu.memory_space<vmem>>, vector<1x4x4xf32>
    %157 = vector.shape_cast %156 : vector<1x4x4xf32> to vector<4x4xf32>
    %cst_138 = arith.constant dense<0.000000e+00> : vector<4x1024xf32>
    %158 = tpu.matmul %157, %155, %cst_138 {dimension_numbers = #tpu.dot_dimension_numbers<[1], [0], [0], [1], [0, 0, 1, 1], [], []>} : vector<4x4xf32>, vector<4x1024xf32>, vector<4x1024xf32> -> vector<4x1024xf32>
    %159 = arith.addf %154, %158 : vector<4x1024xf32>
    %c0_139 = arith.constant 0 : index
    %c0_140 = arith.constant 0 : index
    %160 = vector.load %arg10[%c0_139, %c0_140] : memref<4x1xf32, #tpu.memory_space<vmem>>, vector<4x1xf32>
    %161 = vector.broadcast %160 : vector<4x1xf32> to vector<4x1024xf32>
    %162 = arith.addf %159, %161 : vector<4x1024xf32>
    %cst_141 = arith.constant 0.000000e+00 : f32
    %163 = vector.broadcast %cst_141 : f32 to vector<4x1024xf32>
    %164 = arith.maximumf %162, %163 : vector<4x1024xf32>
    %c0_142 = arith.constant 0 : index
    %c0_143 = arith.constant 0 : index
    %165 = vector.load %arg1[%c0_142, %c0_143] : memref<1x1024xf32, #tpu.memory_space<vmem>>, vector<1x1024xf32>
    %166 = vector.broadcast %165 : vector<1x1024xf32> to vector<4x1024xf32>
    %167 = arith.mulf %164, %166 : vector<4x1024xf32>
    %168 = arith.truncf %167 : vector<4x1024xf32> to vector<4x1024xbf16>
    %c0_144 = arith.constant 0 : index
    %c0_145 = arith.constant 0 : index
    %c0_146 = arith.constant 0 : index
    %169 = vector.load %arg11[%c0_144, %c0_145, %c0_146] : memref<1x4x1024xbf16, #tpu.memory_space<vmem>>, vector<1x4x1024xbf16>
    %170 = vector.shape_cast %169 : vector<1x4x1024xbf16> to vector<4x1024xbf16>
    %171 = vector.shape_cast %168 : vector<4x1024xbf16> to vector<1x4x1024xbf16>
    tpu.vector_store %arg11[%c0_144, %c0_145, %c0_146], %171 {strides = array<i32>} : memref<1x4x1024xbf16, #tpu.memory_space<vmem>>, vector<1x4x1024xbf16>,
    return
  }
  func.func @transform_0(%arg0: i32) -> (i32, i32) {
    %c0_i32 = arith.constant 0 : i32
    %c0_i32_0 = arith.constant 0 : i32
    %c0_i32_1 = arith.constant 0 : i32
    return %c0_i32, %c0_i32_0 : i32, i32
  }
  func.func @transform_1(%arg0: i32) -> (i32, i32, i32) {
    %c0_i32 = arith.constant 0 : i32
    %c0_i32_0 = arith.constant 0 : i32
    %c0_i32_1 = arith.constant 0 : i32
    return %arg0, %c0_i32, %c0_i32_0 : i32, i32, i32
  }
  func.func @transform_2(%arg0: i32) -> (i32, i32, i32) {
    %c0_i32 = arith.constant 0 : i32
    %c0_i32_0 = arith.constant 0 : i32
    %c0_i32_1 = arith.constant 0 : i32
    return %arg0, %c0_i32, %c0_i32_0 : i32, i32, i32
  }
  func.func @transform_3(%arg0: i32) -> (i32, i32, i32) {
    %c0_i32 = arith.constant 0 : i32
    %c0_i32_0 = arith.constant 0 : i32
    %c0_i32_1 = arith.constant 0 : i32
    return %arg0, %c0_i32, %c0_i32_0 : i32, i32, i32
  }
  func.func @transform_4(%arg0: i32) -> (i32, i32) {
    %c0_i32 = arith.constant 0 : i32
    %c0_i32_0 = arith.constant 0 : i32
    %c0_i32_1 = arith.constant 0 : i32
    return %c0_i32, %c0_i32_0 : i32, i32
  }
  func.func @transform_5(%arg0: i32) -> (i32, i32) {
    %c0_i32 = arith.constant 0 : i32
    %c0_i32_0 = arith.constant 0 : i32
    %c0_i32_1 = arith.constant 0 : i32
    return %c0_i32, %c0_i32_0 : i32, i32
  }
  func.func @transform_6(%arg0: i32) -> (i32, i32) {
    %c0_i32 = arith.constant 0 : i32
    %c0_i32_0 = arith.constant 0 : i32
    %c0_i32_1 = arith.constant 0 : i32
    return %c0_i32, %c0_i32_0 : i32, i32
  }
  func.func @transform_7(%arg0: i32) -> (i32, i32) {
    %c0_i32 = arith.constant 0 : i32
    %c0_i32_0 = arith.constant 0 : i32
    %c0_i32_1 = arith.constant 0 : i32
    return %c0_i32, %c0_i32_0 : i32, i32
  }
  func.func @transform_8(%arg0: i32) -> (i32, i32, i32) {
    %c0_i32 = arith.constant 0 : i32
    %c0_i32_0 = arith.constant 0 : i32
    %c0_i32_1 = arith.constant 0 : i32
    %c0_i32_2 = arith.constant 0 : i32
    return %c0_i32, %c0_i32_0, %c0_i32_1 : i32, i32, i32
  }
  func.func @transform_9(%arg0: i32) -> (i32, i32) {
    %c0_i32 = arith.constant 0 : i32
    %c0_i32_0 = arith.constant 0 : i32
    %c0_i32_1 = arith.constant 0 : i32
    return %c0_i32, %c0_i32_0 : i32, i32
  }
  func.func @transform_10(%arg0: i32) -> (i32, i32, i32) {
    %c0_i32 = arith.constant 0 : i32
    %c0_i32_0 = arith.constant 0 : i32
    %c0_i32_1 = arith.constant 0 : i32
    return %arg0, %c0_i32, %c0_i32_0 : i32, i32, i32
  }
}

</mosaic_0001>

<bundles_post_ra>
// kernel: dense_unit_forward.3
= control target key start
LH: loop header
LB: loop body
LE: loop exit
PB: predicated region body
PF: predicated region fallthrough
CT: control target
= control target key end

     0   :  { %s10963_s21 = smov 0   ;;  %s12937_s0 = inlined_call_operand.vmem [shape: f32[1,1024], index: 0, kind: input, shape index: {}]   ;;  %s12938_s1 = inlined_call_operand.vmem [shape: bf16[2,4,1024], index: 1, kind: input, shape index: {}]   ;;  %s12939_s2 = inlined_call_operand.vmem [shape: bf16[4,4], index: 2, kind: input, shape index: {}]   ;;  %s12940_s3 = inlined_call_operand.vmem [shape: f32[4,1], index: 3, kind: input, shape index: {}]   ;;  %s12941_s4 = inlined_call_operand.vmem [shape: f32[27,4,4], index: 4, kind: input, shape index: {}]   ;;  %s12942_s5 = inlined_call_operand.vmem [shape: f32[4,1], index: 5, kind: input, shape index: {}]   ;;  %s12943_s6 = inlined_call_operand.vmem [shape: bf16[2,4,1024], index: 6, kind: output, shape index: {}]  }
   0x1 LB: > { %s10251_s22 = sadd.s32 4294967295, %s10897_s21   ;;  %p10255_p0 = scmp.ge.s32.totalorder %s10897_s21, 1  ;;  %s10897_s21 = sphi %s10963_s21, %s16_s21  }
   0x2   : > { %p212_p1 = scmp.lt.s32.totalorder %s10897_s21, 3 }
   0x4   : > { %p213_p2 = pnand %p10255_p0, %p212_p1 }
   0x6   : > { %216 = sbr.rel (%p213_p2) target bundleno = 1078 (0x436), region = 44 }
   0xd   : > { %p242_p3 = scmp.lt.s32.totalorder %s10251_s22, 1  ;;  %v268_v0 = vlaneseq  ;;  %v10899_v1 = vmov 1983009808   ;;  %v10900_v3 = vmov 0   ;;  %v256_v4 = vld [vmem:[%s12940_s3] sm:$0xf] }
   0xe   : > { %v266_v2 = vunpack.c.l.s4 %v10899_v1  ;;  %359 = vmatprep.mubr.bf16.mxu0 %v10900_v3  ;;  %400 = vmatprep.mubr.bf16.mxu1 %v10900_v3  ;;  %vm302_vm0 = vcmask 1041408   ;;  %v253_v21 = vld [vmem:[%s12939_s2] sm:$0x3]  ;;  %vm298_vm1 = vcmask 31744   ;;  %v12952_v25 = vmov 0.0   ;;  %s10902_s7 = smov 127  }
   0xf   : > { %s13093_s22 = smov (!%p242_p3, %s10251_s22), 1  ;;  %v10976_v5 = vshrl.u32 %v268_v0, 7  ;;  %10871 = vset.pattern.permute.xlu0 %v10900_v3  ;;  %10872 = vset.pattern.permute.xlu1 %v10900_v3  ;;  %550 = vst [vmem:[#allocation2 + $0x24] sm:$0xf] %v12952_v25  ;;  %549 = vst [vmem:[#allocation2] sm:$0xf] %v12952_v25 }
  0x10   : > { %v267_v6 = vunpack.c.0.s8 %v266_v2  ;;  %259 = vperm.xlu0 %10871, %v256_v4   ;;  %s10624_s25 = sshll.u32 %s13093_s22, 4  ;;  %v499_v29 = vld [vmem:[%s12937_s0] sm:$0xff]  ;;  %s10903_s10 = smov 111   ;;  %vm606_vm2 = vcmask 900096   ;;  %vm618_vm3 = vcmask 1043456   ;;  %vm937_vm4 = vcmask 908288  }
  0x11   : > { %12991 = vst [vmem:[#allocation3_spill] sm:$0xff] %v10976_v5  ;;  %s246_s28 = scalar_lea.vmem %s12938_s1, %s10624_s25  ;;  %v12951_v27 = vsub.s32 0, %v10976_v5  ;;  %v12950_v30 = vsub.s32 1, %v10976_v5  ;;  %v12949_v31 = vsub.s32 2, %v10976_v5  ;;  %v12948_v33 = vsub.s32 3, %v10976_v5  ;;  %s10904_s11 = smov 110  }
  0x12   : > { %v10985_v7 = vsub.s32 %v267_v6, %v10976_v5  ;;  %v254_v8 = vld [vmem:[%s246_s28] sm:$0xff]  ;;  %v255_v9 = vld [vmem:[%s246_s28 + $0x8] sm:$0xff]  ;;  %v12947_v52 = vsub.s32 4, %v10976_v5  ;;  %v12946_v56 = vsub.s32 5, %v10976_v5  ;;  %v12945_v58 = vsub.s32 6, %v10976_v5  ;;  %s10905_s12 = smov 101  }
  0x13   : > { %v281_v11 = vcombine.high %v255_v9, %v255_v9  ;;  %v264_v13 = vcombine.high %v254_v8, %v254_v8  ;;  %v504_v35 = vrot.slane %v499_v29, %v12951_v27  ;;  %v508_v38 = vrot.slane %v499_v29, %v12950_v30  ;;  %s10906_s13 = smov 109   ;;  %s10907_s14 = smov 99  }
  0x14   : > { %12992 = vst [vmem:[#allocation4_spill] sm:$0xff] %v10985_v7  ;;  %v271_v10 = vrot.slane %v254_v8, %v10985_v7  ;;  %v288_v12 = vrot.slane %v255_v9, %v10985_v7  ;;  %v512_v43 = vrot.slane %v499_v29, %v12949_v31  ;;  %v516_v48 = vrot.slane %v499_v29, %v12948_v33  ;;  %s10908_s15 = smov 100   ;;  %s10909_s16 = smov 90  }
  0x15   : > { %v278_v16 = vrot.slane %v264_v13, %v10985_v7  ;;  %v295_v18 = vrot.slane %v281_v11, %v10985_v7  ;;  %v12944_v62 = vsub.s32 7, %v10976_v5  ;;  %v520_v0 = vrot.slane %v499_v29, %v12947_v52  ;;  %s10910_s17 = smov 91   ;;  %s10911_s18 = smov 11  }
  0x16   : > { %v279_v14 = vcombine.high %v271_v10, %v271_v10  ;;  %v304_v15 = vsel %vm302_vm0, %v271_v10, 0  ;;  %v296_v17 = vcombine.high %v288_v12, %v288_v12  ;;  %v316_v23 = vsel %vm302_vm0, %v288_v12, 0  ;;  %v5472_v26 = vld [vmem:[#allocation2 + $0x24] sm:$0xf]  ;;  %s10912_s19 = smov 89   ;;  %s10913_s20 = smov 9  }
  0x17   : > { %v280_v19 = vcombine.high %v278_v16, %v278_v16  ;;  %v310_v20 = vsel %vm302_vm0, %v278_v16, 0  ;;  %v297_v22 = vcombine.high %v295_v18, %v295_v18  ;;  %v322_v24 = vsel %vm302_vm0, %v295_v18, 0  ;;  %5500 = vrot.lane.b32.xlu0 %v5472_v26, %s10902_s7  ;;  %s10914_s23 = smov 10   ;;  %s10915_s24 = smov 1  }
  0x18   : > { %10260 = vmatprep.subr.msk.bf16.mxu0 %vm302_vm0, %v279_v14  ;;  %v524_v4 = vrot.slane %v499_v29, %v12946_v56  ;;  %v528_v11 = vrot.slane %v499_v29, %v12945_v58  ;;  %v532_v16 = vrot.slane %v499_v29, %v12944_v62  ;;  %s10916_s26 = smov 119   ;;  %s10917_s29 = smov 118   ;;  %vm1283_vm5 = vcmask 891904  }
  0x19   : > { %328 = vmatpush1.bf16.msra.mxu0 %v304_v15  ;;  %10262 = vmatprep.subr.msk.bf16.mxu1 %vm302_vm0, %v280_v19  ;;  %vm1637_vm6 = vcmask 826368   ;;  %vm1991_vm7 = vcmask 818176   ;;  %vm2345_vm8 = vcmask 809984   ;;  %vm2699_vm9 = vcmask 744448   ;;  %s10921_s30 = smov 37   ;;  %s10925_s27 = smov 19  }
  0x1a   : > { %10264 = vmatprep.subr.msk.bf16.mxu0 %vm302_vm0, %v296_v17  ;;  %369 = vmatpush1.bf16.msra.mxu1 %v310_v20  ;;  %vm3053_vm10 = vcmask 736256   ;;  %vm3407_vm11 = vcmask 728064   ;;  %vm3761_vm12 = vcmask 89088   ;;  %vm4115_vm13 = vcmask 80896   ;;  %s10926_s8 = smov 18  }
  0x1b   : > { %10266 = vmatprep.subr.msk.bf16.mxu1 %vm302_vm0, %v297_v22  ;;  %vm4469_vm14 = vcmask 72704   ;;  %vm4823_vm15 = vcmask 7168   ;;  %vm5502_vm0 = vcmask 1039360  }
  0x1c   : > { %10261 = vmatmul.mubr.msk.bf16.vlgmr.msra.gmra.mrb[0].mxu0 %vm298_vm1, %v253_v21 }
  0x1d   : > { %410 = vmatpush1.bf16.msra.mxu0 %v316_v23  ;;  %441 = vmatprep.mubr.bf16.mxu0 %v10900_v3 }
  0x1e   : > { %10263 = vmatmul.mubr.msk.bf16.vlgmr.msra.gmra.mrb[0].mxu1 %vm298_vm1, %v253_v21 }
  0x1f   : > { %451 = vmatpush1.bf16.msra.mxu1 %v322_v24  ;;  %482 = vmatprep.mubr.bf16.mxu1 %v10900_v3 }
  0x24   : > { %10265 = vmatmul.mubr.msk.bf16.vlgmr.msra.gmra.mrb[4].mxu0 %vm298_vm1, %v253_v21 }
  0x25   : > { %699 = vmatprep.mubr.f32.mxu0 %v12952_v25 }
  0x26   : > { %10267 = vmatmul.mubr.msk.bf16.vlgmr.msra.gmra.mrb[4].mxu1 %vm298_vm1, %v253_v21 }
  0x27   : > { %770 = vmatprep.mubr.f32.mxu1 %v12952_v25 }
  0x8f   : > { %v260_v28 = vpop.permute.xlu0 %259 }
  0xef   : > { %v361_v32 = vpop.f32.mrb[0].mxu0 }
  0xf0   : > { %v362_v34 = vadd.f32 %v361_v32, %v260_v28  ;;  %v363_v36 = vpop.f32.mrb[1].mxu0 }
  0xf1   : > { %v364_v37 = vadd.f32 %v363_v36, %v260_v28  ;;  %v365_v39 = vpop.f32.mrb[2].mxu0  ;;  %v402_v40 = vpop.f32.mrb[0].mxu1 }
  0xf2   : > { %v491_v41 = vmax.f32 %v362_v34, 0.0  ;;  %v403_v42 = vadd.f32 %v402_v40, %v260_v28  ;;  %v366_v44 = vpop.f32.mrb[3].mxu0  ;;  %v404_v45 = vpop.f32.mrb[1].mxu1 }
  0xf3   : > { %v492_v46 = vmax.f32 %v364_v37, 0.0  ;;  %v405_v47 = vadd.f32 %v404_v45, %v260_v28  ;;  %v406_v49 = vpop.f32.mrb[2].mxu1  ;;  %v11127_v37 = vpop.permute.xlu0 %5500 }
  0xf4   : > { %v541_v50 = vmul.f32 %v504_v35, %v491_v41  ;;  %v493_v51 = vmax.f32 %v403_v42, 0.0  ;;  %v407_v53 = vpop.f32.mrb[3].mxu1  ;;  %12993 = vst [vmem:[#allocation5_spill] sm:$0xff] %v11127_v37 }
  0xf5   : > { %v11027_v54 = vmul.f32 %v508_v38, %v492_v46  ;;  %v494_v55 = vmax.f32 %v405_v47, 0.0 }
  0xf6   : > { %v543_v57 = vmul.f32 %v512_v43, %v493_v51 }
  0xf7   : > { %v11032_v59 = vcombine.low %v541_v50, %v11027_v54  ;;  %v11034_v60 = vmul.f32 %v516_v48, %v494_v55  ;;  %v443_v61 = vpop.f32.mrb[4].mxu0  ;;  %v11105_v35 = vcombine.low %v11027_v54, %v11027_v54 }
  0xf8   : > { %v444_v63 = vadd.f32 %v443_v61, %v260_v28  ;;  %v445_v1 = vpop.f32.mrb[5].mxu0 }
  0xf9   : > { %567 = vst [vmem:[#allocation2 + $0x4] sm:$0xff] %v11032_v59  ;;  %v11041_v2 = vcombine.low %v543_v57, %v11034_v60  ;;  %v446_v3 = vadd.f32 %v445_v1, %v260_v28  ;;  %v484_v6 = vpop.f32.mrb[4].mxu1  ;;  %v447_v8 = vpop.f32.mrb[6].mxu0  ;;  %v11131_v38 = vcombine.low %v11034_v60, %v11034_v60 }
  0xfa   : > { %v495_v9 = vmax.f32 %v444_v63, 0.0  ;;  %v485_v10 = vadd.f32 %v484_v6, %v260_v28  ;;  %v486_v12 = vpop.f32.mrb[5].mxu1  ;;  %v448_v13 = vpop.f32.mrb[7].mxu0 }
  0xfb   : > { %568 = vst [vmem:[#allocation2 + $0xc] sm:$0xff] %v11041_v2  ;;  %v496_v14 = vmax.f32 %v446_v3, 0.0  ;;  %v487_v15 = vadd.f32 %v486_v12, %v260_v28  ;;  %v488_v17 = vpop.f32.mrb[6].mxu1 }
  0xfc   : > { %v545_v18 = vmul.f32 %v520_v0, %v495_v9  ;;  %v497_v19 = vmax.f32 %v485_v10, 0.0  ;;  %v489_v20 = vpop.f32.mrb[7].mxu1  ;;  %v11187_v0 = vld [vmem:[%s12941_s4 + $0x4] sm:$0xf] }
  0xfd   : > { %v11050_v21 = vmul.f32 %v524_v4, %v496_v14  ;;  %v498_v22 = vmax.f32 %v487_v15, 0.0 }
  0xfe   : > { %v547_v23 = vmul.f32 %v528_v11, %v497_v19 }
  0xff   : > { %v11053_v24 = vcombine.low %v545_v18, %v11050_v21  ;;  %v11055_v26 = vmul.f32 %v532_v16, %v498_v22 }
 0x100   : > { %v571_v32 = vld [vmem:[#allocation2] sm:$0xff] }
 0x101   : > { %569 = vst [vmem:[#allocation2 + $0x14] sm:$0xff] %v11053_v24  ;;  %v11059_v28 = vcombine.low %v547_v23, %v11055_v26  ;;  %919 = vrot.lane.b32.xlu0 %v571_v32, %s10903_s10  ;;  %588 = vrot.lane.b32.xlu1 %v571_v32, %s10904_s11  ;;  %v1615_v29 = vcombine.high %v571_v32, %v571_v32 }
 0x102   : > { %v572_v34 = vld [vmem:[#allocation2 + $0x8] sm:$0xff] }
 0x103   : > { %570 = vst [vmem:[#allocation2 + $0x1c] sm:$0xff] %v11059_v28  ;;  %v1262_v36 = vcombine.high %v572_v34, %v572_v34 }
 0x105   : > { %1619 = vrot.lane.b32.xlu0 %v571_v32, %s10905_s12  ;;  %1265 = vrot.lane.b32.xlu1 %v571_v32, %s10906_s13 }
 0x108   : > { %v573_v41 = vld [vmem:[#allocation2 + $0x10] sm:$0xff] }
 0x109   : > { %2327 = vrot.lane.b32.xlu0 %v571_v32, %s10907_s14  ;;  %1973 = vrot.lane.b32.xlu1 %v571_v32, %s10908_s15  ;;  %v11177_v55 = vcombine.high %v573_v41, %v573_v41 }
 0x10a   : > { %v11201_v4 = vld [vmem:[#allocation2 + $0x18] sm:$0xff]  ;;  %v575_v9 = vld [vmem:[#allocation2 + $0x20] sm:$0xf] }
 0x10b   : > { %v1607_v16 = vld [vmem:[#allocation2 + $0x20] sm:$0xf] }
 0x10c   : > { %v1253_v17 = vld [vmem:[#allocation2 + $0x20] sm:$0xf] }
 0x10d   : > { %3035 = vrot.lane.b32.xlu0 %v571_v32, %s10909_s16  ;;  %2681 = vrot.lane.b32.xlu1 %v571_v32, %s10910_s17  ;;  %v3731_v58 = vld [vmem:[#allocation2 + $0x20] sm:$0xf] }
 0x10e   : > { %v3377_v56 = vld [vmem:[#allocation2 + $0x20] sm:$0xf] }
 0x10f   : > { %v4439_v27 = vld [vmem:[#allocation2 + $0x20] sm:$0xf] }
 0x111   : > { %3743 = vrot.lane.b32.xlu0 %v571_v32, %s10911_s18  ;;  %3389 = vrot.lane.b32.xlu1 %v571_v32, %s10912_s19 }
 0x115   : > { %4451 = vrot.lane.b32.xlu0 %v571_v32, %s10913_s20  ;;  %4097 = vrot.lane.b32.xlu1 %v571_v32, %s10914_s23 }
 0x119   : > { %5484 = vrot.lane.b32.xlu0 %v11032_v59, %s10902_s7  ;;  %4805 = vrot.lane.b32.xlu1 %v571_v32, %s10915_s24 }
 0x11d   : > { %590 = vrot.lane.b32.xlu0 %v1615_v29, %s10904_s11  ;;  %592 = vrot.lane.b32.xlu1 %v572_v34, %s10904_s11 }
 0x121   : > { %921 = vrot.lane.b32.xlu0 %v1615_v29, %s10903_s10  ;;  %923 = vrot.lane.b32.xlu1 %v572_v34, %s10903_s10 }
 0x125   : > { %1269 = vrot.lane.b32.xlu0 %v572_v34, %s10906_s13  ;;  %1267 = vrot.lane.b32.xlu1 %v1615_v29, %s10906_s13 }
 0x129   : > { %1621 = vrot.lane.b32.xlu0 %v1615_v29, %s10905_s12  ;;  %1623 = vrot.lane.b32.xlu1 %v572_v34, %s10905_s12 }
 0x12d   : > { %1977 = vrot.lane.b32.xlu0 %v572_v34, %s10908_s15  ;;  %1975 = vrot.lane.b32.xlu1 %v1615_v29, %s10908_s15 }
 0x131   : > { %2329 = vrot.lane.b32.xlu0 %v1615_v29, %s10907_s14  ;;  %2331 = vrot.lane.b32.xlu1 %v572_v34, %s10907_s14 }
 0x135   : > { %2685 = vrot.lane.b32.xlu0 %v572_v34, %s10910_s17  ;;  %2683 = vrot.lane.b32.xlu1 %v1615_v29, %s10910_s17 }
 0x139   : > { %3037 = vrot.lane.b32.xlu0 %v1615_v29, %s10909_s16  ;;  %3039 = vrot.lane.b32.xlu1 %v572_v34, %s10909_s16 }
 0x13d   : > { %3393 = vrot.lane.b32.xlu0 %v572_v34, %s10912_s19  ;;  %3391 = vrot.lane.b32.xlu1 %v1615_v29, %s10912_s19 }
 0x141   : > { %3745 = vrot.lane.b32.xlu0 %v1615_v29, %s10911_s18  ;;  %3747 = vrot.lane.b32.xlu1 %v572_v34, %s10911_s18 }
 0x145   : > { %4101 = vrot.lane.b32.xlu0 %v572_v34, %s10914_s23  ;;  %4099 = vrot.lane.b32.xlu1 %v1615_v29, %s10914_s23 }
 0x149   : > { %4453 = vrot.lane.b32.xlu0 %v1615_v29, %s10913_s20  ;;  %4455 = vrot.lane.b32.xlu1 %v572_v34, %s10913_s20 }
 0x14d   : > { %4809 = vrot.lane.b32.xlu0 %v572_v34, %s10915_s24  ;;  %4807 = vrot.lane.b32.xlu1 %v1615_v29, %s10915_s24  ;;  %v2315_v29 = vld [vmem:[#allocation2 + $0x20] sm:$0xf] }
 0x14e   : > { %v1961_v34 = vld [vmem:[#allocation2 + $0x20] sm:$0xf] }
 0x151   : > { %5486 = vrot.lane.b32.xlu0 %v11105_v35, %s10902_s7  ;;  %5488 = vrot.lane.b32.xlu1 %v11041_v2, %s10902_s7 }
 0x155   : > { %5842 = vrot.lane.b32.xlu0 %v11041_v2, %s10916_s26  ;;  %5840 = vrot.lane.b32.xlu1 %v11105_v35, %s10916_s26 }
 0x159   : > { %925 = vrot.lane.b32.xlu0 %v1262_v36, %s10903_s10  ;;  %594 = vrot.lane.b32.xlu1 %v1262_v36, %s10904_s11 }
 0x15d   : > { %1625 = vrot.lane.b32.xlu0 %v1262_v36, %s10905_s12  ;;  %1271 = vrot.lane.b32.xlu1 %v1262_v36, %s10906_s13 }
 0x161   : > { %2333 = vrot.lane.b32.xlu0 %v1262_v36, %s10907_s14  ;;  %1979 = vrot.lane.b32.xlu1 %v1262_v36, %s10908_s15 }
 0x165   : > { %3041 = vrot.lane.b32.xlu0 %v1262_v36, %s10909_s16  ;;  %2687 = vrot.lane.b32.xlu1 %v1262_v36, %s10910_s17 }
 0x169   : > { %3749 = vrot.lane.b32.xlu0 %v1262_v36, %s10911_s18  ;;  %3395 = vrot.lane.b32.xlu1 %v1262_v36, %s10912_s19 }
 0x16d   : > { %4457 = vrot.lane.b32.xlu0 %v1262_v36, %s10913_s20  ;;  %4103 = vrot.lane.b32.xlu1 %v1262_v36, %s10914_s23 }
 0x171   : > { %5490 = vrot.lane.b32.xlu0 %v11131_v38, %s10902_s7  ;;  %4811 = vrot.lane.b32.xlu1 %v1262_v36, %s10915_s24 }
 0x173   : > { %v11136_v39 = vpop.permute.xlu0 %919  ;;  %v589_v40 = vpop.permute.xlu1 %588 }
 0x175   : > { %596 = vrot.lane.b32.xlu0 %v573_v41, %s10904_s11  ;;  %5844 = vrot.lane.b32.xlu1 %v11131_v38, %s10916_s26 }
 0x177   : > { %v11141_v42 = vpop.permute.xlu0 %1619  ;;  %v11143_v43 = vpop.permute.xlu1 %1265 }
 0x179   : > { %1273 = vrot.lane.b32.xlu0 %v573_v41, %s10906_s13  ;;  %927 = vrot.lane.b32.xlu1 %v573_v41, %s10903_s10 }
 0x17b   : > { %v11147_v44 = vpop.permute.xlu0 %2327  ;;  %v11149_v45 = vpop.permute.xlu1 %1973 }
 0x17d   : > { %1981 = vrot.lane.b32.xlu0 %v573_v41, %s10908_s15  ;;  %1627 = vrot.lane.b32.xlu1 %v573_v41, %s10905_s12 }
 0x17f   : > { %v11153_v46 = vpop.permute.xlu0 %3035  ;;  %v11155_v47 = vpop.permute.xlu1 %2681 }
 0x181   : > { %2689 = vrot.lane.b32.xlu0 %v573_v41, %s10910_s17  ;;  %2335 = vrot.lane.b32.xlu1 %v573_v41, %s10907_s14 }
 0x183   : > { %v11159_v48 = vpop.permute.xlu0 %3743  ;;  %v11161_v49 = vpop.permute.xlu1 %3389 }
 0x185   : > { %3397 = vrot.lane.b32.xlu0 %v573_v41, %s10912_s19  ;;  %3043 = vrot.lane.b32.xlu1 %v573_v41, %s10909_s16 }
 0x187   : > { %v11165_v50 = vpop.permute.xlu0 %4451  ;;  %v11167_v51 = vpop.permute.xlu1 %4097 }
 0x189   : > { %4105 = vrot.lane.b32.xlu0 %v573_v41, %s10914_s23  ;;  %3751 = vrot.lane.b32.xlu1 %v573_v41, %s10911_s18 }
 0x18b   : > { %v11171_v53 = vpop.permute.xlu0 %5484  ;;  %v11173_v54 = vpop.permute.xlu1 %4805 }
 0x18c   : > { %12994 = vst [vmem:[#allocation6_spill] sm:$0xff] %v11171_v53  ;;  %12995 = vst [vmem:[#allocation7_spill] sm:$0xff] %v11173_v54 }
 0x18d   : > { %4813 = vrot.lane.b32.xlu0 %v573_v41, %s10915_s24  ;;  %4459 = vrot.lane.b32.xlu1 %v573_v41, %s10913_s20 }
 0x18f   : > { %v591_v57 = vpop.permute.xlu0 %590  ;;  %v11179_v60 = vpop.permute.xlu1 %592 }
 0x190   : > { %v607_v61 = vsel %vm606_vm2, %v589_v40, %v591_v57  ;;  %v608_v63 = vsel %vm606_vm2, %v591_v57, %v11179_v60 }
 0x191   : > { %10269 = vmatprep.subr.msk.mxu0 %vm618_vm3, %v608_v63  ;;  %598 = vrot.lane.b32.xlu0 %v11177_v55, %s10904_s11 }
 0x192   : > { %5492 = vrot.lane.b32.xlu1 %v11053_v24, %s10902_s7  ;;  %10270 = vmatpush1.msk.msra.mxu0 %vm618_vm3, %v607_v61 }
 0x193   : > { %v11195_v1 = vpop.permute.xlu0 %921  ;;  %v11197_v3 = vpop.permute.xlu1 %923  ;;  %10271 = vmatmul.mubr.msk.f32.vlgmr.msra.gmra.mrb[8].mxu0 %vm298_vm1, %v11187_v0 }
 0x194   : > { %841 = vmatprep.mubr.f32.mxu0 %v12952_v25  ;;  %v4085_v25 = vld [vmem:[#allocation2 + $0x20] sm:$0xf] }
 0x195   : > { %931 = vrot.lane.b32.xlu0 %v11201_v4, %s10903_s10 }
 0x196   : > { %600 = vrot.lane.b32.xlu1 %v11201_v4, %s10904_s11 }
 0x197   : > { %v11208_v6 = vpop.permute.xlu0 %1269  ;;  %v11210_v8 = vpop.permute.xlu1 %1267 }
 0x199   : > { %935 = vrot.lane.b32.xlu0 %v575_v9, %s10903_s10 }
 0x19a   : > { %604 = vrot.lane.b32.xlu1 %v575_v9, %s10904_s11  ;;  %v3023_v9 = vld [vmem:[#allocation2 + $0x20] sm:$0xf] }
 0x19b   : > { %v11214_v10 = vpop.permute.xlu0 %1621  ;;  %v11216_v11 = vpop.permute.xlu1 %1623 }
 0x19d   : > { %1275 = vrot.lane.b32.xlu0 %v11177_v55, %s10906_s13 }
 0x19e   : > { %929 = vrot.lane.b32.xlu1 %v11177_v55, %s10903_s10 }
 0x19f   : > { %v11222_v12 = vpop.permute.xlu0 %1977  ;;  %v11224_v13 = vpop.permute.xlu1 %1975 }
 0x1a0   : > { %12996 = vst [vmem:[#allocation8_spill] sm:$0xff] %v11222_v12 }
 0x1a1   : > { %1631 = vrot.lane.b32.xlu0 %v11201_v4, %s10905_s12 }
 0x1a2   : > { %1277 = vrot.lane.b32.xlu1 %v11201_v4, %s10906_s13 }
 0x1a3   : > { %v11230_v14 = vpop.permute.xlu0 %2329  ;;  %v11232_v15 = vpop.permute.xlu1 %2331 }
 0x1a4   : > { %12997 = vst [vmem:[#allocation9_spill] sm:$0xff] %v11232_v15 }
 0x1a5   : > { %1635 = vrot.lane.b32.xlu0 %v1607_v16, %s10905_s12  ;;  %v2669_v16 = vld [vmem:[#allocation2 + $0x20] sm:$0xf] }
 0x1a6   : > { %1281 = vrot.lane.b32.xlu1 %v1253_v17, %s10906_s13 }
 0x1a7   : > { %v11236_v18 = vpop.permute.xlu0 %2685  ;;  %v11238_v19 = vpop.permute.xlu1 %2683 }
 0x1a8   : > { %12998 = vst [vmem:[#allocation10_spill] sm:$0xff] %v11236_v18 }
 0x1a9   : > { %1983 = vrot.lane.b32.xlu0 %v11177_v55, %s10908_s15 }
 0x1aa   : > { %1629 = vrot.lane.b32.xlu1 %v11177_v55, %s10905_s12 }
 0x1ab   : > { %v11244_v20 = vpop.permute.xlu0 %3037  ;;  %v11246_v22 = vpop.permute.xlu1 %3039 }
 0x1ac   : > { %12999 = vst [vmem:[#allocation11_spill] sm:$0xff] %v11246_v22 }
 0x1ad   : > { %2339 = vrot.lane.b32.xlu0 %v11201_v4, %s10907_s14 }
 0x1ae   : > { %1985 = vrot.lane.b32.xlu1 %v11201_v4, %s10908_s15 }
 0x1af   : > { %v11252_v23 = vpop.permute.xlu0 %3393  ;;  %v11254_v32 = vpop.permute.xlu1 %3391 }
 0x1b1   : > { %2343 = vrot.lane.b32.xlu0 %v2315_v29, %s10907_s14 }
 0x1b2   : > { %1989 = vrot.lane.b32.xlu1 %v1961_v34, %s10908_s15 }
 0x1b3   : > { %v11258_v36 = vpop.permute.xlu0 %3745  ;;  %v11260_v40 = vpop.permute.xlu1 %3747 }
 0x1b4   : > { %13000 = vst [vmem:[#allocation12_spill] sm:$0xff] %v11260_v40 }
 0x1b5   : > { %2691 = vrot.lane.b32.xlu0 %v11177_v55, %s10910_s17 }
 0x1b6   : > { %2337 = vrot.lane.b32.xlu1 %v11177_v55, %s10907_s14 }
 0x1b7   : > { %v11266_v41 = vpop.permute.xlu0 %4101  ;;  %v11268_v57 = vpop.permute.xlu1 %4099 }
 0x1b8   : > { %13001 = vst [vmem:[#allocation13_spill] sm:$0xff] %v11266_v41 }
 0x1b9   : > { %3047 = vrot.lane.b32.xlu0 %v11201_v4, %s10909_s16 }
 0x1ba   : > { %2693 = vrot.lane.b32.xlu1 %v11201_v4, %s10910_s17 }
 0x1bb   : > { %v11274_v61 = vpop.permute.xlu0 %4453  ;;  %v11276_v63 = vpop.permute.xlu1 %4455 }
 0x1bd   : > { %3051 = vrot.lane.b32.xlu0 %v3023_v9, %s10909_s16 }
 0x1be   : > { %2697 = vrot.lane.b32.xlu1 %v2669_v16, %s10910_s17 }
 0x1bf   : > { %v11280_v17 = vpop.permute.xlu0 %4809  ;;  %v11282_v29 = vpop.permute.xlu1 %4807 }
 0x1c0   : > { %13002 = vst [vmem:[#allocation14_spill] sm:$0xff] %v11280_v17  ;;  %13003 = vst [vmem:[#allocation15_spill] sm:$0xff] %v11282_v29  ;;  %v939_v17 = vsel %vm937_vm4, %v11195_v1, %v11197_v3 }
 0x1c1   : > { %3399 = vrot.lane.b32.xlu0 %v11177_v55, %s10912_s19 }
 0x1c2   : > { %3045 = vrot.lane.b32.xlu1 %v11177_v55, %s10909_s16 }
 0x1c3   : > { %v11288_v34 = vpop.permute.xlu0 %5486  ;;  %v11290_v62 = vpop.permute.xlu1 %5488 }
 0x1c4   : > { %13004 = vst [vmem:[#allocation16_spill] sm:$0xff] %v11288_v34  ;;  %13005 = vst [vmem:[#allocation17_spill] sm:$0xff] %v11290_v62 }
 0x1c5   : > { %3755 = vrot.lane.b32.xlu0 %v11201_v4, %s10911_s18 }
 0x1c6   : > { %3401 = vrot.lane.b32.xlu1 %v11201_v4, %s10912_s19 }
 0x1c7   : > { %v11296_v9 = vpop.permute.xlu0 %5842  ;;  %v11298_v16 = vpop.permute.xlu1 %5840 }
 0x1c8   : > { %13006 = vst [vmem:[#allocation18_spill] sm:$0xff] %v11296_v9  ;;  %13007 = vst [vmem:[#allocation19_spill] sm:$0xff] %v11298_v16 }
 0x1c9   : > { %3759 = vrot.lane.b32.xlu0 %v3731_v58, %s10911_s18 }
 0x1ca   : > { %3405 = vrot.lane.b32.xlu1 %v3377_v56, %s10912_s19 }
 0x1cb   : > { %v11302_v52 = vpop.permute.xlu0 %925  ;;  %v595_v33 = vpop.permute.xlu1 %594 }
 0x1cd   : > { %4107 = vrot.lane.b32.xlu0 %v11177_v55, %s10914_s23 }
 0x1ce   : > { %3753 = vrot.lane.b32.xlu1 %v11177_v55, %s10911_s18 }
 0x1cf   : > { %v11308_v31 = vpop.permute.xlu0 %1625  ;;  %v11310_v30 = vpop.permute.xlu1 %1271 }
 0x1d0   : > { %13008 = vst [vmem:[#allocation20_spill] sm:$0xff] %v11308_v31 }
 0x1d1   : > { %4463 = vrot.lane.b32.xlu0 %v11201_v4, %s10913_s20 }
 0x1d2   : > { %4109 = vrot.lane.b32.xlu1 %v11201_v4, %s10914_s23 }
 0x1d3   : > { %v11316_v56 = vpop.permute.xlu0 %2333  ;;  %v11318_v58 = vpop.permute.xlu1 %1979 }
 0x1d4   : > { %13009 = vst [vmem:[#allocation21_spill] sm:$0xff] %v11316_v56  ;;  %13010 = vst [vmem:[#allocation22_spill] sm:$0xff] %v11318_v58  ;;  %v11406_v58 = vcombine.low %v11055_v26, %v11055_v26 }
 0x1d5   : > { %4467 = vrot.lane.b32.xlu0 %v4439_v27, %s10913_s20 }
 0x1d6   : > { %4113 = vrot.lane.b32.xlu1 %v4085_v25, %s10914_s23  ;;  %v587_v25 = vcombine.high %v11201_v4, %v11201_v4 }
 0x1d7   : > { %v11322_v7 = vpop.permute.xlu0 %3041  ;;  %v11324_v5 = vpop.permute.xlu1 %2687 }
 0x1d8   : > { %13011 = vst [vmem:[#allocation23_spill] sm:$0xff] %v11322_v7  ;;  %13012 = vst [vmem:[#allocation24_spill] sm:$0xff] %v11324_v5  ;;  %v11352_v5 = vcombine.low %v11050_v21, %v11050_v21 }
 0x1d9   : > { %4815 = vrot.lane.b32.xlu0 %v11177_v55, %s10915_s24 }
 0x1da   : > { %4461 = vrot.lane.b32.xlu1 %v11177_v55, %s10913_s20  ;;  %v4793_v55 = vld [vmem:[#allocation2 + $0x20] sm:$0xf] }
 0x1db   : > { %v11330_v37 = vpop.permute.xlu0 %3749  ;;  %v11332_v16 = vpop.permute.xlu1 %3395 }
 0x1dc   : > { %13013 = vst [vmem:[#allocation25_spill] sm:$0xff] %v11330_v37  ;;  %13014 = vst [vmem:[#allocation26_spill] sm:$0xff] %v11332_v16 }
 0x1dd   : > { %5496 = vrot.lane.b32.xlu0 %v11059_v28, %s10902_s7 }
 0x1de   : > { %4817 = vrot.lane.b32.xlu1 %v11201_v4, %s10915_s24 }
 0x1df   : > { %v11340_v27 = vpop.permute.xlu0 %4457  ;;  %v11342_v7 = vpop.permute.xlu1 %4103 }
 0x1e0   : > { %13015 = vst [vmem:[#allocation27_spill] sm:$0xff] %v11340_v27  ;;  %13016 = vst [vmem:[#allocation28_spill] sm:$0xff] %v11342_v7 }
 0x1e1   : > { %602 = vrot.lane.b32.xlu0 %v587_v25, %s10904_s11  ;;  %s10927_s11 = smov 17  }
 0x1e2   : > { %4821 = vrot.lane.b32.xlu1 %v4793_v55, %s10915_s24  ;;  %v609_v55 = vsel %vm606_vm2, %v11179_v60, %v595_v33 }
 0x1e3   : > { %v11346_v37 = vpop.permute.xlu0 %5490  ;;  %v11348_v16 = vpop.permute.xlu1 %4811 }
 0x1e4   : > { %13017 = vst [vmem:[#allocation29_spill] sm:$0xff] %v11346_v37  ;;  %13018 = vst [vmem:[#allocation30_spill] sm:$0xff] %v11348_v16 }
 0x1e5   : > { %1279 = vrot.lane.b32.xlu0 %v587_v25, %s10906_s13  ;;  %s10922_s13 = smov 29  }
 0x1e6   : > { %5494 = vrot.lane.b32.xlu1 %v11352_v5, %s10902_s7 }
 0x1e7   : > { %v597_v4 = vpop.permute.xlu0 %596  ;;  %v11357_v27 = vpop.permute.xlu1 %5844 }
 0x1e8   : > { %13019 = vst [vmem:[#allocation31_spill] sm:$0xff] %v11357_v27  ;;  %v610_v7 = vsel %vm606_vm2, %v595_v33, %v597_v4  ;;  %v13020_v27 = vmov 0.0  }
 0x1e9   : > { %1987 = vrot.lane.b32.xlu0 %v587_v25, %s10908_s15  ;;  %10272 = vmatprep.subr.msk.mxu1 %vm618_vm3, %v610_v7  ;;  %s10919_s15 = smov 39  }
 0x1ea   : > { %933 = vrot.lane.b32.xlu1 %v587_v25, %s10903_s10  ;;  %10273 = vmatpush1.msk.msra.mxu1 %vm618_vm3, %v609_v55  ;;  %s10918_s10 = smov 117  }
 0x1eb   : > { %v11366_v21 = vpop.permute.xlu0 %1273  ;;  %v11368_v37 = vpop.permute.xlu1 %927  ;;  %10274 = vmatmul.mubr.msk.f32.vlgmr.msra.gmra.mrb[8].mxu1 %vm298_vm1, %v11187_v0 }
 0x1ec   : > { %912 = vmatprep.mubr.f32.mxu1 %v13020_v27 }
 0x1ed   : > { %2695 = vrot.lane.b32.xlu0 %v587_v25, %s10910_s17 }
 0x1ee   : > { %1633 = vrot.lane.b32.xlu1 %v587_v25, %s10905_s12 }
 0x1ef   : > { %v11375_v33 = vpop.permute.xlu0 %1981  ;;  %v11377_v7 = vpop.permute.xlu1 %1627 }
 0x1f1   : > { %3403 = vrot.lane.b32.xlu0 %v587_v25, %s10912_s19 }
 0x1f2   : > { %2341 = vrot.lane.b32.xlu1 %v587_v25, %s10907_s14 }
 0x1f3   : > { %v11381_v60 = vpop.permute.xlu0 %2689  ;;  %v11383_v55 = vpop.permute.xlu1 %2335 }
 0x1f5   : > { %4111 = vrot.lane.b32.xlu0 %v587_v25, %s10914_s23  ;;  %s10924_s23 = smov 27  }
 0x1f6   : > { %3049 = vrot.lane.b32.xlu1 %v587_v25, %s10909_s16 }
 0x1f7   : > { %v11387_v16 = vpop.permute.xlu0 %3397  ;;  %v11389_v9 = vpop.permute.xlu1 %3043 }
 0x1f9   : > { %4819 = vrot.lane.b32.xlu0 %v587_v25, %s10915_s24  ;;  %s10920_s24 = smov 38  }
 0x1fa   : > { %3757 = vrot.lane.b32.xlu1 %v587_v25, %s10911_s18  ;;  %s10923_s18 = smov 28  }
 0x1fb   : > { %v11393_v56 = vpop.permute.xlu0 %4105  ;;  %v11395_v53 = vpop.permute.xlu1 %3751 }
 0x1fc   : > { %13021 = vst [vmem:[#allocation32_spill] sm:$0xff] %v11395_v53 }
 0x1fd   : > { %5846 = vrot.lane.b32.xlu0 %v11053_v24, %s10916_s26 }
 0x1fe   : > { %4465 = vrot.lane.b32.xlu1 %v587_v25, %s10913_s20 }
 0x1ff   : > { %v11400_v34 = vpop.permute.xlu0 %4813  ;;  %v11402_v62 = vpop.permute.xlu1 %4459 }
 0x200   : > { %13022 = vst [vmem:[#allocation33_spill] sm:$0xff] %v11400_v34  ;;  %13023 = vst [vmem:[#allocation34_spill] sm:$0xff] %v11402_v62  ;;  %v5826_v62 = vld [vmem:[#allocation2 + $0x24] sm:$0xf] }
 0x201   : > { %5848 = vrot.lane.b32.xlu0 %v11352_v5, %s10916_s26 }
 0x202   : > { %5498 = vrot.lane.b32.xlu1 %v11406_v58, %s10902_s7 }
 0x203   : > { %v599_v31 = vpop.permute.xlu0 %598 }
 0x204   : > { %v11412_v54 = vpop.permute.xlu1 %5492 }
 0x205   : > { %13024 = vst [vmem:[#allocation35_spill] sm:$0xff] %v11412_v54  ;;  %5852 = vrot.lane.b32.xlu0 %v11406_v58, %s10916_s26  ;;  %v611_v54 = vsel %vm606_vm2, %v597_v4, %v599_v31  ;;  %v1285_v4 = vsel %vm1283_vm5, %v11210_v8, %v11208_v6 }
 0x206   : > { %5838 = vrot.lane.b32.xlu1 %v11032_v59, %s10916_s26 }
 0x207   : > { %v11418_v25 = vpop.permute.xlu0 %931 }
 0x208   : > { %v11420_v26 = vpop.permute.xlu1 %600 }
 0x209   : > { %6194 = vrot.lane.b32.xlu0 %v11105_v35, %s10917_s29  ;;  %v612_v34 = vsel %vm606_vm2, %v599_v31, %v11420_v26  ;;  %v938_v35 = vsel %vm937_vm4, %v11136_v39, %v11195_v1 }
 0x20a   : > { %5850 = vrot.lane.b32.xlu1 %v11059_v28, %s10916_s26  ;;  %10275 = vmatprep.subr.msk.mxu0 %vm618_vm3, %v612_v34 }
 0x20b   : > { %10276 = vmatpush1.msk.msra.mxu0 %vm618_vm3, %v611_v54  ;;  %v11431_v29 = vpop.permute.xlu0 %935  ;;  %v11450_v54 = vld [vmem:[%s12941_s4] sm:$0xf] }
 0x20c   : > { %10277 = vmatmul.mubr.msk.f32.vlgmr.msra.gmra.mrb[10].mxu0 %vm298_vm1, %v11187_v0  ;;  %10281 = vmatprep.subr.msk.mxu0 %vm618_vm3, %v939_v17  ;;  %v11442_v31 = vpop.permute.xlu1 %604 }
 0x20d   : > { %10282 = vmatpush1.msk.msra.mxu0 %vm618_vm3, %v938_v35  ;;  %6198 = vrot.lane.b32.xlu0 %v11131_v38, %s10917_s29 }
 0x20e   : > { %5854 = vrot.lane.b32.xlu1 %v5826_v62, %s10916_s26  ;;  %1029 = vmatprep.mubr.f32.mxu0 %v13020_v27 }
 0x20f   : > { %v1276_v39 = vpop.permute.xlu0 %1275 }
 0x210   : > { %10283 = vmatmul.mubr.msk.f32.vlgmr.msra.gmra.mrb[8].mxu0 %vm298_vm1, %v11450_v54  ;;  %v930_v1 = vpop.permute.xlu1 %929 }
 0x211   : > { %v942_v17 = vsel %vm937_vm4, %v11368_v37, %v930_v1  ;;  %6192 = vrot.lane.b32.xlu0 %v11032_v59, %s10917_s29  ;;  %v943_v34 = vsel %vm937_vm4, %v930_v1, %v11418_v25  ;;  %1171 = vmatprep.mubr.f32.mxu0 %v13020_v27  ;;  %v1284_v59 = vsel %vm1283_vm5, %v11143_v43, %v11210_v8  ;;  %v6180_v43 = vld [vmem:[#allocation2 + $0x24] sm:$0xf] }
 0x212   : > { %6196 = vrot.lane.b32.xlu1 %v11041_v2, %s10917_s29  ;;  %10287 = vmatprep.subr.msk.mxu0 %vm618_vm3, %v943_v34 }
 0x213   : > { %10288 = vmatpush1.msk.msra.mxu0 %vm618_vm3, %v942_v17  ;;  %v11467_v62 = vpop.permute.xlu0 %1631  ;;  %v11488_v17 = vld [vmem:[%s12941_s4 + $0x8] sm:$0xf] }
 0x214   : > { %10289 = vmatmul.mubr.msk.f32.vlgmr.msra.gmra.mrb[10].mxu0 %vm298_vm1, %v11450_v54  ;;  %10294 = vmatprep.subr.msk.mxu0 %vm618_vm3, %v1285_v4  ;;  %v11478_v35 = vpop.permute.xlu1 %1277  ;;  %v1639_v4 = vsel %vm1637_vm6, %v11214_v10, %v11216_v11 }
 0x215   : > { %10295 = vmatpush1.msk.msra.mxu0 %vm618_vm3, %v1284_v59  ;;  %6204 = vrot.lane.b32.xlu0 %v11059_v28, %s10917_s29  ;;  %v1289_v1 = vsel %vm1283_vm5, %v1276_v39, %v11478_v35  ;;  %v1288_v28 = vsel %vm1283_vm5, %v11366_v21, %v1276_v39  ;;  %v1638_v59 = vsel %vm1637_vm6, %v11141_v42, %v11214_v10 }
 0x216   : > { %6200 = vrot.lane.b32.xlu1 %v11053_v24, %s10917_s29  ;;  %10300 = vmatprep.subr.msk.mxu0 %vm618_vm3, %v1289_v1 }
 0x217   : > { %1375 = vmatprep.mubr.f32.mxu0 %v13020_v27  ;;  %v11494_v8 = vpop.permute.xlu0 %1635 }
 0x218   : > { %10296 = vmatmul.mubr.msk.f32.vlgmr.msra.gmra.mrb[8].mxu0 %vm298_vm1, %v11488_v17  ;;  %v11500_v34 = vpop.permute.xlu1 %1281 }
 0x219   : > { %10301 = vmatpush1.msk.msra.mxu0 %vm618_vm3, %v1288_v28  ;;  %6208 = vrot.lane.b32.xlu0 %v6180_v43, %s10917_s29  ;;  %v11524_v28 = vld [vmem:[%s12941_s4 + $0xc] sm:$0xf] }
 0x21a   : > { %10307 = vmatprep.subr.msk.mxu0 %vm618_vm3, %v1639_v4  ;;  %6202 = vrot.lane.b32.xlu1 %v11352_v5, %s10917_s29  ;;  %v11526_v4 = vld [vmem:[#allocation2 + $0x4] sm:$0xff] }
 0x21b   : > { %1517 = vmatprep.mubr.f32.mxu0 %v13020_v27  ;;  %v1984_v39 = vpop.permute.xlu0 %1983 }
 0x21c   : > { %10302 = vmatmul.mubr.msk.f32.vlgmr.msra.gmra.mrb[10].mxu0 %vm298_vm1, %v11488_v17  ;;  %v1630_v1 = vpop.permute.xlu1 %1629 }
 0x21d   : > { %10308 = vmatpush1.msk.msra.mxu0 %vm618_vm3, %v1638_v59  ;;  %6550 = vrot.lane.b32.xlu0 %v11041_v2, %s10918_s10  ;;  %v1643_v43 = vsel %vm1637_vm6, %v1630_v1, %v11467_v62  ;;  %v1642_v2 = vsel %vm1637_vm6, %v11377_v7, %v1630_v1  ;;  %v11542_v59 = vcombine.high %v11526_v4, %v11526_v4 }
 0x21e   : > { %6206 = vrot.lane.b32.xlu1 %v11406_v58, %s10917_s29  ;;  %10313 = vmatprep.subr.msk.mxu0 %vm618_vm3, %v1643_v43  ;;  %v1993_v58 = vsel %vm1991_vm7, %v11224_v13, %v11222_v12  ;;  %v1992_v43 = vsel %vm1991_vm7, %v11149_v45, %v11224_v13  ;;  %v11563_v12 = vld [vmem:[#allocation2 + $0x1c] sm:$0xff] }
 0x21f   : > { %1729 = vmatprep.mubr.f32.mxu0 %v13020_v27  ;;  %v11532_v42 = vpop.permute.xlu0 %2339  ;;  %v11581_v13 = vcombine.high %v11563_v12, %v11563_v12 }
 0x220   : > { %13025 = vst [vmem:[#allocation36_spill] sm:$0xff] %v11532_v42  ;;  %10309 = vmatmul.mubr.msk.f32.vlgmr.msra.gmra.mrb[8].mxu0 %vm298_vm1, %v11524_v28  ;;  %v11538_v10 = vpop.permute.xlu1 %1985 }
 0x221   : > { %10314 = vmatpush1.msk.msra.mxu0 %vm618_vm3, %v1642_v2  ;;  %6554 = vrot.lane.b32.xlu0 %v11053_v24, %s10918_s10  ;;  %v1997_v24 = vsel %vm1991_vm7, %v1984_v39, %v11538_v10 }
 0x222   : > { %10320 = vmatprep.subr.msk.mxu0 %vm618_vm3, %v1993_v58  ;;  %6548 = vrot.lane.b32.xlu1 %v11542_v59, %s10918_s10  ;;  %v11573_v58 = vld [vmem:[%s12941_s4 + $0x10] sm:$0xf] }
 0x223   : > { %1871 = vmatprep.mubr.f32.mxu0 %v13020_v27  ;;  %v11554_v1 = vpop.permute.xlu0 %2343  ;;  %13027 = vst [vmem:[#allocation38_spill] sm:$0xff] %v11573_v58 }
 0x224   : > { %13026 = vst [vmem:[#allocation37_spill] sm:$0xff] %v11554_v1  ;;  %10315 = vmatmul.mubr.msk.f32.vlgmr.msra.gmra.mrb[10].mxu0 %vm298_vm1, %v11524_v28  ;;  %v11561_v2 = vpop.permute.xlu1 %1989  ;;  %v11606_v1 = vld [vmem:[#allocation2 + $0xc] sm:$0xff] }
 0x225   : > { %10321 = vmatpush1.msk.msra.mxu0 %vm618_vm3, %v1992_v43  ;;  %6556 = vrot.lane.b32.xlu0 %v11352_v5, %s10918_s10  ;;  %v1996_v5 = vsel %vm1991_vm7, %v11375_v33, %v1984_v39 }
 0x226   : > { %10326 = vmatprep.subr.msk.mxu0 %vm618_vm3, %v1997_v24  ;;  %6552 = vrot.lane.b32.xlu1 %v11131_v38, %s10918_s10  ;;  %v2347_v38 = vsel %vm2345_vm8, %v11230_v14, %v11232_v15  ;;  %v2346_v24 = vsel %vm2345_vm8, %v11147_v44, %v11230_v14  ;;  %v11616_v44 = vld [vmem:[%s12941_s4 + $0x14] sm:$0xf] }
 0x227   : > { %2083 = vmatprep.mubr.f32.mxu0 %v13020_v27  ;;  %v2692_v45 = vpop.permute.xlu0 %2691 }
 0x228   : > { %10322 = vmatmul.mubr.msk.f32.vlgmr.msra.gmra.mrb[8].mxu0 %vm298_vm1, %v11573_v58  ;;  %v2338_v43 = vpop.permute.xlu1 %2337 }
 0x229   : > { %10327 = vmatpush1.msk.msra.mxu0 %vm618_vm3, %v1996_v5  ;;  %6560 = vrot.lane.b32.xlu0 %v11581_v13, %s10918_s10  ;;  %v2350_v15 = vsel %vm2345_vm8, %v11383_v55, %v2338_v43 }
 0x22a   : > { %10333 = vmatprep.subr.msk.mxu0 %vm618_vm3, %v2347_v38  ;;  %6546 = vrot.lane.b32.xlu1 %v11526_v4, %s10918_s10  ;;  %v2351_v38 = vsel %vm2345_vm8, %v2338_v43, %v11532_v42  ;;  %v6534_v42 = vld [vmem:[#allocation2 + $0x24] sm:$0xf] }
 0x22b   : > { %2225 = vmatprep.mubr.f32.mxu0 %v13020_v27  ;;  %v11597_v39 = vpop.permute.xlu0 %3047 }
 0x22c   : > { %10328 = vmatmul.mubr.msk.f32.vlgmr.msra.gmra.mrb[10].mxu0 %vm298_vm1, %v11573_v58  ;;  %v11604_v5 = vpop.permute.xlu1 %2693 }
 0x22d   : > { %13028 = vst [vmem:[#allocation39_spill] sm:$0xff] %v11604_v5  ;;  %10334 = vmatpush1.msk.msra.mxu0 %vm618_vm3, %v2346_v24  ;;  %6902 = vrot.lane.b32.xlu0 %v11542_v59, %s10919_s15  ;;  %v11626_v24 = vcombine.high %v11606_v1, %v11606_v1 }
 0x22e   : > { %10339 = vmatprep.subr.msk.mxu0 %vm618_vm3, %v2351_v38  ;;  %6558 = vrot.lane.b32.xlu1 %v11563_v12, %s10918_s10  ;;  %v2701_v38 = vsel %vm2699_vm9, %v11238_v19, %v11236_v18 }
 0x22f   : > { %2437 = vmatprep.mubr.f32.mxu0 %v13020_v27  ;;  %v11622_v14 = vpop.permute.xlu0 %3051 }
 0x230   : > { %13029 = vst [vmem:[#allocation40_spill] sm:$0xff] %v11622_v14  ;;  %10335 = vmatmul.mubr.msk.f32.vlgmr.msra.gmra.mrb[8].mxu0 %vm298_vm1, %v11616_v44  ;;  %v11632_v58 = vpop.permute.xlu1 %2697  ;;  %v2700_v14 = vsel %vm2699_vm9, %v11155_v47, %v11238_v19  ;;  %v2704_v19 = vsel %vm2699_vm9, %v11381_v60, %v2692_v45 }
 0x231   : > { %13030 = vst [vmem:[#allocation41_spill] sm:$0xff] %v11632_v58  ;;  %10340 = vmatpush1.msk.msra.mxu0 %vm618_vm3, %v2350_v15  ;;  %6906 = vrot.lane.b32.xlu0 %v11626_v24, %s10919_s15  ;;  %v2705_v58 = vsel %vm2699_vm9, %v2692_v45, %v11604_v5  ;;  %v6888_v45 = vld [vmem:[#allocation2 + $0x24] sm:$0xf] }
 0x232   : > { %10346 = vmatprep.subr.msk.mxu0 %vm618_vm3, %v2701_v38  ;;  %6562 = vrot.lane.b32.xlu1 %v6534_v42, %s10918_s10  ;;  %v11656_v42 = vld [vmem:[%s12941_s4 + $0x18] sm:$0xf] }
 0x233   : > { %2579 = vmatprep.mubr.f32.mxu0 %v13020_v27  ;;  %v3400_v43 = vpop.permute.xlu0 %3399  ;;  %v11676_v38 = vld [vmem:[#allocation2 + $0x14] sm:$0xff] }
 0x234   : > { %10341 = vmatmul.mubr.msk.f32.vlgmr.msra.gmra.mrb[10].mxu0 %vm298_vm1, %v11616_v44  ;;  %v3046_v15 = vpop.permute.xlu1 %3045 }
 0x235   : > { %10347 = vmatpush1.msk.msra.mxu0 %vm618_vm3, %v2700_v14  ;;  %6900 = vrot.lane.b32.xlu0 %v11526_v4, %s10919_s15  ;;  %v3059_v18 = vsel %vm3053_vm10, %v3046_v15, %v11597_v39 }
 0x236   : > { %10352 = vmatprep.subr.msk.mxu0 %vm618_vm3, %v2705_v58  ;;  %6904 = vrot.lane.b32.xlu1 %v11606_v1, %s10919_s15  ;;  %v3055_v58 = vsel %vm3053_vm10, %v11244_v20, %v11246_v22  ;;  %v11689_v22 = vcombine.high %v11676_v38, %v11676_v38 }
 0x237   : > { %2791 = vmatprep.mubr.f32.mxu0 %v13020_v27  ;;  %v11662_v47 = vpop.permute.xlu0 %3755 }
 0x238   : > { %13031 = vst [vmem:[#allocation42_spill] sm:$0xff] %v11662_v47  ;;  %10348 = vmatmul.mubr.msk.f32.vlgmr.msra.gmra.mrb[8].mxu0 %vm298_vm1, %v11656_v42  ;;  %v11668_v14 = vpop.permute.xlu1 %3401 }
 0x239   : > { %10353 = vmatpush1.msk.msra.mxu0 %vm618_vm3, %v2704_v19  ;;  %6912 = vrot.lane.b32.xlu0 %v11563_v12, %s10919_s15  ;;  %v3054_v19 = vsel %vm3053_vm10, %v11153_v46, %v11244_v20  ;;  %v11702_v46 = vld [vmem:[%s12941_s4 + $0x1c] sm:$0xf] }
 0x23a   : > { %10359 = vmatprep.subr.msk.mxu0 %vm618_vm3, %v3055_v58  ;;  %6908 = vrot.lane.b32.xlu1 %v11676_v38, %s10919_s15 }
 0x23b   : > { %2933 = vmatprep.mubr.f32.mxu0 %v13020_v27  ;;  %v11682_v5 = vpop.permute.xlu0 %3759 }
 0x23c   : > { %13032 = vst [vmem:[#allocation43_spill] sm:$0xff] %v11682_v5  ;;  %10354 = vmatmul.mubr.msk.f32.vlgmr.msra.gmra.mrb[10].mxu0 %vm298_vm1, %v11656_v42  ;;  %v11693_v58 = vpop.permute.xlu1 %3405 }
 0x23d   : > { %13033 = vst [vmem:[#allocation44_spill] sm:$0xff] %v11693_v58  ;;  %10360 = vmatpush1.msk.msra.mxu0 %vm618_vm3, %v3054_v19  ;;  %6916 = vrot.lane.b32.xlu0 %v6888_v45, %s10919_s15  ;;  %v3058_v19 = vsel %vm3053_vm10, %v11389_v9, %v3046_v15  ;;  %v11741_v58 = vld [vmem:[%s12941_s4 + $0x20] sm:$0xf] }
 0x23e   : > { %10365 = vmatprep.subr.msk.mxu0 %vm618_vm3, %v3059_v18  ;;  %6910 = vrot.lane.b32.xlu1 %v11689_v22, %s10919_s15  ;;  %v3409_v18 = vsel %vm3407_vm11, %v11254_v32, %v11252_v23 }
 0x23f   : > { %3145 = vmatprep.mubr.f32.mxu0 %v13020_v27  ;;  %v11708_v20 = vpop.permute.xlu0 %4107 }
 0x240   : > { %10361 = vmatmul.mubr.msk.f32.vlgmr.msra.gmra.mrb[8].mxu0 %vm298_vm1, %v11702_v46  ;;  %v3754_v45 = vpop.permute.xlu1 %3753 }
 0x241   : > { %10366 = vmatpush1.msk.msra.mxu0 %vm618_vm3, %v3058_v19  ;;  %7258 = vrot.lane.b32.xlu0 %v11606_v1, %s10920_s24  ;;  %v3408_v19 = vsel %vm3407_vm11, %v11161_v49, %v11254_v32  ;;  %v3412_v32 = vsel %vm3407_vm11, %v11387_v16, %v3400_v43 }
 0x242   : > { %10372 = vmatprep.subr.msk.mxu0 %vm618_vm3, %v3409_v18  ;;  %6914 = vrot.lane.b32.xlu1 %v11581_v13, %s10919_s15  ;;  %v3413_v18 = vsel %vm3407_vm11, %v3400_v43, %v11668_v14 }
 0x243   : > { %3287 = vmatprep.mubr.f32.mxu0 %v13020_v27  ;;  %v11724_v15 = vpop.permute.xlu0 %4463 }
 0x244   : > { %10367 = vmatmul.mubr.msk.f32.vlgmr.msra.gmra.mrb[10].mxu0 %vm298_vm1, %v11702_v46  ;;  %v11731_v5 = vpop.permute.xlu1 %4109 }
 0x245   : > { %10373 = vmatpush1.msk.msra.mxu0 %vm618_vm3, %v3408_v19  ;;  %7262 = vrot.lane.b32.xlu0 %v11676_v38, %s10920_s24 }
 0x246   : > { %10378 = vmatprep.subr.msk.mxu0 %vm618_vm3, %v3413_v18  ;;  %7256 = vrot.lane.b32.xlu1 %v11542_v59, %s10920_s24  ;;  %v3763_v18 = vsel %vm3761_vm12, %v11258_v36, %v11260_v40 }
 0x247   : > { %3499 = vmatprep.mubr.f32.mxu0 %v13020_v27  ;;  %v11747_v49 = vpop.permute.xlu0 %4467 }
 0x248   : > { %13034 = vst [vmem:[#allocation45_spill] sm:$0xff] %v11747_v49  ;;  %10374 = vmatmul.mubr.msk.f32.vlgmr.msra.gmra.mrb[8].mxu0 %vm298_vm1, %v11741_v58  ;;  %v11753_v19 = vpop.permute.xlu1 %4113 }
 0x249   : > { %13035 = vst [vmem:[#allocation46_spill] sm:$0xff] %v11753_v19  ;;  %10379 = vmatpush1.msk.msra.mxu0 %vm618_vm3, %v3412_v32  ;;  %7264 = vrot.lane.b32.xlu0 %v11689_v22, %s10920_s24  ;;  %v3762_v32 = vsel %vm3761_vm12, %v11159_v48, %v11258_v36  ;;  %v11782_v19 = vld [vmem:[%s12941_s4 + $0x24] sm:$0xf]  ;;  %v3766_v36 = vsel %vm3761_vm12, %v11395_v53, %v3754_v45 }
 0x24a   : > { %10385 = vmatprep.subr.msk.mxu0 %vm618_vm3, %v3763_v18  ;;  %7260 = vrot.lane.b32.xlu1 %v11626_v24, %s10920_s24  ;;  %v3767_v18 = vsel %vm3761_vm12, %v3754_v45, %v11662_v47  ;;  %v7242_v47 = vld [vmem:[#allocation2 + $0x24] sm:$0xf]  ;;  %v4121_v53 = vsel %vm4115_vm13, %v11708_v20, %v11731_v5 }
 0x24b   : > { %3641 = vmatprep.mubr.f32.mxu0 %v13020_v27  ;;  %v11765_v43 = vpop.permute.xlu0 %4815 }
 0x24c   : > { %10380 = vmatmul.mubr.msk.f32.vlgmr.msra.gmra.mrb[10].mxu0 %vm298_vm1, %v11741_v58  ;;  %v11772_v49 = vpop.permute.xlu1 %4461 }
 0x24d   : > { %10386 = vmatpush1.msk.msra.mxu0 %vm618_vm3, %v3762_v32  ;;  %7268 = vrot.lane.b32.xlu0 %v11581_v13, %s10920_s24 }
 0x24e   : > { %10391 = vmatprep.subr.msk.mxu0 %vm618_vm3, %v3767_v18  ;;  %7254 = vrot.lane.b32.xlu1 %v11526_v4, %s10920_s24  ;;  %v4117_v18 = vsel %vm4115_vm13, %v11268_v57, %v11266_v41 }
 0x24f   : > { %3853 = vmatprep.mubr.f32.mxu0 %v13020_v27  ;;  %v11788_v48 = vpop.permute.xlu0 %5496 }
 0x250   : > { %10387 = vmatmul.mubr.msk.f32.vlgmr.msra.gmra.mrb[8].mxu0 %vm298_vm1, %v11782_v19  ;;  %v11794_v32 = vpop.permute.xlu1 %4817 }
 0x251   : > { %10392 = vmatpush1.msk.msra.mxu0 %vm618_vm3, %v3766_v36  ;;  %7610 = vrot.lane.b32.xlu0 %v11542_v59, %s10921_s30  ;;  %v4116_v36 = vsel %vm4115_vm13, %v11167_v51, %v11268_v57  ;;  %v11826_v51 = vld [vmem:[%s12941_s4 + $0x28] sm:$0xf] }
 0x252   : > { %10398 = vmatprep.subr.msk.mxu0 %vm618_vm3, %v4117_v18  ;;  %7266 = vrot.lane.b32.xlu1 %v11563_v12, %s10920_s24 }
 0x253   : > { %3995 = vmatprep.mubr.f32.mxu0 %v13020_v27  ;;  %v603_v45 = vpop.permute.xlu0 %602 }
 0x254   : > { %10393 = vmatmul.mubr.msk.f32.vlgmr.msra.gmra.mrb[10].mxu0 %vm298_vm1, %v11782_v19  ;;  %v11811_v41 = vpop.permute.xlu1 %4821  ;;  %v614_v40 = vsel %vm606_vm2, %v603_v45, %v11442_v31  ;;  %v613_v18 = vsel %vm606_vm2, %v11420_v26, %v603_v45  ;;  %v941_v26 = vsel %vm937_vm4, %v11302_v52, %v11368_v37  ;;  %v4471_v37 = vsel %vm4469_vm14, %v11274_v61, %v11276_v63 }
 0x255   : > { %10399 = vmatpush1.msk.msra.mxu0 %vm618_vm3, %v4116_v36  ;;  %7614 = vrot.lane.b32.xlu0 %v11626_v24, %s10921_s30  ;;  %v4475_v45 = vsel %vm4469_vm14, %v11772_v49, %v11724_v15  ;;  %v7596_v36 = vld [vmem:[#allocation2 + $0x24] sm:$0xf]  ;;  %vm5856_vm2 = vcmask 973824  }
 0x256   : > { %10404 = vmatprep.subr.msk.mxu0 %vm618_vm3, %v4121_v53  ;;  %7270 = vrot.lane.b32.xlu1 %v7242_v47, %s10920_s24  ;;  %v940_v53 = vsel %vm937_vm4, %v11197_v3, %v11302_v52  ;;  %v4470_v47 = vsel %vm4469_vm14, %v11165_v50, %v11274_v61  ;;  %v11889_v50 = vld [vmem:[%s12941_s4 + $0x2c] sm:$0xf] }
 0x257   : > { %10278 = vmatprep.subr.msk.mxu1 %vm618_vm3, %v614_v40  ;;  %4207 = vmatprep.mubr.f32.mxu0 %v13020_v27  ;;  %v1280_v57 = vpop.permute.xlu0 %1279  ;;  %v4120_v40 = vsel %vm4115_vm13, %v11393_v56, %v11708_v20 }
 0x258   : > { %10279 = vmatpush1.msk.msra.mxu1 %vm618_vm3, %v613_v18  ;;  %10400 = vmatmul.mubr.msk.f32.vlgmr.msra.gmra.mrb[8].mxu0 %vm298_vm1, %v11826_v51  ;;  %v11838_v31 = vpop.permute.xlu1 %5494  ;;  %v1286_v18 = vsel %vm1283_vm5, %v11208_v6, %v11310_v30  ;;  %v1291_v6 = vsel %vm1283_vm5, %v1280_v57, %v11500_v34 }
 0x259   : > { %10280 = vmatmul.mubr.msk.f32.vlgmr.msra.gmra.mrb[10].mxu1 %vm298_vm1, %v11187_v0  ;;  %10284 = vmatprep.subr.msk.mxu1 %vm618_vm3, %v941_v26  ;;  %v13036_v26 = vld [vmem:[#allocation34_spill] sm:$0xff] }
 0x25a   : > { %10405 = vmatpush1.msk.msra.mxu0 %vm618_vm3, %v4120_v40  ;;  %10285 = vmatpush1.msk.msra.mxu1 %vm618_vm3, %v940_v53  ;;  %v4474_v53 = vsel %vm4469_vm14, %v13036_v26, %v11772_v49 }
 0x25b   : > { %10411 = vmatprep.subr.msk.mxu0 %vm618_vm3, %v4471_v37  ;;  %7608 = vrot.lane.b32.xlu0 %v11526_v4, %s10921_s30  ;;  %v11857_v52 = vpop.permute.xlu0 %1987 }
 0x25c   : > { %7612 = vrot.lane.b32.xlu1 %v11606_v1, %s10921_s30  ;;  %1100 = vmatprep.mubr.f32.mxu1 %v13020_v27  ;;  %v934_v0 = vpop.permute.xlu1 %933 }
 0x25d   : > { %4349 = vmatprep.mubr.f32.mxu0 %v13020_v27  ;;  %10286 = vmatmul.mubr.msk.f32.vlgmr.msra.gmra.mrb[8].mxu1 %vm298_vm1, %v11450_v54  ;;  %v945_v3 = vsel %vm937_vm4, %v934_v0, %v11431_v29  ;;  %v944_v20 = vsel %vm937_vm4, %v11418_v25, %v934_v0  ;;  %v1287_v25 = vsel %vm1283_vm5, %v11310_v30, %v11366_v21  ;;  %v13037_v21 = vld [vmem:[#allocation14_spill] sm:$0xff]  ;;  %v13039_v0 = vld [vmem:[#allocation7_spill] sm:$0xff]  ;;  %vm6210_vm4 = vcmask 965632  }
 0x25e   : > { %10406 = vmatmul.mubr.msk.f32.vlgmr.msra.gmra.mrb[10].mxu0 %vm298_vm1, %v11826_v51  ;;  %10290 = vmatprep.subr.msk.mxu1 %vm618_vm3, %v945_v3 }
 0x25f   : > { %10412 = vmatpush1.msk.msra.mxu0 %vm618_vm3, %v4470_v47  ;;  %7620 = vrot.lane.b32.xlu0 %v11563_v12, %s10921_s30  ;;  %v11881_v29 = vpop.permute.xlu0 %2695  ;;  %v1290_v47 = vsel %vm1283_vm5, %v11478_v35, %v1280_v57  ;;  %v4829_v35 = vsel %vm4823_vm15, %v11765_v43, %v11794_v32  ;;  %v11952_v57 = vld [vmem:[%s12941_s4 + $0x30] sm:$0xf]  ;;  %vm6564_vm5 = vcmask 957440  }
 0x260   : > { %10417 = vmatprep.subr.msk.mxu0 %vm618_vm3, %v4475_v45  ;;  %7616 = vrot.lane.b32.xlu1 %v11676_v38, %s10921_s30  ;;  %v1634_v61 = vpop.permute.xlu1 %1633 }
 0x261   : > { %10291 = vmatpush1.msk.msra.mxu1 %vm618_vm3, %v944_v20  ;;  %1242 = vmatprep.mubr.f32.mxu1 %v13020_v27  ;;  %v13040_v20 = vld [vmem:[#allocation20_spill] sm:$0xff] }
 0x262   : > { %4561 = vmatprep.mubr.f32.mxu0 %v13020_v27  ;;  %10292 = vmatmul.mubr.msk.f32.vlgmr.msra.gmra.mrb[10].mxu1 %vm298_vm1, %v11450_v54  ;;  %v13038_v54 = vld [vmem:[#allocation15_spill] sm:$0xff]  ;;  %v1641_v45 = vsel %vm1637_vm6, %v13040_v20, %v11377_v7 }
 0x263   : > { %10297 = vmatprep.subr.msk.mxu1 %vm618_vm3, %v1287_v25  ;;  %10413 = vmatmul.mubr.msk.f32.vlgmr.msra.gmra.mrb[8].mxu0 %vm298_vm1, %v11889_v50  ;;  %v11908_v40 = vpop.permute.xlu0 %3403  ;;  %v4825_v37 = vsel %vm4823_vm15, %v13038_v54, %v13037_v21  ;;  %v4824_v3 = vsel %vm4823_vm15, %v13039_v0, %v13038_v54  ;;  %v1645_v54 = vsel %vm1637_vm6, %v1634_v61, %v11494_v8 }
 0x264   : > { %10418 = vmatpush1.msk.msra.mxu0 %vm618_vm3, %v4474_v53  ;;  %10298 = vmatpush1.msk.msra.mxu1 %vm618_vm3, %v1286_v18  ;;  %v11915_v30 = vpop.permute.xlu1 %2341  ;;  %v13041_v18 = vld [vmem:[#allocation33_spill] sm:$0xff]  ;;  %v1644_v8 = vsel %vm1637_vm6, %v11467_v62, %v1634_v61  ;;  %v12011_v62 = vld [vmem:[%s12941_s4 + $0x34] sm:$0xf] }
 0x265   : > { %10424 = vmatprep.subr.msk.mxu0 %vm618_vm3, %v4825_v37  ;;  %7624 = vrot.lane.b32.xlu0 %v7596_v36, %s10921_s30  ;;  %v1640_v36 = vsel %vm1637_vm6, %v11216_v11, %v13040_v20  ;;  %v4828_v53 = vsel %vm4823_vm15, %v13041_v18, %v11765_v43  ;;  %v13042_v43 = vld [vmem:[#allocation22_spill] sm:$0xff]  ;;  %v13044_v20 = vld [vmem:[#allocation17_spill] sm:$0xff]  ;;  %vm6918_vm6 = vcmask 318464  }
 0x266   : > { %7618 = vrot.lane.b32.xlu1 %v11689_v22, %s10921_s30  ;;  %10303 = vmatprep.subr.msk.mxu1 %vm618_vm3, %v1291_v6  ;;  %v1995_v37 = vsel %vm1991_vm7, %v13042_v43, %v11375_v33  ;;  %v13043_v33 = vld [vmem:[#allocation8_spill] sm:$0xff] }
 0x267   : > { %1446 = vmatprep.mubr.f32.mxu1 %v13020_v27  ;;  %4703 = vmatprep.mubr.f32.mxu0 %v13020_v27  ;;  %v11926_v49 = vpop.permute.xlu0 %4111  ;;  %v1994_v0 = vsel %vm1991_vm7, %v13043_v33, %v13042_v43 }
 0x268   : > { %10299 = vmatmul.mubr.msk.f32.vlgmr.msra.gmra.mrb[8].mxu1 %vm298_vm1, %v11488_v17  ;;  %10419 = vmatmul.mubr.msk.f32.vlgmr.msra.gmra.mrb[10].mxu0 %vm298_vm1, %v11889_v50  ;;  %v11937_v34 = vpop.permute.xlu1 %3049 }
 0x269   : > { %10304 = vmatpush1.msk.msra.mxu1 %vm618_vm3, %v1290_v47  ;;  %10425 = vmatpush1.msk.msra.mxu0 %vm618_vm3, %v4824_v3  ;;  %v1999_v47 = vsel %vm1991_vm7, %v11857_v52, %v11561_v2  ;;  %v13046_v2 = vld [vmem:[#allocation6_spill] sm:$0xff] }
 0x26a   : > { %10310 = vmatprep.subr.msk.mxu1 %vm618_vm3, %v1641_v45  ;;  %10430 = vmatprep.subr.msk.mxu0 %vm618_vm3, %v4829_v35  ;;  %v13045_v45 = vld [vmem:[#allocation16_spill] sm:$0xff] }
 0x26b   : > { %7966 = vrot.lane.b32.xlu0 %v11606_v1, %s10922_s13  ;;  %7622 = vrot.lane.b32.xlu1 %v11581_v13, %s10921_s30  ;;  %v11958_v7 = vpop.permute.xlu0 %4819  ;;  %v5504_v35 = vsel %vm5502_vm0, %v13045_v45, %v13044_v20 }
 0x26c   : > { %1588 = vmatprep.mubr.f32.mxu1 %v13020_v27  ;;  %4915 = vmatprep.mubr.f32.mxu0 %v13020_v27  ;;  %v11962_v25 = vpop.permute.xlu1 %3757 }
 0x26d   : > { %10305 = vmatmul.mubr.msk.f32.vlgmr.msra.gmra.mrb[10].mxu1 %vm298_vm1, %v11488_v17  ;;  %10426 = vmatmul.mubr.msk.f32.vlgmr.msra.gmra.mrb[8].mxu0 %vm298_vm1, %v11952_v57 }
 0x26e   : > { %10311 = vmatpush1.msk.msra.mxu1 %vm618_vm3, %v1640_v36  ;;  %10431 = vmatpush1.msk.msra.mxu0 %vm618_vm3, %v4828_v53  ;;  %v5503_v53 = vsel %vm5502_vm0, %v13046_v2, %v13045_v45 }
 0x26f   : > { %10316 = vmatprep.subr.msk.mxu1 %vm618_vm3, %v1645_v54  ;;  %10437 = vmatprep.subr.msk.mxu0 %vm618_vm3, %v11542_v59  ;;  %v11981_v11 = vpop.permute.xlu0 %5846  ;;  %v1998_v54 = vsel %vm1991_vm7, %v11538_v10, %v11857_v52  ;;  %v5508_v10 = vsel %vm5502_vm0, %v11838_v31, %v11788_v48  ;;  %v12074_v52 = vld [vmem:[%s12941_s4 + $0x38] sm:$0xf]  ;;  %vm7272_vm7 = vcmask 310272  }
 0x270   : > { %7970 = vrot.lane.b32.xlu0 %v11676_v38, %s10922_s13  ;;  %7964 = vrot.lane.b32.xlu1 %v11542_v59, %s10922_s13  ;;  %v11987_v17 = vpop.permute.xlu1 %4465 }
 0x271   : > { %1800 = vmatprep.mubr.f32.mxu1 %v13020_v27  ;;  %5057 = vmatprep.mubr.f32.mxu0 %v13020_v27 }
 0x272   : > { %10312 = vmatmul.mubr.msk.f32.vlgmr.msra.gmra.mrb[8].mxu1 %vm298_vm1, %v11524_v28  ;;  %10432 = vmatmul.mubr.msk.f32.vlgmr.msra.gmra.mrb[10].mxu0 %vm298_vm1, %v11952_v57 }
 0x273   : > { %10317 = vmatpush1.msk.msra.mxu1 %vm618_vm3, %v1644_v8  ;;  %10438 = vmatpush1.msk.msra.mxu0 %vm618_vm3, %v11526_v4  ;;  %v12003_v6 = vpop.permute.xlu0 %5848  ;;  %v13047_v8 = vld [vmem:[#allocation38_spill] sm:$0xff] }
 0x274   : > { %10323 = vmatprep.subr.msk.mxu1 %vm618_vm3, %v1995_v37  ;;  %10443 = vmatprep.subr.msk.mxu0 %vm618_vm3, %v11689_v22  ;;  %v12013_v61 = vpop.permute.xlu1 %5498  ;;  %v13048_v37 = vld [vmem:[#allocation21_spill] sm:$0xff] }
 0x275   : > { %7972 = vrot.lane.b32.xlu0 %v11689_v22, %s10922_s13  ;;  %7968 = vrot.lane.b32.xlu1 %v11626_v24, %s10922_s13  ;;  %v2349_v33 = vsel %vm2345_vm8, %v13048_v37, %v11383_v55 }
 0x276   : > { %1942 = vmatprep.mubr.f32.mxu1 %v13020_v27  ;;  %5240 = vmatprep.mubr.f32.mxu0 %v13020_v27 }
 0x277   : > { %10318 = vmatmul.mubr.msk.f32.vlgmr.msra.gmra.mrb[10].mxu1 %vm298_vm1, %v11524_v28  ;;  %10439 = vmatmul.mubr.msk.f32.vlgmr.msra.gmra.mrb[8].mxu0 %vm298_vm1, %v12011_v62  ;;  %v12028_v3 = vpop.permute.xlu0 %5852 }
 0x278   : > { %10324 = vmatpush1.msk.msra.mxu1 %vm618_vm3, %v1994_v0  ;;  %10444 = vmatpush1.msk.msra.mxu0 %vm618_vm3, %v11676_v38  ;;  %v5839_v36 = vpop.permute.xlu1 %5838 }
 0x279   : > { %10329 = vmatprep.subr.msk.mxu1 %vm618_vm3, %v1999_v47  ;;  %10450 = vmatprep.subr.msk.mxu0 %vm618_vm3, %v5504_v35  ;;  %v13049_v47 = vld [vmem:[#allocation9_spill] sm:$0xff]  ;;  %v13050_v35 = vld [vmem:[#allocation35_spill] sm:$0xff] }
 0x27a   : > { %7976 = vrot.lane.b32.xlu0 %v11581_v13, %s10922_s13  ;;  %7962 = vrot.lane.b32.xlu1 %v11526_v4, %s10922_s13  ;;  %v2348_v45 = vsel %vm2345_vm8, %v13049_v47, %v13048_v37  ;;  %v5507_v2 = vsel %vm5502_vm0, %v13050_v35, %v11838_v31  ;;  %v13052_v37 = vld [vmem:[#allocation18_spill] sm:$0xff] }
 0x27b   : > { %2154 = vmatprep.mubr.f32.mxu1 %v13020_v27  ;;  %5382 = vmatprep.mubr.f32.mxu0 %v13020_v27  ;;  %v12047_v28 = vpop.permute.xlu0 %6194 }
 0x27c   : > { %10325 = vmatmul.mubr.msk.f32.vlgmr.msra.gmra.mrb[8].mxu1 %vm298_vm1, %v13047_v8  ;;  %10445 = vmatmul.mubr.msk.f32.vlgmr.msra.gmra.mrb[10].mxu0 %vm298_vm1, %v12011_v62  ;;  %v12059_v43 = vpop.permute.xlu1 %5850 }
 0x27d   : > { %10330 = vmatpush1.msk.msra.mxu1 %vm618_vm3, %v1998_v54  ;;  %10451 = vmatpush1.msk.msra.mxu0 %vm618_vm3, %v5503_v53  ;;  %v7950_v53 = vld [vmem:[#allocation2 + $0x24] sm:$0xf]  ;;  %v13051_v54 = vld [vmem:[#allocation37_spill] sm:$0xff] }
 0x27e   : > { %10336 = vmatprep.subr.msk.mxu1 %vm618_vm3, %v2349_v33  ;;  %10456 = vmatprep.subr.msk.mxu0 %vm618_vm3, %v5508_v10  ;;  %v2353_v33 = vsel %vm2345_vm8, %v11915_v30, %v13051_v54  ;;  %v13053_v10 = vld [vmem:[#allocation19_spill] sm:$0xff] }
 0x27f   : > { %8318 = vrot.lane.b32.xlu0 %v11542_v59, %s10923_s18  ;;  %7974 = vrot.lane.b32.xlu1 %v11563_v12, %s10922_s13  ;;  %v6199_v55 = vpop.permute.xlu0 %6198  ;;  %v5858_v47 = vsel %vm5856_vm2, %v13053_v10, %v13052_v37 }
 0x280   : > { %2296 = vmatprep.mubr.f32.mxu1 %v13020_v27  ;;  %5594 = vmatprep.mubr.f32.mxu0 %v13020_v27  ;;  %v12082_v0 = vpop.permute.xlu1 %5854 }
 0x281   : > { %10331 = vmatmul.mubr.msk.f32.vlgmr.msra.gmra.mrb[10].mxu1 %vm298_vm1, %v13047_v8  ;;  %10452 = vmatmul.mubr.msk.f32.vlgmr.msra.gmra.mrb[8].mxu0 %vm298_vm1, %v12074_v52 }
 0x282   : > { %10337 = vmatpush1.msk.msra.mxu1 %vm618_vm3, %v2348_v45  ;;  %10457 = vmatpush1.msk.msra.mxu0 %vm618_vm3, %v5507_v2  ;;  %v13055_v2 = vld [vmem:[#allocation36_spill] sm:$0xff] }
 0x283   : > { %10342 = vmatprep.subr.msk.mxu1 %vm618_vm3, %v2353_v33  ;;  %10463 = vmatprep.subr.msk.mxu0 %vm618_vm3, %v5858_v47  ;;  %v6193_v31 = vpop.permute.xlu0 %6192  ;;  %v2352_v54 = vsel %vm2345_vm8, %v13055_v2, %v11915_v30  ;;  %v5857_v33 = vsel %vm5856_vm2, %v5839_v36, %v13053_v10  ;;  %v13056_v47 = vld [vmem:[#allocation24_spill] sm:$0xff]  ;;  %v12135_v36 = vld [vmem:[%s12941_s4 + $0x3c] sm:$0xf]  ;;  %vm7626_vm8 = vcmask 302080  }
 0x284   : > { %8322 = vrot.lane.b32.xlu0 %v11626_v24, %s10923_s18  ;;  %7978 = vrot.lane.b32.xlu1 %v7950_v53, %s10922_s13  ;;  %v6197_v8 = vpop.permute.xlu1 %6196  ;;  %v5862_v53 = vsel %vm5856_vm2, %v12003_v6, %v12059_v43  ;;  %v2703_v30 = vsel %vm2699_vm9, %v13056_v47, %v11381_v60  ;;  %v13058_v60 = vld [vmem:[#allocation10_spill] sm:$0xff] }
 0x285   : > { %2508 = vmatprep.mubr.f32.mxu1 %v13020_v27  ;;  %5736 = vmatprep.mubr.f32.mxu0 %v13020_v27  ;;  %v12110_v45 = vsel %vm6210_vm4, %v6197_v8, %v6199_v55 }
 0x286   : > { %13054 = vst [vmem:[#allocation34_spill] sm:$0xff] %v12110_v45  ;;  %10338 = vmatmul.mubr.msk.f32.vlgmr.msra.gmra.mrb[8].mxu1 %vm298_vm1, %v11616_v44  ;;  %10458 = vmatmul.mubr.msk.f32.vlgmr.msra.gmra.mrb[10].mxu0 %vm298_vm1, %v12074_v52 }
 0x287   : > { %10343 = vmatpush1.msk.msra.mxu1 %vm618_vm3, %v2352_v54  ;;  %10464 = vmatpush1.msk.msra.mxu0 %vm618_vm3, %v5857_v33  ;;  %v6205_v2 = vpop.permute.xlu0 %6204  ;;  %v2702_v33 = vsel %vm2699_vm9, %v13058_v60, %v13056_v47  ;;  %v13060_v60 = vld [vmem:[#allocation39_spill] sm:$0xff] }
 0x288   : > { %10349 = vmatprep.subr.msk.mxu1 %vm618_vm3, %v2703_v30  ;;  %8316 = vrot.lane.b32.xlu0 %v11526_v4, %s10923_s18  ;;  %v6201_v10 = vpop.permute.xlu1 %6200  ;;  %v5861_v30 = vsel %vm5856_vm2, %v11981_v11, %v12003_v6  ;;  %v8304_v6 = vld [vmem:[#allocation2 + $0x24] sm:$0xf] }
 0x289   : > { %8320 = vrot.lane.b32.xlu1 %v11606_v1, %s10923_s18  ;;  %10469 = vmatprep.subr.msk.mxu0 %vm618_vm3, %v5862_v53  ;;  %v12141_v54 = vsel %vm6210_vm4, %v6199_v55, %v6201_v10  ;;  %v13059_v53 = vld [vmem:[#allocation41_spill] sm:$0xff] }
 0x28a   : > { %13057 = vst [vmem:[#allocation14_spill] sm:$0xff] %v12141_v54  ;;  %2650 = vmatprep.mubr.f32.mxu1 %v13020_v27  ;;  %5948 = vmatprep.mubr.f32.mxu0 %v13020_v27  ;;  %v2707_v45 = vsel %vm2699_vm9, %v11881_v29, %v13059_v53  ;;  %v6211_v54 = vsel %vm6210_vm4, %v6193_v31, %v12047_v28  ;;  %v13063_v31 = vld [vmem:[#allocation40_spill] sm:$0xff] }
 0x28b   : > { %10344 = vmatmul.mubr.msk.f32.vlgmr.msra.gmra.mrb[10].mxu1 %vm298_vm1, %v11616_v44  ;;  %10465 = vmatmul.mubr.msk.f32.vlgmr.msra.gmra.mrb[8].mxu0 %vm298_vm1, %v12135_v36  ;;  %v6209_v55 = vpop.permute.xlu0 %6208  ;;  %v6212_v44 = vsel %vm6210_vm4, %v12047_v28, %v6197_v8  ;;  %v13061_v8 = vld [vmem:[#allocation23_spill] sm:$0xff] }
 0x28c   : > { %10350 = vmatpush1.msk.msra.mxu1 %vm618_vm3, %v2702_v33  ;;  %10470 = vmatpush1.msk.msra.mxu0 %vm618_vm3, %v5861_v30  ;;  %v6203_v47 = vpop.permute.xlu1 %6202  ;;  %v2706_v33 = vsel %vm2699_vm9, %v13060_v60, %v11881_v29  ;;  %v3057_v30 = vsel %vm3053_vm10, %v13061_v8, %v11389_v9  ;;  %v13062_v9 = vld [vmem:[#allocation11_spill] sm:$0xff]  ;;  %vm7980_vm9 = vcmask 236544  }
 0x28d   : > { %10355 = vmatprep.subr.msk.mxu1 %vm618_vm3, %v2707_v45  ;;  %8328 = vrot.lane.b32.xlu0 %v11563_v12, %s10923_s18 }
 0x28e   : > { %8324 = vrot.lane.b32.xlu1 %v11676_v38, %s10923_s18  ;;  %2862 = vmatprep.mubr.f32.mxu1 %v13020_v27 }
 0x28f   : > { %10351 = vmatmul.mubr.msk.f32.vlgmr.msra.gmra.mrb[8].mxu1 %vm298_vm1, %v11656_v42  ;;  %6090 = vmatprep.mubr.f32.mxu0 %v13020_v27  ;;  %v6551_v45 = vpop.permute.xlu0 %6550 }
 0x290   : > { %10356 = vmatpush1.msk.msra.mxu1 %vm618_vm3, %v2706_v33  ;;  %10476 = vmatprep.subr.msk.mxu0 %vm618_vm3, %v6212_v44  ;;  %v6207_v53 = vpop.permute.xlu1 %6206  ;;  %v3056_v44 = vsel %vm3053_vm10, %v13062_v9, %v13061_v8  ;;  %v6216_v33 = vsel %vm6210_vm4, %v6203_v47, %v6205_v2  ;;  %v13065_v9 = vld [vmem:[#allocation44_spill] sm:$0xff] }
 0x291   : > { %10362 = vmatprep.subr.msk.mxu1 %vm618_vm3, %v3057_v30  ;;  %8332 = vrot.lane.b32.xlu0 %v8304_v6, %s10923_s18  ;;  %v12184_v29 = vsel %vm6210_vm4, %v6205_v2, %v6207_v53  ;;  %v12187_v60 = vsel %vm6210_vm4, %v6207_v53, %v6209_v55  ;;  %v3061_v55 = vsel %vm3053_vm10, %v11937_v34, %v13063_v31  ;;  %v13064_v2 = vld [vmem:[#allocation26_spill] sm:$0xff] }
 0x292   : > { %8326 = vrot.lane.b32.xlu1 %v11689_v22, %s10923_s18  ;;  %3004 = vmatprep.mubr.f32.mxu1 %v13020_v27  ;;  %v3411_v8 = vsel %vm3407_vm11, %v13064_v2, %v11387_v16  ;;  %v12229_v30 = vld [vmem:[%s12941_s4 + $0x40] sm:$0xf] }
 0x293   : > { %10471 = vmatmul.mubr.msk.f32.vlgmr.msra.gmra.mrb[10].mxu0 %vm298_vm1, %v12135_v36  ;;  %10357 = vmatmul.mubr.msk.f32.vlgmr.msra.gmra.mrb[10].mxu1 %vm298_vm1, %v11656_v42  ;;  %v12199_v28 = vpop.permute.xlu0 %6554  ;;  %v3060_v42 = vsel %vm3053_vm10, %v11597_v39, %v11937_v34  ;;  %v6215_v34 = vsel %vm6210_vm4, %v6201_v10, %v6203_v47  ;;  %v3410_v10 = vsel %vm3407_vm11, %v11252_v23, %v13064_v2  ;;  %vm8334_vm10 = vcmask 228352  }
 0x294   : > { %10477 = vmatpush1.msk.msra.mxu0 %vm618_vm3, %v6211_v54  ;;  %10363 = vmatpush1.msk.msra.mxu1 %vm618_vm3, %v3056_v44  ;;  %v6549_v6 = vpop.permute.xlu1 %6548  ;;  %v3415_v44 = vsel %vm3407_vm11, %v11908_v40, %v13065_v9  ;;  %v3414_v23 = vsel %vm3407_vm11, %v11668_v14, %v11908_v40  ;;  %v13068_v40 = vld [vmem:[#allocation12_spill] sm:$0xff]  ;;  %vm8688_vm11 = vcmask 220160  }
 0x295   : > { %10368 = vmatprep.subr.msk.mxu1 %vm618_vm3, %v3061_v55  ;;  %8674 = vrot.lane.b32.xlu0 %v11606_v1, %s10924_s23  ;;  %v6566_v31 = vsel %vm6564_vm5, %v6549_v6, %v6551_v45 }
 0x296   : > { %8330 = vrot.lane.b32.xlu1 %v11581_v13, %s10923_s18  ;;  %3216 = vmatprep.mubr.f32.mxu1 %v13020_v27 }
 0x297   : > { %10364 = vmatmul.mubr.msk.f32.vlgmr.msra.gmra.mrb[8].mxu1 %vm298_vm1, %v11702_v46  ;;  %6302 = vmatprep.mubr.f32.mxu0 %v13020_v27  ;;  %v12219_v54 = vpop.permute.xlu0 %6556 }
 0x298   : > { %10369 = vmatpush1.msk.msra.mxu1 %vm618_vm3, %v3060_v42  ;;  %10482 = vmatprep.subr.msk.mxu0 %vm618_vm3, %v6216_v33  ;;  %v6553_v39 = vpop.permute.xlu1 %6552  ;;  %v13067_v33 = vld [vmem:[#allocation25_spill] sm:$0xff] }
 0x299   : > { %10375 = vmatprep.subr.msk.mxu1 %vm618_vm3, %v3411_v8  ;;  %8678 = vrot.lane.b32.xlu0 %v11676_v38, %s10924_s23  ;;  %v12236_v53 = vsel %vm6564_vm5, %v6551_v45, %v6553_v39  ;;  %v12240_v16 = vsel %vm6564_vm5, %v6553_v39, %v12199_v28  ;;  %v13066_v45 = vld [vmem:[#allocation32_spill] sm:$0xff]  ;;  %v3764_v8 = vsel %vm3761_vm12, %v13068_v40, %v13067_v33  ;;  %v13073_v40 = vld [vmem:[#allocation46_spill] sm:$0xff] }
 0x29a   : > { %8672 = vrot.lane.b32.xlu1 %v11542_v59, %s10924_s23  ;;  %3358 = vmatprep.mubr.f32.mxu1 %v13020_v27  ;;  %v3765_v42 = vsel %vm3761_vm12, %v13067_v33, %v13066_v45 }
 0x29b   : > { %10478 = vmatmul.mubr.msk.f32.vlgmr.msra.gmra.mrb[8].mxu0 %vm298_vm1, %v12229_v30  ;;  %10370 = vmatmul.mubr.msk.f32.vlgmr.msra.gmra.mrb[10].mxu1 %vm298_vm1, %v11702_v46  ;;  %v12252_v47 = vpop.permute.xlu0 %6560 }
 0x29c   : > { %10483 = vmatpush1.msk.msra.mxu0 %vm618_vm3, %v6215_v34  ;;  %10376 = vmatpush1.msk.msra.mxu1 %vm618_vm3, %v3410_v10  ;;  %v6547_v55 = vpop.permute.xlu1 %6546  ;;  %v13069_v10 = vld [vmem:[#allocation43_spill] sm:$0xff] }
 0x29d   : > { %10381 = vmatprep.subr.msk.mxu1 %vm618_vm3, %v3415_v44  ;;  %8680 = vrot.lane.b32.xlu0 %v11689_v22, %s10924_s23  ;;  %v6565_v39 = vsel %vm6564_vm5, %v6547_v55, %v6549_v6  ;;  %v3769_v9 = vsel %vm3761_vm12, %v11962_v25, %v13069_v10  ;;  %v4122_v10 = vsel %vm4115_vm13, %v11731_v5, %v11926_v49 }
 0x29e   : > { %8676 = vrot.lane.b32.xlu1 %v11626_v24, %s10924_s23  ;;  %3570 = vmatprep.mubr.f32.mxu1 %v13020_v27 }
 0x29f   : > { %10377 = vmatmul.mubr.msk.f32.vlgmr.msra.gmra.mrb[8].mxu1 %vm298_vm1, %v11741_v58  ;;  %10489 = vmatprep.subr.msk.mxu0 %vm618_vm3, %v6566_v31  ;;  %v12272_v46 = vpop.permute.xlu0 %6902  ;;  %v8658_v31 = vld [vmem:[#allocation2 + $0x24] sm:$0xf] }
 0x2a0   : > { %10382 = vmatpush1.msk.msra.mxu1 %vm618_vm3, %v3414_v23  ;;  %3712 = vmatprep.mubr.f32.mxu1 %v13020_v27  ;;  %v6559_v2 = vpop.permute.xlu1 %6558 }
 0x2a1   : > { %10388 = vmatprep.subr.msk.mxu1 %vm618_vm3, %v3765_v42  ;;  %8684 = vrot.lane.b32.xlu0 %v11581_v13, %s10924_s23  ;;  %v12284_v14 = vsel %vm6564_vm5, %v6559_v2, %v12252_v47  ;;  %v6570_v55 = vsel %vm6564_vm5, %v12219_v54, %v6559_v2 }
 0x2a2   : > { %8670 = vrot.lane.b32.xlu1 %v11526_v4, %s10924_s23  ;;  %6444 = vmatprep.mubr.f32.mxu0 %v13020_v27 }
 0x2a3   : > { %10383 = vmatmul.mubr.msk.f32.vlgmr.msra.gmra.mrb[10].mxu1 %vm298_vm1, %v11741_v58  ;;  %10484 = vmatmul.mubr.msk.f32.vlgmr.msra.gmra.mrb[10].mxu0 %vm298_vm1, %v12229_v30  ;;  %v12297_v34 = vpop.permute.xlu0 %6906  ;;  %v13070_v58 = vld [vmem:[#allocation42_spill] sm:$0xff] }
 0x2a4   : > { %10389 = vmatpush1.msk.msra.mxu1 %vm618_vm3, %v3764_v8  ;;  %3924 = vmatprep.mubr.f32.mxu1 %v13020_v27  ;;  %v12304_v44 = vpop.permute.xlu1 %6562  ;;  %v3768_v6 = vsel %vm3761_vm12, %v13070_v58, %v11962_v25  ;;  %v12328_v25 = vld [vmem:[%s12941_s4 + $0x44] sm:$0xf]  ;;  %v4123_v8 = vsel %vm4115_vm13, %v11926_v49, %v13073_v40  ;;  %vm9042_vm12 = vcmask 154624  }
 0x2a5   : > { %10394 = vmatprep.subr.msk.mxu1 %vm618_vm3, %v3769_v9  ;;  %9026 = vrot.lane.b32.xlu0 %v11542_v59, %s10925_s27  ;;  %v13071_v59 = vld [vmem:[#allocation28_spill] sm:$0xff]  ;;  %v9012_v49 = vld [vmem:[#allocation2 + $0x24] sm:$0xf] }
 0x2a6   : > { %8682 = vrot.lane.b32.xlu1 %v11563_v12, %s10924_s23  ;;  %10490 = vmatpush1.msk.msra.mxu0 %vm618_vm3, %v6565_v39  ;;  %v4119_v45 = vsel %vm4115_vm13, %v13071_v59, %v11393_v56  ;;  %v13072_v56 = vld [vmem:[#allocation13_spill] sm:$0xff] }
 0x2a7   : > { %10390 = vmatmul.mubr.msk.f32.vlgmr.msra.gmra.mrb[8].mxu1 %vm298_vm1, %v11782_v19  ;;  %6656 = vmatprep.mubr.f32.mxu0 %v13020_v27  ;;  %v6901_v23 = vpop.permute.xlu0 %6900  ;;  %v4118_v42 = vsel %vm4115_vm13, %v13072_v56, %v13071_v59  ;;  %vm9396_vm13 = vcmask 146432  }
 0x2a8   : > { %10395 = vmatpush1.msk.msra.mxu1 %vm618_vm3, %v3768_v6  ;;  %4066 = vmatprep.mubr.f32.mxu1 %v13020_v27  ;;  %v12330_v33 = vpop.permute.xlu1 %6904  ;;  %v13075_v6 = vld [vmem:[#allocation45_spill] sm:$0xff] }
 0x2a9   : > { %10401 = vmatprep.subr.msk.mxu1 %vm618_vm3, %v4119_v45  ;;  %9030 = vrot.lane.b32.xlu0 %v11626_v24, %s10925_s27  ;;  %v12430_v45 = vld [vmem:[#allocation2 + $0x4] sm:$0xff] }
 0x2aa   : > { %8686 = vrot.lane.b32.xlu1 %v8658_v31, %s10924_s23  ;;  %10495 = vmatprep.subr.msk.mxu0 %vm618_vm3, %v6570_v55  ;;  %v4477_v31 = vsel %vm4469_vm14, %v11987_v17, %v13075_v6 }
 0x2ab   : > { %10396 = vmatmul.mubr.msk.f32.vlgmr.msra.gmra.mrb[10].mxu1 %vm298_vm1, %v11782_v19  ;;  %10491 = vmatmul.mubr.msk.f32.vlgmr.msra.gmra.mrb[8].mxu0 %vm298_vm1, %v12328_v25  ;;  %v12344_v2 = vpop.permute.xlu0 %6912  ;;  %v6569_v19 = vsel %vm6564_vm5, %v12199_v28, %v12219_v54  ;;  %v6920_v28 = vsel %vm6918_vm6, %v12272_v46, %v12330_v33 }
 0x2ac   : > { %10402 = vmatpush1.msk.msra.mxu1 %vm618_vm3, %v4118_v42  ;;  %4278 = vmatprep.mubr.f32.mxu1 %v13020_v27  ;;  %v12351_v39 = vpop.permute.xlu1 %6908  ;;  %v9374_v42 = vcombine.high %v12430_v45, %v12430_v45 }
 0x2ad   : > { %10407 = vmatprep.subr.msk.mxu1 %vm618_vm3, %v4123_v8  ;;  %9024 = vrot.lane.b32.xlu0 %v11526_v4, %s10925_s27  ;;  %v13074_v4 = vld [vmem:[#allocation27_spill] sm:$0xff] }
 0x2ae   : > { %9028 = vrot.lane.b32.xlu1 %v11606_v1, %s10925_s27  ;;  %10496 = vmatpush1.msk.msra.mxu0 %vm618_vm3, %v6569_v19  ;;  %v4473_v9 = vsel %vm4469_vm14, %v13074_v4, %v13036_v26  ;;  %v4472_v58 = vsel %vm4469_vm14, %v11276_v63, %v13074_v4  ;;  %v6919_v26 = vsel %vm6918_vm6, %v6901_v23, %v12272_v46  ;;  %v13076_v23 = vld [vmem:[#allocation30_spill] sm:$0xff]  ;;  %v13077_v4 = vld [vmem:[#allocation29_spill] sm:$0xff] }
 0x2af   : > { %10403 = vmatmul.mubr.msk.f32.vlgmr.msra.gmra.mrb[8].mxu1 %vm298_vm1, %v11826_v51  ;;  %6798 = vmatprep.mubr.f32.mxu0 %v13020_v27  ;;  %v12371_v54 = vpop.permute.xlu0 %6916  ;;  %v4827_v59 = vsel %vm4823_vm15, %v13076_v23, %v13041_v18  ;;  %v4826_v18 = vsel %vm4823_vm15, %v13037_v21, %v13076_v23  ;;  %v12451_v21 = vld [vmem:[#allocation2 + $0xc] sm:$0xff] }
 0x2b0   : > { %10408 = vmatpush1.msk.msra.mxu1 %vm618_vm3, %v4122_v10  ;;  %4420 = vmatprep.mubr.f32.mxu1 %v13020_v27  ;;  %v6911_v5 = vpop.permute.xlu1 %6910  ;;  %v5154_v8 = vcombine.high %v12451_v21, %v12451_v21  ;;  %v13079_v23 = vld [vmem:[#allocation31_spill] sm:$0xff] }
 0x2b1   : > { %10414 = vmatprep.subr.msk.mxu1 %vm618_vm3, %v4473_v9  ;;  %9036 = vrot.lane.b32.xlu0 %v11563_v12, %s10925_s27  ;;  %v6924_v46 = vsel %vm6918_vm6, %v6911_v5, %v12344_v2  ;;  %v6923_v56 = vsel %vm6918_vm6, %v12351_v39, %v6911_v5  ;;  %v5506_v9 = vsel %vm5502_vm0, %v13077_v4, %v13050_v35  ;;  %v12519_v5 = vld [vmem:[%s12941_s4 + $0x4c] sm:$0xf] }
 0x2b2   : > { %9032 = vrot.lane.b32.xlu1 %v11676_v38, %s10925_s27  ;;  %10502 = vmatprep.subr.msk.mxu0 %vm618_vm3, %v6920_v28  ;;  %v5505_v35 = vsel %vm5502_vm0, %v13044_v20, %v13077_v4 }
 0x2b3   : > { %10409 = vmatmul.mubr.msk.f32.vlgmr.msra.gmra.mrb[10].mxu1 %vm298_vm1, %v11826_v51  ;;  %10497 = vmatmul.mubr.msk.f32.vlgmr.msra.gmra.mrb[10].mxu0 %vm298_vm1, %v12328_v25  ;;  %v12393_v12 = vpop.permute.xlu0 %7258  ;;  %v4476_v51 = vsel %vm4469_vm14, %v11724_v15, %v11987_v17  ;;  %v12425_v15 = vld [vmem:[%s12941_s4 + $0x48] sm:$0xf]  ;;  %vm9750_vm14 = vcmask 138240  }
 0x2b4   : > { %10415 = vmatpush1.msk.msra.mxu1 %vm618_vm3, %v4472_v58  ;;  %4632 = vmatprep.mubr.f32.mxu1 %v13020_v27  ;;  %v12400_v63 = vpop.permute.xlu1 %6914  ;;  %v9366_v58 = vld [vmem:[#allocation2 + $0x24] sm:$0xf] }
 0x2b5   : > { %10420 = vmatprep.subr.msk.mxu1 %vm618_vm3, %v4477_v31  ;;  %9040 = vrot.lane.b32.xlu0 %v9012_v49, %s10925_s27 }
 0x2b6   : > { %9034 = vrot.lane.b32.xlu1 %v11689_v22, %s10925_s27  ;;  %10503 = vmatpush1.msk.msra.mxu0 %vm618_vm3, %v6919_v26  ;;  %v13078_v26 = vld [vmem:[#allocation5_spill] sm:$0xff] }
 0x2b7   : > { %10416 = vmatmul.mubr.msk.f32.vlgmr.msra.gmra.mrb[8].mxu1 %vm298_vm1, %v11889_v50  ;;  %7010 = vmatprep.mubr.f32.mxu0 %v13020_v27  ;;  %v12415_v55 = vpop.permute.xlu0 %7262  ;;  %v5510_v6 = vsel %vm5502_vm0, %v12013_v61, %v13078_v26 }
 0x2b8   : > { %10421 = vmatpush1.msk.msra.mxu1 %vm618_vm3, %v4476_v51  ;;  %4774 = vmatprep.mubr.f32.mxu1 %v13020_v27  ;;  %v7257_v17 = vpop.permute.xlu1 %7256  ;;  %v5509_v51 = vsel %vm5502_vm0, %v11788_v48, %v12013_v61 }
 0x2b9   : > { %10427 = vmatprep.subr.msk.mxu1 %vm618_vm3, %v4827_v59  ;;  %9382 = vrot.lane.b32.xlu0 %v11606_v1, %s10926_s8  ;;  %v5860_v59 = vsel %vm5856_vm2, %v13079_v23, %v11981_v11  ;;  %v5859_v11 = vsel %vm5856_vm2, %v13052_v37, %v13079_v23  ;;  %v9718_v37 = vld [vmem:[#allocation2 + $0x14] sm:$0xff] }
 0x2ba   : > { %9038 = vrot.lane.b32.xlu1 %v11581_v13, %s10925_s27  ;;  %10508 = vmatprep.subr.msk.mxu0 %vm618_vm3, %v6924_v46  ;;  %v4831_v13 = vsel %vm4823_vm15, %v11958_v7, %v11811_v41  ;;  %v4830_v41 = vsel %vm4823_vm15, %v11794_v32, %v11958_v7 }
 0x2bb   : > { %10422 = vmatmul.mubr.msk.f32.vlgmr.msra.gmra.mrb[10].mxu1 %vm298_vm1, %v11889_v50  ;;  %10504 = vmatmul.mubr.msk.f32.vlgmr.msra.gmra.mrb[8].mxu0 %vm298_vm1, %v12425_v15  ;;  %v7265_v1 = vpop.permute.xlu0 %7264  ;;  %v7274_v50 = vsel %vm7272_vm7, %v7257_v17, %v12393_v12 }
 0x2bc   : > { %10428 = vmatpush1.msk.msra.mxu1 %vm618_vm3, %v4826_v18  ;;  %4986 = vmatprep.mubr.f32.mxu1 %v13020_v27  ;;  %v12455_v40 = vpop.permute.xlu1 %7260  ;;  %v7277_v31 = vsel %vm7272_vm7, %v12415_v55, %v7265_v1  ;;  %v5863_v18 = vsel %vm5856_vm2, %v12059_v43, %v12028_v3 }
 0x2bd   : > { %10433 = vmatprep.subr.msk.mxu1 %vm618_vm3, %v4831_v13  ;;  %9386 = vrot.lane.b32.xlu0 %v11676_v38, %s10926_s8  ;;  %v12474_v38 = vld [vmem:[#allocation2 + $0x1c] sm:$0xff]  ;;  %v12602_v13 = vld [vmem:[%s12941_s4 + $0x50] sm:$0xf] }
 0x2be   : > { %9380 = vrot.lane.b32.xlu1 %v9374_v42, %s10926_s8  ;;  %10509 = vmatpush1.msk.msra.mxu0 %vm618_vm3, %v6923_v56  ;;  %v12486_v32 = vcombine.high %v12474_v38, %v12474_v38  ;;  %v9730_v56 = vcombine.high %v9718_v37, %v9718_v37 }
 0x2bf   : > { %10429 = vmatmul.mubr.msk.f32.vlgmr.msra.gmra.mrb[8].mxu1 %vm298_vm1, %v11952_v57  ;;  %10515 = vmatprep.subr.msk.mxu0 %vm618_vm3, %v7274_v50  ;;  %v12470_v19 = vpop.permute.xlu0 %7268 }
 0x2c0   : > { %10434 = vmatpush1.msk.msra.mxu1 %vm618_vm3, %v4830_v41  ;;  %5128 = vmatprep.mubr.f32.mxu1 %v13020_v27  ;;  %v7255_v10 = vpop.permute.xlu1 %7254 }
 0x2c1   : > { %10440 = vmatprep.subr.msk.mxu1 %vm618_vm3, %v5154_v8  ;;  %9388 = vrot.lane.b32.xlu0 %v11689_v22, %s10926_s8  ;;  %v7273_v7 = vsel %vm7272_vm7, %v7255_v10, %v7257_v17  ;;  %v6922_v10 = vsel %vm6918_vm6, %v12297_v34, %v12351_v39  ;;  %v12683_v39 = vld [vmem:[%s12941_s4 + $0x54] sm:$0xf] }
 0x2c2   : > { %9384 = vrot.lane.b32.xlu1 %v11626_v24, %s10926_s8  ;;  %7152 = vmatprep.mubr.f32.mxu0 %v13020_v27 }
 0x2c3   : > { %10435 = vmatmul.mubr.msk.f32.vlgmr.msra.gmra.mrb[10].mxu1 %vm298_vm1, %v11952_v57  ;;  %10510 = vmatmul.mubr.msk.f32.vlgmr.msra.gmra.mrb[10].mxu0 %vm298_vm1, %v12425_v15  ;;  %v7611_v28 = vpop.permute.xlu0 %7610 }
 0x2c4   : > { %10441 = vmatpush1.msk.msra.mxu1 %vm618_vm3, %v12451_v21  ;;  %5311 = vmatprep.mubr.f32.mxu1 %v13020_v27  ;;  %v12494_v22 = vpop.permute.xlu1 %7266 }
 0x2c5   : > { %10446 = vmatprep.subr.msk.mxu1 %vm618_vm3, %v12486_v32  ;;  %9392 = vrot.lane.b32.xlu0 %v12486_v32, %s10926_s8  ;;  %v7278_v24 = vsel %vm7272_vm7, %v7265_v1, %v12494_v22 }
 0x2c6   : > { %9378 = vrot.lane.b32.xlu1 %v12430_v45, %s10926_s8  ;;  %10516 = vmatpush1.msk.msra.mxu0 %vm618_vm3, %v7273_v7 }
 0x2c7   : > { %10442 = vmatmul.mubr.msk.f32.vlgmr.msra.gmra.mrb[8].mxu1 %vm298_vm1, %v12011_v62  ;;  %7364 = vmatprep.mubr.f32.mxu0 %v13020_v27  ;;  %v12508_v57 = vpop.permute.xlu0 %7614 }
 0x2c8   : > { %10447 = vmatpush1.msk.msra.mxu1 %vm618_vm3, %v12474_v38  ;;  %5453 = vmatprep.mubr.f32.mxu1 %v13020_v27  ;;  %v12521_v49 = vpop.permute.xlu1 %7270 }
 0x2c9   : > { %10453 = vmatprep.subr.msk.mxu1 %vm618_vm3, %v5506_v9  ;;  %9734 = vrot.lane.b32.xlu0 %v9374_v42, %s10927_s11  ;;  %v13080_v42 = vld [vmem:[#allocation14_spill] sm:$0xff] }
 0x2ca   : > { %9390 = vrot.lane.b32.xlu1 %v12474_v38, %s10926_s8  ;;  %10521 = vmatprep.subr.msk.mxu0 %vm618_vm3, %v7278_v24 }
 0x2cb   : > { %10448 = vmatmul.mubr.msk.f32.vlgmr.msra.gmra.mrb[10].mxu1 %vm298_vm1, %v12011_v62  ;;  %10517 = vmatmul.mubr.msk.f32.vlgmr.msra.gmra.mrb[8].mxu0 %vm298_vm1, %v12519_v5 }
 0x2cc   : > { %10454 = vmatpush1.msk.msra.mxu1 %vm618_vm3, %v5505_v35  ;;  %5665 = vmatprep.mubr.f32.mxu1 %v13020_v27 }
 0x2cd   : > { %10459 = vmatprep.subr.msk.mxu1 %vm618_vm3, %v5510_v6  ;;  %9738 = vrot.lane.b32.xlu0 %v5154_v8, %s10927_s11  ;;  %v7609_v62 = vpop.permute.xlu0 %7608 }
 0x2ce   : > { %9394 = vrot.lane.b32.xlu1 %v9366_v58, %s10926_s8  ;;  %10522 = vmatpush1.msk.msra.mxu0 %vm618_vm3, %v7277_v31  ;;  %v12546_v20 = vpop.permute.xlu1 %7612  ;;  %v7627_v17 = vsel %vm7626_vm8, %v7609_v62, %v7611_v28 }
 0x2cf   : > { %10455 = vmatmul.mubr.msk.f32.vlgmr.msra.gmra.mrb[8].mxu1 %vm298_vm1, %v12074_v52  ;;  %v7628_v46 = vsel %vm7626_vm8, %v7611_v28, %v12546_v20  ;;  %7506 = vmatprep.mubr.f32.mxu0 %v13020_v27 }
 0x2d0   : > { %10460 = vmatpush1.msk.msra.mxu1 %vm618_vm3, %v5509_v51  ;;  %5807 = vmatprep.mubr.f32.mxu1 %v13020_v27 }
 0x2d1   : > { %10466 = vmatprep.subr.msk.mxu1 %vm618_vm3, %v5860_v59  ;;  %9732 = vrot.lane.b32.xlu0 %v12430_v45, %s10927_s11  ;;  %v12564_v48 = vpop.permute.xlu0 %7620  ;;  %v5864_v45 = vsel %vm5856_vm2, %v12028_v3, %v12082_v0 }
 0x2d2   : > { %9736 = vrot.lane.b32.xlu1 %v12451_v21, %s10927_s11  ;;  %10528 = vmatprep.subr.msk.mxu0 %vm618_vm3, %v7628_v46  ;;  %v12569_v61 = vpop.permute.xlu1 %7616  ;;  %v13081_v21 = vld [vmem:[#allocation34_spill] sm:$0xff] }
 0x2d3   : > { %10461 = vmatmul.mubr.msk.f32.vlgmr.msra.gmra.mrb[10].mxu1 %vm298_vm1, %v12074_v52  ;;  %10523 = vmatmul.mubr.msk.f32.vlgmr.msra.gmra.mrb[10].mxu0 %vm298_vm1, %v12519_v5  ;;  %v9720_v52 = vld [vmem:[#allocation2 + $0x24] sm:$0xf]  ;;  %v7630_v28 = vsel %vm7626_vm8, %v12508_v57, %v12569_v61 }
 0x2d4   : > { %10467 = vmatpush1.msk.msra.mxu1 %vm618_vm3, %v5859_v11  ;;  %6019 = vmatprep.mubr.f32.mxu1 %v13020_v27 }
 0x2d5   : > { %10472 = vmatprep.subr.msk.mxu1 %vm618_vm3, %v5864_v45  ;;  %9744 = vrot.lane.b32.xlu0 %v12474_v38, %s10927_s11 }
 0x2d6   : > { %9740 = vrot.lane.b32.xlu1 %v9718_v37, %s10927_s11  ;;  %10529 = vmatpush1.msk.msra.mxu0 %vm618_vm3, %v7627_v17 }
 0x2d7   : > { %10468 = vmatmul.mubr.msk.f32.vlgmr.msra.gmra.mrb[8].mxu1 %vm298_vm1, %v12135_v36  ;;  %v12594_v0 = vpop.permute.xlu0 %7624  ;;  %7718 = vmatprep.mubr.f32.mxu0 %v13020_v27 }
 0x2d8   : > { %10473 = vmatpush1.msk.msra.mxu1 %vm618_vm3, %v5863_v18  ;;  %6161 = vmatprep.mubr.f32.mxu1 %v13020_v27  ;;  %v7619_v1 = vpop.permute.xlu1 %7618 }
 0x2d9   : > { %10479 = vmatprep.subr.msk.mxu1 %vm618_vm3, %v13080_v42  ;;  %9748 = vrot.lane.b32.xlu0 %v9720_v52, %s10927_s11  ;;  %v7632_v3 = vsel %vm7626_vm8, %v7619_v1, %v12564_v48  ;;  %v7631_v43 = vsel %vm7626_vm8, %v12569_v61, %v7619_v1 }
 0x2da   : > { %9742 = vrot.lane.b32.xlu1 %v9730_v56, %s10927_s11  ;;  %10534 = vmatprep.subr.msk.mxu0 %vm618_vm3, %v7632_v3 }
 0x2db   : > { %10474 = vmatmul.mubr.msk.f32.vlgmr.msra.gmra.mrb[10].mxu1 %vm298_vm1, %v12135_v36  ;;  %10530 = vmatmul.mubr.msk.f32.vlgmr.msra.gmra.mrb[8].mxu0 %vm298_vm1, %v12602_v13  ;;  %v10070_v36 = vld [vmem:[%s12942_s5] sm:$0xf] }
 0x2dc   : > { %10480 = vmatpush1.msk.msra.mxu1 %vm618_vm3, %v13081_v21  ;;  %6373 = vmatprep.mubr.f32.mxu1 %v13020_v27 }
 0x2dd   : > { %10485 = vmatprep.subr.msk.mxu1 %vm618_vm3, %v12187_v60  ;;  %10535 = vmatpush1.msk.msra.mxu0 %vm618_vm3, %v7631_v43  ;;  %v12623_v50 = vpop.permute.xlu0 %7966  ;;  %v12625_v41 = vpop.permute.xlu1 %7622  ;;  %v10566_v43 = vld [vmem:[%s12941_s4 + $0x5c] sm:$0xf] }
 0x2de   : > { %9746 = vrot.lane.b32.xlu1 %v12486_v32, %s10927_s11  ;;  %7860 = vmatprep.mubr.f32.mxu0 %v13020_v27  ;;  %v7634_v9 = vsel %vm7626_vm8, %v12625_v41, %v12594_v0  ;;  %s251_s11 = scalar_lea.vmem %s12943_s6, %s10624_s25 }
 0x2df   : > { %10481 = vmatmul.mubr.msk.f32.vlgmr.msra.gmra.mrb[8].mxu1 %vm298_vm1, %v12229_v30  ;;  %10536 = vmatmul.mubr.msk.f32.vlgmr.msra.gmra.mrb[10].mxu0 %vm298_vm1, %v12602_v13 }
 0x2e0   : > { %10486 = vmatpush1.msk.msra.mxu1 %vm618_vm3, %v12184_v29  ;;  %6515 = vmatprep.mubr.f32.mxu1 %v13020_v27  ;;  %v6572_v29 = vsel %vm6564_vm5, %v12252_v47, %v12304_v44  ;;  %v6926_v47 = vsel %vm6918_vm6, %v12400_v63, %v12371_v54 }
 0x2e1   : > { %10492 = vmatprep.subr.msk.mxu1 %vm618_vm3, %v12240_v16  ;;  %8072 = vmatprep.mubr.f32.mxu0 %v13020_v27 }
 0x2e2   : > { %v12643_v60 = vpop.permute.xlu0 %7970  ;;  %v7965_v8 = vpop.permute.xlu1 %7964  ;;  %10073 = vperm.xlu1 %10872, %v10070_v36  }
 0x2e3   : > { %10487 = vmatmul.mubr.msk.f32.vlgmr.msra.gmra.mrb[10].mxu1 %vm298_vm1, %v12229_v30  ;;  %v7982_v38 = vsel %vm7980_vm9, %v7965_v8, %v12623_v50 }
 0x2e4   : > { %10493 = vmatpush1.msk.msra.mxu1 %vm618_vm3, %v12236_v53  ;;  %6727 = vmatprep.mubr.f32.mxu1 %v13020_v27  ;;  %v6921_v53 = vsel %vm6918_vm6, %v12330_v33, %v12297_v34  ;;  %v7276_v33 = vsel %vm7272_vm7, %v12455_v40, %v12415_v55  ;;  %v7280_v55 = vsel %vm7272_vm7, %v12470_v19, %v12521_v49 }
 0x2e5   : > { %10498 = vmatprep.subr.msk.mxu1 %vm618_vm3, %v6572_v29  ;;  %10541 = vmatprep.subr.msk.mxu0 %vm618_vm3, %v7982_v38 }
 0x2e7   : > { %10494 = vmatmul.mubr.msk.f32.vlgmr.msra.gmra.mrb[8].mxu1 %vm298_vm1, %v12328_v25  ;;  %v7973_v30 = vpop.permute.xlu0 %7972  ;;  %v12659_v16 = vpop.permute.xlu1 %7968 }
 0x2e8   : > { %10499 = vmatpush1.msk.msra.mxu1 %vm618_vm3, %v12284_v14  ;;  %6869 = vmatprep.mubr.f32.mxu1 %v13020_v27  ;;  %v7985_v7 = vsel %vm7980_vm9, %v12643_v60, %v7973_v30  ;;  %v7984_v58 = vsel %vm7980_vm9, %v12659_v16, %v12643_v60  ;;  %v7983_v6 = vsel %vm7980_vm9, %v12623_v50, %v12659_v16 }
 0x2e9   : > { %10505 = vmatprep.subr.msk.mxu1 %vm618_vm3, %v6922_v10 }
 0x2eb   : > { %10500 = vmatmul.mubr.msk.f32.vlgmr.msra.gmra.mrb[10].mxu1 %vm298_vm1, %v12328_v25  ;;  %v6925_v25 = vsel %vm6918_vm6, %v12344_v2, %v12400_v63  ;;  %v7275_v63 = vsel %vm7272_vm7, %v12393_v12, %v12455_v40 }
 0x2ec   : > { %10506 = vmatpush1.msk.msra.mxu1 %vm618_vm3, %v6921_v53  ;;  %7081 = vmatprep.mubr.f32.mxu1 %v13020_v27  ;;  %v12678_v14 = vpop.permute.xlu0 %7976  ;;  %v7963_v44 = vpop.permute.xlu1 %7962 }
 0x2ed   : > { %10511 = vmatprep.subr.msk.mxu1 %vm618_vm3, %v6926_v47  ;;  %v7981_v34 = vsel %vm7980_vm9, %v7963_v44, %v7965_v8 }
 0x2ee   : > { %10542 = vmatpush1.msk.msra.mxu0 %vm618_vm3, %v7981_v34 }
 0x2ef   : > { %10507 = vmatmul.mubr.msk.f32.vlgmr.msra.gmra.mrb[8].mxu1 %vm298_vm1, %v12425_v15  ;;  %10543 = vmatmul.mubr.msk.f32.vlgmr.msra.gmra.mrb[8].mxu0 %vm298_vm1, %v12683_v39 }
 0x2f0   : > { %10512 = vmatpush1.msk.msra.mxu1 %vm618_vm3, %v6925_v25  ;;  %7223 = vmatprep.mubr.f32.mxu1 %v13020_v27 }
 0x2f1   : > { %10518 = vmatprep.subr.msk.mxu1 %vm618_vm3, %v7276_v33  ;;  %v8319_v54 = vpop.permute.xlu0 %8318  ;;  %v7975_v32 = vpop.permute.xlu1 %7974  ;;  %8214 = vmatprep.mubr.f32.mxu0 %v13020_v27 }
 0x2f2   : > { %v7986_v2 = vsel %vm7980_vm9, %v7973_v30, %v7975_v32  ;;  %v7987_v23 = vsel %vm7980_vm9, %v7975_v32, %v12678_v14 }
 0x2f3   : > { %10513 = vmatmul.mubr.msk.f32.vlgmr.msra.gmra.mrb[10].mxu1 %vm298_vm1, %v12425_v15  ;;  %10547 = vmatprep.subr.msk.mxu0 %vm618_vm3, %v7986_v2  ;;  %v7279_v15 = vsel %vm7272_vm7, %v12494_v22, %v12470_v19  ;;  %v7629_v19 = vsel %vm7626_vm8, %v12546_v20, %v12508_v57  ;;  %v10553_v57 = vld [vmem:[%s12941_s4 + $0x58] sm:$0xf] }
 0x2f4   : > { %10519 = vmatpush1.msk.msra.mxu1 %vm618_vm3, %v7275_v63  ;;  %7435 = vmatprep.mubr.f32.mxu1 %v13020_v27 }
 0x2f5   : > { %10524 = vmatprep.subr.msk.mxu1 %vm618_vm3, %v7280_v55  ;;  %10548 = vmatpush1.msk.msra.mxu0 %vm618_vm3, %v7985_v7 }
 0x2f6   : > { %v8323_v12 = vpop.permute.xlu0 %8322  ;;  %v7979_v40 = vpop.permute.xlu1 %7978  ;;  %10549 = vmatmul.mubr.msk.f32.vlgmr.msra.gmra.mrb[10].mxu0 %vm298_vm1, %v12683_v39 }
 0x2f7   : > { %10520 = vmatmul.mubr.msk.f32.vlgmr.msra.gmra.mrb[8].mxu1 %vm298_vm1, %v12519_v5  ;;  %8426 = vmatprep.mubr.f32.mxu0 %v13020_v27  ;;  %v7988_v62 = vsel %vm7980_vm9, %v12678_v14, %v7979_v40  ;;  %v10579_v14 = vld [vmem:[%s12941_s4 + $0x60] sm:$0xf] }
 0x2f8   : > { %10525 = vmatpush1.msk.msra.mxu1 %vm618_vm3, %v7279_v15  ;;  %7577 = vmatprep.mubr.f32.mxu1 %v13020_v27 }
 0x2f9   : > { %10531 = vmatprep.subr.msk.mxu1 %vm618_vm3, %v7630_v28 }
 0x2fa   : > { %v8317_v24 = vpop.permute.xlu0 %8316 }
 0x2fb   : > { %v8335_v22 = vsel %vm8334_vm10, %v8317_v24, %v8319_v54  ;;  %10526 = vmatmul.mubr.msk.f32.vlgmr.msra.gmra.mrb[10].mxu1 %vm298_vm1, %v12519_v5  ;;  %v8321_v4 = vpop.permute.xlu1 %8320  ;;  %v7633_v5 = vsel %vm7626_vm8, %v12564_v48, %v12625_v41 }
 0x2fc   : > { %10532 = vmatpush1.msk.msra.mxu1 %vm618_vm3, %v7629_v19  ;;  %v8336_v49 = vsel %vm8334_vm10, %v8319_v54, %v8321_v4  ;;  %7789 = vmatprep.mubr.f32.mxu1 %v13020_v27  ;;  %v8337_v11 = vsel %vm8334_vm10, %v8321_v4, %v8323_v12 }
 0x2fd   : > { %10537 = vmatprep.subr.msk.mxu1 %vm618_vm3, %v7634_v9  ;;  %10554 = vmatprep.subr.msk.mxu0 %vm618_vm3, %v8336_v49  ;;  %v10592_v49 = vld [vmem:[%s12941_s4 + $0x64] sm:$0xf] }
 0x2fe   : > { %10555 = vmatpush1.msk.msra.mxu0 %vm618_vm3, %v8335_v22 }
 0x2ff   : > { %v8329_v35 = vpop.permute.xlu0 %8328  ;;  %10533 = vmatmul.mubr.msk.f32.vlgmr.msra.gmra.mrb[8].mxu1 %vm298_vm1, %v12602_v13  ;;  %10556 = vmatmul.mubr.msk.f32.vlgmr.msra.gmra.mrb[8].mxu0 %vm298_vm1, %v10553_v57 }
 0x300   : > { %10538 = vmatpush1.msk.msra.mxu1 %vm618_vm3, %v7633_v5  ;;  %v8325_v26 = vpop.permute.xlu1 %8324  ;;  %7931 = vmatprep.mubr.f32.mxu1 %v13020_v27 }
 0x301   : > { %10544 = vmatprep.subr.msk.mxu1 %vm618_vm3, %v7984_v58  ;;  %8568 = vmatprep.mubr.f32.mxu0 %v13020_v27  ;;  %v8338_v48 = vsel %vm8334_vm10, %v8323_v12, %v8325_v26 }
 0x303   : > { %v8333_v31 = vpop.permute.xlu0 %8332  ;;  %10539 = vmatmul.mubr.msk.f32.vlgmr.msra.gmra.mrb[10].mxu1 %vm298_vm1, %v12602_v13 }
 0x304   : > { %10545 = vmatpush1.msk.msra.mxu1 %vm618_vm3, %v7983_v6  ;;  %v8327_v20 = vpop.permute.xlu1 %8326  ;;  %8143 = vmatprep.mubr.f32.mxu1 %v13020_v27 }
 0x305   : > { %v8339_v51 = vsel %vm8334_vm10, %v8325_v26, %v8327_v20  ;;  %v8340_v46 = vsel %vm8334_vm10, %v8327_v20, %v8329_v35  ;;  %10550 = vmatprep.subr.msk.mxu1 %vm618_vm3, %v7988_v62 }
 0x306   : > { %10560 = vmatprep.subr.msk.mxu0 %vm618_vm3, %v8340_v46 }
 0x307   : > { %10561 = vmatpush1.msk.msra.mxu0 %vm618_vm3, %v8339_v51  ;;  %v8675_v59 = vpop.permute.xlu0 %8674  ;;  %10546 = vmatmul.mubr.msk.f32.vlgmr.msra.gmra.mrb[8].mxu1 %vm298_vm1, %v12683_v39 }
 0x308   : > { %10551 = vmatpush1.msk.msra.mxu1 %vm618_vm3, %v7987_v23  ;;  %v8331_v61 = vpop.permute.xlu1 %8330  ;;  %8285 = vmatprep.mubr.f32.mxu1 %v13020_v27 }
 0x309   : > { %10557 = vmatprep.subr.msk.mxu1 %vm618_vm3, %v8338_v48  ;;  %10562 = vmatmul.mubr.msk.f32.vlgmr.msra.gmra.mrb[10].mxu0 %vm298_vm1, %v10553_v57  ;;  %v8342_v45 = vsel %vm8334_vm10, %v8331_v61, %v8333_v31  ;;  %v8341_v18 = vsel %vm8334_vm10, %v8329_v35, %v8331_v61  ;;  %v10605_v61 = vld [vmem:[%s12941_s4 + $0x68] sm:$0xf] }
 0x30a   : > { %8780 = vmatprep.mubr.f32.mxu0 %v13020_v27 }
 0x30b   : > { %v8679_v17 = vpop.permute.xlu0 %8678  ;;  %10552 = vmatmul.mubr.msk.f32.vlgmr.msra.gmra.mrb[10].mxu1 %vm298_vm1, %v12683_v39 }
 0x30c   : > { %10558 = vmatpush1.msk.msra.mxu1 %vm618_vm3, %v8337_v11  ;;  %v8673_v37 = vpop.permute.xlu1 %8672  ;;  %8497 = vmatprep.mubr.f32.mxu1 %v13020_v27 }
 0x30d   : > { %v8690_v52 = vsel %vm8688_vm11, %v8673_v37, %v8675_v59  ;;  %10563 = vmatprep.subr.msk.mxu1 %vm618_vm3, %v8342_v45 }
 0x30e   : > { %10567 = vmatprep.subr.msk.mxu0 %vm618_vm3, %v8690_v52 }
 0x30f   : > { %v8681_v0 = vpop.permute.xlu0 %8680  ;;  %10559 = vmatmul.mubr.msk.f32.vlgmr.msra.gmra.mrb[8].mxu1 %vm298_vm1, %v10553_v57 }
 0x310   : > { %10564 = vmatpush1.msk.msra.mxu1 %vm618_vm3, %v8341_v18  ;;  %v8677_v56 = vpop.permute.xlu1 %8676  ;;  %8639 = vmatprep.mubr.f32.mxu1 %v13020_v27  ;;  %v8693_v60 = vsel %vm8688_vm11, %v8679_v17, %v8681_v0 }
 0x311   : > { %v8692_v1 = vsel %vm8688_vm11, %v8677_v56, %v8679_v17  ;;  %v8691_v13 = vsel %vm8688_vm11, %v8675_v59, %v8677_v56 }
 0x312   : > { %10570 = vmatprep.subr.msk.mxu1 %vm618_vm3, %v8692_v1 }
 0x313   : > { %v8685_v42 = vpop.permute.xlu0 %8684  ;;  %10565 = vmatmul.mubr.msk.f32.vlgmr.msra.gmra.mrb[10].mxu1 %vm298_vm1, %v10553_v57 }
 0x314   : > { %10571 = vmatpush1.msk.msra.mxu1 %vm618_vm3, %v8691_v13  ;;  %v8671_v3 = vpop.permute.xlu1 %8670  ;;  %8851 = vmatprep.mubr.f32.mxu1 %v13020_v27 }
 0x315   : > { %v8689_v21 = vsel %vm8688_vm11, %v8671_v3, %v8673_v37 }
 0x316   : > { %10568 = vmatpush1.msk.msra.mxu0 %vm618_vm3, %v8689_v21 }
 0x317   : > { %v9027_v50 = vpop.permute.xlu0 %9026  ;;  %10569 = vmatmul.mubr.msk.f32.vlgmr.msra.gmra.mrb[8].mxu0 %vm298_vm1, %v10566_v43  ;;  %10572 = vmatmul.mubr.msk.f32.vlgmr.msra.gmra.mrb[8].mxu1 %vm298_vm1, %v10566_v43 }
 0x318   : > { %v8683_v41 = vpop.permute.xlu1 %8682  ;;  %8922 = vmatprep.mubr.f32.mxu0 %v13020_v27  ;;  %8993 = vmatprep.mubr.f32.mxu1 %v13020_v27 }
 0x319   : > { %v8694_v36 = vsel %vm8688_vm11, %v8681_v0, %v8683_v41  ;;  %v8695_v30 = vsel %vm8688_vm11, %v8683_v41, %v8685_v42  ;;  %v13082_v41 = vld [vmem:[#allocation3_spill] sm:$0xff] }
 0x31a   : > { %10573 = vmatprep.subr.msk.mxu0 %vm618_vm3, %v8694_v36  ;;  %v13083_v36 = vsub.s32 0, %v13082_v41 }
 0x31b   : > { %10574 = vmatpush1.msk.msra.mxu0 %vm618_vm3, %v8693_v60  ;;  %v9031_v8 = vpop.permute.xlu0 %9030 }
 0x31c   : > { %v8687_v38 = vpop.permute.xlu1 %8686  ;;  %10575 = vmatmul.mubr.msk.f32.vlgmr.msra.gmra.mrb[10].mxu0 %vm298_vm1, %v10566_v43 }
 0x31d   : > { %v8696_v29 = vsel %vm8688_vm11, %v8685_v42, %v8687_v38  ;;  %9134 = vmatprep.mubr.f32.mxu0 %v13020_v27  ;;  %v13084_v38 = vsub.s32 1, %v13082_v41 }
 0x31e   : > { %10576 = vmatprep.subr.msk.mxu1 %vm618_vm3, %v8696_v29 }
 0x31f   : > { %10577 = vmatpush1.msk.msra.mxu1 %vm618_vm3, %v8695_v30  ;;  %v9025_v16 = vpop.permute.xlu0 %9024 }
 0x320   : > { %v9043_v10 = vsel %vm9042_vm12, %v9025_v16, %v9027_v50  ;;  %v9029_v53 = vpop.permute.xlu1 %9028  ;;  %10578 = vmatmul.mubr.msk.f32.vlgmr.msra.gmra.mrb[10].mxu1 %vm298_vm1, %v10566_v43 }
 0x321   : > { %v9044_v47 = vsel %vm9042_vm12, %v9027_v50, %v9029_v53  ;;  %9205 = vmatprep.mubr.f32.mxu1 %v13020_v27  ;;  %v9045_v25 = vsel %vm9042_vm12, %v9029_v53, %v9031_v8 }
 0x322   : > { %10580 = vmatprep.subr.msk.mxu0 %vm618_vm3, %v9044_v47 }
 0x323   : > { %10581 = vmatpush1.msk.msra.mxu0 %vm618_vm3, %v9043_v10  ;;  %v9037_v44 = vpop.permute.xlu0 %9036 }
 0x324   : > { %v9033_v39 = vpop.permute.xlu1 %9032  ;;  %10582 = vmatmul.mubr.msk.f32.vlgmr.msra.gmra.mrb[8].mxu0 %vm298_vm1, %v10579_v14 }
 0x325   : > { %v9046_v34 = vsel %vm9042_vm12, %v9031_v8, %v9033_v39  ;;  %9276 = vmatprep.mubr.f32.mxu0 %v13020_v27 }
 0x326   : > { %10583 = vmatprep.subr.msk.mxu1 %vm618_vm3, %v9046_v34 }
 0x327   : > { %10584 = vmatpush1.msk.msra.mxu1 %vm618_vm3, %v9045_v25  ;;  %v9041_v33 = vpop.permute.xlu0 %9040 }
 0x328   : > { %v9035_v54 = vpop.permute.xlu1 %9034  ;;  %10585 = vmatmul.mubr.msk.f32.vlgmr.msra.gmra.mrb[8].mxu1 %vm298_vm1, %v10579_v14 }
 0x329   : > { %v9047_v32 = vsel %vm9042_vm12, %v9033_v39, %v9035_v54  ;;  %v9048_v2 = vsel %vm9042_vm12, %v9035_v54, %v9037_v44  ;;  %9347 = vmatprep.mubr.f32.mxu1 %v13020_v27 }
 0x32a   : > { %10586 = vmatprep.subr.msk.mxu0 %vm618_vm3, %v9048_v2 }
 0x32b   : > { %10587 = vmatpush1.msk.msra.mxu0 %vm618_vm3, %v9047_v32  ;;  %v9383_v63 = vpop.permute.xlu0 %9382 }
 0x32c   : > { %v9039_v55 = vpop.permute.xlu1 %9038  ;;  %10588 = vmatmul.mubr.msk.f32.vlgmr.msra.gmra.mrb[10].mxu0 %vm298_vm1, %v10579_v14 }
 0x32d   : > { %v9049_v7 = vsel %vm9042_vm12, %v9037_v44, %v9039_v55  ;;  %v9050_v12 = vsel %vm9042_vm12, %v9039_v55, %v9041_v33  ;;  %9488 = vmatprep.mubr.f32.mxu0 %v13020_v27  ;;  %v13086_v33 = vsub.s32 3, %v13082_v41 }
 0x32e   : > { %10589 = vmatprep.subr.msk.mxu1 %vm618_vm3, %v9050_v12 }
 0x32f   : > { %10590 = vmatpush1.msk.msra.mxu1 %vm618_vm3, %v9049_v7  ;;  %v9387_v40 = vpop.permute.xlu0 %9386 }
 0x330   : > { %v9381_v15 = vpop.permute.xlu1 %9380  ;;  %10591 = vmatmul.mubr.msk.f32.vlgmr.msra.gmra.mrb[10].mxu1 %vm298_vm1, %v10579_v14  ;;  %v13085_v14 = vsub.s32 2, %v13082_v41 }
 0x331   : > { %v9398_v28 = vsel %vm9396_vm13, %v9381_v15, %v9383_v63  ;;  %9559 = vmatprep.mubr.f32.mxu1 %v13020_v27 }
 0x332   : > { %10593 = vmatprep.subr.msk.mxu0 %vm618_vm3, %v9398_v28 }
 0x333   : > { %v9389_v24 = vpop.permute.xlu0 %9388 }
 0x334   : > { %v9385_v19 = vpop.permute.xlu1 %9384  ;;  %v9401_v6 = vsel %vm9396_vm13, %v9387_v40, %v9389_v24 }
 0x335   : > { %v9399_v22 = vsel %vm9396_vm13, %v9383_v63, %v9385_v19  ;;  %v9400_v4 = vsel %vm9396_vm13, %v9385_v19, %v9387_v40  ;;  %v13087_v40 = vsub.s32 4, %v13082_v41 }
 0x336   : > { %10596 = vmatprep.subr.msk.mxu1 %vm618_vm3, %v9400_v4 }
 0x337   : > { %10597 = vmatpush1.msk.msra.mxu1 %vm618_vm3, %v9399_v22  ;;  %v9393_v9 = vpop.permute.xlu0 %9392  ;;  %v13088_v22 = vsub.s32 5, %v13082_v41 }
 0x338   : > { %v9379_v57 = vpop.permute.xlu1 %9378  ;;  %10598 = vmatmul.mubr.msk.f32.vlgmr.msra.gmra.mrb[8].mxu1 %vm298_vm1, %v10592_v49 }
 0x339   : > { %v9397_v5 = vsel %vm9396_vm13, %v9379_v57, %v9381_v15  ;;  %9701 = vmatprep.mubr.f32.mxu1 %v13020_v27 }
 0x33a   : > { %10594 = vmatpush1.msk.msra.mxu0 %vm618_vm3, %v9397_v5 }
 0x33b   : > { %v9735_v35 = vpop.permute.xlu0 %9734  ;;  %10595 = vmatmul.mubr.msk.f32.vlgmr.msra.gmra.mrb[8].mxu0 %vm298_vm1, %v10592_v49 }
 0x33c   : > { %v9391_v58 = vpop.permute.xlu1 %9390  ;;  %9630 = vmatprep.mubr.f32.mxu0 %v13020_v27 }
 0x33d   : > { %v9402_v26 = vsel %vm9396_vm13, %v9389_v24, %v9391_v58  ;;  %v9403_v51 = vsel %vm9396_vm13, %v9391_v58, %v9393_v9 }
 0x33e   : > { %10599 = vmatprep.subr.msk.mxu0 %vm618_vm3, %v9402_v26  ;;  %v13089_v26 = vsub.s32 6, %v13082_v41 }
 0x33f   : > { %10600 = vmatpush1.msk.msra.mxu0 %vm618_vm3, %v9401_v6  ;;  %v9739_v31 = vpop.permute.xlu0 %9738 }
 0x340   : > { %v9395_v62 = vpop.permute.xlu1 %9394  ;;  %10601 = vmatmul.mubr.msk.f32.vlgmr.msra.gmra.mrb[10].mxu0 %vm298_vm1, %v10592_v49 }
 0x341   : > { %v9404_v20 = vsel %vm9396_vm13, %v9393_v9, %v9395_v62  ;;  %9842 = vmatprep.mubr.f32.mxu0 %v13020_v27  ;;  %v13090_v62 = vsub.s32 7, %v13082_v41 }
 0x342   : > { %10602 = vmatprep.subr.msk.mxu1 %vm618_vm3, %v9404_v20 }
 0x343   : > { %10603 = vmatpush1.msk.msra.mxu1 %vm618_vm3, %v9403_v51  ;;  %v9733_v46 = vpop.permute.xlu0 %9732  ;;  %v13091_v51 = vld [vmem:[#allocation4_spill] sm:$0xff] }
 0x344   : > { %v9751_v23 = vsel %vm9750_vm14, %v9733_v46, %v9735_v35  ;;  %v9737_v59 = vpop.permute.xlu1 %9736  ;;  %10604 = vmatmul.mubr.msk.f32.vlgmr.msra.gmra.mrb[10].mxu1 %vm298_vm1, %v10592_v49 }
 0x345   : > { %v9752_v48 = vsel %vm9750_vm14, %v9735_v35, %v9737_v59  ;;  %9913 = vmatprep.mubr.f32.mxu1 %v13020_v27  ;;  %v9753_v45 = vsel %vm9750_vm14, %v9737_v59, %v9739_v31 }
 0x346   : > { %10606 = vmatprep.subr.msk.mxu0 %vm618_vm3, %v9752_v48 }
 0x347   : > { %10607 = vmatpush1.msk.msra.mxu0 %vm618_vm3, %v9751_v23  ;;  %v9745_v37 = vpop.permute.xlu0 %9744 }
 0x348   : > { %10608 = vmatmul.mubr.msk.f32.vlgmr.msra.gmra.mrb[8].mxu0 %vm298_vm1, %v10605_v61  ;;  %v9741_v11 = vpop.permute.xlu1 %9740 }
 0x349   : > { %v9754_v17 = vsel %vm9750_vm14, %v9739_v31, %v9741_v11  ;;  %9984 = vmatprep.mubr.f32.mxu0 %v13020_v27 }
 0x34a   : > { %10609 = vmatprep.subr.msk.mxu1 %vm618_vm3, %v9754_v17 }
 0x34b   : > { %10610 = vmatpush1.msk.msra.mxu1 %vm618_vm3, %v9753_v45  ;;  %v9749_v56 = vpop.permute.xlu0 %9748 }
 0x34c   : > { %10611 = vmatmul.mubr.msk.f32.vlgmr.msra.gmra.mrb[8].mxu1 %vm298_vm1, %v10605_v61  ;;  %v9743_v52 = vpop.permute.xlu1 %9742 }
 0x34d   : > { %v9755_v18 = vsel %vm9750_vm14, %v9741_v11, %v9743_v52  ;;  %v9756_v0 = vsel %vm9750_vm14, %v9743_v52, %v9745_v37  ;;  %10055 = vmatprep.mubr.f32.mxu1 %v13020_v27  ;;  %v10092_v27 = vld [vmem:[%s12937_s0] sm:$0xff] }
 0x34e   : > { %10612 = vmatprep.subr.msk.mxu0 %vm618_vm3, %v9756_v0  ;;  %v10097_v60 = vrot.slane %v10092_v27, %v13083_v36  ;;  %v10101_v29 = vrot.slane %v10092_v27, %v13084_v38  ;;  %v10105_v44 = vrot.slane %v10092_v27, %v13085_v14  ;;  %v10109_v54 = vrot.slane %v10092_v27, %v13086_v33 }
 0x34f   : > { %10613 = vmatpush1.msk.msra.mxu0 %vm618_vm3, %v9755_v18  ;;  %v10113_v15 = vrot.slane %v10092_v27, %v13087_v40  ;;  %v10117_v4 = vrot.slane %v10092_v27, %v13088_v22  ;;  %v10121_v6 = vrot.slane %v10092_v27, %v13089_v26  ;;  %v10125_v20 = vrot.slane %v10092_v27, %v13090_v62 }
 0x350   : > { %10614 = vmatmul.mubr.msk.f32.vlgmr.msra.gmra.mrb[10].mxu0 %vm298_vm1, %v10605_v61  ;;  %v9747_v1 = vpop.permute.xlu1 %9746 }
 0x351   : > { %v9757_v13 = vsel %vm9750_vm14, %v9745_v37, %v9747_v1  ;;  %v9758_v42 = vsel %vm9750_vm14, %v9747_v1, %v9749_v56 }
 0x352   : > { %10615 = vmatprep.subr.msk.mxu1 %vm618_vm3, %v9758_v42 }
 0x353   : > { %10616 = vmatpush1.msk.msra.mxu1 %vm618_vm3, %v9757_v13 }
 0x354   : > { %10617 = vmatmul.mubr.msk.f32.vlgmr.msra.gmra.mrb[10].mxu1 %vm298_vm1, %v10605_v61 }
 0x361   : > { %v10074_v3 = vpop.permute.xlu1 %10073 }
 0x41b   : > { %v9844_v43 = vpop.f32.mrb[8].mxu0 }
 0x41c   : > { %v9846_v21 = vpop.f32.mrb[9].mxu0  ;;  %v10076_v50 = vadd.f32 %v10074_v3, %v9844_v43 }
 0x41d   : > { %v10077_v8 = vadd.f32 %v10074_v3, %v9846_v21 }
 0x41e   : > { %v10084_v30 = vmax.f32 %v10076_v50, 0.0 }
 0x41f   : > { %v10085_v16 = vmax.f32 %v10077_v8, 0.0  ;;  %v9915_v10 = vpop.f32.mrb[8].mxu1 }
 0x420   : > { %v10134_v53 = vmul.f32 %v10097_v60, %v10084_v30  ;;  %v10078_v47 = vadd.f32 %v10074_v3, %v9915_v10  ;;  %v9917_v39 = vpop.f32.mrb[9].mxu1 }
 0x421   : > { %v10135_v34 = vmul.f32 %v10101_v29, %v10085_v16  ;;  %v10079_v25 = vadd.f32 %v10074_v3, %v9917_v39 }
 0x422   : > { %v10086_v32 = vmax.f32 %v10078_v47, 0.0 }
 0x423   : > { %v10618_v2 = vpack.c.bf16 %v10135_v34, %v10134_v53  ;;  %v10087_v63 = vmax.f32 %v10079_v25, 0.0  ;;  %v9986_v55 = vpop.f32.mrb[10].mxu0 }
 0x424   : > { %v10136_v7 = vmul.f32 %v10105_v44, %v10086_v32  ;;  %v10080_v12 = vadd.f32 %v10074_v3, %v9986_v55  ;;  %v9988_v28 = vpop.f32.mrb[11].mxu0 }
 0x425   : > { %v10137_v24 = vmul.f32 %v10109_v54, %v10087_v63  ;;  %v10081_v19 = vadd.f32 %v10074_v3, %v9988_v28  ;;  %v10166_v46 = vrot.slane %v10618_v2, %v13091_v51 }
 0x426   : > { %v10088_v9 = vmax.f32 %v10080_v12, 0.0 }
 0x427   : > { %v10619_v49 = vpack.c.bf16 %v10137_v24, %v10136_v7  ;;  %v10089_v57 = vmax.f32 %v10081_v19, 0.0  ;;  %v10057_v5 = vpop.f32.mrb[10].mxu1 }
 0x428   : > { %v10138_v35 = vmul.f32 %v10113_v15, %v10088_v9  ;;  %v10082_v58 = vadd.f32 %v10074_v3, %v10057_v5  ;;  %v10059_v31 = vpop.f32.mrb[11].mxu1 }
 0x429   : > { %v10173_v23 = vrot.slane %v10619_v49, %v13091_v51  ;;  %v10139_v59 = vmul.f32 %v10117_v4, %v10089_v57  ;;  %v10083_v48 = vadd.f32 %v10074_v3, %v10059_v31 }
 0x42a   : > { %v10090_v61 = vmax.f32 %v10082_v58, 0.0 }
 0x42b   : > { %v10174_v11 = vcombine.low %v10166_v46, %v10173_v23  ;;  %v10620_v17 = vpack.c.bf16 %v10139_v59, %v10138_v35  ;;  %v10091_v45 = vmax.f32 %v10083_v48, 0.0 }
 0x42c   : > { %v10140_v37 = vmul.f32 %v10121_v6, %v10090_v61 }
 0x42d   : > { %10194 = vst [vmem:[%s251_s11] sm:$0xff] %v10174_v11  ;;  %v10141_v52 = vmul.f32 %v10125_v20, %v10091_v45  ;;  %v10183_v0 = vrot.slane %v10620_v17, %v13091_v51 }
 0x42f   : > { %v10621_v18 = vpack.c.bf16 %v10141_v52, %v10140_v37 }
 0x431   : > { %v10190_v56 = vrot.slane %v10621_v18, %v13091_v51 }
 0x433   : > { %v10191_v1 = vcombine.low %v10183_v0, %v10190_v56 }
 0x435   : > { %10195 = vst [vmem:[%s251_s11 + $0x8] sm:$0xff] %v10191_v1 }
 0x436 PF: > { %s16_s21 = sadd.s32 1, %s10897_s21  }
 0x437   : > { %p13_p4 = scmp.ge.s32.totalorder %s16_s21, 4  }
 0x439   :  { %15 = sbr.rel (!%p13_p4) target bundleno = 1 (0x1), region = 100 }

// kernel: dense_unit_forward.4
= control target key start
LH: loop header
LB: loop body
LE: loop exit
PB: predicated region body
PF: predicated region fallthrough
CT: control target
= control target key end

     0   :  { %s11310_s27 = smov 0   ;;  %s13348_s0 = inlined_call_operand.vmem [shape: f32[1,1024], index: 0, kind: input, shape index: {}]   ;;  %s13349_s1 = inlined_call_operand.vmem [shape: bf16[2,4,1024], index: 1, kind: input, shape index: {}]   ;;  %s13350_s2 = inlined_call_operand.vmem [shape: bf16[2,4,1024], index: 2, kind: input, shape index: {}]   ;;  %s13351_s3 = inlined_call_operand.vmem [shape: bf16[4,4], index: 3, kind: input, shape index: {}]   ;;  %s13352_s4 = inlined_call_operand.vmem [shape: bf16[4,4], index: 4, kind: input, shape index: {}]   ;;  %s13353_s5 = inlined_call_operand.vmem [shape: f32[4,1], index: 5, kind: input, shape index: {}]   ;;  %s13354_s6 = inlined_call_operand.vmem [shape: f32[27,4,4], index: 6, kind: input, shape index: {}]   ;;  %s13355_s7 = inlined_call_operand.vmem [shape: f32[4,1], index: 7, kind: input, shape index: {}]   ;;  %s13356_s8 = inlined_call_operand.vmem [shape: bf16[2,4,1024], index: 8, kind: output, shape index: {}]  }
   0x1 LB: > { %s10575_s28 = sadd.s32 4294967295, %s11234_s27   ;;  %p10579_p0 = scmp.ge.s32.totalorder %s11234_s27, 1  ;;  %s11234_s27 = sphi %s11310_s27, %s18_s27  }
   0x2   : > { %p272_p1 = scmp.lt.s32.totalorder %s11234_s27, 3 }
   0x4   : > { %p273_p2 = pnand %p10579_p0, %p272_p1 }
   0x6   : > { %276 = sbr.rel (%p273_p2) target bundleno = 1093 (0x445), region = 52 }
   0xd   : > { %p311_p3 = scmp.lt.s32.totalorder %s10575_s28, 1  ;;  %v339_v0 = vlaneseq  ;;  %v11236_v1 = vmov 1983009808   ;;  %v11237_v3 = vmov 0   ;;  %v789_v5 = vld [vmem:[%s13353_s5] sm:$0xf] }
   0xe   : > { %v337_v2 = vunpack.c.l.s4 %v11236_v1  ;;  %430 = vmatprep.mubr.bf16.mxu0 %v11237_v3  ;;  %471 = vmatprep.mubr.bf16.mxu1 %v11237_v3  ;;  %vm373_vm0 = vcmask 1041408   ;;  %v330_v25 = vld [vmem:[%s13352_s4] sm:$0x3]  ;;  %vm369_vm1 = vcmask 31744   ;;  %v13365_v42 = vmov 0.0   ;;  %s11239_s20 = smov 119  }
   0xf   : > { %s13529_s28 = smov (!%p311_p3, %s10575_s28), 1  ;;  %v11320_v4 = vshrl.u32 %v339_v0, 7  ;;  %11206 = vset.pattern.permute.xlu0 %v11237_v3  ;;  %11207 = vset.pattern.permute.xlu1 %v11237_v3  ;;  %v327_v39 = vld [vmem:[%s13351_s3] sm:$0x3]  ;;  %862 = vst [vmem:[#allocation2 + $0x24] sm:$0xf] %v13365_v42 }
  0x10   : > { %v338_v6 = vunpack.c.0.s8 %v337_v2  ;;  %792 = vperm.xlu0 %11206, %v789_v5   ;;  %s11327_s9 = sshll.u32 %s13529_s28, 4  ;;  %861 = vst [vmem:[#allocation2] sm:$0xf] %v13365_v42  ;;  %s11240_s21 = smov 127   ;;  %v811_v0 = vld [vmem:[%s13348_s0] sm:$0xff]  ;;  %vm918_vm2 = vcmask 900096  }
  0x11   : > { %13409 = vst [vmem:[#allocation3_spill] sm:$0xff] %v11320_v4  ;;  %s315_s12 = scalar_lea.vmem %s13349_s1, %s11327_s9  ;;  %s320_s15 = scalar_lea.vmem %s13350_s2, %s11327_s9  ;;  %v13364_v61 = vsub.s32 0, %v11320_v4  ;;  %v13363_v1 = vsub.s32 1, %v11320_v4  ;;  %v13362_v5 = vsub.s32 2, %v11320_v4  ;;  %vm930_vm3 = vcmask 1043456  }
  0x12   : > { %v11338_v7 = vsub.s32 %v338_v6, %v11320_v4  ;;  %v331_v8 = vld [vmem:[%s320_s15] sm:$0xff]  ;;  %v332_v9 = vld [vmem:[%s320_s15 + $0x8] sm:$0xff]  ;;  %s11241_s24 = smov 111   ;;  %s11242_s25 = smov 110   ;;  %vm1249_vm4 = vcmask 908288   ;;  %vm1595_vm5 = vcmask 891904  }
  0x13   : > { %v328_v10 = vld [vmem:[%s315_s12] sm:$0xff]  ;;  %v352_v12 = vcombine.high %v332_v9, %v332_v9  ;;  %v335_v14 = vcombine.high %v331_v8, %v331_v8  ;;  %v329_v27 = vld [vmem:[%s315_s12 + $0x8] sm:$0xff]  ;;  %s11243_s26 = smov 101   ;;  %s11244_s28 = smov 109   ;;  %vm1949_vm6 = vcmask 826368   ;;  %vm2303_vm7 = vcmask 818176  }
  0x14   : > { %13410 = vst [vmem:[#allocation4_spill] sm:$0xff] %v11338_v7  ;;  %v342_v11 = vrot.slane %v331_v8, %v11338_v7  ;;  %v359_v13 = vrot.slane %v332_v9, %v11338_v7  ;;  %v571_v15 = vrot.slane %v328_v10, %v11338_v7  ;;  %v564_v16 = vcombine.high %v328_v10, %v328_v10  ;;  %s11245_s29 = smov 99   ;;  %s11246_s30 = smov 100  }
  0x15   : > { %v349_v19 = vrot.slane %v335_v14, %v11338_v7  ;;  %v366_v21 = vrot.slane %v352_v12, %v11338_v7  ;;  %v581_v32 = vcombine.high %v329_v27, %v329_v27  ;;  %v588_v33 = vrot.slane %v329_v27, %v11338_v7  ;;  %s11247_s10 = smov 90   ;;  %s11248_s11 = smov 91  }
  0x16   : > { %v350_v17 = vcombine.high %v342_v11, %v342_v11  ;;  %v375_v18 = vsel %vm373_vm0, %v342_v11, 0  ;;  %v367_v20 = vcombine.high %v359_v13, %v359_v13  ;;  %v578_v24 = vrot.slane %v564_v16, %v11338_v7  ;;  %v6138_v43 = vld [vmem:[#allocation2 + $0x24] sm:$0xf]  ;;  %s11249_s12 = smov 11   ;;  %s11250_s13 = smov 89  }
  0x17   : > { %v351_v22 = vcombine.high %v349_v19, %v349_v19  ;;  %v381_v23 = vsel %vm373_vm0, %v349_v19, 0  ;;  %v368_v26 = vcombine.high %v366_v21, %v366_v21  ;;  %v387_v28 = vsel %vm373_vm0, %v359_v13, 0  ;;  %v5784_v44 = vld [vmem:[#allocation2 + $0x24] sm:$0xf]  ;;  %6166 = vrot.lane.b32.xlu1 %v6138_v43, %s11239_s20  ;;  %s11251_s14 = smov 9   ;;  %s11252_s15 = smov 10  }
  0x18   : > { %10586 = vmatprep.subr.msk.bf16.mxu0 %vm373_vm0, %v350_v17  ;;  %v579_v29 = vcombine.high %v571_v15, %v571_v15  ;;  %v393_v30 = vsel %vm373_vm0, %v366_v21, 0  ;;  %v580_v31 = vcombine.high %v578_v24, %v578_v24  ;;  %v595_v34 = vrot.slane %v581_v32, %v11338_v7  ;;  %5812 = vrot.lane.b32.xlu0 %v5784_v44, %s11240_s21  ;;  %s11253_s16 = smov 1   ;;  %s11254_s17 = smov 118  }
  0x19   : > { %399 = vmatpush1.bf16.msra.mxu0 %v375_v18  ;;  %10588 = vmatprep.subr.msk.bf16.mxu1 %vm373_vm0, %v351_v22  ;;  %v602_v35 = vsel %vm373_vm0, %v571_v15, 0  ;;  %v596_v36 = vcombine.high %v588_v33, %v588_v33  ;;  %v608_v37 = vsel %vm373_vm0, %v578_v24, 0  ;;  %v614_v40 = vsel %vm373_vm0, %v588_v33, 0  ;;  %s11255_s22 = smov 117   ;;  %s11258_s19 = smov 37  }
  0x1a   : > { %10590 = vmatprep.subr.msk.bf16.mxu0 %vm373_vm0, %v367_v20  ;;  %440 = vmatpush1.bf16.msra.mxu1 %v381_v23  ;;  %v597_v38 = vcombine.high %v595_v34, %v595_v34  ;;  %v620_v41 = vsel %vm373_vm0, %v595_v34, 0  ;;  %v13361_v10 = vsub.s32 3, %v11320_v4  ;;  %v816_v15 = vrot.slane %v811_v0, %v13364_v61 }
  0x1b   : > { %10592 = vmatprep.subr.msk.bf16.mxu1 %vm373_vm0, %v368_v26  ;;  %v820_v19 = vrot.slane %v811_v0, %v13363_v1  ;;  %v824_v22 = vrot.slane %v811_v0, %v13362_v5  ;;  %v13359_v32 = vsub.s32 5, %v11320_v4  ;;  %vm2657_vm8 = vcmask 809984  }
  0x1c   : > { %10587 = vmatmul.mubr.msk.bf16.vlgmr.msra.gmra.mrb[0].mxu0 %vm369_vm1, %v330_v25  ;;  %v828_v26 = vrot.slane %v811_v0, %v13361_v10  ;;  %vm3011_vm9 = vcmask 744448   ;;  %vm3365_vm10 = vcmask 736256   ;;  %vm3719_vm11 = vcmask 728064  }
  0x1d   : > { %481 = vmatpush1.bf16.msra.mxu0 %v387_v28  ;;  %512 = vmatprep.mubr.bf16.mxu0 %v11237_v3  ;;  %v13360_v28 = vsub.s32 4, %v11320_v4  ;;  %vm4073_vm12 = vcmask 89088   ;;  %vm4427_vm13 = vcmask 80896   ;;  %vm4781_vm14 = vcmask 72704  }
  0x1e   : > { %10589 = vmatmul.mubr.msk.bf16.vlgmr.msra.gmra.mrb[0].mxu1 %vm369_vm1, %v330_v25  ;;  %10594 = vmatprep.subr.msk.bf16.mxu0 %vm373_vm0, %v579_v29  ;;  %vm5135_vm15 = vcmask 7168  }
  0x1f   : > { %522 = vmatpush1.bf16.msra.mxu1 %v393_v30  ;;  %553 = vmatprep.mubr.bf16.mxu1 %v11237_v3 }
  0x20   : > { %10596 = vmatprep.subr.msk.bf16.mxu1 %vm373_vm0, %v580_v31 }
  0x24   : > { %10591 = vmatmul.mubr.msk.bf16.vlgmr.msra.gmra.mrb[4].mxu0 %vm369_vm1, %v330_v25 }
  0x25   : > { %626 = vmatpush1.bf16.msra.mxu0 %v602_v35  ;;  %657 = vmatprep.mubr.bf16.mxu0 %v11237_v3 }
  0x26   : > { %10593 = vmatmul.mubr.msk.bf16.vlgmr.msra.gmra.mrb[4].mxu1 %vm369_vm1, %v330_v25  ;;  %10598 = vmatprep.subr.msk.bf16.mxu0 %vm373_vm0, %v596_v36 }
  0x27   : > { %667 = vmatpush1.bf16.msra.mxu1 %v608_v37  ;;  %698 = vmatprep.mubr.bf16.mxu1 %v11237_v3  ;;  %v13358_v37 = vsub.s32 6, %v11320_v4 }
  0x28   : > { %10600 = vmatprep.subr.msk.bf16.mxu1 %vm373_vm0, %v597_v38  ;;  %vm5814_vm0 = vcmask 1039360  }
  0x2c   : > { %10595 = vmatmul.mubr.msk.bf16.vlgmr.msra.gmra.mrb[8].mxu0 %vm369_vm1, %v327_v39 }
  0x2d   : > { %708 = vmatpush1.bf16.msra.mxu0 %v614_v40  ;;  %739 = vmatprep.mubr.bf16.mxu0 %v11237_v3 }
  0x2e   : > { %10597 = vmatmul.mubr.msk.bf16.vlgmr.msra.gmra.mrb[8].mxu1 %vm369_vm1, %v327_v39 }
  0x2f   : > { %749 = vmatpush1.bf16.msra.mxu1 %v620_v41  ;;  %780 = vmatprep.mubr.bf16.mxu1 %v11237_v3  ;;  %v13357_v41 = vsub.s32 7, %v11320_v4 }
  0x34   : > { %10599 = vmatmul.mubr.msk.bf16.vlgmr.msra.gmra.mrb[12].mxu0 %vm369_vm1, %v327_v39 }
  0x35   : > { %1011 = vmatprep.mubr.f32.mxu0 %v13365_v42 }
  0x36   : > { %10601 = vmatmul.mubr.msk.bf16.vlgmr.msra.gmra.mrb[12].mxu1 %vm369_vm1, %v327_v39 }
  0x37   : > { %1082 = vmatprep.mubr.f32.mxu1 %v13365_v42 }
  0x8f   : > { %v793_v63 = vpop.permute.xlu0 %792 }
  0xef   : > { %v432_v45 = vpop.f32.mrb[0].mxu0 }
  0xf0   : > { %v434_v46 = vpop.f32.mrb[1].mxu0 }
  0xf1   : > { %v436_v47 = vpop.f32.mrb[2].mxu0  ;;  %v473_v48 = vpop.f32.mrb[0].mxu1 }
  0xf2   : > { %v437_v49 = vpop.f32.mrb[3].mxu0  ;;  %v475_v50 = vpop.f32.mrb[1].mxu1 }
  0xf3   : > { %v477_v51 = vpop.f32.mrb[2].mxu1 }
  0xf4   : > { %v478_v52 = vpop.f32.mrb[3].mxu1 }
  0xf5   : > { %v836_v52 = vrot.slane %v811_v0, %v13359_v32 }
  0xf7   : > { %v514_v53 = vpop.f32.mrb[4].mxu0 }
  0xf8   : > { %v516_v54 = vpop.f32.mrb[5].mxu0 }
  0xf9   : > { %v518_v55 = vpop.f32.mrb[6].mxu0  ;;  %v555_v56 = vpop.f32.mrb[4].mxu1 }
  0xfa   : > { %v519_v57 = vpop.f32.mrb[7].mxu0  ;;  %v557_v58 = vpop.f32.mrb[5].mxu1 }
  0xfb   : > { %v559_v59 = vpop.f32.mrb[6].mxu1 }
  0xfc   : > { %v560_v60 = vpop.f32.mrb[7].mxu1  ;;  %v840_v59 = vrot.slane %v811_v0, %v13358_v37 }
  0xff   : > { %v659_v62 = vpop.f32.mrb[8].mxu0 }
 0x100   : > { %v660_v2 = vadd.f32 %v659_v62, %v432_v45  ;;  %v661_v3 = vpop.f32.mrb[9].mxu0 }
 0x101   : > { %v662_v6 = vadd.f32 %v661_v3, %v434_v46  ;;  %v663_v8 = vpop.f32.mrb[10].mxu0  ;;  %v700_v9 = vpop.f32.mrb[8].mxu1  ;;  %v832_v46 = vrot.slane %v811_v0, %v13360_v28 }
 0x102   : > { %v795_v11 = vadd.f32 %v793_v63, %v660_v2  ;;  %v701_v12 = vadd.f32 %v700_v9, %v473_v48  ;;  %v664_v13 = vpop.f32.mrb[11].mxu0  ;;  %v702_v14 = vpop.f32.mrb[9].mxu1  ;;  %v844_v2 = vrot.slane %v811_v0, %v13357_v41 }
 0x103   : > { %v796_v16 = vadd.f32 %v793_v63, %v662_v6  ;;  %v703_v17 = vadd.f32 %v702_v14, %v475_v50  ;;  %v704_v18 = vpop.f32.mrb[10].mxu1 }
 0x104   : > { %v803_v20 = vmax.f32 %v795_v11, 0.0  ;;  %v797_v21 = vadd.f32 %v793_v63, %v701_v12  ;;  %v705_v23 = vpop.f32.mrb[11].mxu1  ;;  %v11511_v18 = vpop.permute.xlu0 %5812 }
 0x105   : > { %v804_v24 = vmax.f32 %v796_v16, 0.0  ;;  %v798_v25 = vadd.f32 %v793_v63, %v703_v17  ;;  %v11509_v17 = vpop.permute.xlu1 %6166  ;;  %13412 = vst [vmem:[#allocation6_spill] sm:$0xff] %v11511_v18 }
 0x106   : > { %v805_v27 = vmax.f32 %v797_v21, 0.0  ;;  %v853_v29 = vmul.f32 %v816_v15, %v803_v20  ;;  %13411 = vst [vmem:[#allocation5_spill] sm:$0xff] %v11509_v17 }
 0x107   : > { %v806_v30 = vmax.f32 %v798_v25, 0.0  ;;  %v741_v31 = vpop.f32.mrb[12].mxu0  ;;  %v11407_v33 = vmul.f32 %v820_v19, %v804_v24 }
 0x108   : > { %v855_v34 = vmul.f32 %v824_v22, %v805_v27  ;;  %v742_v35 = vadd.f32 %v741_v31, %v514_v53  ;;  %v743_v36 = vpop.f32.mrb[13].mxu0 }
 0x109   : > { %v11410_v38 = vmul.f32 %v828_v26, %v806_v30  ;;  %v744_v39 = vadd.f32 %v743_v36, %v516_v54  ;;  %v782_v40 = vpop.f32.mrb[12].mxu1  ;;  %v11414_v43 = vcombine.low %v853_v29, %v11407_v33  ;;  %v745_v44 = vpop.f32.mrb[14].mxu0  ;;  %v11485_v15 = vcombine.low %v11407_v33, %v11407_v33 }
 0x10a   : > { %v799_v45 = vadd.f32 %v793_v63, %v742_v35  ;;  %v783_v47 = vadd.f32 %v782_v40, %v555_v56  ;;  %v784_v48 = vpop.f32.mrb[13].mxu1  ;;  %v746_v49 = vpop.f32.mrb[15].mxu0 }
 0x10b   : > { %v11419_v50 = vcombine.low %v855_v34, %v11410_v38  ;;  %v800_v51 = vadd.f32 %v793_v63, %v744_v39  ;;  %v785_v53 = vadd.f32 %v784_v48, %v557_v58  ;;  %879 = vst [vmem:[#allocation2 + $0x4] sm:$0xff] %v11414_v43  ;;  %v786_v54 = vpop.f32.mrb[14].mxu1  ;;  %v11517_v19 = vcombine.low %v11410_v38, %v11410_v38 }
 0x10c   : > { %v807_v55 = vmax.f32 %v799_v45, 0.0  ;;  %v801_v57 = vadd.f32 %v793_v63, %v783_v47  ;;  %v787_v60 = vpop.f32.mrb[15].mxu1 }
 0x10d   : > { %880 = vst [vmem:[#allocation2 + $0xc] sm:$0xff] %v11419_v50  ;;  %v808_v56 = vmax.f32 %v800_v51, 0.0  ;;  %v802_v62 = vadd.f32 %v793_v63, %v785_v53 }
 0x10e   : > { %v857_v3 = vmul.f32 %v832_v46, %v807_v55  ;;  %v809_v6 = vmax.f32 %v801_v57, 0.0  ;;  %v11574_v46 = vld [vmem:[%s13354_s6 + $0x4] sm:$0xf] }
 0x10f   : > { %v11429_v8 = vmul.f32 %v836_v52, %v808_v56  ;;  %v810_v58 = vmax.f32 %v802_v62, 0.0 }
 0x110   : > { %v859_v9 = vmul.f32 %v840_v59, %v809_v6 }
 0x111   : > { %v11432_v11 = vcombine.low %v857_v3, %v11429_v8  ;;  %v11434_v12 = vmul.f32 %v844_v2, %v810_v58 }
 0x112   : > { %v883_v13 = vld [vmem:[#allocation2] sm:$0xff] }
 0x113   : > { %881 = vst [vmem:[#allocation2 + $0x14] sm:$0xff] %v11432_v11  ;;  %v11438_v14 = vcombine.low %v859_v9, %v11434_v12  ;;  %1231 = vrot.lane.b32.xlu0 %v883_v13, %s11241_s24  ;;  %900 = vrot.lane.b32.xlu1 %v883_v13, %s11242_s25  ;;  %v1927_v63 = vcombine.high %v883_v13, %v883_v13 }
 0x114   : > { %v884_v0 = vld [vmem:[#allocation2 + $0x8] sm:$0xff] }
 0x115   : > { %882 = vst [vmem:[#allocation2 + $0x1c] sm:$0xff] %v11438_v14  ;;  %v1574_v16 = vcombine.high %v884_v0, %v884_v0 }
 0x117   : > { %1931 = vrot.lane.b32.xlu0 %v883_v13, %s11243_s26  ;;  %1577 = vrot.lane.b32.xlu1 %v883_v13, %s11244_s28 }
 0x11a   : > { %v885_v24 = vld [vmem:[#allocation2 + $0x10] sm:$0xff] }
 0x11b   : > { %2639 = vrot.lane.b32.xlu0 %v883_v13, %s11245_s29  ;;  %2285 = vrot.lane.b32.xlu1 %v883_v13, %s11246_s30  ;;  %v11582_v48 = vcombine.high %v885_v24, %v885_v24 }
 0x11c   : > { %v11599_v54 = vld [vmem:[#allocation2 + $0x18] sm:$0xff]  ;;  %v887_v59 = vld [vmem:[#allocation2 + $0x20] sm:$0xf] }
 0x11d   : > { %v1919_v58 = vld [vmem:[#allocation2 + $0x20] sm:$0xf] }
 0x11e   : > { %v1565_v9 = vld [vmem:[#allocation2 + $0x20] sm:$0xf] }
 0x11f   : > { %3347 = vrot.lane.b32.xlu0 %v883_v13, %s11247_s10  ;;  %2993 = vrot.lane.b32.xlu1 %v883_v13, %s11248_s11  ;;  %v3335_v41 = vld [vmem:[#allocation2 + $0x20] sm:$0xf] }
 0x120   : > { %v2981_v37 = vld [vmem:[#allocation2 + $0x20] sm:$0xf] }
 0x121   : > { %v4043_v1 = vld [vmem:[#allocation2 + $0x20] sm:$0xf] }
 0x122   : > { %v3689_v61 = vld [vmem:[#allocation2 + $0x20] sm:$0xf] }
 0x123   : > { %4055 = vrot.lane.b32.xlu0 %v883_v13, %s11249_s12  ;;  %3701 = vrot.lane.b32.xlu1 %v883_v13, %s11250_s13  ;;  %v4751_v18 = vld [vmem:[#allocation2 + $0x20] sm:$0xf] }
 0x127   : > { %4763 = vrot.lane.b32.xlu0 %v883_v13, %s11251_s14  ;;  %4409 = vrot.lane.b32.xlu1 %v883_v13, %s11252_s15 }
 0x12b   : > { %5796 = vrot.lane.b32.xlu0 %v11414_v43, %s11240_s21  ;;  %5117 = vrot.lane.b32.xlu1 %v883_v13, %s11253_s16 }
 0x12f   : > { %6150 = vrot.lane.b32.xlu1 %v11414_v43, %s11239_s20  ;;  %902 = vrot.lane.b32.xlu0 %v1927_v63, %s11242_s25 }
 0x133   : > { %1233 = vrot.lane.b32.xlu0 %v1927_v63, %s11241_s24  ;;  %904 = vrot.lane.b32.xlu1 %v884_v0, %s11242_s25 }
 0x137   : > { %1581 = vrot.lane.b32.xlu0 %v884_v0, %s11244_s28  ;;  %1235 = vrot.lane.b32.xlu1 %v884_v0, %s11241_s24 }
 0x13b   : > { %1933 = vrot.lane.b32.xlu0 %v1927_v63, %s11243_s26  ;;  %1579 = vrot.lane.b32.xlu1 %v1927_v63, %s11244_s28 }
 0x13f   : > { %2289 = vrot.lane.b32.xlu0 %v884_v0, %s11246_s30  ;;  %1935 = vrot.lane.b32.xlu1 %v884_v0, %s11243_s26 }
 0x143   : > { %2641 = vrot.lane.b32.xlu0 %v1927_v63, %s11245_s29  ;;  %2287 = vrot.lane.b32.xlu1 %v1927_v63, %s11246_s30 }
 0x147   : > { %2997 = vrot.lane.b32.xlu0 %v884_v0, %s11248_s11  ;;  %2643 = vrot.lane.b32.xlu1 %v884_v0, %s11245_s29 }
 0x14b   : > { %3349 = vrot.lane.b32.xlu0 %v1927_v63, %s11247_s10  ;;  %2995 = vrot.lane.b32.xlu1 %v1927_v63, %s11248_s11 }
 0x14f   : > { %3705 = vrot.lane.b32.xlu0 %v884_v0, %s11250_s13  ;;  %3351 = vrot.lane.b32.xlu1 %v884_v0, %s11247_s10 }
 0x153   : > { %4057 = vrot.lane.b32.xlu0 %v1927_v63, %s11249_s12  ;;  %3703 = vrot.lane.b32.xlu1 %v1927_v63, %s11250_s13 }
 0x157   : > { %4413 = vrot.lane.b32.xlu0 %v884_v0, %s11252_s15  ;;  %4059 = vrot.lane.b32.xlu1 %v884_v0, %s11249_s12 }
 0x15b   : > { %4765 = vrot.lane.b32.xlu0 %v1927_v63, %s11251_s14  ;;  %4411 = vrot.lane.b32.xlu1 %v1927_v63, %s11252_s15 }
 0x15f   : > { %5121 = vrot.lane.b32.xlu0 %v884_v0, %s11253_s16  ;;  %4767 = vrot.lane.b32.xlu1 %v884_v0, %s11251_s14 }
 0x163   : > { %5798 = vrot.lane.b32.xlu0 %v11485_v15, %s11240_s21  ;;  %5119 = vrot.lane.b32.xlu1 %v1927_v63, %s11253_s16 }
 0x167   : > { %6154 = vrot.lane.b32.xlu0 %v11419_v50, %s11239_s20  ;;  %5800 = vrot.lane.b32.xlu1 %v11419_v50, %s11240_s21 }
 0x16b   : > { %6506 = vrot.lane.b32.xlu0 %v11485_v15, %s11254_s17  ;;  %6152 = vrot.lane.b32.xlu1 %v11485_v15, %s11239_s20 }
 0x16f   : > { %6508 = vrot.lane.b32.xlu1 %v11419_v50, %s11254_s17  ;;  %1237 = vrot.lane.b32.xlu0 %v1574_v16, %s11241_s24 }
 0x173   : > { %1937 = vrot.lane.b32.xlu0 %v1574_v16, %s11243_s26  ;;  %906 = vrot.lane.b32.xlu1 %v1574_v16, %s11242_s25 }
 0x177   : > { %2645 = vrot.lane.b32.xlu0 %v1574_v16, %s11245_s29  ;;  %1583 = vrot.lane.b32.xlu1 %v1574_v16, %s11244_s28 }
 0x17b   : > { %3353 = vrot.lane.b32.xlu0 %v1574_v16, %s11247_s10  ;;  %2291 = vrot.lane.b32.xlu1 %v1574_v16, %s11246_s30 }
 0x17f   : > { %4061 = vrot.lane.b32.xlu0 %v1574_v16, %s11249_s12  ;;  %2999 = vrot.lane.b32.xlu1 %v1574_v16, %s11248_s11 }
 0x183   : > { %4769 = vrot.lane.b32.xlu0 %v1574_v16, %s11251_s14  ;;  %3707 = vrot.lane.b32.xlu1 %v1574_v16, %s11250_s13 }
 0x185   : > { %v11519_v20 = vpop.permute.xlu0 %1231  ;;  %v901_v21 = vpop.permute.xlu1 %900 }
 0x187   : > { %5802 = vrot.lane.b32.xlu0 %v11517_v19, %s11240_s21  ;;  %4415 = vrot.lane.b32.xlu1 %v1574_v16, %s11252_s15 }
 0x189   : > { %v11524_v22 = vpop.permute.xlu0 %1931  ;;  %v11526_v23 = vpop.permute.xlu1 %1577 }
 0x18b   : > { %908 = vrot.lane.b32.xlu0 %v885_v24, %s11242_s25  ;;  %5123 = vrot.lane.b32.xlu1 %v1574_v16, %s11253_s16 }
 0x18d   : > { %v11530_v25 = vpop.permute.xlu0 %2639  ;;  %v11532_v26 = vpop.permute.xlu1 %2285 }
 0x18f   : > { %1585 = vrot.lane.b32.xlu0 %v885_v24, %s11244_s28  ;;  %6156 = vrot.lane.b32.xlu1 %v11517_v19, %s11239_s20 }
 0x191   : > { %v11537_v27 = vpop.permute.xlu0 %3347  ;;  %v11539_v29 = vpop.permute.xlu1 %2993 }
 0x193   : > { %2293 = vrot.lane.b32.xlu0 %v885_v24, %s11246_s30  ;;  %1239 = vrot.lane.b32.xlu1 %v885_v24, %s11241_s24 }
 0x195   : > { %v11543_v30 = vpop.permute.xlu0 %4055  ;;  %v11545_v31 = vpop.permute.xlu1 %3701 }
 0x197   : > { %3001 = vrot.lane.b32.xlu0 %v885_v24, %s11248_s11  ;;  %1939 = vrot.lane.b32.xlu1 %v885_v24, %s11243_s26 }
 0x199   : > { %v11549_v33 = vpop.permute.xlu0 %4763  ;;  %v11551_v34 = vpop.permute.xlu1 %4409 }
 0x19b   : > { %3709 = vrot.lane.b32.xlu0 %v885_v24, %s11250_s13  ;;  %2647 = vrot.lane.b32.xlu1 %v885_v24, %s11245_s29 }
 0x19d   : > { %v11555_v35 = vpop.permute.xlu0 %5796  ;;  %v11557_v36 = vpop.permute.xlu1 %5117 }
 0x19e   : > { %13413 = vst [vmem:[#allocation7_spill] sm:$0xff] %v11555_v35  ;;  %13414 = vst [vmem:[#allocation8_spill] sm:$0xff] %v11557_v36 }
 0x19f   : > { %4417 = vrot.lane.b32.xlu0 %v885_v24, %s11252_s15  ;;  %3355 = vrot.lane.b32.xlu1 %v885_v24, %s11247_s10 }
 0x1a1   : > { %v11561_v38 = vpop.permute.xlu1 %6150  ;;  %v903_v39 = vpop.permute.xlu0 %902 }
 0x1a2   : > { %13415 = vst [vmem:[#allocation9_spill] sm:$0xff] %v11561_v38  ;;  %v919_v47 = vsel %vm918_vm2, %v901_v21, %v903_v39 }
 0x1a3   : > { %5125 = vrot.lane.b32.xlu0 %v885_v24, %s11253_s16  ;;  %4063 = vrot.lane.b32.xlu1 %v885_v24, %s11249_s12 }
 0x1a5   : > { %v11565_v40 = vpop.permute.xlu0 %1233  ;;  %v11567_v44 = vpop.permute.xlu1 %904 }
 0x1a6   : > { %v920_v45 = vsel %vm918_vm2, %v903_v39, %v11567_v44  ;;  %v2627_v39 = vld [vmem:[#allocation2 + $0x20] sm:$0xf] }
 0x1a7   : > { %10603 = vmatprep.subr.msk.mxu0 %vm930_vm3, %v920_v45  ;;  %6158 = vrot.lane.b32.xlu0 %v11432_v11, %s11239_s20  ;;  %v2273_v45 = vld [vmem:[#allocation2 + $0x20] sm:$0xf] }
 0x1a8   : > { %4771 = vrot.lane.b32.xlu1 %v885_v24, %s11251_s14  ;;  %10604 = vmatpush1.msk.msra.mxu0 %vm930_vm3, %v919_v47 }
 0x1a9   : > { %v11584_v49 = vpop.permute.xlu0 %1581  ;;  %v11586_v51 = vpop.permute.xlu1 %1235  ;;  %10605 = vmatmul.mubr.msk.f32.vlgmr.msra.gmra.mrb[16].mxu0 %vm369_vm1, %v11574_v46 }
 0x1aa   : > { %1153 = vmatprep.mubr.f32.mxu0 %v13365_v42 }
 0x1ab   : > { %910 = vrot.lane.b32.xlu0 %v11582_v48, %s11242_s25 }
 0x1ac   : > { %5804 = vrot.lane.b32.xlu1 %v11432_v11, %s11240_s21 }
 0x1ad   : > { %v11595_v52 = vpop.permute.xlu0 %1933  ;;  %v11597_v53 = vpop.permute.xlu1 %1579 }
 0x1af   : > { %1243 = vrot.lane.b32.xlu0 %v11599_v54, %s11241_s24 }
 0x1b0   : > { %912 = vrot.lane.b32.xlu1 %v11599_v54, %s11242_s25 }
 0x1b1   : > { %v11605_v55 = vpop.permute.xlu0 %2289  ;;  %v11607_v57 = vpop.permute.xlu1 %1935 }
 0x1b2   : > { %13416 = vst [vmem:[#allocation10_spill] sm:$0xff] %v11605_v55 }
 0x1b3   : > { %1247 = vrot.lane.b32.xlu0 %v887_v59, %s11241_s24 }
 0x1b4   : > { %916 = vrot.lane.b32.xlu1 %v887_v59, %s11242_s25 }
 0x1b5   : > { %v11611_v60 = vpop.permute.xlu0 %2641  ;;  %v11613_v56 = vpop.permute.xlu1 %2287 }
 0x1b7   : > { %1587 = vrot.lane.b32.xlu0 %v11582_v48, %s11244_s28 }
 0x1b8   : > { %1241 = vrot.lane.b32.xlu1 %v11582_v48, %s11241_s24 }
 0x1b9   : > { %v11619_v62 = vpop.permute.xlu0 %2997  ;;  %v11621_v2 = vpop.permute.xlu1 %2643 }
 0x1ba   : > { %13417 = vst [vmem:[#allocation11_spill] sm:$0xff] %v11619_v62  ;;  %13418 = vst [vmem:[#allocation12_spill] sm:$0xff] %v11621_v2 }
 0x1bb   : > { %1943 = vrot.lane.b32.xlu0 %v11599_v54, %s11243_s26 }
 0x1bc   : > { %1589 = vrot.lane.b32.xlu1 %v11599_v54, %s11244_s28 }
 0x1bd   : > { %v11627_v3 = vpop.permute.xlu0 %3349  ;;  %v11629_v6 = vpop.permute.xlu1 %2995 }
 0x1bf   : > { %1947 = vrot.lane.b32.xlu0 %v1919_v58, %s11243_s26 }
 0x1c0   : > { %1593 = vrot.lane.b32.xlu1 %v1565_v9, %s11244_s28 }
 0x1c1   : > { %v11633_v13 = vpop.permute.xlu0 %3705  ;;  %v11635_v63 = vpop.permute.xlu1 %3351 }
 0x1c2   : > { %13419 = vst [vmem:[#allocation13_spill] sm:$0xff] %v11633_v13  ;;  %13420 = vst [vmem:[#allocation14_spill] sm:$0xff] %v11635_v63 }
 0x1c3   : > { %2295 = vrot.lane.b32.xlu0 %v11582_v48, %s11246_s30 }
 0x1c4   : > { %1941 = vrot.lane.b32.xlu1 %v11582_v48, %s11243_s26 }
 0x1c5   : > { %v11641_v0 = vpop.permute.xlu0 %4057  ;;  %v11643_v16 = vpop.permute.xlu1 %3703 }
 0x1c7   : > { %2651 = vrot.lane.b32.xlu0 %v11599_v54, %s11245_s29 }
 0x1c8   : > { %2297 = vrot.lane.b32.xlu1 %v11599_v54, %s11246_s30 }
 0x1c9   : > { %v11649_v21 = vpop.permute.xlu0 %4413  ;;  %v11651_v24 = vpop.permute.xlu1 %4059 }
 0x1ca   : > { %13421 = vst [vmem:[#allocation15_spill] sm:$0xff] %v11649_v21 }
 0x1cb   : > { %2655 = vrot.lane.b32.xlu0 %v2627_v39, %s11245_s29 }
 0x1cc   : > { %2301 = vrot.lane.b32.xlu1 %v2273_v45, %s11246_s30 }
 0x1cd   : > { %v11655_v47 = vpop.permute.xlu0 %4765  ;;  %v11657_v59 = vpop.permute.xlu1 %4411 }
 0x1cf   : > { %3003 = vrot.lane.b32.xlu0 %v11582_v48, %s11248_s11 }
 0x1d0   : > { %2649 = vrot.lane.b32.xlu1 %v11582_v48, %s11245_s29 }
 0x1d1   : > { %v11663_v58 = vpop.permute.xlu0 %5121  ;;  %v11665_v9 = vpop.permute.xlu1 %4767 }
 0x1d2   : > { %13422 = vst [vmem:[#allocation16_spill] sm:$0xff] %v11663_v58  ;;  %v1250_v58 = vsel %vm1249_vm4, %v11519_v20, %v11565_v40  ;;  %v6492_v20 = vld [vmem:[#allocation2 + $0x24] sm:$0xf] }
 0x1d3   : > { %3359 = vrot.lane.b32.xlu0 %v11599_v54, %s11247_s10 }
 0x1d4   : > { %3005 = vrot.lane.b32.xlu1 %v11599_v54, %s11248_s11 }
 0x1d5   : > { %v11671_v39 = vpop.permute.xlu0 %5798  ;;  %v11673_v45 = vpop.permute.xlu1 %5119 }
 0x1d6   : > { %13423 = vst [vmem:[#allocation17_spill] sm:$0xff] %v11671_v39  ;;  %13424 = vst [vmem:[#allocation18_spill] sm:$0xff] %v11673_v45 }
 0x1d7   : > { %3363 = vrot.lane.b32.xlu0 %v3335_v41, %s11247_s10 }
 0x1d8   : > { %3009 = vrot.lane.b32.xlu1 %v2981_v37, %s11248_s11 }
 0x1d9   : > { %v11677_v32 = vpop.permute.xlu0 %6154  ;;  %v11679_v28 = vpop.permute.xlu1 %5800 }
 0x1da   : > { %13425 = vst [vmem:[#allocation19_spill] sm:$0xff] %v11677_v32  ;;  %13426 = vst [vmem:[#allocation20_spill] sm:$0xff] %v11679_v28  ;;  %v11227_v28 = vcombine.low %v11434_v12, %v11434_v12 }
 0x1db   : > { %3711 = vrot.lane.b32.xlu0 %v11582_v48, %s11250_s13 }
 0x1dc   : > { %3357 = vrot.lane.b32.xlu1 %v11582_v48, %s11247_s10 }
 0x1dd   : > { %v11685_v10 = vpop.permute.xlu0 %6506  ;;  %v11687_v5 = vpop.permute.xlu1 %6152 }
 0x1de   : > { %13427 = vst [vmem:[#allocation21_spill] sm:$0xff] %v11685_v10  ;;  %13428 = vst [vmem:[#allocation22_spill] sm:$0xff] %v11687_v5  ;;  %v4397_v10 = vld [vmem:[#allocation2 + $0x20] sm:$0xf] }
 0x1df   : > { %4067 = vrot.lane.b32.xlu0 %v11599_v54, %s11249_s12 }
 0x1e0   : > { %3713 = vrot.lane.b32.xlu1 %v11599_v54, %s11250_s13 }
 0x1e1   : > { %v11693_v37 = vpop.permute.xlu1 %6508  ;;  %v11695_v41 = vpop.permute.xlu0 %1237 }
 0x1e2   : > { %13429 = vst [vmem:[#allocation23_spill] sm:$0xff] %v11693_v37 }
 0x1e3   : > { %4071 = vrot.lane.b32.xlu0 %v4043_v1, %s11249_s12 }
 0x1e4   : > { %3717 = vrot.lane.b32.xlu1 %v3689_v61, %s11250_s13 }
 0x1e5   : > { %v11699_v42 = vpop.permute.xlu0 %1937  ;;  %v907_v7 = vpop.permute.xlu1 %906 }
 0x1e6   : > { %13430 = vst [vmem:[#allocation24_spill] sm:$0xff] %v11699_v42 }
 0x1e7   : > { %4419 = vrot.lane.b32.xlu0 %v11582_v48, %s11252_s15 }
 0x1e8   : > { %4065 = vrot.lane.b32.xlu1 %v11582_v48, %s11249_s12 }
 0x1e9   : > { %v11705_v4 = vpop.permute.xlu0 %2645  ;;  %v11707_v17 = vpop.permute.xlu1 %1583 }
 0x1ea   : > { %13431 = vst [vmem:[#allocation25_spill] sm:$0xff] %v11705_v4  ;;  %13432 = vst [vmem:[#allocation26_spill] sm:$0xff] %v11707_v17 }
 0x1eb   : > { %4775 = vrot.lane.b32.xlu0 %v11599_v54, %s11251_s14 }
 0x1ec   : > { %4421 = vrot.lane.b32.xlu1 %v11599_v54, %s11252_s15 }
 0x1ed   : > { %v11713_v61 = vpop.permute.xlu0 %3353  ;;  %v11715_v1 = vpop.permute.xlu1 %2291 }
 0x1ee   : > { %13433 = vst [vmem:[#allocation27_spill] sm:$0xff] %v11713_v61  ;;  %13434 = vst [vmem:[#allocation28_spill] sm:$0xff] %v11715_v1 }
 0x1ef   : > { %4779 = vrot.lane.b32.xlu0 %v4751_v18, %s11251_s14 }
 0x1f0   : > { %4425 = vrot.lane.b32.xlu1 %v4397_v10, %s11252_s15  ;;  %v11737_v10 = vcombine.low %v11429_v8, %v11429_v8  ;;  %v921_v8 = vsel %vm918_vm2, %v11567_v44, %v907_v7 }
 0x1f1   : > { %v11719_v37 = vpop.permute.xlu0 %4061  ;;  %v11721_v38 = vpop.permute.xlu1 %2999 }
 0x1f2   : > { %13435 = vst [vmem:[#allocation29_spill] sm:$0xff] %v11719_v37  ;;  %13436 = vst [vmem:[#allocation30_spill] sm:$0xff] %v11721_v38 }
 0x1f3   : > { %5127 = vrot.lane.b32.xlu0 %v11582_v48, %s11253_s16 }
 0x1f4   : > { %4773 = vrot.lane.b32.xlu1 %v11582_v48, %s11251_s14  ;;  %v5105_v48 = vld [vmem:[#allocation2 + $0x20] sm:$0xf] }
 0x1f5   : > { %v11727_v5 = vpop.permute.xlu0 %4769  ;;  %v11729_v61 = vpop.permute.xlu1 %3707 }
 0x1f6   : > { %13437 = vst [vmem:[#allocation31_spill] sm:$0xff] %v11727_v5  ;;  %13438 = vst [vmem:[#allocation32_spill] sm:$0xff] %v11729_v61  ;;  %v899_v5 = vcombine.high %v11599_v54, %v11599_v54 }
 0x1f7   : > { %5808 = vrot.lane.b32.xlu0 %v11438_v14, %s11240_s21 }
 0x1f8   : > { %5129 = vrot.lane.b32.xlu1 %v11599_v54, %s11253_s16 }
 0x1f9   : > { %v11739_v18 = vpop.permute.xlu0 %5802  ;;  %v11741_v37 = vpop.permute.xlu1 %4415 }
 0x1fa   : > { %13439 = vst [vmem:[#allocation33_spill] sm:$0xff] %v11739_v18  ;;  %13440 = vst [vmem:[#allocation34_spill] sm:$0xff] %v11741_v37  ;;  %v13443_v18 = vmov 0.0  }
 0x1fb   : > { %6160 = vrot.lane.b32.xlu0 %v11737_v10, %s11239_s20 }
 0x1fc   : > { %5133 = vrot.lane.b32.xlu1 %v5105_v48, %s11253_s16 }
 0x1fd   : > { %v909_v61 = vpop.permute.xlu0 %908  ;;  %v11748_v38 = vpop.permute.xlu1 %5123 }
 0x1fe   : > { %13441 = vst [vmem:[#allocation35_spill] sm:$0xff] %v11748_v38  ;;  %v922_v32 = vsel %vm918_vm2, %v907_v7, %v909_v61 }
 0x1ff   : > { %914 = vrot.lane.b32.xlu0 %v899_v5, %s11242_s25  ;;  %10606 = vmatprep.subr.msk.mxu1 %vm930_vm3, %v922_v32 }
 0x200   : > { %5806 = vrot.lane.b32.xlu1 %v11737_v10, %s11240_s21  ;;  %10607 = vmatpush1.msk.msra.mxu1 %vm930_vm3, %v921_v8 }
 0x201   : > { %v11758_v48 = vpop.permute.xlu0 %1585  ;;  %v11760_v54 = vpop.permute.xlu1 %6156  ;;  %10608 = vmatmul.mubr.msk.f32.vlgmr.msra.gmra.mrb[16].mxu1 %vm369_vm1, %v11574_v46 }
 0x202   : > { %13442 = vst [vmem:[#allocation36_spill] sm:$0xff] %v11760_v54  ;;  %1224 = vmatprep.mubr.f32.mxu1 %v13443_v18 }
 0x203   : > { %1591 = vrot.lane.b32.xlu0 %v899_v5, %s11244_s28  ;;  %s11256_s28 = smov 39  }
 0x204   : > { %6162 = vrot.lane.b32.xlu1 %v11438_v14, %s11239_s20 }
 0x205   : > { %v11768_v7 = vpop.permute.xlu0 %2293  ;;  %v11770_v32 = vpop.permute.xlu1 %1239 }
 0x207   : > { %2299 = vrot.lane.b32.xlu0 %v899_v5, %s11246_s30 }
 0x208   : > { %1245 = vrot.lane.b32.xlu1 %v899_v5, %s11241_s24  ;;  %s11259_s24 = smov 29  }
 0x209   : > { %v11774_v44 = vpop.permute.xlu0 %3001  ;;  %v11776_v8 = vpop.permute.xlu1 %1939 }
 0x20b   : > { %3007 = vrot.lane.b32.xlu0 %v899_v5, %s11248_s11  ;;  %s11260_s11 = smov 28  }
 0x20c   : > { %1945 = vrot.lane.b32.xlu1 %v899_v5, %s11243_s26 }
 0x20d   : > { %v11780_v54 = vpop.permute.xlu0 %3709  ;;  %v11782_v38 = vpop.permute.xlu1 %2647 }
 0x20f   : > { %3715 = vrot.lane.b32.xlu0 %v899_v5, %s11250_s13 }
 0x210   : > { %2653 = vrot.lane.b32.xlu1 %v899_v5, %s11245_s29  ;;  %s325_s29 = scalar_lea.vmem %s13356_s8, %s11327_s9 }
 0x211   : > { %v11786_v37 = vpop.permute.xlu0 %4417  ;;  %v11788_v4 = vpop.permute.xlu1 %3355 }
 0x213   : > { %4423 = vrot.lane.b32.xlu0 %v899_v5, %s11252_s15 }
 0x214   : > { %3361 = vrot.lane.b32.xlu1 %v899_v5, %s11247_s10 }
 0x215   : > { %v11792_v35 = vpop.permute.xlu0 %5125  ;;  %v11794_v39 = vpop.permute.xlu1 %4063 }
 0x216   : > { %13444 = vst [vmem:[#allocation37_spill] sm:$0xff] %v11792_v35 }
 0x217   : > { %5131 = vrot.lane.b32.xlu0 %v899_v5, %s11253_s16  ;;  %s11261_s16 = smov 27  }
 0x218   : > { %4069 = vrot.lane.b32.xlu1 %v899_v5, %s11249_s12 }
 0x219   : > { %v11800_v1 = vpop.permute.xlu0 %6158 }
 0x21a   : > { %13445 = vst [vmem:[#allocation38_spill] sm:$0xff] %v11800_v1  ;;  %v11802_v42 = vpop.permute.xlu1 %4771 }
 0x21b   : > { %6164 = vrot.lane.b32.xlu0 %v11227_v28, %s11239_s20 }
 0x21c   : > { %4777 = vrot.lane.b32.xlu1 %v899_v5, %s11251_s14  ;;  %s11257_s14 = smov 38  }
 0x21d   : > { %v911_v36 = vpop.permute.xlu0 %910 }
 0x21e   : > { %v11806_v17 = vpop.permute.xlu1 %5804  ;;  %v923_v5 = vsel %vm918_vm2, %v909_v61, %v911_v36  ;;  %v11843_v61 = vld [vmem:[%s13354_s6] sm:$0xf] }
 0x21f   : > { %13446 = vst [vmem:[#allocation39_spill] sm:$0xff] %v11806_v17  ;;  %6510 = vrot.lane.b32.xlu0 %v11517_v19, %s11254_s17  ;;  %v1251_v17 = vsel %vm1249_vm4, %v11565_v40, %v11586_v51 }
 0x220   : > { %5810 = vrot.lane.b32.xlu1 %v11227_v28, %s11240_s21 }
 0x221   : > { %v11811_v35 = vpop.permute.xlu0 %1243 }
 0x222   : > { %v11813_v45 = vpop.permute.xlu1 %912 }
 0x223   : > { %6504 = vrot.lane.b32.xlu0 %v11414_v43, %s11254_s17  ;;  %v924_v12 = vsel %vm918_vm2, %v911_v36, %v11813_v45 }
 0x224   : > { %6512 = vrot.lane.b32.xlu1 %v11432_v11, %s11254_s17  ;;  %10609 = vmatprep.subr.msk.mxu0 %vm930_vm3, %v924_v12 }
 0x225   : > { %10610 = vmatpush1.msk.msra.mxu0 %vm930_vm3, %v923_v5  ;;  %v11824_v1 = vpop.permute.xlu0 %1247  ;;  %v1597_v5 = vsel %vm1595_vm5, %v11597_v53, %v11584_v49 }
 0x226   : > { %10611 = vmatmul.mubr.msk.f32.vlgmr.msra.gmra.mrb[18].mxu0 %vm369_vm1, %v11574_v46  ;;  %10615 = vmatprep.subr.msk.mxu0 %vm930_vm3, %v1251_v17  ;;  %v11835_v36 = vpop.permute.xlu1 %916 }
 0x227   : > { %10616 = vmatpush1.msk.msra.mxu0 %vm930_vm3, %v1250_v58  ;;  %6516 = vrot.lane.b32.xlu0 %v11438_v14, %s11254_s17 }
 0x228   : > { %6514 = vrot.lane.b32.xlu1 %v11737_v10, %s11254_s17  ;;  %1341 = vmatprep.mubr.f32.mxu0 %v13443_v18 }
 0x229   : > { %v1588_v40 = vpop.permute.xlu0 %1587 }
 0x22a   : > { %10617 = vmatmul.mubr.msk.f32.vlgmr.msra.gmra.mrb[16].mxu0 %vm369_vm1, %v11843_v61  ;;  %v1242_v17 = vpop.permute.xlu1 %1241 }
 0x22b   : > { %v1254_v14 = vsel %vm1249_vm4, %v11770_v32, %v1242_v17  ;;  %6520 = vrot.lane.b32.xlu0 %v6492_v20, %s11254_s17  ;;  %v1255_v58 = vsel %vm1249_vm4, %v1242_v17, %v11811_v35  ;;  %1483 = vmatprep.mubr.f32.mxu0 %v13443_v18  ;;  %v1596_v20 = vsel %vm1595_vm5, %v11526_v23, %v11597_v53  ;;  %v11880_v23 = vld [vmem:[%s13354_s6 + $0x8] sm:$0xf] }
 0x22c   : > { %6518 = vrot.lane.b32.xlu1 %v11227_v28, %s11254_s17  ;;  %10621 = vmatprep.subr.msk.mxu0 %vm930_vm3, %v1255_v58  ;;  %v1951_v58 = vsel %vm1949_vm6, %v11595_v52, %v11607_v57 }
 0x22d   : > { %10622 = vmatpush1.msk.msra.mxu0 %vm930_vm3, %v1254_v14  ;;  %v11859_v12 = vpop.permute.xlu0 %1943 }
 0x22e   : > { %10623 = vmatmul.mubr.msk.f32.vlgmr.msra.gmra.mrb[18].mxu0 %vm369_vm1, %v11843_v61  ;;  %10628 = vmatprep.subr.msk.mxu0 %vm930_vm3, %v1597_v5  ;;  %v11870_v28 = vpop.permute.xlu1 %1589  ;;  %v1950_v5 = vsel %vm1949_vm6, %v11524_v22, %v11595_v52 }
 0x22f   : > { %10629 = vmatpush1.msk.msra.mxu0 %vm930_vm3, %v1596_v20  ;;  %6862 = vrot.lane.b32.xlu0 %v11419_v50, %s11255_s22  ;;  %v1601_v17 = vsel %vm1595_vm5, %v1588_v40, %v11870_v28  ;;  %v1600_v50 = vsel %vm1595_vm5, %v11758_v48, %v1588_v40 }
 0x230   : > { %6860 = vrot.lane.b32.xlu1 %v11485_v15, %s11255_s22  ;;  %10634 = vmatprep.subr.msk.mxu0 %vm930_vm3, %v1601_v17  ;;  %v11909_v17 = vld [vmem:[#allocation2 + $0x1c] sm:$0xff] }
 0x231   : > { %1687 = vmatprep.mubr.f32.mxu0 %v13443_v18  ;;  %v11886_v53 = vpop.permute.xlu0 %1947  ;;  %v11929_v52 = vcombine.high %v11909_v17, %v11909_v17 }
 0x232   : > { %10630 = vmatmul.mubr.msk.f32.vlgmr.msra.gmra.mrb[16].mxu0 %vm369_vm1, %v11880_v23  ;;  %v11892_v14 = vpop.permute.xlu1 %1593 }
 0x233   : > { %10635 = vmatpush1.msk.msra.mxu0 %vm930_vm3, %v1600_v50  ;;  %6866 = vrot.lane.b32.xlu0 %v11432_v11, %s11255_s22 }
 0x234   : > { %10641 = vmatprep.subr.msk.mxu0 %vm930_vm3, %v1951_v58  ;;  %6864 = vrot.lane.b32.xlu1 %v11517_v19, %s11255_s22  ;;  %v11919_v19 = vld [vmem:[%s13354_s6 + $0xc] sm:$0xf]  ;;  %v2305_v58 = vsel %vm2303_vm7, %v11613_v56, %v11605_v55 }
 0x235   : > { %1829 = vmatprep.mubr.f32.mxu0 %v13443_v18  ;;  %v2296_v40 = vpop.permute.xlu0 %2295  ;;  %v11956_v55 = vld [vmem:[#allocation2 + $0xc] sm:$0xff] }
 0x236   : > { %10636 = vmatmul.mubr.msk.f32.vlgmr.msra.gmra.mrb[18].mxu0 %vm369_vm1, %v11880_v23  ;;  %v1942_v20 = vpop.permute.xlu1 %1941 }
 0x237   : > { %10642 = vmatpush1.msk.msra.mxu0 %vm930_vm3, %v1950_v5  ;;  %6868 = vrot.lane.b32.xlu0 %v11737_v10, %s11255_s22  ;;  %v1955_v11 = vsel %vm1949_vm6, %v1942_v20, %v11859_v12  ;;  %v1954_v10 = vsel %vm1949_vm6, %v11776_v8, %v1942_v20  ;;  %v6846_v20 = vld [vmem:[#allocation2 + $0x24] sm:$0xf] }
 0x238   : > { %6858 = vrot.lane.b32.xlu1 %v11414_v43, %s11255_s22  ;;  %10647 = vmatprep.subr.msk.mxu0 %vm930_vm3, %v1955_v11  ;;  %v2304_v11 = vsel %vm2303_vm7, %v11532_v26, %v11613_v56  ;;  %v11966_v26 = vld [vmem:[%s13354_s6 + $0x10] sm:$0xf] }
 0x239   : > { %2041 = vmatprep.mubr.f32.mxu0 %v13443_v18  ;;  %v11925_v22 = vpop.permute.xlu0 %2651 }
 0x23a   : > { %13447 = vst [vmem:[#allocation40_spill] sm:$0xff] %v11925_v22  ;;  %10643 = vmatmul.mubr.msk.f32.vlgmr.msra.gmra.mrb[16].mxu0 %vm369_vm1, %v11919_v19  ;;  %v11935_v50 = vpop.permute.xlu1 %2297 }
 0x23b   : > { %13448 = vst [vmem:[#allocation41_spill] sm:$0xff] %v11935_v50  ;;  %10648 = vmatpush1.msk.msra.mxu0 %vm930_vm3, %v1954_v10  ;;  %6872 = vrot.lane.b32.xlu0 %v11929_v52, %s11255_s22 }
 0x23c   : > { %10654 = vmatprep.subr.msk.mxu0 %vm930_vm3, %v2305_v58  ;;  %6870 = vrot.lane.b32.xlu1 %v11909_v17, %s11255_s22  ;;  %v2309_v58 = vsel %vm2303_vm7, %v2296_v40, %v11935_v50  ;;  %v12008_v50 = vld [vmem:[%s13354_s6 + $0x14] sm:$0xf] }
 0x23d   : > { %2183 = vmatprep.mubr.f32.mxu0 %v13443_v18  ;;  %v11947_v5 = vpop.permute.xlu0 %2655 }
 0x23e   : > { %13449 = vst [vmem:[#allocation42_spill] sm:$0xff] %v11947_v5  ;;  %10649 = vmatmul.mubr.msk.f32.vlgmr.msra.gmra.mrb[18].mxu0 %vm369_vm1, %v11919_v19  ;;  %v11954_v10 = vpop.permute.xlu1 %2301 }
 0x23f   : > { %10655 = vmatpush1.msk.msra.mxu0 %vm930_vm3, %v2304_v11  ;;  %7214 = vrot.lane.b32.xlu0 %v11485_v15, %s11256_s28  ;;  %v11973_v11 = vcombine.high %v11956_v55, %v11956_v55  ;;  %v2308_v15 = vsel %vm2303_vm7, %v11768_v7, %v2296_v40 }
 0x240   : > { %10660 = vmatprep.subr.msk.mxu0 %vm930_vm3, %v2309_v58  ;;  %6874 = vrot.lane.b32.xlu1 %v6846_v20, %s11255_s22  ;;  %v2659_v20 = vsel %vm2657_vm8, %v11611_v60, %v11621_v2  ;;  %v2658_v58 = vsel %vm2657_vm8, %v11530_v25, %v11611_v60  ;;  %v12003_v2 = vld [vmem:[#allocation2 + $0x14] sm:$0xff] }
 0x241   : > { %2395 = vmatprep.mubr.f32.mxu0 %v13443_v18  ;;  %v3004_v56 = vpop.permute.xlu0 %3003  ;;  %v12020_v60 = vcombine.high %v12003_v2, %v12003_v2 }
 0x242   : > { %10656 = vmatmul.mubr.msk.f32.vlgmr.msra.gmra.mrb[16].mxu0 %vm369_vm1, %v11966_v26  ;;  %v2650_v5 = vpop.permute.xlu1 %2649 }
 0x243   : > { %10661 = vmatpush1.msk.msra.mxu0 %vm930_vm3, %v2308_v15  ;;  %7218 = vrot.lane.b32.xlu0 %v11973_v11, %s11256_s28 }
 0x244   : > { %10667 = vmatprep.subr.msk.mxu0 %vm930_vm3, %v2659_v20  ;;  %7216 = vrot.lane.b32.xlu1 %v11956_v55, %s11256_s28  ;;  %v2663_v20 = vsel %vm2657_vm8, %v2650_v5, %v11925_v22  ;;  %v12050_v22 = vld [vmem:[#allocation2 + $0x4] sm:$0xff] }
 0x245   : > { %2537 = vmatprep.mubr.f32.mxu0 %v13443_v18  ;;  %v11989_v40 = vpop.permute.xlu0 %3359 }
 0x246   : > { %10662 = vmatmul.mubr.msk.f32.vlgmr.msra.gmra.mrb[18].mxu0 %vm369_vm1, %v11966_v26  ;;  %v11996_v15 = vpop.permute.xlu1 %3005 }
 0x247   : > { %10668 = vmatpush1.msk.msra.mxu0 %vm930_vm3, %v2658_v58  ;;  %7212 = vrot.lane.b32.xlu0 %v11414_v43, %s11256_s28  ;;  %v2662_v43 = vsel %vm2657_vm8, %v11782_v38, %v2650_v5  ;;  %v7200_v5 = vld [vmem:[#allocation2 + $0x24] sm:$0xf] }
 0x248   : > { %10673 = vmatprep.subr.msk.mxu0 %vm930_vm3, %v2663_v20  ;;  %7220 = vrot.lane.b32.xlu1 %v12003_v2, %s11256_s28  ;;  %v3013_v20 = vsel %vm3011_vm9, %v11629_v6, %v11619_v62  ;;  %v12048_v62 = vld [vmem:[%s13354_s6 + $0x18] sm:$0xf] }
 0x249   : > { %2749 = vmatprep.mubr.f32.mxu0 %v13443_v18  ;;  %v12014_v25 = vpop.permute.xlu0 %3363 }
 0x24a   : > { %13450 = vst [vmem:[#allocation43_spill] sm:$0xff] %v12014_v25  ;;  %10669 = vmatmul.mubr.msk.f32.vlgmr.msra.gmra.mrb[16].mxu0 %vm369_vm1, %v12008_v50  ;;  %v12024_v58 = vpop.permute.xlu1 %3009 }
 0x24b   : > { %13451 = vst [vmem:[#allocation44_spill] sm:$0xff] %v12024_v58  ;;  %10674 = vmatpush1.msk.msra.mxu0 %vm930_vm3, %v2662_v43  ;;  %7224 = vrot.lane.b32.xlu0 %v11909_v17, %s11256_s28  ;;  %v3012_v43 = vsel %vm3011_vm9, %v11539_v29, %v11629_v6  ;;  %v3016_v6 = vsel %vm3011_vm9, %v11774_v44, %v3004_v56 }
 0x24c   : > { %10680 = vmatprep.subr.msk.mxu0 %vm930_vm3, %v3013_v20  ;;  %7222 = vrot.lane.b32.xlu1 %v12020_v60, %s11256_s28  ;;  %v3017_v20 = vsel %vm3011_vm9, %v3004_v56, %v11996_v15 }
 0x24d   : > { %2891 = vmatprep.mubr.f32.mxu0 %v13443_v18  ;;  %v3712_v25 = vpop.permute.xlu0 %3711 }
 0x24e   : > { %10675 = vmatmul.mubr.msk.f32.vlgmr.msra.gmra.mrb[18].mxu0 %vm369_vm1, %v12008_v50  ;;  %v3358_v58 = vpop.permute.xlu1 %3357 }
 0x24f   : > { %10681 = vmatpush1.msk.msra.mxu0 %vm930_vm3, %v3012_v43  ;;  %7228 = vrot.lane.b32.xlu0 %v7200_v5, %s11256_s28  ;;  %v12066_v43 = vcombine.high %v12050_v22, %v12050_v22 }
 0x250   : > { %10686 = vmatprep.subr.msk.mxu0 %vm930_vm3, %v3017_v20  ;;  %7226 = vrot.lane.b32.xlu1 %v11929_v52, %s11256_s28  ;;  %v3367_v20 = vsel %vm3365_vm10, %v11627_v3, %v11635_v63  ;;  %s11264_s28 = smov 17  }
 0x251   : > { %3103 = vmatprep.mubr.f32.mxu0 %v13443_v18  ;;  %v12056_v29 = vpop.permute.xlu0 %4067 }
 0x252   : > { %10682 = vmatmul.mubr.msk.f32.vlgmr.msra.gmra.mrb[16].mxu0 %vm369_vm1, %v12048_v62  ;;  %v12062_v5 = vpop.permute.xlu1 %3713 }
 0x253   : > { %13452 = vst [vmem:[#allocation45_spill] sm:$0xff] %v12062_v5  ;;  %10687 = vmatpush1.msk.msra.mxu0 %vm930_vm3, %v3016_v6  ;;  %7570 = vrot.lane.b32.xlu0 %v11956_v55, %s11257_s14  ;;  %v3366_v6 = vsel %vm3365_vm10, %v11537_v27, %v11627_v3  ;;  %v3370_v3 = vsel %vm3365_vm10, %v11788_v4, %v3358_v58 }
 0x254   : > { %10693 = vmatprep.subr.msk.mxu0 %vm930_vm3, %v3367_v20  ;;  %7568 = vrot.lane.b32.xlu1 %v12066_v43, %s11257_s14  ;;  %v3371_v20 = vsel %vm3365_vm10, %v3358_v58, %v11989_v40 }
 0x255   : > { %3245 = vmatprep.mubr.f32.mxu0 %v13443_v18  ;;  %v12078_v56 = vpop.permute.xlu0 %4071 }
 0x256   : > { %13453 = vst [vmem:[#allocation46_spill] sm:$0xff] %v12078_v56  ;;  %10688 = vmatmul.mubr.msk.f32.vlgmr.msra.gmra.mrb[18].mxu0 %vm369_vm1, %v12048_v62  ;;  %v12085_v63 = vpop.permute.xlu1 %3717  ;;  %v12095_v56 = vld [vmem:[%s13354_s6 + $0x1c] sm:$0xf] }
 0x257   : > { %13454 = vst [vmem:[#allocation47_spill] sm:$0xff] %v12085_v63  ;;  %10694 = vmatpush1.msk.msra.mxu0 %vm930_vm3, %v3366_v6  ;;  %7574 = vrot.lane.b32.xlu0 %v12003_v2, %s11257_s14 }
 0x258   : > { %10699 = vmatprep.subr.msk.mxu0 %vm930_vm3, %v3371_v20  ;;  %7572 = vrot.lane.b32.xlu1 %v11973_v11, %s11257_s14  ;;  %v3721_v20 = vsel %vm3719_vm11, %v11643_v16, %v11633_v13  ;;  %v12134_v13 = vld [vmem:[%s13354_s6 + $0x20] sm:$0xf] }
 0x259   : > { %3457 = vmatprep.mubr.f32.mxu0 %v13443_v18  ;;  %v12101_v27 = vpop.permute.xlu0 %4419 }
 0x25a   : > { %10695 = vmatmul.mubr.msk.f32.vlgmr.msra.gmra.mrb[16].mxu0 %vm369_vm1, %v12095_v56  ;;  %v4066_v6 = vpop.permute.xlu1 %4065 }
 0x25b   : > { %10700 = vmatpush1.msk.msra.mxu0 %vm930_vm3, %v3370_v3  ;;  %7576 = vrot.lane.b32.xlu0 %v12020_v60, %s11257_s14  ;;  %v3720_v3 = vsel %vm3719_vm11, %v11545_v31, %v11643_v16  ;;  %v7554_v16 = vld [vmem:[#allocation2 + $0x24] sm:$0xf] }
 0x25c   : > { %10706 = vmatprep.subr.msk.mxu0 %vm930_vm3, %v3721_v20  ;;  %7566 = vrot.lane.b32.xlu1 %v12050_v22, %s11257_s14  ;;  %v3725_v20 = vsel %vm3719_vm11, %v3712_v25, %v12062_v5 }
 0x25d   : > { %3599 = vmatprep.mubr.f32.mxu0 %v13443_v18  ;;  %v12117_v58 = vpop.permute.xlu0 %4775 }
 0x25e   : > { %10701 = vmatmul.mubr.msk.f32.vlgmr.msra.gmra.mrb[18].mxu0 %vm369_vm1, %v12095_v56  ;;  %v12124_v63 = vpop.permute.xlu1 %4421 }
 0x25f   : > { %13455 = vst [vmem:[#allocation48_spill] sm:$0xff] %v12124_v63  ;;  %10707 = vmatpush1.msk.msra.mxu0 %vm930_vm3, %v3720_v3  ;;  %7580 = vrot.lane.b32.xlu0 %v11929_v52, %s11257_s14  ;;  %v3724_v3 = vsel %vm3719_vm11, %v11780_v54, %v3712_v25 }
 0x260   : > { %10712 = vmatprep.subr.msk.mxu0 %vm930_vm3, %v3725_v20  ;;  %7578 = vrot.lane.b32.xlu1 %v11909_v17, %s11257_s14  ;;  %v4075_v20 = vsel %vm4073_vm12, %v11641_v0, %v11651_v24 }
 0x261   : > { %3811 = vmatprep.mubr.f32.mxu0 %v13443_v18  ;;  %v12140_v31 = vpop.permute.xlu0 %4779 }
 0x262   : > { %13456 = vst [vmem:[#allocation49_spill] sm:$0xff] %v12140_v31  ;;  %10708 = vmatmul.mubr.msk.f32.vlgmr.msra.gmra.mrb[16].mxu0 %vm369_vm1, %v12134_v13  ;;  %v12146_v5 = vpop.permute.xlu1 %4425 }
 0x263   : > { %13457 = vst [vmem:[#allocation50_spill] sm:$0xff] %v12146_v5  ;;  %10713 = vmatpush1.msk.msra.mxu0 %vm930_vm3, %v3724_v3  ;;  %7922 = vrot.lane.b32.xlu0 %v12066_v43, %s11258_s19  ;;  %v4074_v3 = vsel %vm4073_vm12, %v11543_v30, %v11641_v0  ;;  %v4078_v0 = vsel %vm4073_vm12, %v11794_v39, %v4066_v6 }
 0x264   : > { %10719 = vmatprep.subr.msk.mxu0 %vm930_vm3, %v4075_v20  ;;  %7582 = vrot.lane.b32.xlu1 %v7554_v16, %s11257_s14  ;;  %v4079_v20 = vsel %vm4073_vm12, %v4066_v6, %v12056_v29  ;;  %v12174_v16 = vld [vmem:[%s13354_s6 + $0x24] sm:$0xf] }
 0x265   : > { %3953 = vmatprep.mubr.f32.mxu0 %v13443_v18  ;;  %v12157_v25 = vpop.permute.xlu0 %5127  ;;  %13458 = vst [vmem:[#allocation51_spill] sm:$0xff] %v12174_v16 }
 0x266   : > { %10714 = vmatmul.mubr.msk.f32.vlgmr.msra.gmra.mrb[18].mxu0 %vm369_vm1, %v12134_v13  ;;  %v12164_v31 = vpop.permute.xlu1 %4773 }
 0x267   : > { %10720 = vmatpush1.msk.msra.mxu0 %vm930_vm3, %v4074_v3  ;;  %7926 = vrot.lane.b32.xlu0 %v11973_v11, %s11258_s19 }
 0x268   : > { %10725 = vmatprep.subr.msk.mxu0 %vm930_vm3, %v4079_v20  ;;  %7924 = vrot.lane.b32.xlu1 %v11956_v55, %s11258_s19  ;;  %v4429_v20 = vsel %vm4427_vm13, %v11657_v59, %v11649_v21  ;;  %v12216_v21 = vld [vmem:[%s13354_s6 + $0x28] sm:$0xf] }
 0x269   : > { %4165 = vmatprep.mubr.f32.mxu0 %v13443_v18  ;;  %v12180_v30 = vpop.permute.xlu0 %5808 }
 0x26a   : > { %10721 = vmatmul.mubr.msk.f32.vlgmr.msra.gmra.mrb[16].mxu0 %vm369_vm1, %v12174_v16  ;;  %v12186_v3 = vpop.permute.xlu1 %5129 }
 0x26b   : > { %10726 = vmatpush1.msk.msra.mxu0 %vm930_vm3, %v4078_v0  ;;  %7920 = vrot.lane.b32.xlu0 %v12050_v22, %s11258_s19  ;;  %v4428_v0 = vsel %vm4427_vm13, %v11551_v34, %v11657_v59  ;;  %v7908_v34 = vld [vmem:[#allocation2 + $0x24] sm:$0xf] }
 0x26c   : > { %10732 = vmatprep.subr.msk.mxu0 %vm930_vm3, %v4429_v20  ;;  %7928 = vrot.lane.b32.xlu1 %v12003_v2, %s11258_s19  ;;  %v4433_v20 = vsel %vm4427_vm13, %v12101_v27, %v12124_v63 }
 0x26d   : > { %4307 = vmatprep.mubr.f32.mxu0 %v13443_v18  ;;  %v12198_v6 = vpop.permute.xlu0 %6160 }
 0x26e   : > { %10727 = vmatmul.mubr.msk.f32.vlgmr.msra.gmra.mrb[18].mxu0 %vm369_vm1, %v12174_v16  ;;  %v12205_v5 = vpop.permute.xlu1 %5133  ;;  %v4783_v16 = vsel %vm4781_vm14, %v11655_v47, %v11665_v9 }
 0x26f   : > { %13459 = vst [vmem:[#allocation52_spill] sm:$0xff] %v12205_v5  ;;  %10733 = vmatpush1.msk.msra.mxu0 %vm930_vm3, %v4428_v0  ;;  %7932 = vrot.lane.b32.xlu0 %v11909_v17, %s11258_s19  ;;  %v4432_v0 = vsel %vm4427_vm13, %v11786_v37, %v12101_v27 }
 0x270   : > { %10738 = vmatprep.subr.msk.mxu0 %vm930_vm3, %v4433_v20  ;;  %7930 = vrot.lane.b32.xlu1 %v12020_v60, %s11258_s19 }
 0x271   : > { %4519 = vmatprep.mubr.f32.mxu0 %v13443_v18  ;;  %v915_v59 = vpop.permute.xlu0 %914 }
 0x272   : > { %10734 = vmatmul.mubr.msk.f32.vlgmr.msra.gmra.mrb[16].mxu0 %vm369_vm1, %v12216_v21  ;;  %v12227_v5 = vpop.permute.xlu1 %5806  ;;  %v926_v20 = vsel %vm918_vm2, %v915_v59, %v11835_v36  ;;  %v925_v63 = vsel %vm918_vm2, %v11813_v45, %v915_v59  ;;  %v1253_v45 = vsel %vm1249_vm4, %v11695_v41, %v11770_v32  ;;  %v13461_v59 = vld [vmem:[#allocation16_spill] sm:$0xff]  ;;  %vm6522_vm2 = vcmask 965632  }
 0x273   : > { %10739 = vmatpush1.msk.msra.mxu0 %vm930_vm3, %v4432_v0  ;;  %7936 = vrot.lane.b32.xlu0 %v7908_v34, %s11258_s19  ;;  %v1252_v34 = vsel %vm1249_vm4, %v11586_v51, %v11695_v41  ;;  %v4786_v41 = vsel %vm4781_vm14, %v11802_v42, %v12164_v31  ;;  %v13462_v0 = vld [vmem:[#allocation18_spill] sm:$0xff] }
 0x274   : > { %10745 = vmatprep.subr.msk.mxu0 %vm930_vm3, %v4783_v16  ;;  %7934 = vrot.lane.b32.xlu1 %v11929_v52, %s11258_s19  ;;  %v4782_v16 = vsel %vm4781_vm14, %v11549_v33, %v11655_v47  ;;  %s11262_s19 = smov 19  }
 0x275   : > { %10612 = vmatprep.subr.msk.mxu1 %vm930_vm3, %v926_v20  ;;  %4661 = vmatprep.mubr.f32.mxu0 %v13443_v18  ;;  %v1592_v36 = vpop.permute.xlu0 %1591  ;;  %v5137_v20 = vsel %vm5135_vm15, %v13462_v0, %v13461_v59 }
 0x276   : > { %10613 = vmatpush1.msk.msra.mxu1 %vm930_vm3, %v925_v63  ;;  %10740 = vmatmul.mubr.msk.f32.vlgmr.msra.gmra.mrb[18].mxu0 %vm369_vm1, %v12216_v21  ;;  %v12249_v27 = vpop.permute.xlu1 %6162  ;;  %v4787_v63 = vsel %vm4781_vm14, %v12164_v31, %v12117_v58 }
 0x277   : > { %13460 = vst [vmem:[#allocation53_spill] sm:$0xff] %v12249_v27  ;;  %10614 = vmatmul.mubr.msk.f32.vlgmr.msra.gmra.mrb[18].mxu1 %vm369_vm1, %v11574_v46  ;;  %10618 = vmatprep.subr.msk.mxu1 %vm930_vm3, %v1253_v45  ;;  %v12273_v46 = vld [vmem:[%s13354_s6 + $0x2c] sm:$0xf] }
 0x278   : > { %10746 = vmatpush1.msk.msra.mxu0 %vm930_vm3, %v4782_v16  ;;  %10619 = vmatpush1.msk.msra.mxu1 %vm930_vm3, %v1252_v34  ;;  %v13464_v16 = vld [vmem:[#allocation8_spill] sm:$0xff] }
 0x279   : > { %10751 = vmatprep.subr.msk.mxu0 %vm930_vm3, %v4787_v63  ;;  %8278 = vrot.lane.b32.xlu0 %v11956_v55, %s11259_s24  ;;  %v12268_v33 = vpop.permute.xlu0 %2299  ;;  %v5136_v34 = vsel %vm5135_vm15, %v13464_v16, %v13462_v0  ;;  %v1602_v0 = vsel %vm1595_vm5, %v11870_v28, %v1592_v36 }
 0x27a   : > { %8276 = vrot.lane.b32.xlu1 %v12066_v43, %s11259_s24  ;;  %1412 = vmatprep.mubr.f32.mxu1 %v13443_v18  ;;  %v1246_v51 = vpop.permute.xlu1 %1245 }
 0x27b   : > { %4873 = vmatprep.mubr.f32.mxu0 %v13443_v18  ;;  %10620 = vmatmul.mubr.msk.f32.vlgmr.msra.gmra.mrb[16].mxu1 %vm369_vm1, %v11843_v61  ;;  %v1257_v47 = vsel %vm1249_vm4, %v1246_v51, %v11824_v1  ;;  %v1256_v32 = vsel %vm1249_vm4, %v11811_v35, %v1246_v51  ;;  %v13463_v35 = vld [vmem:[#allocation26_spill] sm:$0xff]  ;;  %vm6168_vm4 = vcmask 973824  }
 0x27c   : > { %10747 = vmatmul.mubr.msk.f32.vlgmr.msra.gmra.mrb[16].mxu0 %vm369_vm1, %v12273_v46  ;;  %10624 = vmatprep.subr.msk.mxu1 %vm930_vm3, %v1257_v47  ;;  %v1599_v45 = vsel %vm1595_vm5, %v13463_v35, %v11758_v48  ;;  %v1598_v63 = vsel %vm1595_vm5, %v11584_v49, %v13463_v35  ;;  %v5141_v48 = vsel %vm5135_vm15, %v12157_v25, %v12186_v3  ;;  %v12336_v47 = vld [vmem:[%s13354_s6 + $0x30] sm:$0xf] }
 0x27d   : > { %10752 = vmatpush1.msk.msra.mxu0 %vm930_vm3, %v4786_v41  ;;  %8282 = vrot.lane.b32.xlu0 %v12003_v2, %s11259_s24  ;;  %v12297_v1 = vpop.permute.xlu0 %3007  ;;  %v1603_v49 = vsel %vm1595_vm5, %v1592_v36, %v11892_v14  ;;  %v13466_v35 = vld [vmem:[#allocation24_spill] sm:$0xff]  ;;  %v8262_v36 = vld [vmem:[#allocation2 + $0x24] sm:$0xf]  ;;  %vm6876_vm5 = vcmask 957440  }
 0x27e   : > { %10758 = vmatprep.subr.msk.mxu0 %vm930_vm3, %v5137_v20  ;;  %8280 = vrot.lane.b32.xlu1 %v11973_v11, %s11259_s24  ;;  %v1946_v31 = vpop.permute.xlu1 %1945 }
 0x27f   : > { %10625 = vmatpush1.msk.msra.mxu1 %vm930_vm3, %v1256_v32  ;;  %1554 = vmatprep.mubr.f32.mxu1 %v13443_v18  ;;  %v13465_v32 = vld [vmem:[#allocation37_spill] sm:$0xff]  ;;  %v1957_v16 = vsel %vm1949_vm6, %v1946_v31, %v11886_v53  ;;  %v1956_v53 = vsel %vm1949_vm6, %v11859_v12, %v1946_v31 }
 0x280   : > { %5015 = vmatprep.mubr.f32.mxu0 %v13443_v18  ;;  %10626 = vmatmul.mubr.msk.f32.vlgmr.msra.gmra.mrb[18].mxu1 %vm369_vm1, %v11843_v61  ;;  %v5140_v14 = vsel %vm5135_vm15, %v13465_v32, %v12157_v25 }
 0x281   : > { %10631 = vmatprep.subr.msk.mxu1 %vm930_vm3, %v1599_v45  ;;  %10753 = vmatmul.mubr.msk.f32.vlgmr.msra.gmra.mrb[18].mxu0 %vm369_vm1, %v12273_v46  ;;  %v12319_v51 = vpop.permute.xlu0 %3715  ;;  %v1953_v45 = vsel %vm1949_vm6, %v13466_v35, %v11776_v8  ;;  %v1952_v8 = vsel %vm1949_vm6, %v11607_v57, %v13466_v35  ;;  %v12392_v57 = vld [vmem:[%s13354_s6 + $0x34] sm:$0xf]  ;;  %vm7230_vm6 = vcmask 318464  }
 0x282   : > { %10759 = vmatpush1.msk.msra.mxu0 %vm930_vm3, %v5136_v34  ;;  %10632 = vmatpush1.msk.msra.mxu1 %vm930_vm3, %v1598_v63  ;;  %v12326_v61 = vpop.permute.xlu1 %2653  ;;  %v13467_v63 = vld [vmem:[#allocation28_spill] sm:$0xff] }
 0x283   : > { %10764 = vmatprep.subr.msk.mxu0 %vm930_vm3, %v5141_v48  ;;  %8284 = vrot.lane.b32.xlu0 %v12020_v60, %s11259_s24  ;;  %v2307_v48 = vsel %vm2303_vm7, %v13467_v63, %v11768_v7  ;;  %v13471_v7 = vld [vmem:[#allocation7_spill] sm:$0xff] }
 0x284   : > { %8274 = vrot.lane.b32.xlu1 %v12050_v22, %s11259_s24  ;;  %10637 = vmatprep.subr.msk.mxu1 %vm930_vm3, %v1603_v49  ;;  %v13468_v49 = vld [vmem:[#allocation20_spill] sm:$0xff] }
 0x285   : > { %1758 = vmatprep.mubr.f32.mxu1 %v13443_v18  ;;  %5227 = vmatprep.mubr.f32.mxu0 %v13443_v18  ;;  %v12343_v41 = vpop.permute.xlu0 %4423 }
 0x286   : > { %10633 = vmatmul.mubr.msk.f32.vlgmr.msra.gmra.mrb[16].mxu1 %vm369_vm1, %v11880_v23  ;;  %10760 = vmatmul.mubr.msk.f32.vlgmr.msra.gmra.mrb[16].mxu0 %vm369_vm1, %v12336_v47  ;;  %v12354_v20 = vpop.permute.xlu1 %3361 }
 0x287   : > { %10638 = vmatpush1.msk.msra.mxu1 %vm930_vm3, %v1602_v0  ;;  %10765 = vmatpush1.msk.msra.mxu0 %vm930_vm3, %v5140_v14  ;;  %v13469_v14 = vld [vmem:[#allocation17_spill] sm:$0xff] }
 0x288   : > { %10644 = vmatprep.subr.msk.mxu1 %vm930_vm3, %v1953_v45  ;;  %10771 = vmatprep.subr.msk.mxu0 %vm930_vm3, %v12066_v43  ;;  %v5816_v0 = vsel %vm5814_vm0, %v13469_v14, %v13468_v49  ;;  %v5815_v35 = vsel %vm5814_vm0, %v13471_v7, %v13469_v14  ;;  %v13472_v45 = vld [vmem:[#allocation10_spill] sm:$0xff]  ;;  %v13474_v14 = vld [vmem:[#allocation39_spill] sm:$0xff]  ;;  %v13475_v7 = vld [vmem:[#allocation41_spill] sm:$0xff] }
 0x289   : > { %8288 = vrot.lane.b32.xlu0 %v11929_v52, %s11259_s24  ;;  %8286 = vrot.lane.b32.xlu1 %v11909_v17, %s11259_s24  ;;  %v12368_v28 = vpop.permute.xlu0 %5131 }
 0x28a   : > { %1900 = vmatprep.mubr.f32.mxu1 %v13443_v18  ;;  %5369 = vmatprep.mubr.f32.mxu0 %v13443_v18  ;;  %v12372_v25 = vpop.permute.xlu1 %4069 }
 0x28b   : > { %10639 = vmatmul.mubr.msk.f32.vlgmr.msra.gmra.mrb[18].mxu1 %vm369_vm1, %v11880_v23  ;;  %10766 = vmatmul.mubr.msk.f32.vlgmr.msra.gmra.mrb[18].mxu0 %vm369_vm1, %v12336_v47 }
 0x28c   : > { %10645 = vmatpush1.msk.msra.mxu1 %vm930_vm3, %v1952_v8  ;;  %10772 = vmatpush1.msk.msra.mxu0 %vm930_vm3, %v12050_v22  ;;  %v2306_v8 = vsel %vm2303_vm7, %v13472_v45, %v13467_v63 }
 0x28d   : > { %10650 = vmatprep.subr.msk.mxu1 %vm930_vm3, %v1957_v16  ;;  %10777 = vmatprep.subr.msk.mxu0 %vm930_vm3, %v12020_v60  ;;  %v12394_v23 = vpop.permute.xlu0 %6164  ;;  %v2311_v16 = vsel %vm2303_vm7, %v12268_v33, %v11954_v10 }
 0x28e   : > { %8630 = vrot.lane.b32.xlu0 %v12066_v43, %s11260_s11  ;;  %8290 = vrot.lane.b32.xlu1 %v8262_v36, %s11259_s24  ;;  %v12399_v34 = vpop.permute.xlu1 %4777  ;;  %s11263_s24 = smov 18  }
 0x28f   : > { %2112 = vmatprep.mubr.f32.mxu1 %v13443_v18  ;;  %5552 = vmatprep.mubr.f32.mxu0 %v13443_v18 }
 0x290   : > { %10646 = vmatmul.mubr.msk.f32.vlgmr.msra.gmra.mrb[16].mxu1 %vm369_vm1, %v11919_v19  ;;  %10773 = vmatmul.mubr.msk.f32.vlgmr.msra.gmra.mrb[16].mxu0 %vm369_vm1, %v12392_v57 }
 0x291   : > { %10651 = vmatpush1.msk.msra.mxu1 %vm930_vm3, %v1956_v53  ;;  %10778 = vmatpush1.msk.msra.mxu0 %vm930_vm3, %v12003_v2  ;;  %v12418_v12 = vpop.permute.xlu0 %6510  ;;  %v5820_v53 = vsel %vm5814_vm0, %v12227_v5, %v12180_v30 }
 0x292   : > { %13470 = vst [vmem:[#allocation16_spill] sm:$0xff] %v12418_v12  ;;  %10657 = vmatprep.subr.msk.mxu1 %vm930_vm3, %v2307_v48  ;;  %10784 = vmatprep.subr.msk.mxu0 %vm930_vm3, %v5816_v0  ;;  %v12422_v31 = vpop.permute.xlu1 %5810  ;;  %v5819_v0 = vsel %vm5814_vm0, %v13474_v14, %v12227_v5 }
 0x293   : > { %8634 = vrot.lane.b32.xlu0 %v11973_v11, %s11260_s11  ;;  %8632 = vrot.lane.b32.xlu1 %v11956_v55, %s11260_s11 }
 0x294   : > { %2254 = vmatprep.mubr.f32.mxu1 %v13443_v18  ;;  %5694 = vmatprep.mubr.f32.mxu0 %v13443_v18 }
 0x295   : > { %10652 = vmatmul.mubr.msk.f32.vlgmr.msra.gmra.mrb[18].mxu1 %vm369_vm1, %v11919_v19  ;;  %10779 = vmatmul.mubr.msk.f32.vlgmr.msra.gmra.mrb[18].mxu0 %vm369_vm1, %v12392_v57  ;;  %v12440_v36 = vpop.permute.xlu0 %6504  ;;  %v12457_v19 = vld [vmem:[%s13354_s6 + $0x38] sm:$0xf] }
 0x296   : > { %10658 = vmatpush1.msk.msra.mxu1 %vm930_vm3, %v2306_v8  ;;  %10785 = vmatpush1.msk.msra.mxu0 %vm930_vm3, %v5815_v35  ;;  %v12450_v63 = vpop.permute.xlu1 %6512  ;;  %v2310_v35 = vsel %vm2303_vm7, %v13475_v7, %v12268_v33  ;;  %v13476_v8 = vld [vmem:[#allocation25_spill] sm:$0xff]  ;;  %vm7584_vm7 = vcmask 310272  }
 0x297   : > { %10663 = vmatprep.subr.msk.mxu1 %vm930_vm3, %v2311_v16  ;;  %10790 = vmatprep.subr.msk.mxu0 %vm930_vm3, %v5820_v53  ;;  %v12462_v10 = vsel %vm6522_vm2, %v12418_v12, %v12450_v63  ;;  %v2661_v5 = vsel %vm2657_vm8, %v13476_v8, %v11782_v38  ;;  %v13477_v16 = vld [vmem:[#allocation19_spill] sm:$0xff]  ;;  %v13478_v53 = vld [vmem:[#allocation22_spill] sm:$0xff] }
 0x298   : > { %13473 = vst [vmem:[#allocation18_spill] sm:$0xff] %v12462_v10  ;;  %8628 = vrot.lane.b32.xlu0 %v12050_v22, %s11260_s11  ;;  %8636 = vrot.lane.b32.xlu1 %v12003_v2, %s11260_s11  ;;  %v6170_v33 = vsel %vm6168_vm4, %v13478_v53, %v13477_v16  ;;  %v8616_v12 = vld [vmem:[#allocation2 + $0x24] sm:$0xf] }
 0x299   : > { %2466 = vmatprep.mubr.f32.mxu1 %v13443_v18  ;;  %5906 = vmatprep.mubr.f32.mxu0 %v13443_v18  ;;  %v12470_v48 = vpop.permute.xlu0 %6516 }
 0x29a   : > { %10659 = vmatmul.mubr.msk.f32.vlgmr.msra.gmra.mrb[16].mxu1 %vm369_vm1, %v11966_v26  ;;  %10786 = vmatmul.mubr.msk.f32.vlgmr.msra.gmra.mrb[16].mxu0 %vm369_vm1, %v12457_v19  ;;  %v12482_v45 = vpop.permute.xlu1 %6514 }
 0x29b   : > { %10664 = vmatpush1.msk.msra.mxu1 %vm930_vm3, %v2310_v35  ;;  %10791 = vmatpush1.msk.msra.mxu0 %vm930_vm3, %v5819_v0  ;;  %v13479_v0 = vld [vmem:[#allocation9_spill] sm:$0xff] }
 0x29c   : > { %10670 = vmatprep.subr.msk.mxu1 %vm930_vm3, %v2661_v5  ;;  %10797 = vmatprep.subr.msk.mxu0 %vm930_vm3, %v6170_v33  ;;  %v6169_v35 = vsel %vm6168_vm4, %v13479_v0, %v13478_v53  ;;  %v13480_v5 = vld [vmem:[#allocation12_spill] sm:$0xff]  ;;  %v13483_v0 = vld [vmem:[#allocation42_spill] sm:$0xff] }
 0x29d   : > { %8640 = vrot.lane.b32.xlu0 %v11909_v17, %s11260_s11  ;;  %8638 = vrot.lane.b32.xlu1 %v12020_v60, %s11260_s11  ;;  %v6521_v7 = vpop.permute.xlu0 %6520  ;;  %v2660_v33 = vsel %vm2657_vm8, %v13480_v5, %v13476_v8  ;;  %v2665_v8 = vsel %vm2657_vm8, %v12326_v61, %v13483_v0  ;;  %v13484_v5 = vld [vmem:[#allocation38_spill] sm:$0xff]  ;;  %v13485_v0 = vld [vmem:[#allocation40_spill] sm:$0xff] }
 0x29e   : > { %2608 = vmatprep.mubr.f32.mxu1 %v13443_v18  ;;  %6048 = vmatprep.mubr.f32.mxu0 %v13443_v18  ;;  %v6519_v38 = vpop.permute.xlu1 %6518 }
 0x29f   : > { %10665 = vmatmul.mubr.msk.f32.vlgmr.msra.gmra.mrb[18].mxu1 %vm369_vm1, %v11966_v26  ;;  %10792 = vmatmul.mubr.msk.f32.vlgmr.msra.gmra.mrb[18].mxu0 %vm369_vm1, %v12457_v19  ;;  %v12512_v10 = vsel %vm6522_vm2, %v12470_v48, %v6519_v38  ;;  %v12515_v53 = vsel %vm6522_vm2, %v6519_v38, %v6521_v7  ;;  %v6174_v26 = vsel %vm6168_vm4, %v12198_v6, %v12249_v27  ;;  %v12530_v7 = vld [vmem:[%s13354_s6 + $0x3c] sm:$0xf] }
 0x2a0   : > { %13481 = vst [vmem:[#allocation26_spill] sm:$0xff] %v12512_v10  ;;  %13482 = vst [vmem:[#allocation8_spill] sm:$0xff] %v12515_v53  ;;  %10671 = vmatpush1.msk.msra.mxu1 %vm930_vm3, %v2660_v33  ;;  %10798 = vmatpush1.msk.msra.mxu0 %vm930_vm3, %v6169_v35  ;;  %v6173_v33 = vsel %vm6168_vm4, %v13484_v5, %v12198_v6  ;;  %v13487_v10 = vld [vmem:[#allocation23_spill] sm:$0xff]  ;;  %v13488_v6 = vld [vmem:[#allocation21_spill] sm:$0xff] }
 0x2a1   : > { %10676 = vmatprep.subr.msk.mxu1 %vm930_vm3, %v2665_v8  ;;  %10803 = vmatprep.subr.msk.mxu0 %vm930_vm3, %v6174_v26  ;;  %v6863_v38 = vpop.permute.xlu0 %6862  ;;  %v2664_v8 = vsel %vm2657_vm8, %v13485_v0, %v12326_v61  ;;  %v6524_v53 = vsel %vm6522_vm2, %v13488_v6, %v13487_v10  ;;  %vm7938_vm8 = vcmask 302080  }
 0x2a2   : > { %8644 = vrot.lane.b32.xlu0 %v8616_v12, %s11260_s11  ;;  %8642 = vrot.lane.b32.xlu1 %v11929_v52, %s11260_s11  ;;  %v6861_v35 = vpop.permute.xlu1 %6860  ;;  %v13486_v12 = vld [vmem:[#allocation30_spill] sm:$0xff] }
 0x2a3   : > { %2820 = vmatprep.mubr.f32.mxu1 %v13443_v18  ;;  %6260 = vmatprep.mubr.f32.mxu0 %v13443_v18  ;;  %v3015_v26 = vsel %vm3011_vm9, %v13486_v12, %v11774_v44 }
 0x2a4   : > { %10672 = vmatmul.mubr.msk.f32.vlgmr.msra.gmra.mrb[16].mxu1 %vm369_vm1, %v12008_v50  ;;  %10799 = vmatmul.mubr.msk.f32.vlgmr.msra.gmra.mrb[16].mxu0 %vm369_vm1, %v12530_v7 }
 0x2a5   : > { %10677 = vmatpush1.msk.msra.mxu1 %vm930_vm3, %v2664_v8  ;;  %10804 = vmatpush1.msk.msra.mxu0 %vm930_vm3, %v6173_v33  ;;  %v12555_v27 = vpop.permute.xlu0 %6866  ;;  %v6523_v8 = vsel %vm6522_vm2, %v12440_v36, %v13488_v6 }
 0x2a6   : > { %10683 = vmatprep.subr.msk.mxu1 %vm930_vm3, %v3015_v26  ;;  %10810 = vmatprep.subr.msk.mxu0 %vm930_vm3, %v6524_v53  ;;  %v6865_v61 = vpop.permute.xlu1 %6864  ;;  %v13489_v53 = vld [vmem:[#allocation11_spill] sm:$0xff] }
 0x2a7   : > { %8986 = vrot.lane.b32.xlu0 %v11956_v55, %s11261_s16  ;;  %8984 = vrot.lane.b32.xlu1 %v12066_v43, %s11261_s16  ;;  %v12564_v44 = vsel %vm6876_vm5, %v6863_v38, %v6865_v61  ;;  %v12568_v33 = vsel %vm6876_vm5, %v6865_v61, %v12555_v27  ;;  %v3014_v0 = vsel %vm3011_vm9, %v13489_v53, %v13486_v12  ;;  %v13490_v12 = vld [vmem:[#allocation44_spill] sm:$0xff] }
 0x2a8   : > { %2962 = vmatprep.mubr.f32.mxu1 %v13443_v18  ;;  %6402 = vmatprep.mubr.f32.mxu0 %v13443_v18  ;;  %v6528_v61 = vsel %vm6522_vm2, %v12482_v45, %v12470_v48  ;;  %v3019_v36 = vsel %vm3011_vm9, %v12297_v1, %v13490_v12  ;;  %v3018_v53 = vsel %vm3011_vm9, %v11996_v15, %v12297_v1  ;;  %v13491_v12 = vld [vmem:[#allocation27_spill] sm:$0xff]  ;;  %vm8292_vm9 = vcmask 236544  }
 0x2a9   : > { %10678 = vmatmul.mubr.msk.f32.vlgmr.msra.gmra.mrb[18].mxu1 %vm369_vm1, %v12008_v50  ;;  %10805 = vmatmul.mubr.msk.f32.vlgmr.msra.gmra.mrb[18].mxu0 %vm369_vm1, %v12530_v7  ;;  %v12582_v26 = vpop.permute.xlu0 %6868  ;;  %v12597_v50 = vld [vmem:[%s13354_s6 + $0x40] sm:$0xf]  ;;  %v3369_v15 = vsel %vm3365_vm10, %v13491_v12, %v11788_v4 }
 0x2aa   : > { %10684 = vmatpush1.msk.msra.mxu1 %vm930_vm3, %v3014_v0  ;;  %10811 = vmatpush1.msk.msra.mxu0 %vm930_vm3, %v6523_v8  ;;  %v6859_v6 = vpop.permute.xlu1 %6858  ;;  %v6527_v0 = vsel %vm6522_vm2, %v12450_v63, %v12482_v45  ;;  %v6878_v8 = vsel %vm6876_vm5, %v6861_v35, %v6863_v38  ;;  %v13492_v45 = vld [vmem:[#allocation14_spill] sm:$0xff] }
 0x2ab   : > { %10689 = vmatprep.subr.msk.mxu1 %vm930_vm3, %v3019_v36  ;;  %10816 = vmatprep.subr.msk.mxu0 %vm930_vm3, %v6528_v61  ;;  %v3368_v38 = vsel %vm3365_vm10, %v13492_v45, %v13491_v12  ;;  %v6877_v36 = vsel %vm6876_vm5, %v6859_v6, %v6861_v35  ;;  %v8970_v35 = vld [vmem:[#allocation2 + $0x24] sm:$0xf] }
 0x2ac   : > { %8990 = vrot.lane.b32.xlu0 %v12003_v2, %s11261_s16  ;;  %8988 = vrot.lane.b32.xlu1 %v11973_v11, %s11261_s16 }
 0x2ad   : > { %3174 = vmatprep.mubr.f32.mxu1 %v13443_v18  ;;  %6614 = vmatprep.mubr.f32.mxu0 %v13443_v18  ;;  %v6873_v48 = vpop.permute.xlu0 %6872 }
 0x2ae   : > { %10685 = vmatmul.mubr.msk.f32.vlgmr.msra.gmra.mrb[16].mxu1 %vm369_vm1, %v12048_v62  ;;  %10812 = vmatmul.mubr.msk.f32.vlgmr.msra.gmra.mrb[16].mxu0 %vm369_vm1, %v12597_v50  ;;  %v6871_v61 = vpop.permute.xlu1 %6870 }
 0x2af   : > { %10690 = vmatpush1.msk.msra.mxu1 %vm930_vm3, %v3018_v53  ;;  %10817 = vmatpush1.msk.msra.mxu0 %vm930_vm3, %v6527_v0  ;;  %v12622_v1 = vsel %vm6876_vm5, %v6871_v61, %v6873_v48  ;;  %v13493_v0 = vld [vmem:[#allocation43_spill] sm:$0xff]  ;;  %v6882_v12 = vsel %vm6876_vm5, %v12582_v26, %v6871_v61 }
 0x2b0   : > { %10696 = vmatprep.subr.msk.mxu1 %vm930_vm3, %v3369_v15  ;;  %8992 = vrot.lane.b32.xlu0 %v12020_v60, %s11261_s16 }
 0x2b1   : > { %8982 = vrot.lane.b32.xlu1 %v12050_v22, %s11261_s16  ;;  %10823 = vmatprep.subr.msk.mxu0 %vm930_vm3, %v6878_v8  ;;  %v12630_v63 = vpop.permute.xlu0 %7214  ;;  %v3373_v8 = vsel %vm3365_vm10, %v12354_v20, %v13493_v0  ;;  %v13496_v0 = vld [vmem:[#allocation47_spill] sm:$0xff] }
 0x2b2   : > { %3316 = vmatprep.mubr.f32.mxu1 %v13443_v18  ;;  %6756 = vmatprep.mubr.f32.mxu0 %v13443_v18  ;;  %v6875_v4 = vpop.permute.xlu1 %6874 }
 0x2b3   : > { %10691 = vmatmul.mubr.msk.f32.vlgmr.msra.gmra.mrb[18].mxu1 %vm369_vm1, %v12048_v62  ;;  %10818 = vmatmul.mubr.msk.f32.vlgmr.msra.gmra.mrb[18].mxu0 %vm369_vm1, %v12597_v50  ;;  %v12643_v53 = vsel %vm6876_vm5, %v6873_v48, %v6875_v4  ;;  %v3372_v48 = vsel %vm3365_vm10, %v11989_v40, %v12354_v20  ;;  %v13494_v4 = vld [vmem:[#allocation32_spill] sm:$0xff]  ;;  %v12676_v40 = vld [vmem:[%s13354_s6 + $0x44] sm:$0xf]  ;;  %vm8646_vm10 = vcmask 228352  }
 0x2b4   : > { %10697 = vmatpush1.msk.msra.mxu1 %vm930_vm3, %v3368_v38  ;;  %8996 = vrot.lane.b32.xlu0 %v11929_v52, %s11261_s16  ;;  %v3723_v45 = vsel %vm3719_vm11, %v13494_v4, %v11780_v54  ;;  %v13495_v54 = vld [vmem:[#allocation13_spill] sm:$0xff] }
 0x2b5   : > { %10702 = vmatprep.subr.msk.mxu1 %vm930_vm3, %v3373_v8  ;;  %8994 = vrot.lane.b32.xlu1 %v11909_v17, %s11261_s16  ;;  %v7219_v62 = vpop.permute.xlu0 %7218  ;;  %v3722_v38 = vsel %vm3719_vm11, %v13495_v54, %v13494_v4  ;;  %v3727_v8 = vsel %vm3719_vm11, %v12319_v51, %v13496_v0 }
 0x2b6   : > { %3528 = vmatprep.mubr.f32.mxu1 %v13443_v18  ;;  %10824 = vmatpush1.msk.msra.mxu0 %vm930_vm3, %v6877_v36  ;;  %v7217_v6 = vpop.permute.xlu1 %7216 }
 0x2b7   : > { %10698 = vmatmul.mubr.msk.f32.vlgmr.msra.gmra.mrb[16].mxu1 %vm369_vm1, %v12095_v56  ;;  %6968 = vmatprep.mubr.f32.mxu0 %v13443_v18  ;;  %v12665_v15 = vsel %vm7230_vm6, %v7217_v6, %v7219_v62 }
 0x2b8   : > { %10703 = vmatpush1.msk.msra.mxu1 %vm930_vm3, %v3372_v48  ;;  %9338 = vrot.lane.b32.xlu0 %v12066_v43, %s11262_s19 }
 0x2b9   : > { %10709 = vmatprep.subr.msk.mxu1 %vm930_vm3, %v3723_v45  ;;  %8998 = vrot.lane.b32.xlu1 %v8970_v35, %s11261_s16  ;;  %v7213_v20 = vpop.permute.xlu0 %7212  ;;  %v7232_v35 = vsel %vm7230_vm6, %v12630_v63, %v7217_v6 }
 0x2ba   : > { %3670 = vmatprep.mubr.f32.mxu1 %v13443_v18  ;;  %10829 = vmatprep.subr.msk.mxu0 %vm930_vm3, %v6882_v12  ;;  %v7221_v61 = vpop.permute.xlu1 %7220  ;;  %v13497_v12 = vld [vmem:[#allocation45_spill] sm:$0xff] }
 0x2bb   : > { %10704 = vmatmul.mubr.msk.f32.vlgmr.msra.gmra.mrb[18].mxu1 %vm369_vm1, %v12095_v56  ;;  %10825 = vmatmul.mubr.msk.f32.vlgmr.msra.gmra.mrb[16].mxu0 %vm369_vm1, %v12676_v40  ;;  %v12690_v36 = vsel %vm7230_vm6, %v7219_v62, %v7221_v61  ;;  %v6881_v56 = vsel %vm6876_vm5, %v12555_v27, %v12582_v26  ;;  %v3726_v4 = vsel %vm3719_vm11, %v13497_v12, %v12319_v51  ;;  %v13498_v27 = vld [vmem:[#allocation29_spill] sm:$0xff]  ;;  %vm9000_vm11 = vcmask 220160  }
 0x2bc   : > { %10710 = vmatpush1.msk.msra.mxu1 %vm930_vm3, %v3722_v38  ;;  %9342 = vrot.lane.b32.xlu0 %v11973_v11, %s11262_s19  ;;  %v4077_v26 = vsel %vm4073_vm12, %v13498_v27, %v11794_v39  ;;  %v4076_v6 = vsel %vm4073_vm12, %v11651_v24, %v13498_v27  ;;  %v7231_v39 = vsel %vm7230_vm6, %v7213_v20, %v12630_v63  ;;  %v13499_v24 = vld [vmem:[#allocation46_spill] sm:$0xff] }
 0x2bd   : > { %10715 = vmatprep.subr.msk.mxu1 %vm930_vm3, %v3727_v8  ;;  %9340 = vrot.lane.b32.xlu1 %v11956_v55, %s11262_s19  ;;  %v7225_v62 = vpop.permute.xlu0 %7224  ;;  %v4081_v0 = vsel %vm4073_vm12, %v12372_v25, %v13499_v24  ;;  %v4080_v8 = vsel %vm4073_vm12, %v12056_v29, %v12372_v25  ;;  %v13502_v25 = vld [vmem:[#allocation15_spill] sm:$0xff]  ;;  %vm9354_vm12 = vcmask 154624  }
 0x2be   : > { %3882 = vmatprep.mubr.f32.mxu1 %v13443_v18  ;;  %10830 = vmatpush1.msk.msra.mxu0 %vm930_vm3, %v6881_v56  ;;  %v7223_v48 = vpop.permute.xlu1 %7222  ;;  %v13501_v56 = vld [vmem:[#allocation34_spill] sm:$0xff] }
 0x2bf   : > { %10711 = vmatmul.mubr.msk.f32.vlgmr.msra.gmra.mrb[16].mxu1 %vm369_vm1, %v12134_v13  ;;  %10836 = vmatprep.subr.msk.mxu0 %vm930_vm3, %v7232_v35  ;;  %v13500_v35 = vld [vmem:[#allocation51_spill] sm:$0xff]  ;;  %v4431_v12 = vsel %vm4427_vm13, %v13501_v56, %v11786_v37  ;;  %v7235_v27 = vsel %vm7230_vm6, %v7221_v61, %v7223_v48 }
 0x2c0   : > { %10716 = vmatpush1.msk.msra.mxu1 %vm930_vm3, %v3726_v4  ;;  %9336 = vrot.lane.b32.xlu0 %v12050_v22, %s11262_s19  ;;  %v12766_v4 = vld [vmem:[%s13354_s6 + $0x48] sm:$0xf] }
 0x2c1   : > { %10722 = vmatprep.subr.msk.mxu1 %vm930_vm3, %v4077_v26  ;;  %9344 = vrot.lane.b32.xlu1 %v12003_v2, %s11262_s19  ;;  %v7229_v51 = vpop.permute.xlu0 %7228 }
 0x2c2   : > { %4024 = vmatprep.mubr.f32.mxu1 %v13443_v18  ;;  %7110 = vmatprep.mubr.f32.mxu0 %v13443_v18  ;;  %v7227_v45 = vpop.permute.xlu1 %7226 }
 0x2c3   : > { %10717 = vmatmul.mubr.msk.f32.vlgmr.msra.gmra.mrb[18].mxu1 %vm369_vm1, %v12134_v13  ;;  %10831 = vmatmul.mubr.msk.f32.vlgmr.msra.gmra.mrb[18].mxu0 %vm369_vm1, %v12676_v40  ;;  %v12735_v54 = vsel %vm7230_vm6, %v7225_v62, %v7227_v45  ;;  %v12738_v38 = vsel %vm7230_vm6, %v7227_v45, %v7229_v51  ;;  %v9324_v13 = vld [vmem:[#allocation2 + $0x24] sm:$0xf] }
 0x2c4   : > { %10723 = vmatpush1.msk.msra.mxu1 %vm930_vm3, %v4076_v6  ;;  %9348 = vrot.lane.b32.xlu0 %v11909_v17, %s11262_s19  ;;  %v7236_v17 = vsel %vm7230_vm6, %v7223_v48, %v7225_v62  ;;  %v4430_v62 = vsel %vm4427_vm13, %v13502_v25, %v13501_v56  ;;  %v13503_v51 = vld [vmem:[#allocation50_spill] sm:$0xff] }
 0x2c5   : > { %10728 = vmatprep.subr.msk.mxu1 %vm930_vm3, %v4081_v0  ;;  %9346 = vrot.lane.b32.xlu1 %v12020_v60, %s11262_s19  ;;  %v7571_v63 = vpop.permute.xlu0 %7570  ;;  %v4435_v6 = vsel %vm4427_vm13, %v12343_v41, %v13503_v51 }
 0x2c6   : > { %4236 = vmatprep.mubr.f32.mxu1 %v13443_v18  ;;  %10837 = vmatpush1.msk.msra.mxu0 %vm930_vm3, %v7231_v39  ;;  %v7569_v20 = vpop.permute.xlu1 %7568  ;;  %v13504_v39 = vld [vmem:[#allocation48_spill] sm:$0xff] }
 0x2c7   : > { %10724 = vmatmul.mubr.msk.f32.vlgmr.msra.gmra.mrb[16].mxu1 %vm369_vm1, %v13500_v35  ;;  %7322 = vmatprep.mubr.f32.mxu0 %v13443_v18  ;;  %v7586_v61 = vsel %vm7584_vm7, %v7569_v20, %v7571_v63  ;;  %v4434_v24 = vsel %vm4427_vm13, %v13504_v39, %v12343_v41  ;;  %vm9708_vm13 = vcmask 146432  }
 0x2c8   : > { %10729 = vmatpush1.msk.msra.mxu1 %vm930_vm3, %v4080_v8  ;;  %9352 = vrot.lane.b32.xlu0 %v9324_v13, %s11262_s19  ;;  %v13506_v8 = vld [vmem:[#allocation49_spill] sm:$0xff] }
 0x2c9   : > { %10735 = vmatprep.subr.msk.mxu1 %vm930_vm3, %v4431_v12  ;;  %9350 = vrot.lane.b32.xlu1 %v11929_v52, %s11262_s19  ;;  %v12771_v29 = vpop.permute.xlu0 %7574  ;;  %v9678_v12 = vld [vmem:[#allocation2 + $0x24] sm:$0xf] }
 0x2ca   : > { %4378 = vmatprep.mubr.f32.mxu1 %v13443_v18  ;;  %10842 = vmatprep.subr.msk.mxu0 %vm930_vm3, %v7236_v17  ;;  %v7573_v37 = vpop.permute.xlu1 %7572  ;;  %v13507_v17 = vld [vmem:[#allocation35_spill] sm:$0xff] }
 0x2cb   : > { %10730 = vmatmul.mubr.msk.f32.vlgmr.msra.gmra.mrb[18].mxu1 %vm369_vm1, %v13500_v35  ;;  %10838 = vmatmul.mubr.msk.f32.vlgmr.msra.gmra.mrb[16].mxu0 %vm369_vm1, %v12766_v4  ;;  %v12784_v52 = vsel %vm7584_vm7, %v7571_v63, %v7573_v37  ;;  %v12788_v26 = vsel %vm7584_vm7, %v7573_v37, %v12771_v29  ;;  %v5139_v56 = vsel %vm5135_vm15, %v13507_v17, %v13465_v32  ;;  %v13508_v37 = vld [vmem:[#allocation52_spill] sm:$0xff] }
 0x2cc   : > { %10736 = vmatpush1.msk.msra.mxu1 %vm930_vm3, %v4430_v62  ;;  %9694 = vrot.lane.b32.xlu0 %v11956_v55, %s11263_s24  ;;  %v13505_v55 = vld [vmem:[#allocation31_spill] sm:$0xff]  ;;  %v5138_v25 = vsel %vm5135_vm15, %v13461_v59, %v13507_v17  ;;  %v13511_v17 = vld [vmem:[#allocation36_spill] sm:$0xff] }
 0x2cd   : > { %10741 = vmatprep.subr.msk.mxu1 %vm930_vm3, %v4435_v6  ;;  %9692 = vrot.lane.b32.xlu1 %v12066_v43, %s11263_s24  ;;  %v7577_v48 = vpop.permute.xlu0 %7576  ;;  %v4785_v0 = vsel %vm4781_vm14, %v13505_v55, %v11802_v42  ;;  %v4784_v63 = vsel %vm4781_vm14, %v11665_v9, %v13505_v55  ;;  %v12826_v42 = vld [vmem:[#allocation2 + $0x1c] sm:$0xff]  ;;  %v4789_v9 = vsel %vm4781_vm14, %v12399_v34, %v13506_v8  ;;  %v5456_v62 = vld [vmem:[#allocation2 + $0xc] sm:$0xff] }
 0x2ce   : > { %4590 = vmatprep.mubr.f32.mxu1 %v13443_v18  ;;  %10843 = vmatpush1.msk.msra.mxu0 %vm930_vm3, %v7235_v27  ;;  %v7567_v45 = vpop.permute.xlu1 %7566  ;;  %v5143_v27 = vsel %vm5135_vm15, %v12368_v28, %v13508_v37  ;;  %v5466_v6 = vcombine.high %v5456_v62, %v5456_v62  ;;  %v13513_v37 = vld [vmem:[#allocation53_spill] sm:$0xff] }
 0x2cf   : > { %10737 = vmatmul.mubr.msk.f32.vlgmr.msra.gmra.mrb[16].mxu1 %vm369_vm1, %v12216_v21  ;;  %10849 = vmatprep.subr.msk.mxu0 %vm930_vm3, %v7586_v61 }
 0x2d0   : > { %10742 = vmatpush1.msk.msra.mxu1 %vm930_vm3, %v4434_v24  ;;  %9698 = vrot.lane.b32.xlu0 %v12003_v2, %s11263_s24  ;;  %v7585_v2 = vsel %vm7584_vm7, %v7567_v45, %v7569_v20  ;;  %v12847_v20 = vcombine.high %v12826_v42, %v12826_v42  ;;  %v10030_v45 = vld [vmem:[#allocation2 + $0x14] sm:$0xff] }
 0x2d1   : > { %10748 = vmatprep.subr.msk.mxu1 %vm930_vm3, %v4785_v0  ;;  %9696 = vrot.lane.b32.xlu1 %v11973_v11, %s11263_s24  ;;  %v12817_v41 = vpop.permute.xlu0 %7580  ;;  %v10042_v24 = vcombine.high %v10030_v45, %v10030_v45  ;;  %v13509_v0 = vld [vmem:[#allocation33_spill] sm:$0xff] }
 0x2d2   : > { %4732 = vmatprep.mubr.f32.mxu1 %v13443_v18  ;;  %7464 = vmatprep.mubr.f32.mxu0 %v13443_v18  ;;  %v7579_v13 = vpop.permute.xlu1 %7578 }
 0x2d3   : > { %10743 = vmatmul.mubr.msk.f32.vlgmr.msra.gmra.mrb[18].mxu1 %vm369_vm1, %v12216_v21  ;;  %10844 = vmatmul.mubr.msk.f32.vlgmr.msra.gmra.mrb[18].mxu0 %vm369_vm1, %v12766_v4  ;;  %v12833_v11 = vsel %vm7584_vm7, %v7579_v13, %v12817_v41 }
 0x2d4   : > { %10749 = vmatpush1.msk.msra.mxu1 %vm930_vm3, %v4784_v63  ;;  %9700 = vrot.lane.b32.xlu0 %v12020_v60, %s11263_s24  ;;  %v4788_v60 = vsel %vm4781_vm14, %v12117_v58, %v12399_v34  ;;  %v12868_v58 = vld [vmem:[%s13354_s6 + $0x4c] sm:$0xf]  ;;  %v12947_v63 = vld [vmem:[%s13354_s6 + $0x50] sm:$0xf]  ;;  %vm10062_vm14 = vcmask 138240  }
 0x2d5   : > { %10754 = vmatprep.subr.msk.mxu1 %vm930_vm3, %v4789_v9  ;;  %9690 = vrot.lane.b32.xlu1 %v12050_v22, %s11263_s24  ;;  %v7923_v21 = vpop.permute.xlu0 %7922  ;;  %v7590_v22 = vsel %vm7584_vm7, %v7577_v48, %v7579_v13  ;;  %v5818_v13 = vsel %vm5814_vm0, %v13509_v0, %v13474_v14  ;;  %v5817_v14 = vsel %vm5814_vm0, %v13468_v49, %v13509_v0  ;;  %v13510_v9 = vld [vmem:[#allocation6_spill] sm:$0xff] }
 0x2d6   : > { %4944 = vmatprep.mubr.f32.mxu1 %v13443_v18  ;;  %10850 = vmatpush1.msk.msra.mxu0 %vm930_vm3, %v7585_v2  ;;  %v12850_v35 = vpop.permute.xlu1 %7582  ;;  %v10032_v2 = vld [vmem:[#allocation2 + $0x24] sm:$0xf] }
 0x2d7   : > { %10750 = vmatmul.mubr.msk.f32.vlgmr.msra.gmra.mrb[16].mxu1 %vm369_vm1, %v12273_v46  ;;  %7676 = vmatprep.mubr.f32.mxu0 %v13443_v18 }
 0x2d8   : > { %10755 = vmatpush1.msk.msra.mxu1 %vm930_vm3, %v4788_v60  ;;  %9704 = vrot.lane.b32.xlu0 %v12847_v20, %s11263_s24  ;;  %v5821_v60 = vsel %vm5814_vm0, %v12180_v30, %v12422_v31 }
 0x2d9   : > { %10761 = vmatprep.subr.msk.mxu1 %vm930_vm3, %v5139_v56  ;;  %9702 = vrot.lane.b32.xlu1 %v12826_v42, %s11263_s24  ;;  %v12873_v34 = vpop.permute.xlu0 %7926  ;;  %v6172_v56 = vsel %vm6168_vm4, %v13511_v17, %v13484_v5  ;;  %v13512_v5 = vld [vmem:[#allocation5_spill] sm:$0xff] }
 0x2da   : > { %5086 = vmatprep.mubr.f32.mxu1 %v13443_v18  ;;  %10855 = vmatprep.subr.msk.mxu0 %vm930_vm3, %v7590_v22  ;;  %v12877_v32 = vpop.permute.xlu1 %7924 }
 0x2db   : > { %10756 = vmatmul.mubr.msk.f32.vlgmr.msra.gmra.mrb[18].mxu1 %vm369_vm1, %v12273_v46  ;;  %10851 = vmatmul.mubr.msk.f32.vlgmr.msra.gmra.mrb[16].mxu0 %vm369_vm1, %v12868_v58  ;;  %v7940_v59 = vsel %vm7938_vm8, %v7923_v21, %v12877_v32  ;;  %v7589_v46 = vsel %vm7584_vm7, %v12771_v29, %v7577_v48  ;;  %v11223_v48 = vld [vmem:[#allocation2 + $0x4] sm:$0xff]  ;;  %v7941_v0 = vsel %vm7938_vm8, %v12877_v32, %v12873_v34 }
 0x2dc   : > { %10762 = vmatpush1.msk.msra.mxu1 %vm930_vm3, %v5138_v25  ;;  %10046 = vrot.lane.b32.xlu0 %v12066_v43, %s11264_s28  ;;  %v5142_v43 = vsel %vm5135_vm15, %v12186_v3, %v12368_v28 }
 0x2dd   : > { %10767 = vmatprep.subr.msk.mxu1 %vm930_vm3, %v5143_v27  ;;  %9706 = vrot.lane.b32.xlu1 %v9678_v12, %s11263_s24  ;;  %v7921_v51 = vpop.permute.xlu0 %7920  ;;  %v6176_v12 = vsel %vm6168_vm4, %v12394_v23, %v13512_v5  ;;  %v13019_v27 = vld [vmem:[%s13354_s6 + $0x54] sm:$0xf] }
 0x2de   : > { %5298 = vmatprep.mubr.f32.mxu1 %v13443_v18  ;;  %10856 = vmatpush1.msk.msra.mxu0 %vm930_vm3, %v7589_v46  ;;  %v12900_v61 = vpop.permute.xlu1 %7928  ;;  %v7939_v28 = vsel %vm7938_vm8, %v7921_v51, %v7923_v21  ;;  %v5822_v21 = vsel %vm5814_vm0, %v12422_v31, %v13510_v9  ;;  %v6171_v31 = vsel %vm6168_vm4, %v13477_v16, %v13511_v17 }
 0x2df   : > { %10763 = vmatmul.mubr.msk.f32.vlgmr.msra.gmra.mrb[16].mxu1 %vm369_vm1, %v12336_v47  ;;  %10862 = vmatprep.subr.msk.mxu0 %vm930_vm3, %v7940_v59  ;;  %v6175_v16 = vsel %vm6168_vm4, %v13513_v37, %v12394_v23  ;;  %v13514_v59 = vld [vmem:[#allocation18_spill] sm:$0xff]  ;;  %v13515_v23 = vld [vmem:[#allocation16_spill] sm:$0xff] }
 0x2e0   : > { %10768 = vmatpush1.msk.msra.mxu1 %vm930_vm3, %v5142_v43  ;;  %10050 = vrot.lane.b32.xlu0 %v5466_v6, %s11264_s28  ;;  %v6525_v46 = vsel %vm6522_vm2, %v13487_v10, %v13515_v23 }
 0x2e1   : > { %10774 = vmatprep.subr.msk.mxu1 %vm930_vm3, %v5466_v6  ;;  %10048 = vrot.lane.b32.xlu1 %v5456_v62, %s11264_s28  ;;  %v12912_v29 = vpop.permute.xlu0 %7932 }
 0x2e2   : > { %5440 = vmatprep.mubr.f32.mxu1 %v13443_v18  ;;  %7818 = vmatprep.mubr.f32.mxu0 %v13443_v18  ;;  %v7931_v3 = vpop.permute.xlu1 %7930 }
 0x2e3   : > { %10769 = vmatmul.mubr.msk.f32.vlgmr.msra.gmra.mrb[18].mxu1 %vm369_vm1, %v12336_v47  ;;  %10857 = vmatmul.mubr.msk.f32.vlgmr.msra.gmra.mrb[18].mxu0 %vm369_vm1, %v12868_v58  ;;  %v7944_v55 = vsel %vm7938_vm8, %v7931_v3, %v12912_v29 }
 0x2e4   : > { %10775 = vmatpush1.msk.msra.mxu1 %vm930_vm3, %v5456_v62  ;;  %10044 = vrot.lane.b32.xlu0 %v11223_v48, %s11264_s28 }
 0x2e5   : > { %10780 = vmatprep.subr.msk.mxu1 %vm930_vm3, %v12847_v20  ;;  %10052 = vrot.lane.b32.xlu1 %v10030_v45, %s11264_s28  ;;  %v12926_v39 = vpop.permute.xlu0 %7936 }
 0x2e6   : > { %5623 = vmatprep.mubr.f32.mxu1 %v13443_v18  ;;  %10863 = vmatpush1.msk.msra.mxu0 %vm930_vm3, %v7939_v28  ;;  %v12930_v47 = vpop.permute.xlu1 %7934 }
 0x2e7   : > { %10776 = vmatmul.mubr.msk.f32.vlgmr.msra.gmra.mrb[16].mxu1 %vm369_vm1, %v12392_v57  ;;  %8030 = vmatprep.mubr.f32.mxu0 %v13443_v18 }
 0x2e8   : > { %10781 = vmatpush1.msk.msra.mxu1 %vm930_vm3, %v12826_v42  ;;  %10056 = vrot.lane.b32.xlu0 %v12826_v42, %s11264_s28  ;;  %v7943_v42 = vsel %vm7938_vm8, %v12900_v61, %v7931_v3  ;;  %v13516_v3 = vld [vmem:[#allocation8_spill] sm:$0xff] }
 0x2e9   : > { %10787 = vmatprep.subr.msk.mxu1 %vm930_vm3, %v5818_v13  ;;  %10054 = vrot.lane.b32.xlu1 %v10042_v24, %s11264_s28 }
 0x2ea   : > { %5765 = vmatprep.mubr.f32.mxu1 %v13443_v18  ;;  %10868 = vmatprep.subr.msk.mxu0 %vm930_vm3, %v7944_v55  ;;  %v13089_v55 = vld [vmem:[%s13354_s6 + $0x58] sm:$0xf] }
 0x2eb   : > { %10782 = vmatmul.mubr.msk.f32.vlgmr.msra.gmra.mrb[18].mxu1 %vm369_vm1, %v12392_v57  ;;  %10864 = vmatmul.mubr.msk.f32.vlgmr.msra.gmra.mrb[16].mxu0 %vm369_vm1, %v12947_v63  ;;  %v12962_v8 = vpop.permute.xlu0 %8278 }
 0x2ec   : > { %10788 = vmatpush1.msk.msra.mxu1 %vm930_vm3, %v5817_v14  ;;  %10060 = vrot.lane.b32.xlu0 %v10032_v2, %s11264_s28  ;;  %v8277_v49 = vpop.permute.xlu1 %8276 }
 0x2ed   : > { %10793 = vmatprep.subr.msk.mxu1 %vm930_vm3, %v5822_v21  ;;  %10058 = vrot.lane.b32.xlu1 %v12847_v20, %s11264_s28  ;;  %v8294_v57 = vsel %vm8292_vm9, %v8277_v49, %v12962_v8  ;;  %v10382_v20 = vld [vmem:[%s13355_s7] sm:$0xf] }
 0x2ee   : > { %5977 = vmatprep.mubr.f32.mxu1 %v13443_v18  ;;  %10869 = vmatpush1.msk.msra.mxu0 %vm930_vm3, %v7943_v42 }
 0x2ef   : > { %10789 = vmatmul.mubr.msk.f32.vlgmr.msra.gmra.mrb[16].mxu1 %vm369_vm1, %v12457_v19  ;;  %10875 = vmatprep.subr.msk.mxu0 %vm930_vm3, %v8294_v57  ;;  %v12982_v22 = vpop.permute.xlu0 %8282 }
 0x2f0   : > { %10794 = vmatpush1.msk.msra.mxu1 %vm930_vm3, %v5821_v60  ;;  %6119 = vmatprep.mubr.f32.mxu1 %v13443_v18  ;;  %v12992_v30 = vpop.permute.xlu1 %8280 }
 0x2f1   : > { %10800 = vmatprep.subr.msk.mxu1 %vm930_vm3, %v6172_v56  ;;  %8172 = vmatprep.mubr.f32.mxu0 %v13443_v18 }
 0x2f2   : > { %10870 = vmatmul.mubr.msk.f32.vlgmr.msra.gmra.mrb[18].mxu0 %vm369_vm1, %v12947_v63  ;;  %10385 = vperm.xlu1 %11207, %v10382_v20  }
 0x2f3   : > { %10795 = vmatmul.mubr.msk.f32.vlgmr.msra.gmra.mrb[18].mxu1 %vm369_vm1, %v12457_v19  ;;  %8384 = vmatprep.mubr.f32.mxu0 %v13443_v18 }
 0x2f4   : > { %10801 = vmatpush1.msk.msra.mxu1 %vm930_vm3, %v6171_v31  ;;  %6331 = vmatprep.mubr.f32.mxu1 %v13443_v18 }
 0x2f5   : > { %10806 = vmatprep.subr.msk.mxu1 %vm930_vm3, %v6176_v12  ;;  %v8285_v25 = vpop.permute.xlu0 %8284 }
 0x2f6   : > { %v8275_v62 = vpop.permute.xlu1 %8274  ;;  %v8297_v10 = vsel %vm8292_vm9, %v12982_v22, %v8285_v25 }
 0x2f7   : > { %10802 = vmatmul.mubr.msk.f32.vlgmr.msra.gmra.mrb[16].mxu1 %vm369_vm1, %v12530_v7  ;;  %v8293_v19 = vsel %vm8292_vm9, %v8275_v62, %v8277_v49 }
 0x2f8   : > { %10807 = vmatpush1.msk.msra.mxu1 %vm930_vm3, %v6175_v16  ;;  %6473 = vmatprep.mubr.f32.mxu1 %v13443_v18  ;;  %v10913_v16 = vld [vmem:[%s13354_s6 + $0x60] sm:$0xf] }
 0x2f9   : > { %10813 = vmatprep.subr.msk.mxu1 %vm930_vm3, %v13514_v59  ;;  %10876 = vmatpush1.msk.msra.mxu0 %vm930_vm3, %v8293_v19 }
 0x2fa   : > { %10877 = vmatmul.mubr.msk.f32.vlgmr.msra.gmra.mrb[16].mxu0 %vm369_vm1, %v13019_v27 }
 0x2fb   : > { %10808 = vmatmul.mubr.msk.f32.vlgmr.msra.gmra.mrb[18].mxu1 %vm369_vm1, %v12530_v7  ;;  %v13033_v51 = vpop.permute.xlu0 %8288  ;;  %v13035_v6 = vpop.permute.xlu1 %8286  ;;  %8526 = vmatprep.mubr.f32.mxu0 %v13443_v18  ;;  %v13517_v7 = vld [vmem:[#allocation26_spill] sm:$0xff] }
 0x2fc   : > { %10814 = vmatpush1.msk.msra.mxu1 %vm930_vm3, %v6525_v46  ;;  %6685 = vmatprep.mubr.f32.mxu1 %v13443_v18  ;;  %v8298_v43 = vsel %vm8292_vm9, %v8285_v25, %v13035_v6  ;;  %v8299_v42 = vsel %vm8292_vm9, %v13035_v6, %v13033_v51 }
 0x2fd   : > { %10819 = vmatprep.subr.msk.mxu1 %vm930_vm3, %v13516_v3  ;;  %10881 = vmatprep.subr.msk.mxu0 %vm930_vm3, %v8298_v43 }
 0x2fe   : > { %10882 = vmatpush1.msk.msra.mxu0 %vm930_vm3, %v8297_v10 }
 0x2ff   : > { %10815 = vmatmul.mubr.msk.f32.vlgmr.msra.gmra.mrb[16].mxu1 %vm369_vm1, %v12597_v50  ;;  %10883 = vmatmul.mubr.msk.f32.vlgmr.msra.gmra.mrb[18].mxu0 %vm369_vm1, %v13019_v27 }
 0x300   : > { %10820 = vmatpush1.msk.msra.mxu1 %vm930_vm3, %v13517_v7  ;;  %6827 = vmatprep.mubr.f32.mxu1 %v13443_v18  ;;  %v8631_v28 = vpop.permute.xlu0 %8630  ;;  %v13055_v48 = vpop.permute.xlu1 %8290 }
 0x301   : > { %10826 = vmatprep.subr.msk.mxu1 %vm930_vm3, %v12568_v33  ;;  %8738 = vmatprep.mubr.f32.mxu0 %v13443_v18  ;;  %v8300_v2 = vsel %vm8292_vm9, %v13033_v51, %v13055_v48 }
 0x303   : > { %10821 = vmatmul.mubr.msk.f32.vlgmr.msra.gmra.mrb[18].mxu1 %vm369_vm1, %v12597_v50 }
 0x304   : > { %10827 = vmatpush1.msk.msra.mxu1 %vm930_vm3, %v12564_v44  ;;  %7039 = vmatprep.mubr.f32.mxu1 %v13443_v18 }
 0x305   : > { %10832 = vmatprep.subr.msk.mxu1 %vm930_vm3, %v12643_v53  ;;  %v13067_v45 = vpop.permute.xlu0 %8634  ;;  %v13069_v24 = vpop.permute.xlu1 %8632 }
 0x306   : > { %v8648_v33 = vsel %vm8646_vm10, %v8631_v28, %v13069_v24  ;;  %v8649_v60 = vsel %vm8646_vm10, %v13069_v24, %v13067_v45 }
 0x307   : > { %10828 = vmatmul.mubr.msk.f32.vlgmr.msra.gmra.mrb[16].mxu1 %vm369_vm1, %v12676_v40  ;;  %10888 = vmatprep.subr.msk.mxu0 %vm930_vm3, %v8648_v33 }
 0x308   : > { %10833 = vmatpush1.msk.msra.mxu1 %vm930_vm3, %v12622_v1  ;;  %7181 = vmatprep.mubr.f32.mxu1 %v13443_v18 }
 0x309   : > { %10839 = vmatprep.subr.msk.mxu1 %vm930_vm3, %v12690_v36 }
 0x30a   : > { %v8629_v44 = vpop.permute.xlu0 %8628  ;;  %v13081_v50 = vpop.permute.xlu1 %8636 }
 0x30b   : > { %10834 = vmatmul.mubr.msk.f32.vlgmr.msra.gmra.mrb[18].mxu1 %vm369_vm1, %v12676_v40  ;;  %v8647_v53 = vsel %vm8646_vm10, %v8629_v44, %v8631_v28  ;;  %v8650_v9 = vsel %vm8646_vm10, %v13067_v45, %v13081_v50 }
 0x30c   : > { %10840 = vmatpush1.msk.msra.mxu1 %vm930_vm3, %v12665_v15  ;;  %7393 = vmatprep.mubr.f32.mxu1 %v13443_v18 }
 0x30d   : > { %10845 = vmatprep.subr.msk.mxu1 %vm930_vm3, %v12738_v38  ;;  %10889 = vmatpush1.msk.msra.mxu0 %vm930_vm3, %v8647_v53 }
 0x30e   : > { %10890 = vmatmul.mubr.msk.f32.vlgmr.msra.gmra.mrb[16].mxu0 %vm369_vm1, %v13089_v55 }
 0x30f   : > { %10841 = vmatmul.mubr.msk.f32.vlgmr.msra.gmra.mrb[16].mxu1 %vm369_vm1, %v12766_v4  ;;  %v13101_v1 = vpop.permute.xlu0 %8640  ;;  %v8639_v40 = vpop.permute.xlu1 %8638  ;;  %8880 = vmatprep.mubr.f32.mxu0 %v13443_v18 }
 0x310   : > { %10846 = vmatpush1.msk.msra.mxu1 %vm930_vm3, %v12735_v54  ;;  %7535 = vmatprep.mubr.f32.mxu1 %v13443_v18  ;;  %v8651_v15 = vsel %vm8646_vm10, %v13081_v50, %v8639_v40  ;;  %v8652_v36 = vsel %vm8646_vm10, %v8639_v40, %v13101_v1  ;;  %v7592_v54 = vsel %vm7584_vm7, %v12817_v41, %v12850_v35 }
 0x311   : > { %10852 = vmatprep.subr.msk.mxu1 %vm930_vm3, %v12788_v26  ;;  %10894 = vmatprep.subr.msk.mxu0 %vm930_vm3, %v8652_v36 }
 0x312   : > { %10895 = vmatpush1.msk.msra.mxu0 %vm930_vm3, %v8651_v15 }
 0x313   : > { %10847 = vmatmul.mubr.msk.f32.vlgmr.msra.gmra.mrb[18].mxu1 %vm369_vm1, %v12766_v4  ;;  %10896 = vmatmul.mubr.msk.f32.vlgmr.msra.gmra.mrb[18].mxu0 %vm369_vm1, %v13089_v55  ;;  %v7942_v4 = vsel %vm7938_vm8, %v12873_v34, %v12900_v61  ;;  %v7945_v34 = vsel %vm7938_vm8, %v12912_v29, %v12930_v47 }
 0x314   : > { %10853 = vmatpush1.msk.msra.mxu1 %vm930_vm3, %v12784_v52  ;;  %7747 = vmatprep.mubr.f32.mxu1 %v13443_v18  ;;  %v8645_v38 = vpop.permute.xlu0 %8644  ;;  %v13125_v26 = vpop.permute.xlu1 %8642 }
 0x315   : > { %10858 = vmatprep.subr.msk.mxu1 %vm930_vm3, %v7592_v54  ;;  %9092 = vmatprep.mubr.f32.mxu0 %v13443_v18  ;;  %v8654_v20 = vsel %vm8646_vm10, %v13125_v26, %v8645_v38  ;;  %v8653_v56 = vsel %vm8646_vm10, %v13101_v1, %v13125_v26  ;;  %v10926_v1 = vld [vmem:[%s13354_s6 + $0x64] sm:$0xf] }
 0x317   : > { %10854 = vmatmul.mubr.msk.f32.vlgmr.msra.gmra.mrb[16].mxu1 %vm369_vm1, %v12868_v58 }
 0x318   : > { %10859 = vmatpush1.msk.msra.mxu1 %vm930_vm3, %v12833_v11  ;;  %7889 = vmatprep.mubr.f32.mxu1 %v13443_v18  ;;  %v7946_v11 = vsel %vm7938_vm8, %v12930_v47, %v12926_v39  ;;  %v8295_v39 = vsel %vm8292_vm9, %v12962_v8, %v12992_v30  ;;  %v13173_v47 = vld [vmem:[%s13354_s6 + $0x5c] sm:$0xf] }
 0x319   : > { %10865 = vmatprep.subr.msk.mxu1 %vm930_vm3, %v7942_v4  ;;  %v13138_v52 = vpop.permute.xlu0 %8986  ;;  %v8985_v41 = vpop.permute.xlu1 %8984 }
 0x31a   : > { %v9002_v35 = vsel %vm9000_vm11, %v8985_v41, %v13138_v52 }
 0x31b   : > { %10860 = vmatmul.mubr.msk.f32.vlgmr.msra.gmra.mrb[18].mxu1 %vm369_vm1, %v12868_v58  ;;  %10901 = vmatprep.subr.msk.mxu0 %vm930_vm3, %v9002_v35  ;;  %v8296_v58 = vsel %vm8292_vm9, %v12992_v30, %v12982_v22 }
 0x31c   : > { %10866 = vmatpush1.msk.msra.mxu1 %vm930_vm3, %v7941_v0  ;;  %8101 = vmatprep.mubr.f32.mxu1 %v13443_v18 }
 0x31d   : > { %10871 = vmatprep.subr.msk.mxu1 %vm930_vm3, %v7946_v11 }
 0x31e   : > { %v8991_v61 = vpop.permute.xlu0 %8990  ;;  %v8989_v13 = vpop.permute.xlu1 %8988 }
 0x31f   : > { %10867 = vmatmul.mubr.msk.f32.vlgmr.msra.gmra.mrb[16].mxu1 %vm369_vm1, %v12947_v63  ;;  %v9004_v31 = vsel %vm9000_vm11, %v8989_v13, %v8991_v61  ;;  %v9003_v25 = vsel %vm9000_vm11, %v13138_v52, %v8989_v13 }
 0x320   : > { %10872 = vmatpush1.msk.msra.mxu1 %vm930_vm3, %v7945_v34  ;;  %8243 = vmatprep.mubr.f32.mxu1 %v13443_v18  ;;  %v10939_v34 = vld [vmem:[%s13354_s6 + $0x68] sm:$0xf] }
 0x321   : > { %10878 = vmatprep.subr.msk.mxu1 %vm930_vm3, %v8296_v58 }
 0x322   : > { %v8993_v32 = vpop.permute.xlu0 %8992 }
 0x323   : > { %10873 = vmatmul.mubr.msk.f32.vlgmr.msra.gmra.mrb[18].mxu1 %vm369_vm1, %v12947_v63  ;;  %v8983_v29 = vpop.permute.xlu1 %8982  ;;  %v9005_v49 = vsel %vm9000_vm11, %v8991_v61, %v8993_v32 }
 0x324   : > { %10879 = vmatpush1.msk.msra.mxu1 %vm930_vm3, %v8295_v39  ;;  %v9001_v14 = vsel %vm9000_vm11, %v8983_v29, %v8985_v41  ;;  %8455 = vmatprep.mubr.f32.mxu1 %v13443_v18 }
 0x325   : > { %10884 = vmatprep.subr.msk.mxu1 %vm930_vm3, %v8300_v2  ;;  %10902 = vmatpush1.msk.msra.mxu0 %vm930_vm3, %v9001_v14 }
 0x326   : > { %v8997_v63 = vpop.permute.xlu0 %8996  ;;  %10903 = vmatmul.mubr.msk.f32.vlgmr.msra.gmra.mrb[16].mxu0 %vm369_vm1, %v13173_v47 }
 0x327   : > { %10880 = vmatmul.mubr.msk.f32.vlgmr.msra.gmra.mrb[16].mxu1 %vm369_vm1, %v13019_v27  ;;  %v8995_v8 = vpop.permute.xlu1 %8994  ;;  %9234 = vmatprep.mubr.f32.mxu0 %v13443_v18 }
 0x328   : > { %10885 = vmatpush1.msk.msra.mxu1 %vm930_vm3, %v8299_v42  ;;  %v9006_v21 = vsel %vm9000_vm11, %v8993_v32, %v8995_v8  ;;  %8597 = vmatprep.mubr.f32.mxu1 %v13443_v18  ;;  %v9007_v59 = vsel %vm9000_vm11, %v8995_v8, %v8997_v63 }
 0x329   : > { %10891 = vmatprep.subr.msk.mxu1 %vm930_vm3, %v8650_v9  ;;  %10907 = vmatprep.subr.msk.mxu0 %vm930_vm3, %v9006_v21 }
 0x32a   : > { %10908 = vmatpush1.msk.msra.mxu0 %vm930_vm3, %v9005_v49  ;;  %v9339_v57 = vpop.permute.xlu0 %9338 }
 0x32b   : > { %10886 = vmatmul.mubr.msk.f32.vlgmr.msra.gmra.mrb[18].mxu1 %vm369_vm1, %v13019_v27  ;;  %v8999_v22 = vpop.permute.xlu1 %8998  ;;  %10909 = vmatmul.mubr.msk.f32.vlgmr.msra.gmra.mrb[18].mxu0 %vm369_vm1, %v13173_v47 }
 0x32c   : > { %10892 = vmatpush1.msk.msra.mxu1 %vm930_vm3, %v8649_v60  ;;  %8809 = vmatprep.mubr.f32.mxu1 %v13443_v18  ;;  %v9008_v19 = vsel %vm9000_vm11, %v8997_v63, %v8999_v22 }
 0x32d   : > { %10897 = vmatprep.subr.msk.mxu1 %vm930_vm3, %v8654_v20  ;;  %9446 = vmatprep.mubr.f32.mxu0 %v13443_v18  ;;  %v13518_v20 = vld [vmem:[#allocation3_spill] sm:$0xff] }
 0x32e   : > { %v9343_v17 = vpop.permute.xlu0 %9342 }
 0x32f   : > { %10893 = vmatmul.mubr.msk.f32.vlgmr.msra.gmra.mrb[16].mxu1 %vm369_vm1, %v13089_v55  ;;  %v9341_v30 = vpop.permute.xlu1 %9340 }
 0x330   : > { %10898 = vmatpush1.msk.msra.mxu1 %vm930_vm3, %v8653_v56  ;;  %v9356_v5 = vsel %vm9354_vm12, %v9339_v57, %v9341_v30  ;;  %8951 = vmatprep.mubr.f32.mxu1 %v13443_v18  ;;  %v9357_v3 = vsel %vm9354_vm12, %v9341_v30, %v9343_v17 }
 0x331   : > { %10904 = vmatprep.subr.msk.mxu1 %vm930_vm3, %v9004_v31  ;;  %10914 = vmatprep.subr.msk.mxu0 %vm930_vm3, %v9356_v5  ;;  %v13520_v31 = vsub.s32 1, %v13518_v20 }
 0x332   : > { %v9337_v12 = vpop.permute.xlu0 %9336 }
 0x333   : > { %v9355_v62 = vsel %vm9354_vm12, %v9337_v12, %v9339_v57  ;;  %10899 = vmatmul.mubr.msk.f32.vlgmr.msra.gmra.mrb[18].mxu1 %vm369_vm1, %v13089_v55  ;;  %v9345_v37 = vpop.permute.xlu1 %9344 }
 0x334   : > { %10905 = vmatpush1.msk.msra.mxu1 %vm930_vm3, %v9003_v25  ;;  %10915 = vmatpush1.msk.msra.mxu0 %vm930_vm3, %v9355_v62  ;;  %v9358_v46 = vsel %vm9354_vm12, %v9343_v17, %v9345_v37  ;;  %v13519_v17 = vsub.s32 0, %v13518_v20 }
 0x335   : > { %10910 = vmatprep.subr.msk.mxu1 %vm930_vm3, %v9008_v19  ;;  %9163 = vmatprep.mubr.f32.mxu1 %v13443_v18 }
 0x336   : > { %v9349_v27 = vpop.permute.xlu0 %9348  ;;  %10916 = vmatmul.mubr.msk.f32.vlgmr.msra.gmra.mrb[16].mxu0 %vm369_vm1, %v10913_v16 }
 0x337   : > { %10906 = vmatmul.mubr.msk.f32.vlgmr.msra.gmra.mrb[16].mxu1 %vm369_vm1, %v13173_v47  ;;  %v9347_v23 = vpop.permute.xlu1 %9346  ;;  %9588 = vmatprep.mubr.f32.mxu0 %v13443_v18 }
 0x338   : > { %10911 = vmatpush1.msk.msra.mxu1 %vm930_vm3, %v9007_v59  ;;  %v9359_v51 = vsel %vm9354_vm12, %v9345_v37, %v9347_v23  ;;  %v9360_v6 = vsel %vm9354_vm12, %v9347_v23, %v9349_v27  ;;  %9305 = vmatprep.mubr.f32.mxu1 %v13443_v18  ;;  %v13521_v37 = vsub.s32 2, %v13518_v20  ;;  %v13522_v23 = vsub.s32 3, %v13518_v20 }
 0x339   : > { %10917 = vmatprep.subr.msk.mxu1 %vm930_vm3, %v9358_v46  ;;  %10920 = vmatprep.subr.msk.mxu0 %vm930_vm3, %v9360_v6 }
 0x33a   : > { %10921 = vmatpush1.msk.msra.mxu0 %vm930_vm3, %v9359_v51  ;;  %v9353_v43 = vpop.permute.xlu0 %9352 }
 0x33b   : > { %10912 = vmatmul.mubr.msk.f32.vlgmr.msra.gmra.mrb[18].mxu1 %vm369_vm1, %v13173_v47  ;;  %v9351_v10 = vpop.permute.xlu1 %9350  ;;  %10922 = vmatmul.mubr.msk.f32.vlgmr.msra.gmra.mrb[18].mxu0 %vm369_vm1, %v10913_v16 }
 0x33c   : > { %10918 = vmatpush1.msk.msra.mxu1 %vm930_vm3, %v9357_v3  ;;  %v9362_v7 = vsel %vm9354_vm12, %v9351_v10, %v9353_v43  ;;  %9517 = vmatprep.mubr.f32.mxu1 %v13443_v18  ;;  %v9361_v48 = vsel %vm9354_vm12, %v9349_v27, %v9351_v10 }
 0x33d   : > { %10923 = vmatprep.subr.msk.mxu1 %vm930_vm3, %v9362_v7  ;;  %9800 = vmatprep.mubr.f32.mxu0 %v13443_v18 }
 0x33e   : > { %v9695_v28 = vpop.permute.xlu0 %9694 }
 0x33f   : > { %10919 = vmatmul.mubr.msk.f32.vlgmr.msra.gmra.mrb[16].mxu1 %vm369_vm1, %v10913_v16  ;;  %v9693_v45 = vpop.permute.xlu1 %9692 }
 0x340   : > { %10924 = vmatpush1.msk.msra.mxu1 %vm930_vm3, %v9361_v48  ;;  %v9710_v24 = vsel %vm9708_vm13, %v9693_v45, %v9695_v28  ;;  %9659 = vmatprep.mubr.f32.mxu1 %v13443_v18  ;;  %v13523_v48 = vsub.s32 4, %v13518_v20 }
 0x341   : > { %10927 = vmatprep.subr.msk.mxu0 %vm930_vm3, %v9710_v24 }
 0x342   : > { %v9699_v33 = vpop.permute.xlu0 %9698 }
 0x343   : > { %v9697_v44 = vpop.permute.xlu1 %9696  ;;  %10925 = vmatmul.mubr.msk.f32.vlgmr.msra.gmra.mrb[18].mxu1 %vm369_vm1, %v10913_v16 }
 0x344   : > { %v9711_v50 = vsel %vm9708_vm13, %v9695_v28, %v9697_v44  ;;  %v9712_v53 = vsel %vm9708_vm13, %v9697_v44, %v9699_v33  ;;  %9871 = vmatprep.mubr.f32.mxu1 %v13443_v18 }
 0x345   : > { %10930 = vmatprep.subr.msk.mxu1 %vm930_vm3, %v9712_v53  ;;  %v13524_v53 = vsub.s32 5, %v13518_v20 }
 0x346   : > { %10931 = vmatpush1.msk.msra.mxu1 %vm930_vm3, %v9711_v50  ;;  %v9701_v55 = vpop.permute.xlu0 %9700 }
 0x347   : > { %v9691_v40 = vpop.permute.xlu1 %9690  ;;  %10932 = vmatmul.mubr.msk.f32.vlgmr.msra.gmra.mrb[16].mxu1 %vm369_vm1, %v10926_v1  ;;  %v9713_v26 = vsel %vm9708_vm13, %v9699_v33, %v9701_v55 }
 0x348   : > { %v9709_v15 = vsel %vm9708_vm13, %v9691_v40, %v9693_v45  ;;  %10013 = vmatprep.mubr.f32.mxu1 %v13443_v18  ;;  %v13525_v40 = vld [vmem:[#allocation4_spill] sm:$0xff] }
 0x349   : > { %10928 = vmatpush1.msk.msra.mxu0 %vm930_vm3, %v9709_v15 }
 0x34a   : > { %v9705_v36 = vpop.permute.xlu0 %9704  ;;  %10929 = vmatmul.mubr.msk.f32.vlgmr.msra.gmra.mrb[16].mxu0 %vm369_vm1, %v10926_v1 }
 0x34b   : > { %v9703_v54 = vpop.permute.xlu1 %9702  ;;  %9942 = vmatprep.mubr.f32.mxu0 %v13443_v18 }
 0x34c   : > { %v9714_v38 = vsel %vm9708_vm13, %v9701_v55, %v9703_v54  ;;  %v9715_v35 = vsel %vm9708_vm13, %v9703_v54, %v9705_v36 }
 0x34d   : > { %10933 = vmatprep.subr.msk.mxu0 %vm930_vm3, %v9714_v38 }
 0x34e   : > { %10934 = vmatpush1.msk.msra.mxu0 %vm930_vm3, %v9713_v26  ;;  %v10047_v4 = vpop.permute.xlu0 %10046 }
 0x34f   : > { %v9707_v52 = vpop.permute.xlu1 %9706  ;;  %10935 = vmatmul.mubr.msk.f32.vlgmr.msra.gmra.mrb[18].mxu0 %vm369_vm1, %v10926_v1 }
 0x350   : > { %v9716_v41 = vsel %vm9708_vm13, %v9705_v36, %v9707_v52  ;;  %10154 = vmatprep.mubr.f32.mxu0 %v13443_v18  ;;  %v13526_v52 = vsub.s32 6, %v13518_v20 }
 0x351   : > { %10936 = vmatprep.subr.msk.mxu1 %vm930_vm3, %v9716_v41 }
 0x352   : > { %10937 = vmatpush1.msk.msra.mxu1 %vm930_vm3, %v9715_v35  ;;  %v10051_v0 = vpop.permute.xlu0 %10050 }
 0x353   : > { %v10049_v11 = vpop.permute.xlu1 %10048  ;;  %10938 = vmatmul.mubr.msk.f32.vlgmr.msra.gmra.mrb[18].mxu1 %vm369_vm1, %v10926_v1 }
 0x354   : > { %v10064_v61 = vsel %vm10062_vm14, %v10047_v4, %v10049_v11  ;;  %10225 = vmatprep.mubr.f32.mxu1 %v13443_v18  ;;  %v10065_v29 = vsel %vm10062_vm14, %v10049_v11, %v10051_v0 }
 0x355   : > { %10940 = vmatprep.subr.msk.mxu0 %vm930_vm3, %v10064_v61 }
 0x356   : > { %v10045_v13 = vpop.permute.xlu0 %10044 }
 0x357   : > { %v10063_v58 = vsel %vm10062_vm14, %v10045_v13, %v10047_v4  ;;  %v10053_v32 = vpop.permute.xlu1 %10052  ;;  %v13527_v13 = vsub.s32 7, %v13518_v20 }
 0x358   : > { %v10066_v39 = vsel %vm10062_vm14, %v10051_v0, %v10053_v32  ;;  %10941 = vmatpush1.msk.msra.mxu0 %vm930_vm3, %v10063_v58 }
 0x359   : > { %10943 = vmatprep.subr.msk.mxu1 %vm930_vm3, %v10066_v39  ;;  %10942 = vmatmul.mubr.msk.f32.vlgmr.msra.gmra.mrb[16].mxu0 %vm369_vm1, %v10939_v34 }
 0x35a   : > { %10944 = vmatpush1.msk.msra.mxu1 %vm930_vm3, %v10065_v29  ;;  %v10057_v47 = vpop.permute.xlu0 %10056  ;;  %10296 = vmatprep.mubr.f32.mxu0 %v13443_v18 }
 0x35b   : > { %10945 = vmatmul.mubr.msk.f32.vlgmr.msra.gmra.mrb[16].mxu1 %vm369_vm1, %v10939_v34  ;;  %v10055_v2 = vpop.permute.xlu1 %10054 }
 0x35c   : > { %v10067_v14 = vsel %vm10062_vm14, %v10053_v32, %v10055_v2  ;;  %v10068_v63 = vsel %vm10062_vm14, %v10055_v2, %v10057_v47  ;;  %10367 = vmatprep.mubr.f32.mxu1 %v13443_v18  ;;  %v10404_v18 = vld [vmem:[%s13348_s0] sm:$0xff] }
 0x35d   : > { %10946 = vmatprep.subr.msk.mxu0 %vm930_vm3, %v10068_v63  ;;  %v10409_v56 = vrot.slane %v10404_v18, %v13519_v17  ;;  %v10413_v5 = vrot.slane %v10404_v18, %v13520_v31  ;;  %v10417_v16 = vrot.slane %v10404_v18, %v13521_v37  ;;  %v10421_v46 = vrot.slane %v10404_v18, %v13522_v23 }
 0x35e   : > { %10947 = vmatpush1.msk.msra.mxu0 %vm930_vm3, %v10067_v14  ;;  %v10061_v42 = vpop.permute.xlu0 %10060  ;;  %v10425_v45 = vrot.slane %v10404_v18, %v13523_v48  ;;  %v10429_v55 = vrot.slane %v10404_v18, %v13524_v53  ;;  %v10433_v41 = vrot.slane %v10404_v18, %v13526_v52 }
 0x35f   : > { %10948 = vmatmul.mubr.msk.f32.vlgmr.msra.gmra.mrb[18].mxu0 %vm369_vm1, %v10939_v34  ;;  %v10059_v8 = vpop.permute.xlu1 %10058 }
 0x360   : > { %v10069_v9 = vsel %vm10062_vm14, %v10057_v47, %v10059_v8  ;;  %v10070_v21 = vsel %vm10062_vm14, %v10059_v8, %v10061_v42 }
 0x361   : > { %10949 = vmatprep.subr.msk.mxu1 %vm930_vm3, %v10070_v21 }
 0x362   : > { %10950 = vmatpush1.msk.msra.mxu1 %vm930_vm3, %v10069_v9 }
 0x363   : > { %10951 = vmatmul.mubr.msk.f32.vlgmr.msra.gmra.mrb[18].mxu1 %vm369_vm1, %v10939_v34  ;;  %v10437_v34 = vrot.slane %v10404_v18, %v13527_v13 }
 0x371   : > { %v10386_v49 = vpop.permute.xlu1 %10385 }
 0x42c   : > { %v10156_v57 = vpop.f32.mrb[16].mxu0 }
 0x42d   : > { %v10158_v60 = vpop.f32.mrb[17].mxu0  ;;  %v10388_v22 = vadd.f32 %v10386_v49, %v10156_v57 }
 0x42e   : > { %v10389_v30 = vadd.f32 %v10386_v49, %v10158_v60  ;;  %v10227_v12 = vpop.f32.mrb[16].mxu1 }
 0x42f   : > { %v10396_v25 = vmax.f32 %v10388_v22, 0.0  ;;  %v10390_v62 = vadd.f32 %v10386_v49, %v10227_v12  ;;  %v10229_v19 = vpop.f32.mrb[17].mxu1 }
 0x430   : > { %v10397_v27 = vmax.f32 %v10389_v30, 0.0  ;;  %v10391_v59 = vadd.f32 %v10386_v49, %v10229_v19 }
 0x431   : > { %v10446_v51 = vmul.f32 %v10409_v56, %v10396_v25  ;;  %v10398_v6 = vmax.f32 %v10390_v62, 0.0 }
 0x432   : > { %v10447_v43 = vmul.f32 %v10413_v5, %v10397_v27  ;;  %v10399_v3 = vmax.f32 %v10391_v59, 0.0  ;;  %v10298_v10 = vpop.f32.mrb[18].mxu0 }
 0x433   : > { %v10448_v7 = vmul.f32 %v10417_v16, %v10398_v6  ;;  %v10392_v28 = vadd.f32 %v10386_v49, %v10298_v10  ;;  %v10300_v24 = vpop.f32.mrb[19].mxu0 }
 0x434   : > { %v10952_v33 = vpack.c.bf16 %v10447_v43, %v10446_v51  ;;  %v10449_v44 = vmul.f32 %v10421_v46, %v10399_v3  ;;  %v10393_v50 = vadd.f32 %v10386_v49, %v10300_v24 }
 0x435   : > { %v10400_v1 = vmax.f32 %v10392_v28, 0.0 }
 0x436   : > { %v10478_v15 = vrot.slane %v10952_v33, %v13525_v40  ;;  %v10953_v36 = vpack.c.bf16 %v10449_v44, %v10448_v7  ;;  %v10401_v54 = vmax.f32 %v10393_v50, 0.0  ;;  %v10369_v38 = vpop.f32.mrb[18].mxu1 }
 0x437   : > { %v10450_v26 = vmul.f32 %v10425_v45, %v10400_v1  ;;  %v10394_v4 = vadd.f32 %v10386_v49, %v10369_v38  ;;  %v10371_v35 = vpop.f32.mrb[19].mxu1 }
 0x438   : > { %v10485_v0 = vrot.slane %v10953_v36, %v13525_v40  ;;  %v10451_v11 = vmul.f32 %v10429_v55, %v10401_v54  ;;  %v10395_v61 = vadd.f32 %v10386_v49, %v10371_v35 }
 0x439   : > { %v10402_v58 = vmax.f32 %v10394_v4, 0.0 }
 0x43a   : > { %v10486_v32 = vcombine.low %v10478_v15, %v10485_v0  ;;  %v10954_v39 = vpack.c.bf16 %v10451_v11, %v10450_v26  ;;  %v10403_v29 = vmax.f32 %v10395_v61, 0.0 }
 0x43b   : > { %v10452_v47 = vmul.f32 %v10433_v41, %v10402_v58 }
 0x43c   : > { %10506 = vst [vmem:[%s325_s29] sm:$0xff] %v10486_v32  ;;  %v10453_v2 = vmul.f32 %v10437_v34, %v10403_v29  ;;  %v10495_v63 = vrot.slane %v10954_v39, %v13525_v40 }
 0x43e   : > { %v10955_v14 = vpack.c.bf16 %v10453_v2, %v10452_v47 }
 0x440   : > { %v10502_v42 = vrot.slane %v10955_v14, %v13525_v40 }
 0x442   : > { %v10503_v8 = vcombine.low %v10495_v63, %v10502_v42 }
 0x444   : > { %10507 = vst [vmem:[%s325_s29 + $0x8] sm:$0xff] %v10503_v8 }
 0x445 PF: > { %s18_s27 = sadd.s32 1, %s11234_s27  }
 0x446   : > { %p15_p4 = scmp.ge.s32.totalorder %s18_s27, 4  }
 0x448   :  { %17 = sbr.rel (!%p15_p4) target bundleno = 1 (0x1), region = 111 }

// kernel: dense_unit_forward.5
= control target key start
LH: loop header
LB: loop body
LE: loop exit
PB: predicated region body
PF: predicated region fallthrough
CT: control target
= control target key end

     0   :  { %s11656_s13 = smov 0   ;;  %s13753_s0 = inlined_call_operand.vmem [shape: f32[1,1024], index: 0, kind: input, shape index: {}]   ;;  %s13754_s1 = inlined_call_operand.vmem [shape: bf16[2,4,1024], index: 1, kind: input, shape index: {}]   ;;  %s13755_s2 = inlined_call_operand.vmem [shape: bf16[2,4,1024], index: 2, kind: input, shape index: {}]   ;;  %s13756_s3 = inlined_call_operand.vmem [shape: bf16[2,4,1024], index: 3, kind: input, shape index: {}]   ;;  %s13757_s4 = inlined_call_operand.vmem [shape: bf16[4,4], index: 4, kind: input, shape index: {}]   ;;  %s13758_s5 = inlined_call_operand.vmem [shape: bf16[4,4], index: 5, kind: input, shape index: {}]   ;;  %s13759_s6 = inlined_call_operand.vmem [shape: bf16[4,4], index: 6, kind: input, shape index: {}]   ;;  %s13760_s7 = inlined_call_operand.vmem [shape: f32[4,1], index: 7, kind: input, shape index: {}]   ;;  %s13761_s8 = inlined_call_operand.vmem [shape: f32[27,4,4], index: 8, kind: input, shape index: {}]   ;;  %s13762_s9 = inlined_call_operand.vmem [shape: f32[4,1], index: 9, kind: input, shape index: {}]   ;;  %s13763_s10 = inlined_call_operand.vmem [shape: bf16[2,4,1024], index: 10, kind: output, shape index: {}]  }
   0x1 LB: > { %s10899_s14 = sadd.s32 4294967295, %s11570_s13   ;;  %p10903_p0 = scmp.ge.s32.totalorder %s11570_s13, 1  ;;  %s11570_s13 = sphi %s11656_s13, %s20_s13  }
   0x2   : > { %p332_p1 = scmp.lt.s32.totalorder %s11570_s13, 3 }
   0x4   : > { %p333_p2 = pnand %p10903_p0, %p332_p1 }
   0x6   : > { %336 = sbr.rel (%p333_p2) target bundleno = 1110 (0x456), region = 60 }
   0xd   : > { %p380_p3 = scmp.lt.s32.totalorder %s10899_s14, 1  ;;  %v413_v0 = vlaneseq  ;;  %v11572_v1 = vmov 1983009808   ;;  %v11573_v3 = vmov 0   ;;  %v1101_v5 = vld [vmem:[%s13760_s7] sm:$0xf] }
   0xe   : > { %v411_v2 = vunpack.c.l.s4 %v11572_v1  ;;  %504 = vmatprep.mubr.bf16.mxu0 %v11573_v3  ;;  %545 = vmatprep.mubr.bf16.mxu1 %v11573_v3  ;;  %vm447_vm0 = vcmask 1041408   ;;  %v404_v25 = vld [vmem:[%s13758_s5] sm:$0x3]  ;;  %vm443_vm1 = vcmask 31744   ;;  %v13774_v59 = vmov 0.0   ;;  %s11576_s15 = smov 119  }
   0xf   : > { %s13958_s14 = smov (!%p380_p3, %s10899_s14), 1  ;;  %v11666_v4 = vshrl.u32 %v413_v0, 7  ;;  %11541 = vset.pattern.permute.xlu0 %v11573_v3  ;;  %11542 = vset.pattern.permute.xlu1 %v11573_v3  ;;  %v401_v43 = vld [vmem:[%s13757_s4] sm:$0x3]  ;;  %1174 = vst [vmem:[#allocation2 + $0x24] sm:$0xf] %v13774_v59 }
  0x10   : > { %v412_v6 = vunpack.c.0.s8 %v411_v2  ;;  %1104 = vperm.xlu0 %11541, %v1101_v5   ;;  %s11673_s17 = sshll.u32 %s13958_s14, 4  ;;  %v863_v56 = vld [vmem:[%s13759_s6] sm:$0x3]  ;;  %1173 = vst [vmem:[#allocation2] sm:$0xf] %v13774_v59  ;;  %s11575_s14 = smov 127  }
  0x11   : > { %13821 = vst [vmem:[#allocation3_spill] sm:$0xff] %v11666_v4  ;;  %s389_s20 = scalar_lea.vmem %s13755_s2, %s11673_s17  ;;  %s384_s23 = scalar_lea.vmem %s13754_s1, %s11673_s17  ;;  %vm1230_vm2 = vcmask 900096   ;;  %vm1242_vm3 = vcmask 1043456   ;;  %vm1561_vm4 = vcmask 908288   ;;  %vm1907_vm5 = vcmask 891904  }
  0x12   : > { %v11680_v7 = vsub.s32 %v412_v6, %v11666_v4  ;;  %v405_v8 = vld [vmem:[%s389_s20] sm:$0xff]  ;;  %v406_v9 = vld [vmem:[%s389_s20 + $0x8] sm:$0xff]  ;;  %s394_s28 = scalar_lea.vmem %s13756_s3, %s11673_s17  ;;  %s11577_s16 = smov 118   ;;  %vm2261_vm6 = vcmask 826368   ;;  %vm2615_vm7 = vcmask 818176   ;;  %vm2969_vm8 = vcmask 809984  }
  0x13   : > { %v402_v10 = vld [vmem:[%s384_s23] sm:$0xff]  ;;  %v426_v12 = vcombine.high %v406_v9, %v406_v9  ;;  %v409_v14 = vcombine.high %v405_v8, %v405_v8  ;;  %v403_v27 = vld [vmem:[%s384_s23 + $0x8] sm:$0xff]  ;;  %s11578_s20 = smov 111   ;;  %s11579_s21 = smov 110   ;;  %vm3323_vm9 = vcmask 744448   ;;  %vm3677_vm10 = vcmask 736256  }
  0x14   : > { %13822 = vst [vmem:[#allocation4_spill] sm:$0xff] %v11680_v7  ;;  %v416_v11 = vrot.slane %v405_v8, %v11680_v7  ;;  %v433_v13 = vrot.slane %v406_v9, %v11680_v7  ;;  %v645_v15 = vrot.slane %v402_v10, %v11680_v7  ;;  %v638_v16 = vcombine.high %v402_v10, %v402_v10  ;;  %v864_v35 = vld [vmem:[%s394_s28] sm:$0xff]  ;;  %v865_v44 = vld [vmem:[%s394_s28 + $0x8] sm:$0xff]  ;;  %s11580_s22 = smov 101   ;;  %s11581_s23 = smov 109  }
  0x15   : > { %v423_v19 = vrot.slane %v409_v14, %v11680_v7  ;;  %v440_v21 = vrot.slane %v426_v12, %v11680_v7  ;;  %v655_v32 = vcombine.high %v403_v27, %v403_v27  ;;  %v662_v33 = vrot.slane %v403_v27, %v11680_v7  ;;  %s11582_s24 = smov 99   ;;  %s11583_s25 = smov 100  }
  0x16   : > { %v424_v17 = vcombine.high %v416_v11, %v416_v11  ;;  %v449_v18 = vsel %vm447_vm0, %v416_v11, 0  ;;  %v441_v20 = vcombine.high %v433_v13, %v433_v13  ;;  %v652_v24 = vrot.slane %v638_v16, %v11680_v7  ;;  %v6096_v60 = vld [vmem:[#allocation2 + $0x24] sm:$0xf]  ;;  %s11584_s26 = smov 90   ;;  %s11585_s27 = smov 91  }
  0x17   : > { %v425_v22 = vcombine.high %v423_v19, %v423_v19  ;;  %v455_v23 = vsel %vm447_vm0, %v423_v19, 0  ;;  %v442_v26 = vcombine.high %v440_v21, %v440_v21  ;;  %v461_v28 = vsel %vm447_vm0, %v433_v13, 0  ;;  %6124 = vrot.lane.b32.xlu0 %v6096_v60, %s11575_s14  ;;  %v6450_v61 = vld [vmem:[#allocation2 + $0x24] sm:$0xf]  ;;  %s11586_s28 = smov 11   ;;  %s11587_s29 = smov 89  }
  0x18   : > { %10912 = vmatprep.subr.msk.bf16.mxu0 %vm447_vm0, %v424_v17  ;;  %v653_v29 = vcombine.high %v645_v15, %v645_v15  ;;  %v467_v30 = vsel %vm447_vm0, %v440_v21, 0  ;;  %v654_v31 = vcombine.high %v652_v24, %v652_v24  ;;  %v669_v34 = vrot.slane %v655_v32, %v11680_v7  ;;  %v6804_v62 = vld [vmem:[#allocation2 + $0x24] sm:$0xf]  ;;  %6478 = vrot.lane.b32.xlu1 %v6450_v61, %s11576_s15  ;;  %s11588_s30 = smov 9   ;;  %s11589_s11 = smov 10  }
  0x19   : > { %473 = vmatpush1.bf16.msra.mxu0 %v449_v18  ;;  %10914 = vmatprep.subr.msk.bf16.mxu1 %vm447_vm0, %v425_v22  ;;  %v676_v36 = vsel %vm447_vm0, %v645_v15, 0  ;;  %v670_v37 = vcombine.high %v662_v33, %v662_v33  ;;  %v682_v38 = vsel %vm447_vm0, %v652_v24, 0  ;;  %v868_v40 = vcombine.high %v864_v35, %v864_v35  ;;  %s11590_s12 = smov 1   ;;  %s13764_s18 = smov 117  }
  0x1a   : > { %10916 = vmatprep.subr.msk.bf16.mxu0 %vm447_vm0, %v441_v20  ;;  %514 = vmatpush1.bf16.msra.mxu1 %v455_v23  ;;  %v671_v39 = vcombine.high %v669_v34, %v669_v34  ;;  %v875_v41 = vrot.slane %v864_v35, %v11680_v7  ;;  %v688_v45 = vsel %vm447_vm0, %v662_v33, 0  ;;  %v694_v47 = vsel %vm447_vm0, %v669_v34, 0 }
  0x1b   : > { %10918 = vmatprep.subr.msk.bf16.mxu1 %vm447_vm0, %v442_v26  ;;  %v882_v42 = vrot.slane %v868_v40, %v11680_v7  ;;  %v885_v49 = vcombine.high %v865_v44, %v865_v44  ;;  %v892_v50 = vrot.slane %v865_v44, %v11680_v7  ;;  %6832 = vrot.lane.b32.xlu0 %v6804_v62, %s11577_s16  ;;  %v1123_v44 = vld [vmem:[%s13753_s0] sm:$0xff]  ;;  %vm4031_vm11 = vcmask 728064  }
  0x1c   : > { %10913 = vmatmul.mubr.msk.bf16.vlgmr.msra.gmra.mrb[0].mxu0 %vm443_vm1, %v404_v25  ;;  %v883_v46 = vcombine.high %v875_v41, %v875_v41  ;;  %v906_v52 = vsel %vm447_vm0, %v875_v41, 0  ;;  %v13773_v41 = vsub.s32 0, %v11666_v4  ;;  %vm4385_vm12 = vcmask 89088  }
  0x1d   : > { %555 = vmatpush1.bf16.msra.mxu0 %v461_v28  ;;  %586 = vmatprep.mubr.bf16.mxu0 %v11573_v3  ;;  %v884_v48 = vcombine.high %v882_v42, %v882_v42  ;;  %v899_v51 = vrot.slane %v885_v49, %v11680_v7  ;;  %v900_v53 = vcombine.high %v892_v50, %v892_v50  ;;  %v912_v54 = vsel %vm447_vm0, %v882_v42, 0 }
  0x1e   : > { %10915 = vmatmul.mubr.msk.bf16.vlgmr.msra.gmra.mrb[0].mxu1 %vm443_vm1, %v404_v25  ;;  %10920 = vmatprep.subr.msk.bf16.mxu0 %vm447_vm0, %v653_v29  ;;  %v918_v57 = vsel %vm447_vm0, %v892_v50, 0  ;;  %vm4739_vm13 = vcmask 80896   ;;  %vm5093_vm14 = vcmask 72704   ;;  %vm5447_vm15 = vcmask 7168  }
  0x1f   : > { %596 = vmatpush1.bf16.msra.mxu1 %v467_v30  ;;  %627 = vmatprep.mubr.bf16.mxu1 %v11573_v3  ;;  %v901_v55 = vcombine.high %v899_v51, %v899_v51  ;;  %v924_v58 = vsel %vm447_vm0, %v899_v51, 0 }
  0x20   : > { %10922 = vmatprep.subr.msk.bf16.mxu1 %vm447_vm0, %v654_v31 }
  0x24   : > { %10917 = vmatmul.mubr.msk.bf16.vlgmr.msra.gmra.mrb[4].mxu0 %vm443_vm1, %v404_v25 }
  0x25   : > { %700 = vmatpush1.bf16.msra.mxu0 %v676_v36  ;;  %731 = vmatprep.mubr.bf16.mxu0 %v11573_v3 }
  0x26   : > { %10919 = vmatmul.mubr.msk.bf16.vlgmr.msra.gmra.mrb[4].mxu1 %vm443_vm1, %v404_v25  ;;  %10924 = vmatprep.subr.msk.bf16.mxu0 %vm447_vm0, %v670_v37 }
  0x27   : > { %741 = vmatpush1.bf16.msra.mxu1 %v682_v38  ;;  %772 = vmatprep.mubr.bf16.mxu1 %v11573_v3 }
  0x28   : > { %10926 = vmatprep.subr.msk.bf16.mxu1 %vm447_vm0, %v671_v39 }
  0x2c   : > { %10921 = vmatmul.mubr.msk.bf16.vlgmr.msra.gmra.mrb[8].mxu0 %vm443_vm1, %v401_v43 }
  0x2d   : > { %782 = vmatpush1.bf16.msra.mxu0 %v688_v45  ;;  %813 = vmatprep.mubr.bf16.mxu0 %v11573_v3  ;;  %v13772_v45 = vsub.s32 1, %v11666_v4 }
  0x2e   : > { %10923 = vmatmul.mubr.msk.bf16.vlgmr.msra.gmra.mrb[8].mxu1 %vm443_vm1, %v401_v43  ;;  %10928 = vmatprep.subr.msk.bf16.mxu0 %vm447_vm0, %v883_v46 }
  0x2f   : > { %823 = vmatpush1.bf16.msra.mxu1 %v694_v47  ;;  %854 = vmatprep.mubr.bf16.mxu1 %v11573_v3  ;;  %v1132_v62 = vrot.slane %v1123_v44, %v13772_v45 }
  0x30   : > { %10930 = vmatprep.subr.msk.bf16.mxu1 %vm447_vm0, %v884_v48  ;;  %v13771_v48 = vsub.s32 2, %v11666_v4 }
  0x34   : > { %10925 = vmatmul.mubr.msk.bf16.vlgmr.msra.gmra.mrb[12].mxu0 %vm443_vm1, %v401_v43 }
  0x35   : > { %930 = vmatpush1.bf16.msra.mxu0 %v906_v52  ;;  %961 = vmatprep.mubr.bf16.mxu0 %v11573_v3  ;;  %v13770_v52 = vsub.s32 3, %v11666_v4 }
  0x36   : > { %10927 = vmatmul.mubr.msk.bf16.vlgmr.msra.gmra.mrb[12].mxu1 %vm443_vm1, %v401_v43  ;;  %10932 = vmatprep.subr.msk.bf16.mxu0 %vm447_vm0, %v900_v53 }
  0x37   : > { %971 = vmatpush1.bf16.msra.mxu1 %v912_v54  ;;  %1002 = vmatprep.mubr.bf16.mxu1 %v11573_v3 }
  0x38   : > { %10934 = vmatprep.subr.msk.bf16.mxu1 %vm447_vm0, %v901_v55  ;;  %vm6126_vm0 = vcmask 1039360  }
  0x3c   : > { %10929 = vmatmul.mubr.msk.bf16.vlgmr.msra.gmra.mrb[16].mxu0 %vm443_vm1, %v863_v56 }
  0x3d   : > { %1012 = vmatpush1.bf16.msra.mxu0 %v918_v57  ;;  %1043 = vmatprep.mubr.bf16.mxu0 %v11573_v3  ;;  %v1128_v57 = vrot.slane %v1123_v44, %v13773_v41 }
  0x3e   : > { %10931 = vmatmul.mubr.msk.bf16.vlgmr.msra.gmra.mrb[16].mxu1 %vm443_vm1, %v863_v56 }
  0x3f   : > { %1053 = vmatpush1.bf16.msra.mxu1 %v924_v58  ;;  %1084 = vmatprep.mubr.bf16.mxu1 %v11573_v3 }
  0x44   : > { %10933 = vmatmul.mubr.msk.bf16.vlgmr.msra.gmra.mrb[20].mxu0 %vm443_vm1, %v863_v56 }
  0x45   : > { %1323 = vmatprep.mubr.f32.mxu0 %v13774_v59 }
  0x46   : > { %10935 = vmatmul.mubr.msk.bf16.vlgmr.msra.gmra.mrb[20].mxu1 %vm443_vm1, %v863_v56 }
  0x47   : > { %1394 = vmatprep.mubr.f32.mxu1 %v13774_v59 }
  0x8f   : > { %v1105_v43 = vpop.permute.xlu0 %1104 }
  0xef   : > { %v506_v63 = vpop.f32.mrb[0].mxu0 }
  0xf0   : > { %v508_v0 = vpop.f32.mrb[1].mxu0 }
  0xf1   : > { %v510_v1 = vpop.f32.mrb[2].mxu0  ;;  %v547_v2 = vpop.f32.mrb[0].mxu1 }
  0xf2   : > { %v511_v3 = vpop.f32.mrb[3].mxu0  ;;  %v549_v5 = vpop.f32.mrb[1].mxu1  ;;  %v1136_v1 = vrot.slane %v1123_v44, %v13771_v48 }
  0xf3   : > { %v551_v6 = vpop.f32.mrb[2].mxu1 }
  0xf4   : > { %v552_v8 = vpop.f32.mrb[3].mxu1  ;;  %v1140_v6 = vrot.slane %v1123_v44, %v13770_v52 }
  0xf7   : > { %v588_v9 = vpop.f32.mrb[4].mxu0 }
  0xf8   : > { %v590_v10 = vpop.f32.mrb[5].mxu0 }
  0xf9   : > { %v592_v11 = vpop.f32.mrb[6].mxu0  ;;  %v629_v12 = vpop.f32.mrb[4].mxu1 }
  0xfa   : > { %v593_v13 = vpop.f32.mrb[7].mxu0  ;;  %v631_v14 = vpop.f32.mrb[5].mxu1 }
  0xfb   : > { %v633_v15 = vpop.f32.mrb[6].mxu1  ;;  %v13768_v13 = vsub.s32 5, %v11666_v4 }
  0xfc   : > { %v634_v16 = vpop.f32.mrb[7].mxu1 }
  0xff   : > { %v733_v17 = vpop.f32.mrb[8].mxu0 }
 0x100   : > { %v734_v18 = vadd.f32 %v733_v17, %v506_v63  ;;  %v735_v19 = vpop.f32.mrb[9].mxu0 }
 0x101   : > { %v736_v20 = vadd.f32 %v735_v19, %v508_v0  ;;  %v737_v21 = vpop.f32.mrb[10].mxu0  ;;  %v774_v22 = vpop.f32.mrb[8].mxu1 }
 0x102   : > { %v738_v23 = vpop.f32.mrb[11].mxu0  ;;  %v775_v24 = vadd.f32 %v774_v22, %v547_v2  ;;  %v776_v25 = vpop.f32.mrb[9].mxu1  ;;  %v13766_v22 = vsub.s32 7, %v11666_v4 }
 0x103   : > { %v777_v26 = vadd.f32 %v776_v25, %v549_v5  ;;  %v778_v27 = vpop.f32.mrb[10].mxu1 }
 0x104   : > { %v779_v28 = vpop.f32.mrb[11].mxu1 }
 0x107   : > { %v815_v29 = vpop.f32.mrb[12].mxu0 }
 0x108   : > { %v816_v30 = vadd.f32 %v815_v29, %v588_v9  ;;  %v817_v31 = vpop.f32.mrb[13].mxu0  ;;  %v13769_v9 = vsub.s32 4, %v11666_v4 }
 0x109   : > { %v818_v32 = vadd.f32 %v817_v31, %v590_v10  ;;  %v819_v33 = vpop.f32.mrb[14].mxu0  ;;  %v856_v34 = vpop.f32.mrb[12].mxu1 }
 0x10a   : > { %v820_v35 = vpop.f32.mrb[15].mxu0  ;;  %v857_v36 = vadd.f32 %v856_v34, %v629_v12  ;;  %v858_v37 = vpop.f32.mrb[13].mxu1 }
 0x10b   : > { %v859_v38 = vadd.f32 %v858_v37, %v631_v14  ;;  %v860_v39 = vpop.f32.mrb[14].mxu1 }
 0x10c   : > { %v861_v40 = vpop.f32.mrb[15].mxu1 }
 0x10f   : > { %v963_v42 = vpop.f32.mrb[16].mxu0 }
 0x110   : > { %v1093_v46 = vadd.f32 %v963_v42, %v734_v18  ;;  %v965_v47 = vpop.f32.mrb[17].mxu0  ;;  %v13767_v18 = vsub.s32 6, %v11666_v4 }
 0x111   : > { %v1094_v49 = vadd.f32 %v965_v47, %v736_v20  ;;  %v967_v50 = vpop.f32.mrb[18].mxu0  ;;  %v1004_v51 = vpop.f32.mrb[16].mxu1 }
 0x112   : > { %v1107_v53 = vadd.f32 %v1105_v43, %v1093_v46  ;;  %v1095_v54 = vadd.f32 %v1004_v51, %v775_v24  ;;  %v968_v55 = vpop.f32.mrb[19].mxu0  ;;  %v1006_v56 = vpop.f32.mrb[17].mxu1  ;;  %v1152_v39 = vrot.slane %v1123_v44, %v13767_v18  ;;  %v1156_v46 = vrot.slane %v1123_v44, %v13766_v22 }
 0x113   : > { %v1108_v58 = vadd.f32 %v1105_v43, %v1094_v49  ;;  %v1096_v60 = vadd.f32 %v1006_v56, %v777_v26  ;;  %v1008_v61 = vpop.f32.mrb[18].mxu1  ;;  %v1144_v26 = vrot.slane %v1123_v44, %v13769_v9 }
 0x114   : > { %v1115_v63 = vmax.f32 %v1107_v53, 0.0  ;;  %v1109_v0 = vadd.f32 %v1105_v43, %v1095_v54  ;;  %v1009_v2 = vpop.f32.mrb[19].mxu1  ;;  %v11887_v61 = vpop.permute.xlu1 %6478 }
 0x115   : > { %v1116_v3 = vmax.f32 %v1108_v58, 0.0  ;;  %v1110_v5 = vadd.f32 %v1105_v43, %v1096_v60  ;;  %v11881_v60 = vpop.permute.xlu0 %6124  ;;  %13824 = vst [vmem:[#allocation6_spill] sm:$0xff] %v11887_v61 }
 0x116   : > { %v1117_v8 = vmax.f32 %v1109_v0, 0.0  ;;  %v1165_v10 = vmul.f32 %v1128_v57, %v1115_v63  ;;  %13823 = vst [vmem:[#allocation5_spill] sm:$0xff] %v11881_v60 }
 0x117   : > { %v1118_v11 = vmax.f32 %v1110_v5, 0.0  ;;  %v1045_v12 = vpop.f32.mrb[20].mxu0  ;;  %v11781_v14 = vmul.f32 %v1132_v62, %v1116_v3 }
 0x118   : > { %v1167_v15 = vmul.f32 %v1136_v1, %v1117_v8  ;;  %v1097_v16 = vadd.f32 %v1045_v12, %v816_v30  ;;  %v1047_v17 = vpop.f32.mrb[21].mxu0 }
 0x119   : > { %v11784_v19 = vmul.f32 %v1140_v6, %v1118_v11  ;;  %v1098_v20 = vadd.f32 %v1047_v17, %v818_v32  ;;  %v1086_v21 = vpop.f32.mrb[20].mxu1  ;;  %v11788_v23 = vcombine.low %v1165_v10, %v11781_v14  ;;  %v1049_v24 = vpop.f32.mrb[22].mxu0  ;;  %v1148_v32 = vrot.slane %v1123_v44, %v13768_v13 }
 0x11a   : > { %v1111_v25 = vadd.f32 %v1105_v43, %v1097_v16  ;;  %v1099_v27 = vadd.f32 %v1086_v21, %v857_v36  ;;  %v1088_v28 = vpop.f32.mrb[21].mxu1  ;;  %v1050_v29 = vpop.f32.mrb[23].mxu0  ;;  %v11862_v57 = vcombine.low %v11781_v14, %v11781_v14 }
 0x11b   : > { %v11793_v30 = vcombine.low %v1167_v15, %v11784_v19  ;;  %v1112_v31 = vadd.f32 %v1105_v43, %v1098_v20  ;;  %v1100_v33 = vadd.f32 %v1088_v28, %v859_v38  ;;  %1191 = vst [vmem:[#allocation2 + $0x4] sm:$0xff] %v11788_v23  ;;  %v1090_v34 = vpop.f32.mrb[22].mxu1  ;;  %v11889_v62 = vpop.permute.xlu0 %6832  ;;  %v11899_v1 = vcombine.low %v11784_v19, %v11784_v19  ;;  %v11958_v28 = vld [vmem:[%s13761_s8 + $0x4] sm:$0xf] }
 0x11c   : > { %v1119_v35 = vmax.f32 %v1111_v25, 0.0  ;;  %v1113_v37 = vadd.f32 %v1105_v43, %v1099_v27  ;;  %v1091_v40 = vpop.f32.mrb[23].mxu1  ;;  %13825 = vst [vmem:[#allocation7_spill] sm:$0xff] %v11889_v62 }
 0x11d   : > { %1192 = vst [vmem:[#allocation2 + $0xc] sm:$0xff] %v11793_v30  ;;  %v1120_v36 = vmax.f32 %v1112_v31, 0.0  ;;  %v1114_v42 = vadd.f32 %v1105_v43, %v1100_v33 }
 0x11e   : > { %v1169_v47 = vmul.f32 %v1144_v26, %v1119_v35  ;;  %v1121_v49 = vmax.f32 %v1113_v37, 0.0 }
 0x11f   : > { %v11803_v50 = vmul.f32 %v1148_v32, %v1120_v36  ;;  %v1122_v38 = vmax.f32 %v1114_v42, 0.0 }
 0x120   : > { %v1171_v51 = vmul.f32 %v1152_v39, %v1121_v49 }
 0x121   : > { %v11806_v53 = vcombine.low %v1169_v47, %v11803_v50  ;;  %v11808_v54 = vmul.f32 %v1156_v46, %v1122_v38 }
 0x122   : > { %v1195_v55 = vld [vmem:[#allocation2] sm:$0xff] }
 0x123   : > { %1193 = vst [vmem:[#allocation2 + $0x14] sm:$0xff] %v11806_v53  ;;  %v11812_v56 = vcombine.low %v1171_v51, %v11808_v54  ;;  %1543 = vrot.lane.b32.xlu0 %v1195_v55, %s11578_s20  ;;  %1212 = vrot.lane.b32.xlu1 %v1195_v55, %s11579_s21  ;;  %v2239_v43 = vcombine.high %v1195_v55, %v1195_v55 }
 0x124   : > { %v1196_v44 = vld [vmem:[#allocation2 + $0x8] sm:$0xff] }
 0x125   : > { %1194 = vst [vmem:[#allocation2 + $0x1c] sm:$0xff] %v11812_v56  ;;  %v1886_v58 = vcombine.high %v1196_v44, %v1196_v44 }
 0x127   : > { %2243 = vrot.lane.b32.xlu0 %v1195_v55, %s11580_s22  ;;  %1889 = vrot.lane.b32.xlu1 %v1195_v55, %s11581_s23 }
 0x12a   : > { %v1197_v11 = vld [vmem:[#allocation2 + $0x10] sm:$0xff] }
 0x12b   : > { %2951 = vrot.lane.b32.xlu0 %v1195_v55, %s11582_s24  ;;  %2597 = vrot.lane.b32.xlu1 %v1195_v55, %s11583_s25  ;;  %v11977_v34 = vcombine.high %v1197_v11, %v1197_v11 }
 0x12c   : > { %v11991_v36 = vld [vmem:[#allocation2 + $0x18] sm:$0xff]  ;;  %v1199_v47 = vld [vmem:[#allocation2 + $0x20] sm:$0xf] }
 0x12d   : > { %v2585_v22 = vld [vmem:[#allocation2 + $0x20] sm:$0xf] }
 0x12e   : > { %v3647_v48 = vld [vmem:[#allocation2 + $0x20] sm:$0xf] }
 0x12f   : > { %3659 = vrot.lane.b32.xlu0 %v1195_v55, %s11584_s26  ;;  %3305 = vrot.lane.b32.xlu1 %v1195_v55, %s11585_s27  ;;  %v3293_v45 = vld [vmem:[#allocation2 + $0x20] sm:$0xf] }
 0x130   : > { %v4355_v62 = vld [vmem:[#allocation2 + $0x20] sm:$0xf] }
 0x131   : > { %v4001_v61 = vld [vmem:[#allocation2 + $0x20] sm:$0xf] }
 0x133   : > { %4367 = vrot.lane.b32.xlu0 %v1195_v55, %s11586_s28  ;;  %4013 = vrot.lane.b32.xlu1 %v1195_v55, %s11587_s29 }
 0x137   : > { %5075 = vrot.lane.b32.xlu0 %v1195_v55, %s11588_s30  ;;  %4721 = vrot.lane.b32.xlu1 %v1195_v55, %s11589_s11 }
 0x13b   : > { %6108 = vrot.lane.b32.xlu0 %v11788_v23, %s11575_s14  ;;  %5429 = vrot.lane.b32.xlu1 %v1195_v55, %s11590_s12 }
 0x13f   : > { %6816 = vrot.lane.b32.xlu0 %v11788_v23, %s11577_s16  ;;  %6462 = vrot.lane.b32.xlu1 %v11788_v23, %s11576_s15 }
 0x143   : > { %1214 = vrot.lane.b32.xlu0 %v2239_v43, %s11579_s21  ;;  %1216 = vrot.lane.b32.xlu1 %v1196_v44, %s11579_s21 }
 0x147   : > { %1545 = vrot.lane.b32.xlu0 %v2239_v43, %s11578_s20  ;;  %1547 = vrot.lane.b32.xlu1 %v1196_v44, %s11578_s20 }
 0x14b   : > { %1893 = vrot.lane.b32.xlu0 %v1196_v44, %s11581_s23  ;;  %1891 = vrot.lane.b32.xlu1 %v2239_v43, %s11581_s23 }
 0x14f   : > { %2245 = vrot.lane.b32.xlu0 %v2239_v43, %s11580_s22  ;;  %2247 = vrot.lane.b32.xlu1 %v1196_v44, %s11580_s22 }
 0x153   : > { %2601 = vrot.lane.b32.xlu0 %v1196_v44, %s11583_s25  ;;  %2599 = vrot.lane.b32.xlu1 %v2239_v43, %s11583_s25 }
 0x157   : > { %2953 = vrot.lane.b32.xlu0 %v2239_v43, %s11582_s24  ;;  %2955 = vrot.lane.b32.xlu1 %v1196_v44, %s11582_s24 }
 0x15b   : > { %3309 = vrot.lane.b32.xlu0 %v1196_v44, %s11585_s27  ;;  %3307 = vrot.lane.b32.xlu1 %v2239_v43, %s11585_s27 }
 0x15f   : > { %3661 = vrot.lane.b32.xlu0 %v2239_v43, %s11584_s26  ;;  %3663 = vrot.lane.b32.xlu1 %v1196_v44, %s11584_s26 }
 0x163   : > { %4017 = vrot.lane.b32.xlu0 %v1196_v44, %s11587_s29  ;;  %4015 = vrot.lane.b32.xlu1 %v2239_v43, %s11587_s29 }
 0x167   : > { %4369 = vrot.lane.b32.xlu0 %v2239_v43, %s11586_s28  ;;  %4371 = vrot.lane.b32.xlu1 %v1196_v44, %s11586_s28 }
 0x16b   : > { %4725 = vrot.lane.b32.xlu0 %v1196_v44, %s11589_s11  ;;  %4723 = vrot.lane.b32.xlu1 %v2239_v43, %s11589_s11 }
 0x16f   : > { %5077 = vrot.lane.b32.xlu0 %v2239_v43, %s11588_s30  ;;  %5079 = vrot.lane.b32.xlu1 %v1196_v44, %s11588_s30 }
 0x173   : > { %5433 = vrot.lane.b32.xlu0 %v1196_v44, %s11590_s12  ;;  %5431 = vrot.lane.b32.xlu1 %v2239_v43, %s11590_s12 }
 0x177   : > { %6110 = vrot.lane.b32.xlu0 %v11862_v57, %s11575_s14  ;;  %6112 = vrot.lane.b32.xlu1 %v11793_v30, %s11575_s14 }
 0x17b   : > { %6466 = vrot.lane.b32.xlu0 %v11793_v30, %s11576_s15  ;;  %6464 = vrot.lane.b32.xlu1 %v11862_v57, %s11576_s15 }
 0x17f   : > { %6818 = vrot.lane.b32.xlu0 %v11862_v57, %s11577_s16  ;;  %6820 = vrot.lane.b32.xlu1 %v11793_v30, %s11577_s16 }
 0x183   : > { %7172 = vrot.lane.b32.xlu1 %v11862_v57, %s13764_s18  ;;  %1549 = vrot.lane.b32.xlu0 %v1886_v58, %s11578_s20  ;;  %s11597_s18 = smov 27  }
 0x187   : > { %2249 = vrot.lane.b32.xlu0 %v1886_v58, %s11580_s22  ;;  %1218 = vrot.lane.b32.xlu1 %v1886_v58, %s11579_s21 }
 0x18b   : > { %2957 = vrot.lane.b32.xlu0 %v1886_v58, %s11582_s24  ;;  %1895 = vrot.lane.b32.xlu1 %v1886_v58, %s11581_s23 }
 0x18f   : > { %3665 = vrot.lane.b32.xlu0 %v1886_v58, %s11584_s26  ;;  %2603 = vrot.lane.b32.xlu1 %v1886_v58, %s11583_s25 }
 0x193   : > { %4373 = vrot.lane.b32.xlu0 %v1886_v58, %s11586_s28  ;;  %3311 = vrot.lane.b32.xlu1 %v1886_v58, %s11585_s27 }
 0x195   : > { %v11893_v63 = vpop.permute.xlu0 %1543  ;;  %v1213_v0 = vpop.permute.xlu1 %1212 }
 0x197   : > { %5081 = vrot.lane.b32.xlu0 %v1886_v58, %s11588_s30  ;;  %4019 = vrot.lane.b32.xlu1 %v1886_v58, %s11587_s29 }
 0x199   : > { %v11901_v2 = vpop.permute.xlu0 %2243  ;;  %v11903_v3 = vpop.permute.xlu1 %1889 }
 0x19b   : > { %6114 = vrot.lane.b32.xlu0 %v11899_v1, %s11575_s14  ;;  %4727 = vrot.lane.b32.xlu1 %v1886_v58, %s11589_s11 }
 0x19d   : > { %v11908_v5 = vpop.permute.xlu0 %2951  ;;  %v11910_v6 = vpop.permute.xlu1 %2597 }
 0x19f   : > { %6822 = vrot.lane.b32.xlu0 %v11899_v1, %s11577_s16  ;;  %5435 = vrot.lane.b32.xlu1 %v1886_v58, %s11590_s12  ;;  %v2231_v58 = vld [vmem:[#allocation2 + $0x20] sm:$0xf] }
 0x1a1   : > { %v11915_v8 = vpop.permute.xlu0 %3659  ;;  %v11917_v10 = vpop.permute.xlu1 %3305 }
 0x1a3   : > { %1220 = vrot.lane.b32.xlu0 %v1197_v11, %s11579_s21  ;;  %6468 = vrot.lane.b32.xlu1 %v11899_v1, %s11576_s15 }
 0x1a5   : > { %v11922_v12 = vpop.permute.xlu0 %4367  ;;  %v11924_v14 = vpop.permute.xlu1 %4013 }
 0x1a7   : > { %1897 = vrot.lane.b32.xlu0 %v1197_v11, %s11581_s23  ;;  %1551 = vrot.lane.b32.xlu1 %v1197_v11, %s11578_s20 }
 0x1a9   : > { %v11928_v15 = vpop.permute.xlu0 %5075  ;;  %v11930_v16 = vpop.permute.xlu1 %4721 }
 0x1ab   : > { %2605 = vrot.lane.b32.xlu0 %v1197_v11, %s11583_s25  ;;  %2251 = vrot.lane.b32.xlu1 %v1197_v11, %s11580_s22 }
 0x1ad   : > { %v11934_v17 = vpop.permute.xlu0 %6108  ;;  %v11936_v19 = vpop.permute.xlu1 %5429 }
 0x1ae   : > { %13826 = vst [vmem:[#allocation8_spill] sm:$0xff] %v11934_v17  ;;  %13827 = vst [vmem:[#allocation9_spill] sm:$0xff] %v11936_v19 }
 0x1af   : > { %3313 = vrot.lane.b32.xlu0 %v1197_v11, %s11585_s27  ;;  %2959 = vrot.lane.b32.xlu1 %v1197_v11, %s11582_s24 }
 0x1b1   : > { %v11940_v20 = vpop.permute.xlu0 %6816  ;;  %v11942_v21 = vpop.permute.xlu1 %6462 }
 0x1b2   : > { %13828 = vst [vmem:[#allocation10_spill] sm:$0xff] %v11940_v20  ;;  %13829 = vst [vmem:[#allocation11_spill] sm:$0xff] %v11942_v21 }
 0x1b3   : > { %4021 = vrot.lane.b32.xlu0 %v1197_v11, %s11587_s29  ;;  %3667 = vrot.lane.b32.xlu1 %v1197_v11, %s11584_s26 }
 0x1b5   : > { %v1215_v24 = vpop.permute.xlu0 %1214  ;;  %v11946_v25 = vpop.permute.xlu1 %1216 }
 0x1b6   : > { %v1231_v26 = vsel %vm1230_vm2, %v1213_v0, %v1215_v24  ;;  %v1232_v27 = vsel %vm1230_vm2, %v1215_v24, %v11946_v25  ;;  %v1877_v0 = vld [vmem:[#allocation2 + $0x20] sm:$0xf] }
 0x1b7   : > { %10937 = vmatprep.subr.msk.mxu0 %vm1242_vm3, %v1232_v27  ;;  %4729 = vrot.lane.b32.xlu0 %v1197_v11, %s11589_s11 }
 0x1b8   : > { %4375 = vrot.lane.b32.xlu1 %v1197_v11, %s11586_s28  ;;  %10938 = vmatpush1.msk.msra.mxu0 %vm1242_vm3, %v1231_v26 }
 0x1b9   : > { %v11960_v29 = vpop.permute.xlu0 %1545  ;;  %v11962_v31 = vpop.permute.xlu1 %1547  ;;  %10939 = vmatmul.mubr.msk.f32.vlgmr.msra.gmra.mrb[24].mxu0 %vm443_vm1, %v11958_v28 }
 0x1ba   : > { %1465 = vmatprep.mubr.f32.mxu0 %v13774_v59 }
 0x1bb   : > { %5437 = vrot.lane.b32.xlu0 %v1197_v11, %s11590_s12 }
 0x1bc   : > { %5083 = vrot.lane.b32.xlu1 %v1197_v11, %s11588_s30 }
 0x1bd   : > { %v11969_v32 = vpop.permute.xlu0 %1893  ;;  %v11971_v33 = vpop.permute.xlu1 %1891 }
 0x1bf   : > { %6470 = vrot.lane.b32.xlu0 %v11806_v53, %s11576_s15 }
 0x1c0   : > { %6116 = vrot.lane.b32.xlu1 %v11806_v53, %s11575_s14 }
 0x1c1   : > { %v11979_v35 = vpop.permute.xlu0 %2245  ;;  %v11981_v37 = vpop.permute.xlu1 %2247 }
 0x1c3   : > { %1222 = vrot.lane.b32.xlu0 %v11977_v34, %s11579_s21 }
 0x1c4   : > { %6824 = vrot.lane.b32.xlu1 %v11806_v53, %s11577_s16 }
 0x1c5   : > { %v11987_v39 = vpop.permute.xlu0 %2601  ;;  %v11989_v40 = vpop.permute.xlu1 %2599 }
 0x1c6   : > { %13830 = vst [vmem:[#allocation12_spill] sm:$0xff] %v11987_v39 }
 0x1c7   : > { %1555 = vrot.lane.b32.xlu0 %v11991_v36, %s11578_s20 }
 0x1c8   : > { %1224 = vrot.lane.b32.xlu1 %v11991_v36, %s11579_s21 }
 0x1c9   : > { %v11997_v42 = vpop.permute.xlu0 %2953  ;;  %v11999_v46 = vpop.permute.xlu1 %2955 }
 0x1ca   : > { %13831 = vst [vmem:[#allocation13_spill] sm:$0xff] %v11999_v46 }
 0x1cb   : > { %1559 = vrot.lane.b32.xlu0 %v1199_v47, %s11578_s20 }
 0x1cc   : > { %1228 = vrot.lane.b32.xlu1 %v1199_v47, %s11579_s21 }
 0x1cd   : > { %v12003_v49 = vpop.permute.xlu0 %3309  ;;  %v12005_v38 = vpop.permute.xlu1 %3307 }
 0x1cf   : > { %1899 = vrot.lane.b32.xlu0 %v11977_v34, %s11581_s23 }
 0x1d0   : > { %1553 = vrot.lane.b32.xlu1 %v11977_v34, %s11578_s20 }
 0x1d1   : > { %v12011_v51 = vpop.permute.xlu0 %3661  ;;  %v12013_v55 = vpop.permute.xlu1 %3663 }
 0x1d2   : > { %13832 = vst [vmem:[#allocation14_spill] sm:$0xff] %v12013_v55 }
 0x1d3   : > { %2255 = vrot.lane.b32.xlu0 %v11991_v36, %s11580_s22 }
 0x1d4   : > { %1901 = vrot.lane.b32.xlu1 %v11991_v36, %s11581_s23 }
 0x1d5   : > { %v12019_v43 = vpop.permute.xlu0 %4017  ;;  %v12021_v44 = vpop.permute.xlu1 %4015 }
 0x1d7   : > { %2259 = vrot.lane.b32.xlu0 %v2231_v58, %s11580_s22 }
 0x1d8   : > { %1905 = vrot.lane.b32.xlu1 %v1877_v0, %s11581_s23  ;;  %v2939_v0 = vld [vmem:[#allocation2 + $0x20] sm:$0xf] }
 0x1d9   : > { %v12025_v11 = vpop.permute.xlu0 %4369  ;;  %v12027_v24 = vpop.permute.xlu1 %4371 }
 0x1da   : > { %13833 = vst [vmem:[#allocation15_spill] sm:$0xff] %v12027_v24 }
 0x1db   : > { %2607 = vrot.lane.b32.xlu0 %v11977_v34, %s11583_s25 }
 0x1dc   : > { %2253 = vrot.lane.b32.xlu1 %v11977_v34, %s11580_s22 }
 0x1dd   : > { %v12033_v26 = vpop.permute.xlu0 %4725  ;;  %v12035_v27 = vpop.permute.xlu1 %4723 }
 0x1de   : > { %13834 = vst [vmem:[#allocation16_spill] sm:$0xff] %v12033_v26 }
 0x1df   : > { %2963 = vrot.lane.b32.xlu0 %v11991_v36, %s11582_s24 }
 0x1e0   : > { %2609 = vrot.lane.b32.xlu1 %v11991_v36, %s11583_s25 }
 0x1e1   : > { %v12041_v47 = vpop.permute.xlu0 %5077  ;;  %v12043_v58 = vpop.permute.xlu1 %5079 }
 0x1e2   : > { %13835 = vst [vmem:[#allocation17_spill] sm:$0xff] %v12043_v58 }
 0x1e3   : > { %2967 = vrot.lane.b32.xlu0 %v2939_v0, %s11582_s24 }
 0x1e4   : > { %2613 = vrot.lane.b32.xlu1 %v2585_v22, %s11583_s25 }
 0x1e5   : > { %v12047_v18 = vpop.permute.xlu0 %5433  ;;  %v12049_v13 = vpop.permute.xlu1 %5431 }
 0x1e6   : > { %13836 = vst [vmem:[#allocation18_spill] sm:$0xff] %v12049_v13 }
 0x1e7   : > { %3315 = vrot.lane.b32.xlu0 %v11977_v34, %s11585_s27 }
 0x1e8   : > { %2961 = vrot.lane.b32.xlu1 %v11977_v34, %s11582_s24 }
 0x1e9   : > { %v12055_v9 = vpop.permute.xlu0 %6110  ;;  %v12057_v52 = vpop.permute.xlu1 %6112 }
 0x1ea   : > { %13837 = vst [vmem:[#allocation19_spill] sm:$0xff] %v12055_v9  ;;  %13838 = vst [vmem:[#allocation20_spill] sm:$0xff] %v12057_v52 }
 0x1eb   : > { %3671 = vrot.lane.b32.xlu0 %v11991_v36, %s11584_s26 }
 0x1ec   : > { %3317 = vrot.lane.b32.xlu1 %v11991_v36, %s11585_s27 }
 0x1ed   : > { %v12063_v22 = vpop.permute.xlu0 %6466  ;;  %v12065_v0 = vpop.permute.xlu1 %6464 }
 0x1ee   : > { %13839 = vst [vmem:[#allocation21_spill] sm:$0xff] %v12063_v22  ;;  %13840 = vst [vmem:[#allocation22_spill] sm:$0xff] %v12065_v0 }
 0x1ef   : > { %3675 = vrot.lane.b32.xlu0 %v3647_v48, %s11584_s26 }
 0x1f0   : > { %3321 = vrot.lane.b32.xlu1 %v3293_v45, %s11585_s27 }
 0x1f1   : > { %v12069_v41 = vpop.permute.xlu0 %6818  ;;  %v12071_v59 = vpop.permute.xlu1 %6820 }
 0x1f2   : > { %13841 = vst [vmem:[#allocation23_spill] sm:$0xff] %v12069_v41  ;;  %13842 = vst [vmem:[#allocation24_spill] sm:$0xff] %v12071_v59  ;;  %v5063_v59 = vld [vmem:[#allocation2 + $0x20] sm:$0xf] }
 0x1f3   : > { %4023 = vrot.lane.b32.xlu0 %v11977_v34, %s11587_s29 }
 0x1f4   : > { %3669 = vrot.lane.b32.xlu1 %v11977_v34, %s11584_s26 }
 0x1f5   : > { %v12077_v7 = vpop.permute.xlu1 %7172  ;;  %v12079_v4 = vpop.permute.xlu0 %1549 }
 0x1f6   : > { %13843 = vst [vmem:[#allocation25_spill] sm:$0xff] %v12077_v7 }
 0x1f7   : > { %4379 = vrot.lane.b32.xlu0 %v11991_v36, %s11586_s28 }
 0x1f8   : > { %4025 = vrot.lane.b32.xlu1 %v11991_v36, %s11587_s29 }
 0x1f9   : > { %v12085_v45 = vpop.permute.xlu0 %2249  ;;  %v1219_v48 = vpop.permute.xlu1 %1218 }
 0x1fa   : > { %13844 = vst [vmem:[#allocation26_spill] sm:$0xff] %v12085_v45 }
 0x1fb   : > { %4383 = vrot.lane.b32.xlu0 %v4355_v62, %s11586_s28 }
 0x1fc   : > { %4029 = vrot.lane.b32.xlu1 %v4001_v61, %s11587_s29 }
 0x1fd   : > { %v12089_v60 = vpop.permute.xlu0 %2957  ;;  %v12091_v7 = vpop.permute.xlu1 %1895 }
 0x1fe   : > { %13845 = vst [vmem:[#allocation27_spill] sm:$0xff] %v12089_v60  ;;  %13846 = vst [vmem:[#allocation28_spill] sm:$0xff] %v12091_v7  ;;  %v4709_v60 = vld [vmem:[#allocation2 + $0x20] sm:$0xf]  ;;  %v11563_v7 = vcombine.low %v11808_v54, %v11808_v54 }
 0x1ff   : > { %4731 = vrot.lane.b32.xlu0 %v11977_v34, %s11589_s11 }
 0x200   : > { %4377 = vrot.lane.b32.xlu1 %v11977_v34, %s11586_s28 }
 0x201   : > { %v12097_v20 = vpop.permute.xlu0 %3665  ;;  %v12099_v41 = vpop.permute.xlu1 %2603 }
 0x202   : > { %13847 = vst [vmem:[#allocation29_spill] sm:$0xff] %v12097_v20  ;;  %13848 = vst [vmem:[#allocation30_spill] sm:$0xff] %v12099_v41 }
 0x203   : > { %5087 = vrot.lane.b32.xlu0 %v11991_v36, %s11588_s30 }
 0x204   : > { %4733 = vrot.lane.b32.xlu1 %v11991_v36, %s11589_s11 }
 0x205   : > { %v12105_v61 = vpop.permute.xlu0 %4373  ;;  %v12107_v62 = vpop.permute.xlu1 %3311 }
 0x206   : > { %13849 = vst [vmem:[#allocation31_spill] sm:$0xff] %v12105_v61  ;;  %13850 = vst [vmem:[#allocation32_spill] sm:$0xff] %v12107_v62  ;;  %v1233_v62 = vsel %vm1230_vm2, %v11946_v25, %v1219_v48  ;;  %v13858_v25 = vmov 0.0  }
 0x207   : > { %5091 = vrot.lane.b32.xlu0 %v5063_v59, %s11588_s30  ;;  %v12129_v59 = vcombine.low %v11803_v50, %v11803_v50  ;;  %v1211_v50 = vcombine.high %v11991_v36, %v11991_v36 }
 0x208   : > { %4737 = vrot.lane.b32.xlu1 %v4709_v60, %s11589_s11 }
 0x209   : > { %v12111_v21 = vpop.permute.xlu0 %5081  ;;  %v12113_v20 = vpop.permute.xlu1 %4019 }
 0x20a   : > { %13851 = vst [vmem:[#allocation33_spill] sm:$0xff] %v12111_v21  ;;  %13852 = vst [vmem:[#allocation34_spill] sm:$0xff] %v12113_v20 }
 0x20b   : > { %5439 = vrot.lane.b32.xlu0 %v11977_v34, %s11590_s12 }
 0x20c   : > { %5085 = vrot.lane.b32.xlu1 %v11977_v34, %s11588_s30  ;;  %v5417_v34 = vld [vmem:[#allocation2 + $0x20] sm:$0xf] }
 0x20d   : > { %v12119_v0 = vpop.permute.xlu0 %6114  ;;  %v12121_v61 = vpop.permute.xlu1 %4727 }
 0x20e   : > { %13853 = vst [vmem:[#allocation35_spill] sm:$0xff] %v12119_v0  ;;  %13854 = vst [vmem:[#allocation36_spill] sm:$0xff] %v12121_v61 }
 0x20f   : > { %6120 = vrot.lane.b32.xlu0 %v11812_v56, %s11575_s14 }
 0x210   : > { %5441 = vrot.lane.b32.xlu1 %v11991_v36, %s11590_s12 }
 0x211   : > { %v12131_v60 = vpop.permute.xlu0 %6822  ;;  %v12133_v21 = vpop.permute.xlu1 %5435 }
 0x212   : > { %13855 = vst [vmem:[#allocation37_spill] sm:$0xff] %v12131_v60  ;;  %13856 = vst [vmem:[#allocation38_spill] sm:$0xff] %v12133_v21 }
 0x213   : > { %6472 = vrot.lane.b32.xlu0 %v12129_v59, %s11576_s15 }
 0x214   : > { %5445 = vrot.lane.b32.xlu1 %v5417_v34, %s11590_s12 }
 0x215   : > { %v1221_v0 = vpop.permute.xlu0 %1220  ;;  %v12138_v61 = vpop.permute.xlu1 %6468 }
 0x216   : > { %13857 = vst [vmem:[#allocation39_spill] sm:$0xff] %v12138_v61  ;;  %v1234_v20 = vsel %vm1230_vm2, %v1219_v48, %v1221_v0 }
 0x217   : > { %6828 = vrot.lane.b32.xlu0 %v11812_v56, %s11577_s16  ;;  %10940 = vmatprep.subr.msk.mxu1 %vm1242_vm3, %v1234_v20 }
 0x218   : > { %6118 = vrot.lane.b32.xlu1 %v12129_v59, %s11575_s14  ;;  %10941 = vmatpush1.msk.msra.mxu1 %vm1242_vm3, %v1233_v62 }
 0x219   : > { %v12151_v34 = vpop.permute.xlu0 %1897  ;;  %v12153_v60 = vpop.permute.xlu1 %1551  ;;  %10942 = vmatmul.mubr.msk.f32.vlgmr.msra.gmra.mrb[24].mxu1 %vm443_vm1, %v11958_v28 }
 0x21a   : > { %1536 = vmatprep.mubr.f32.mxu1 %v13858_v25 }
 0x21b   : > { %1226 = vrot.lane.b32.xlu0 %v1211_v50, %s11579_s21  ;;  %s11595_s21 = smov 29  }
 0x21c   : > { %6474 = vrot.lane.b32.xlu1 %v11812_v56, %s11576_s15 }
 0x21d   : > { %v12161_v20 = vpop.permute.xlu0 %2605  ;;  %v12163_v48 = vpop.permute.xlu1 %2251 }
 0x21f   : > { %1903 = vrot.lane.b32.xlu0 %v1211_v50, %s11581_s23  ;;  %s11599_s23 = smov 18  }
 0x220   : > { %6826 = vrot.lane.b32.xlu1 %v12129_v59, %s11577_s16 }
 0x221   : > { %v12168_v36 = vpop.permute.xlu0 %3313  ;;  %v12170_v62 = vpop.permute.xlu1 %2959 }
 0x223   : > { %2611 = vrot.lane.b32.xlu0 %v1211_v50, %s11583_s25 }
 0x224   : > { %1557 = vrot.lane.b32.xlu1 %v1211_v50, %s11578_s20  ;;  %s13863_s20 = smov 117  }
 0x225   : > { %v12174_v61 = vpop.permute.xlu0 %4021  ;;  %v12176_v21 = vpop.permute.xlu1 %3667 }
 0x227   : > { %3319 = vrot.lane.b32.xlu0 %v1211_v50, %s11585_s27  ;;  %s11593_s27 = smov 38  }
 0x228   : > { %2257 = vrot.lane.b32.xlu1 %v1211_v50, %s11580_s22  ;;  %s11592_s22 = smov 39  }
 0x229   : > { %v12180_v22 = vpop.permute.xlu0 %4729 }
 0x22a   : > { %v12182_v41 = vpop.permute.xlu1 %4375 }
 0x22b   : > { %4027 = vrot.lane.b32.xlu0 %v1211_v50, %s11587_s29 }
 0x22c   : > { %2965 = vrot.lane.b32.xlu1 %v1211_v50, %s11582_s24 }
 0x22d   : > { %v12186_v17 = vpop.permute.xlu0 %5437 }
 0x22e   : > { %13859 = vst [vmem:[#allocation40_spill] sm:$0xff] %v12186_v17  ;;  %v12188_v9 = vpop.permute.xlu1 %5083 }
 0x22f   : > { %4735 = vrot.lane.b32.xlu0 %v1211_v50, %s11589_s11  ;;  %s399_s11 = scalar_lea.vmem %s13763_s10, %s11673_s17 }
 0x230   : > { %3673 = vrot.lane.b32.xlu1 %v1211_v50, %s11584_s26  ;;  %s11596_s26 = smov 28  }
 0x231   : > { %v12192_v52 = vpop.permute.xlu0 %6470 }
 0x232   : > { %13860 = vst [vmem:[#allocation41_spill] sm:$0xff] %v12192_v52  ;;  %v12194_v45 = vpop.permute.xlu1 %6116 }
 0x233   : > { %13861 = vst [vmem:[#allocation42_spill] sm:$0xff] %v12194_v45  ;;  %5443 = vrot.lane.b32.xlu0 %v1211_v50, %s11590_s12  ;;  %s11594_s12 = smov 37  }
 0x234   : > { %4381 = vrot.lane.b32.xlu1 %v1211_v50, %s11586_s28 }
 0x235   : > { %v1223_v19 = vpop.permute.xlu0 %1222 }
 0x236   : > { %v12200_v13 = vpop.permute.xlu1 %6824  ;;  %v1235_v54 = vsel %vm1230_vm2, %v1221_v0, %v1223_v19  ;;  %v12235_v0 = vld [vmem:[%s13761_s8] sm:$0xf] }
 0x237   : > { %13862 = vst [vmem:[#allocation43_spill] sm:$0xff] %v12200_v13  ;;  %6476 = vrot.lane.b32.xlu0 %v11563_v7, %s11576_s15  ;;  %v1563_v13 = vsel %vm1561_vm4, %v11960_v29, %v11962_v31 }
 0x238   : > { %5089 = vrot.lane.b32.xlu1 %v1211_v50, %s11588_s30 }
 0x239   : > { %v12204_v17 = vpop.permute.xlu0 %1555 }
 0x23a   : > { %v12206_v52 = vpop.permute.xlu1 %1224 }
 0x23b   : > { %7174 = vrot.lane.b32.xlu0 %v11793_v30, %s13863_s20  ;;  %v1236_v45 = vsel %vm1230_vm2, %v1223_v19, %v12206_v52  ;;  %v1562_v30 = vsel %vm1561_vm4, %v11893_v63, %v11960_v29 }
 0x23c   : > { %6122 = vrot.lane.b32.xlu1 %v11563_v7, %s11575_s14  ;;  %10943 = vmatprep.subr.msk.mxu0 %vm1242_vm3, %v1236_v45 }
 0x23d   : > { %10944 = vmatpush1.msk.msra.mxu0 %vm1242_vm3, %v1235_v54  ;;  %v12216_v50 = vpop.permute.xlu0 %1559  ;;  %v1909_v54 = vsel %vm1907_vm5, %v11971_v33, %v11969_v32 }
 0x23e   : > { %10945 = vmatmul.mubr.msk.f32.vlgmr.msra.gmra.mrb[26].mxu0 %vm443_vm1, %v11958_v28  ;;  %10949 = vmatprep.subr.msk.mxu0 %vm1242_vm3, %v1563_v13  ;;  %v12227_v19 = vpop.permute.xlu1 %1228 }
 0x23f   : > { %10950 = vmatpush1.msk.msra.mxu0 %vm1242_vm3, %v1562_v30  ;;  %7178 = vrot.lane.b32.xlu0 %v11806_v53, %s13863_s20 }
 0x240   : > { %6830 = vrot.lane.b32.xlu1 %v11563_v7, %s11577_s16  ;;  %1653 = vmatprep.mubr.f32.mxu0 %v13858_v25  ;;  %s11598_s16 = smov 19  }
 0x241   : > { %v1900_v63 = vpop.permute.xlu0 %1899 }
 0x242   : > { %10951 = vmatmul.mubr.msk.f32.vlgmr.msra.gmra.mrb[24].mxu0 %vm443_vm1, %v12235_v0  ;;  %v1554_v13 = vpop.permute.xlu1 %1553 }
 0x243   : > { %v1566_v29 = vsel %vm1561_vm4, %v12153_v60, %v1554_v13  ;;  %7180 = vrot.lane.b32.xlu0 %v12129_v59, %s13863_s20  ;;  %v1567_v53 = vsel %vm1561_vm4, %v1554_v13, %v12204_v17  ;;  %1795 = vmatprep.mubr.f32.mxu0 %v13858_v25  ;;  %v1908_v59 = vsel %vm1907_vm5, %v11903_v3, %v11971_v33  ;;  %v12272_v13 = vld [vmem:[%s13761_s8 + $0x8] sm:$0xf] }
 0x244   : > { %7176 = vrot.lane.b32.xlu1 %v11899_v1, %s13863_s20  ;;  %10955 = vmatprep.subr.msk.mxu0 %vm1242_vm3, %v1567_v53  ;;  %v2263_v53 = vsel %vm2261_vm6, %v11979_v35, %v11981_v37 }
 0x245   : > { %10956 = vmatpush1.msk.msra.mxu0 %vm1242_vm3, %v1566_v29  ;;  %v12252_v45 = vpop.permute.xlu0 %2255  ;;  %v12286_v29 = vld [vmem:[#allocation2 + $0xc] sm:$0xff] }
 0x246   : > { %10957 = vmatmul.mubr.msk.f32.vlgmr.msra.gmra.mrb[26].mxu0 %vm443_vm1, %v12235_v0  ;;  %10962 = vmatprep.subr.msk.mxu0 %vm1242_vm3, %v1909_v54  ;;  %v12263_v1 = vpop.permute.xlu1 %1901  ;;  %v12300_v54 = vcombine.high %v12286_v29, %v12286_v29 }
 0x247   : > { %10963 = vmatpush1.msk.msra.mxu0 %vm1242_vm3, %v1908_v59  ;;  %7184 = vrot.lane.b32.xlu0 %v11563_v7, %s13863_s20  ;;  %v1913_v30 = vsel %vm1907_vm5, %v1900_v63, %v12263_v1  ;;  %v1912_v7 = vsel %vm1907_vm5, %v12151_v34, %v1900_v63  ;;  %v7158_v59 = vld [vmem:[#allocation2 + $0x24] sm:$0xf] }
 0x248   : > { %7170 = vrot.lane.b32.xlu1 %v11788_v23, %s13863_s20  ;;  %10968 = vmatprep.subr.msk.mxu0 %vm1242_vm3, %v1913_v30  ;;  %v2262_v30 = vsel %vm2261_vm6, %v11901_v2, %v11979_v35 }
 0x249   : > { %1999 = vmatprep.mubr.f32.mxu0 %v13858_v25  ;;  %v12278_v3 = vpop.permute.xlu0 %2259 }
 0x24a   : > { %10964 = vmatmul.mubr.msk.f32.vlgmr.msra.gmra.mrb[24].mxu0 %vm443_vm1, %v12272_v13  ;;  %v12284_v33 = vpop.permute.xlu1 %1905 }
 0x24b   : > { %10969 = vmatpush1.msk.msra.mxu0 %vm1242_vm3, %v1912_v7  ;;  %7526 = vrot.lane.b32.xlu0 %v11862_v57, %s11592_s22  ;;  %v12315_v7 = vld [vmem:[%s13761_s8 + $0xc] sm:$0xf] }
 0x24c   : > { %10975 = vmatprep.subr.msk.mxu0 %vm1242_vm3, %v2263_v53  ;;  %7182 = vrot.lane.b32.xlu1 %v11812_v56, %s13863_s20 }
 0x24d   : > { %2141 = vmatprep.mubr.f32.mxu0 %v13858_v25  ;;  %v2608_v63 = vpop.permute.xlu0 %2607 }
 0x24e   : > { %10970 = vmatmul.mubr.msk.f32.vlgmr.msra.gmra.mrb[26].mxu0 %vm443_vm1, %v12272_v13  ;;  %v2254_v57 = vpop.permute.xlu1 %2253 }
 0x24f   : > { %10976 = vmatpush1.msk.msra.mxu0 %vm1242_vm3, %v2262_v30  ;;  %7530 = vrot.lane.b32.xlu0 %v12300_v54, %s11592_s22  ;;  %v2267_v56 = vsel %vm2261_vm6, %v2254_v57, %v12252_v45  ;;  %v2266_v35 = vsel %vm2261_vm6, %v12163_v48, %v2254_v57  ;;  %v2616_v57 = vsel %vm2615_vm7, %v11910_v6, %v11989_v40  ;;  %v12359_v6 = vld [vmem:[%s13761_s8 + $0x10] sm:$0xf] }
 0x250   : > { %7186 = vrot.lane.b32.xlu1 %v7158_v59, %s13863_s20  ;;  %10981 = vmatprep.subr.msk.mxu0 %vm1242_vm3, %v2267_v56  ;;  %v2617_v59 = vsel %vm2615_vm7, %v11989_v40, %v11987_v39  ;;  %13868 = vst [vmem:[#allocation48_spill] sm:$0xff] %v12359_v6  ;;  %v7512_v40 = vld [vmem:[#allocation2 + $0x24] sm:$0xf]  ;;  %v2970_v39 = vsel %vm2969_vm8, %v11908_v5, %v11997_v42  ;;  %v12403_v5 = vld [vmem:[%s13761_s8 + $0x14] sm:$0xf] }
 0x251   : > { %2353 = vmatprep.mubr.f32.mxu0 %v13858_v25  ;;  %v12320_v2 = vpop.permute.xlu0 %2963 }
 0x252   : > { %13864 = vst [vmem:[#allocation44_spill] sm:$0xff] %v12320_v2  ;;  %10977 = vmatmul.mubr.msk.f32.vlgmr.msra.gmra.mrb[24].mxu0 %vm443_vm1, %v12315_v7  ;;  %v12326_v53 = vpop.permute.xlu1 %2609 }
 0x253   : > { %13865 = vst [vmem:[#allocation45_spill] sm:$0xff] %v12326_v53  ;;  %10982 = vmatpush1.msk.msra.mxu0 %vm1242_vm3, %v2266_v35  ;;  %7524 = vrot.lane.b32.xlu0 %v11788_v23, %s11592_s22  ;;  %v12347_v35 = vld [vmem:[#allocation2 + $0x1c] sm:$0xff]  ;;  %v2621_v23 = vsel %vm2615_vm7, %v2608_v63, %v12326_v53 }
 0x254   : > { %10988 = vmatprep.subr.msk.mxu0 %vm1242_vm3, %v2617_v59  ;;  %7528 = vrot.lane.b32.xlu1 %v12286_v29, %s11592_s22  ;;  %v12354_v59 = vld [vmem:[#allocation2 + $0x14] sm:$0xff] }
 0x255   : > { %2495 = vmatprep.mubr.f32.mxu0 %v13858_v25  ;;  %v12338_v30 = vpop.permute.xlu0 %2967  ;;  %v12369_v53 = vcombine.high %v12354_v59, %v12354_v59 }
 0x256   : > { %13866 = vst [vmem:[#allocation46_spill] sm:$0xff] %v12338_v30  ;;  %10983 = vmatmul.mubr.msk.f32.vlgmr.msra.gmra.mrb[26].mxu0 %vm443_vm1, %v12315_v7  ;;  %v12345_v56 = vpop.permute.xlu1 %2613  ;;  %v2620_v30 = vsel %vm2615_vm7, %v12161_v20, %v2608_v63 }
 0x257   : > { %13867 = vst [vmem:[#allocation47_spill] sm:$0xff] %v12345_v56  ;;  %10989 = vmatpush1.msk.msra.mxu0 %vm1242_vm3, %v2616_v57  ;;  %7536 = vrot.lane.b32.xlu0 %v12347_v35, %s11592_s22 }
 0x258   : > { %10994 = vmatprep.subr.msk.mxu0 %vm1242_vm3, %v2621_v23  ;;  %7532 = vrot.lane.b32.xlu1 %v12354_v59, %s11592_s22  ;;  %v2971_v23 = vsel %vm2969_vm8, %v11997_v42, %v11999_v46  ;;  %v12405_v42 = vld [vmem:[#allocation2 + $0x4] sm:$0xff] }
 0x259   : > { %2707 = vmatprep.mubr.f32.mxu0 %v13858_v25  ;;  %v3316_v57 = vpop.permute.xlu0 %3315 }
 0x25a   : > { %10990 = vmatmul.mubr.msk.f32.vlgmr.msra.gmra.mrb[24].mxu0 %vm443_vm1, %v12359_v6  ;;  %v2962_v56 = vpop.permute.xlu1 %2961 }
 0x25b   : > { %10995 = vmatpush1.msk.msra.mxu0 %vm1242_vm3, %v2620_v30  ;;  %7540 = vrot.lane.b32.xlu0 %v7512_v40, %s11592_s22  ;;  %v12389_v30 = vcombine.high %v12347_v35, %v12347_v35 }
 0x25c   : > { %11001 = vmatprep.subr.msk.mxu0 %vm1242_vm3, %v2971_v23  ;;  %7534 = vrot.lane.b32.xlu1 %v12369_v53, %s11592_s22  ;;  %v2975_v23 = vsel %vm2969_vm8, %v2962_v56, %v12320_v2  ;;  %v2974_v2 = vsel %vm2969_vm8, %v12170_v62, %v2962_v56 }
 0x25d   : > { %2849 = vmatprep.mubr.f32.mxu0 %v13858_v25  ;;  %v12382_v63 = vpop.permute.xlu0 %3671 }
 0x25e   : > { %13869 = vst [vmem:[#allocation49_spill] sm:$0xff] %v12382_v63  ;;  %10996 = vmatmul.mubr.msk.f32.vlgmr.msra.gmra.mrb[26].mxu0 %vm443_vm1, %v12359_v6  ;;  %v12393_v40 = vpop.permute.xlu1 %3317  ;;  %v12421_v6 = vcombine.high %v12405_v42, %v12405_v42 }
 0x25f   : > { %11002 = vmatpush1.msk.msra.mxu0 %vm1242_vm3, %v2970_v39  ;;  %7882 = vrot.lane.b32.xlu0 %v12286_v29, %s11593_s27 }
 0x260   : > { %11007 = vmatprep.subr.msk.mxu0 %vm1242_vm3, %v2975_v23  ;;  %7538 = vrot.lane.b32.xlu1 %v12389_v30, %s11592_s22  ;;  %v3325_v23 = vsel %vm3323_vm9, %v12005_v38, %v12003_v49 }
 0x261   : > { %3061 = vmatprep.mubr.f32.mxu0 %v13858_v25  ;;  %v12411_v39 = vpop.permute.xlu0 %3675 }
 0x262   : > { %13870 = vst [vmem:[#allocation50_spill] sm:$0xff] %v12411_v39  ;;  %11003 = vmatmul.mubr.msk.f32.vlgmr.msra.gmra.mrb[24].mxu0 %vm443_vm1, %v12403_v5  ;;  %v12417_v46 = vpop.permute.xlu1 %3321  ;;  %v3324_v39 = vsel %vm3323_vm9, %v11917_v10, %v12005_v38  ;;  %v3328_v38 = vsel %vm3323_vm9, %v12168_v36, %v3316_v57 }
 0x263   : > { %13871 = vst [vmem:[#allocation51_spill] sm:$0xff] %v12417_v46  ;;  %11008 = vmatpush1.msk.msra.mxu0 %vm1242_vm3, %v2974_v2  ;;  %7886 = vrot.lane.b32.xlu0 %v12354_v59, %s11593_s27  ;;  %v3329_v46 = vsel %vm3323_vm9, %v3316_v57, %v12393_v40 }
 0x264   : > { %11014 = vmatprep.subr.msk.mxu0 %vm1242_vm3, %v3325_v23  ;;  %7880 = vrot.lane.b32.xlu1 %v12421_v6, %s11593_s27  ;;  %v12446_v23 = vld [vmem:[%s13761_s8 + $0x18] sm:$0xf] }
 0x265   : > { %3203 = vmatprep.mubr.f32.mxu0 %v13858_v25  ;;  %v4024_v56 = vpop.permute.xlu0 %4023 }
 0x266   : > { %11009 = vmatmul.mubr.msk.f32.vlgmr.msra.gmra.mrb[26].mxu0 %vm443_vm1, %v12403_v5  ;;  %v3670_v2 = vpop.permute.xlu1 %3669 }
 0x267   : > { %11015 = vmatpush1.msk.msra.mxu0 %vm1242_vm3, %v3324_v39  ;;  %7888 = vrot.lane.b32.xlu0 %v12369_v53, %s11593_s27 }
 0x268   : > { %11020 = vmatprep.subr.msk.mxu0 %vm1242_vm3, %v3329_v46  ;;  %7884 = vrot.lane.b32.xlu1 %v12300_v54, %s11593_s27  ;;  %v3679_v46 = vsel %vm3677_vm10, %v12011_v51, %v12013_v55 }
 0x269   : > { %3415 = vmatprep.mubr.f32.mxu0 %v13858_v25  ;;  %v12452_v10 = vpop.permute.xlu0 %4379 }
 0x26a   : > { %11016 = vmatmul.mubr.msk.f32.vlgmr.msra.gmra.mrb[24].mxu0 %vm443_vm1, %v12446_v23  ;;  %v12458_v39 = vpop.permute.xlu1 %4025 }
 0x26b   : > { %11021 = vmatpush1.msk.msra.mxu0 %vm1242_vm3, %v3328_v38  ;;  %7892 = vrot.lane.b32.xlu0 %v12389_v30, %s11593_s27  ;;  %v3678_v38 = vsel %vm3677_vm10, %v11915_v8, %v12011_v51  ;;  %v7866_v51 = vld [vmem:[#allocation2 + $0x24] sm:$0xf] }
 0x26c   : > { %11027 = vmatprep.subr.msk.mxu0 %vm1242_vm3, %v3679_v46  ;;  %7878 = vrot.lane.b32.xlu1 %v12405_v42, %s11593_s27  ;;  %v3683_v46 = vsel %vm3677_vm10, %v3670_v2, %v12382_v63  ;;  %v4032_v63 = vsel %vm4031_vm11, %v11924_v14, %v12021_v44 }
 0x26d   : > { %3557 = vmatprep.mubr.f32.mxu0 %v13858_v25  ;;  %v12470_v57 = vpop.permute.xlu0 %4383 }
 0x26e   : > { %13872 = vst [vmem:[#allocation52_spill] sm:$0xff] %v12470_v57  ;;  %11022 = vmatmul.mubr.msk.f32.vlgmr.msra.gmra.mrb[26].mxu0 %vm443_vm1, %v12446_v23  ;;  %v12477_v55 = vpop.permute.xlu1 %4029  ;;  %v12487_v57 = vld [vmem:[%s13761_s8 + $0x1c] sm:$0xf] }
 0x26f   : > { %13873 = vst [vmem:[#allocation53_spill] sm:$0xff] %v12477_v55  ;;  %11028 = vmatpush1.msk.msra.mxu0 %vm1242_vm3, %v3678_v38  ;;  %8234 = vrot.lane.b32.xlu0 %v12421_v6, %s11594_s12  ;;  %v3682_v38 = vsel %vm3677_vm10, %v12176_v21, %v3670_v2 }
 0x270   : > { %11033 = vmatprep.subr.msk.mxu0 %vm1242_vm3, %v3683_v46  ;;  %7890 = vrot.lane.b32.xlu1 %v12347_v35, %s11593_s27  ;;  %v4033_v46 = vsel %vm4031_vm11, %v12021_v44, %v12019_v43  ;;  %v4036_v44 = vsel %vm4031_vm11, %v12174_v61, %v4024_v56 }
 0x271   : > { %3769 = vmatprep.mubr.f32.mxu0 %v13858_v25  ;;  %v12493_v8 = vpop.permute.xlu0 %4731 }
 0x272   : > { %11029 = vmatmul.mubr.msk.f32.vlgmr.msra.gmra.mrb[24].mxu0 %vm443_vm1, %v12487_v57  ;;  %v4378_v55 = vpop.permute.xlu1 %4377 }
 0x273   : > { %11034 = vmatpush1.msk.msra.mxu0 %vm1242_vm3, %v3682_v38  ;;  %8238 = vrot.lane.b32.xlu0 %v12300_v54, %s11594_s12 }
 0x274   : > { %11040 = vmatprep.subr.msk.mxu0 %vm1242_vm3, %v4033_v46  ;;  %7894 = vrot.lane.b32.xlu1 %v7866_v51, %s11593_s27  ;;  %v4037_v46 = vsel %vm4031_vm11, %v4024_v56, %v12458_v39  ;;  %v12525_v51 = vld [vmem:[%s13761_s8 + $0x20] sm:$0xf]  ;;  %v8220_v56 = vld [vmem:[#allocation2 + $0x24] sm:$0xf] }
 0x275   : > { %3911 = vmatprep.mubr.f32.mxu0 %v13858_v25  ;;  %v12508_v2 = vpop.permute.xlu0 %5087 }
 0x276   : > { %11035 = vmatmul.mubr.msk.f32.vlgmr.msra.gmra.mrb[26].mxu0 %vm443_vm1, %v12487_v57  ;;  %v12515_v38 = vpop.permute.xlu1 %4733 }
 0x277   : > { %13874 = vst [vmem:[#allocation54_spill] sm:$0xff] %v12515_v38  ;;  %11041 = vmatpush1.msk.msra.mxu0 %vm1242_vm3, %v4032_v63  ;;  %8232 = vrot.lane.b32.xlu0 %v12405_v42, %s11594_s12 }
 0x278   : > { %11046 = vmatprep.subr.msk.mxu0 %vm1242_vm3, %v4037_v46  ;;  %8236 = vrot.lane.b32.xlu1 %v12286_v29, %s11594_s12  ;;  %v4387_v46 = vsel %vm4385_vm12, %v12025_v11, %v12027_v24  ;;  %v12565_v24 = vld [vmem:[%s13761_s8 + $0x24] sm:$0xf] }
 0x279   : > { %4123 = vmatprep.mubr.f32.mxu0 %v13858_v25  ;;  %v12531_v14 = vpop.permute.xlu0 %5091 }
 0x27a   : > { %13875 = vst [vmem:[#allocation55_spill] sm:$0xff] %v12531_v14  ;;  %11042 = vmatmul.mubr.msk.f32.vlgmr.msra.gmra.mrb[24].mxu0 %vm443_vm1, %v12525_v51  ;;  %v12537_v63 = vpop.permute.xlu1 %4737 }
 0x27b   : > { %13876 = vst [vmem:[#allocation56_spill] sm:$0xff] %v12537_v63  ;;  %11047 = vmatpush1.msk.msra.mxu0 %vm1242_vm3, %v4036_v44  ;;  %8244 = vrot.lane.b32.xlu0 %v12347_v35, %s11594_s12  ;;  %v4386_v44 = vsel %vm4385_vm12, %v11922_v12, %v12025_v11  ;;  %v4390_v11 = vsel %vm4385_vm12, %v12182_v41, %v4378_v55 }
 0x27c   : > { %11053 = vmatprep.subr.msk.mxu0 %vm1242_vm3, %v4387_v46  ;;  %8240 = vrot.lane.b32.xlu1 %v12354_v59, %s11594_s12  ;;  %v4391_v46 = vsel %vm4385_vm12, %v4378_v55, %v12452_v10 }
 0x27d   : > { %4265 = vmatprep.mubr.f32.mxu0 %v13858_v25  ;;  %v12549_v14 = vpop.permute.xlu0 %5439 }
 0x27e   : > { %11048 = vmatmul.mubr.msk.f32.vlgmr.msra.gmra.mrb[26].mxu0 %vm443_vm1, %v12525_v51  ;;  %v12556_v63 = vpop.permute.xlu1 %5085 }
 0x27f   : > { %11054 = vmatpush1.msk.msra.mxu0 %vm1242_vm3, %v4386_v44  ;;  %8248 = vrot.lane.b32.xlu0 %v8220_v56, %s11594_s12  ;;  %v4741_v44 = vsel %vm4739_vm13, %v12035_v27, %v12033_v26  ;;  %v12607_v26 = vld [vmem:[%s13761_s8 + $0x28] sm:$0xf] }
 0x280   : > { %11059 = vmatprep.subr.msk.mxu0 %vm1242_vm3, %v4391_v46  ;;  %8242 = vrot.lane.b32.xlu1 %v12369_v53, %s11594_s12  ;;  %v4740_v46 = vsel %vm4739_vm13, %v11930_v16, %v12035_v27  ;;  %v4744_v27 = vsel %vm4739_vm13, %v12180_v22, %v12493_v8 }
 0x281   : > { %4477 = vmatprep.mubr.f32.mxu0 %v13858_v25  ;;  %v12571_v12 = vpop.permute.xlu0 %6120 }
 0x282   : > { %11055 = vmatmul.mubr.msk.f32.vlgmr.msra.gmra.mrb[24].mxu0 %vm443_vm1, %v12565_v24  ;;  %v12577_v56 = vpop.permute.xlu1 %5441 }
 0x283   : > { %11060 = vmatpush1.msk.msra.mxu0 %vm1242_vm3, %v4390_v11  ;;  %8590 = vrot.lane.b32.xlu0 %v12286_v29, %s11595_s21 }
 0x284   : > { %11066 = vmatprep.subr.msk.mxu0 %vm1242_vm3, %v4741_v44  ;;  %8246 = vrot.lane.b32.xlu1 %v12389_v30, %s11594_s12  ;;  %v4745_v44 = vsel %vm4739_vm13, %v12493_v8, %v12515_v38  ;;  %v5099_v38 = vsel %vm5093_vm14, %v12556_v63, %v12508_v2 }
 0x285   : > { %4619 = vmatprep.mubr.f32.mxu0 %v13858_v25  ;;  %v12589_v55 = vpop.permute.xlu0 %6472 }
 0x286   : > { %11061 = vmatmul.mubr.msk.f32.vlgmr.msra.gmra.mrb[26].mxu0 %vm443_vm1, %v12565_v24  ;;  %v12596_v11 = vpop.permute.xlu1 %5445 }
 0x287   : > { %13877 = vst [vmem:[#allocation57_spill] sm:$0xff] %v12596_v11  ;;  %11067 = vmatpush1.msk.msra.mxu0 %vm1242_vm3, %v4740_v46  ;;  %8594 = vrot.lane.b32.xlu0 %v12354_v59, %s11595_s21  ;;  %v5094_v11 = vsel %vm5093_vm14, %v11928_v15, %v12041_v47 }
 0x288   : > { %11072 = vmatprep.subr.msk.mxu0 %vm1242_vm3, %v4745_v44  ;;  %8588 = vrot.lane.b32.xlu1 %v12421_v6, %s11595_s21  ;;  %v5095_v44 = vsel %vm5093_vm14, %v12041_v47, %v12043_v58  ;;  %v1565_v47 = vsel %vm1561_vm4, %v12079_v4, %v12153_v60 }
 0x289   : > { %4831 = vmatprep.mubr.f32.mxu0 %v13858_v25  ;;  %v12613_v16 = vpop.permute.xlu0 %6828 }
 0x28a   : > { %11068 = vmatmul.mubr.msk.f32.vlgmr.msra.gmra.mrb[24].mxu0 %vm443_vm1, %v12607_v26  ;;  %v12620_v46 = vpop.permute.xlu1 %6118 }
 0x28b   : > { %11073 = vmatpush1.msk.msra.mxu0 %vm1242_vm3, %v4744_v27  ;;  %8596 = vrot.lane.b32.xlu0 %v12369_v53, %s11595_s21 }
 0x28c   : > { %11079 = vmatprep.subr.msk.mxu0 %vm1242_vm3, %v5095_v44  ;;  %8592 = vrot.lane.b32.xlu1 %v12300_v54, %s11595_s21 }
 0x28d   : > { %4973 = vmatprep.mubr.f32.mxu0 %v13858_v25  ;;  %v1227_v8 = vpop.permute.xlu0 %1226 }
 0x28e   : > { %v1237_v27 = vsel %vm1230_vm2, %v12206_v52, %v1227_v8  ;;  %11074 = vmatmul.mubr.msk.f32.vlgmr.msra.gmra.mrb[26].mxu0 %vm443_vm1, %v12607_v26  ;;  %v12639_v58 = vpop.permute.xlu1 %6474  ;;  %v1238_v44 = vsel %vm1230_vm2, %v1227_v8, %v12227_v19  ;;  %v12654_v52 = vld [vmem:[%s13761_s8 + $0x2c] sm:$0xf]  ;;  %vm6480_vm2 = vcmask 973824  }
 0x28f   : > { %13878 = vst [vmem:[#allocation58_spill] sm:$0xff] %v12639_v58  ;;  %11080 = vmatpush1.msk.msra.mxu0 %vm1242_vm3, %v5094_v11  ;;  %8600 = vrot.lane.b32.xlu0 %v12389_v30, %s11595_s21  ;;  %v5098_v11 = vsel %vm5093_vm14, %v12188_v9, %v12556_v63  ;;  %v8574_v63 = vld [vmem:[#allocation2 + $0x24] sm:$0xf] }
 0x290   : > { %11085 = vmatprep.subr.msk.mxu0 %vm1242_vm3, %v5099_v38  ;;  %10946 = vmatprep.subr.msk.mxu1 %vm1242_vm3, %v1238_v44  ;;  %v1564_v38 = vsel %vm1561_vm4, %v11962_v31, %v12079_v4 }
 0x291   : > { %8586 = vrot.lane.b32.xlu1 %v12405_v42, %s11595_s21  ;;  %10947 = vmatpush1.msk.msra.mxu1 %vm1242_vm3, %v1237_v27  ;;  %v1904_v15 = vpop.permute.xlu0 %1903  ;;  %v13880_v27 = vld [vmem:[#allocation9_spill] sm:$0xff] }
 0x292   : > { %5185 = vmatprep.mubr.f32.mxu0 %v13858_v25  ;;  %10948 = vmatmul.mubr.msk.f32.vlgmr.msra.gmra.mrb[26].mxu1 %vm443_vm1, %v11958_v28  ;;  %v12665_v19 = vpop.permute.xlu1 %6826  ;;  %v13879_v28 = vld [vmem:[#allocation18_spill] sm:$0xff] }
 0x293   : > { %10952 = vmatprep.subr.msk.mxu1 %vm1242_vm3, %v1565_v47  ;;  %11081 = vmatmul.mubr.msk.f32.vlgmr.msra.gmra.mrb[24].mxu0 %vm443_vm1, %v12654_v52  ;;  %v5449_v60 = vsel %vm5447_vm15, %v13879_v28, %v12047_v18  ;;  %v5448_v44 = vsel %vm5447_vm15, %v13880_v27, %v13879_v28  ;;  %v13881_v28 = vld [vmem:[#allocation28_spill] sm:$0xff] }
 0x294   : > { %11086 = vmatpush1.msk.msra.mxu0 %vm1242_vm3, %v5098_v11  ;;  %10953 = vmatpush1.msk.msra.mxu1 %vm1242_vm3, %v1564_v38  ;;  %v5453_v38 = vsel %vm5447_vm15, %v12549_v14, %v12577_v56 }
 0x295   : > { %11092 = vmatprep.subr.msk.mxu0 %vm1242_vm3, %v5449_v60  ;;  %8942 = vrot.lane.b32.xlu0 %v12421_v6, %s11596_s26  ;;  %v12684_v4 = vpop.permute.xlu0 %2611  ;;  %v1911_v60 = vsel %vm1907_vm5, %v13881_v28, %v12151_v34 }
 0x296   : > { %8598 = vrot.lane.b32.xlu1 %v12347_v35, %s11595_s21  ;;  %1724 = vmatprep.mubr.f32.mxu1 %v13858_v25  ;;  %v1558_v31 = vpop.permute.xlu1 %1557 }
 0x297   : > { %5327 = vmatprep.mubr.f32.mxu0 %v13858_v25  ;;  %10954 = vmatmul.mubr.msk.f32.vlgmr.msra.gmra.mrb[24].mxu1 %vm443_vm1, %v12235_v0  ;;  %v1569_v8 = vsel %vm1561_vm4, %v1558_v31, %v12216_v50  ;;  %v1568_v47 = vsel %vm1561_vm4, %v12204_v17, %v1558_v31  ;;  %v12715_v17 = vld [vmem:[%s13761_s8 + $0x30] sm:$0xf]  ;;  %v1910_v31 = vsel %vm1907_vm5, %v11969_v32, %v13881_v28  ;;  %v8928_v28 = vld [vmem:[#allocation2 + $0x24] sm:$0xf]  ;;  %vm7188_vm4 = vcmask 957440  }
 0x298   : > { %11087 = vmatmul.mubr.msk.f32.vlgmr.msra.gmra.mrb[26].mxu0 %vm443_vm1, %v12654_v52  ;;  %10958 = vmatprep.subr.msk.mxu1 %vm1242_vm3, %v1569_v8  ;;  %v1915_v32 = vsel %vm1907_vm5, %v1904_v15, %v12284_v33 }
 0x299   : > { %11093 = vmatpush1.msk.msra.mxu0 %vm1242_vm3, %v5448_v44  ;;  %8946 = vrot.lane.b32.xlu0 %v12300_v54, %s11596_s26  ;;  %v12708_v50 = vpop.permute.xlu0 %3319  ;;  %v13883_v44 = vld [vmem:[#allocation26_spill] sm:$0xff] }
 0x29a   : > { %11098 = vmatprep.subr.msk.mxu0 %vm1242_vm3, %v5453_v38  ;;  %8602 = vrot.lane.b32.xlu1 %v8574_v63, %s11595_s21  ;;  %v2258_v11 = vpop.permute.xlu1 %2257  ;;  %v13882_v63 = vld [vmem:[#allocation40_spill] sm:$0xff]  ;;  %v2264_v38 = vsel %vm2261_vm6, %v11981_v37, %v13883_v44 }
 0x29b   : > { %10959 = vmatpush1.msk.msra.mxu1 %vm1242_vm3, %v1568_v47  ;;  %1866 = vmatprep.mubr.f32.mxu1 %v13858_v25  ;;  %v5452_v8 = vsel %vm5447_vm15, %v13882_v63, %v12549_v14  ;;  %v1914_v14 = vsel %vm1907_vm5, %v12263_v1, %v1904_v15  ;;  %v2265_v47 = vsel %vm2261_vm6, %v13883_v44, %v12163_v48  ;;  %v12773_v1 = vld [vmem:[%s13761_s8 + $0x34] sm:$0xf]  ;;  %vm6834_vm5 = vcmask 965632  }
 0x29c   : > { %5539 = vmatprep.mubr.f32.mxu0 %v13858_v25  ;;  %10960 = vmatmul.mubr.msk.f32.vlgmr.msra.gmra.mrb[26].mxu1 %vm443_vm1, %v12235_v0  ;;  %v2268_v44 = vsel %vm2261_vm6, %v12252_v45, %v2258_v11  ;;  %v12835_v45 = vld [vmem:[%s13761_s8 + $0x38] sm:$0xf] }
 0x29d   : > { %10965 = vmatprep.subr.msk.mxu1 %vm1242_vm3, %v1911_v60  ;;  %11094 = vmatmul.mubr.msk.f32.vlgmr.msra.gmra.mrb[24].mxu0 %vm443_vm1, %v12715_v17  ;;  %v12734_v27 = vpop.permute.xlu0 %4027  ;;  %v2269_v60 = vsel %vm2261_vm6, %v2258_v11, %v12278_v3  ;;  %v13887_v3 = vld [vmem:[#allocation8_spill] sm:$0xff]  ;;  %vm7542_vm6 = vcmask 318464  }
 0x29e   : > { %11099 = vmatpush1.msk.msra.mxu0 %vm1242_vm3, %v5452_v8  ;;  %10966 = vmatpush1.msk.msra.mxu1 %vm1242_vm3, %v1910_v31  ;;  %v12738_v34 = vpop.permute.xlu1 %2965  ;;  %v13884_v31 = vld [vmem:[#allocation20_spill] sm:$0xff]  ;;  %v13885_v8 = vld [vmem:[#allocation19_spill] sm:$0xff] }
 0x29f   : > { %11105 = vmatprep.subr.msk.mxu0 %vm1242_vm3, %v12421_v6  ;;  %8940 = vrot.lane.b32.xlu0 %v12405_v42, %s11596_s26 }
 0x2a0   : > { %8944 = vrot.lane.b32.xlu1 %v12286_v29, %s11596_s26  ;;  %10971 = vmatprep.subr.msk.mxu1 %vm1242_vm3, %v1915_v32  ;;  %v6128_v32 = vsel %vm6126_vm0, %v13885_v8, %v13884_v31 }
 0x2a1   : > { %2070 = vmatprep.mubr.f32.mxu1 %v13858_v25  ;;  %5681 = vmatprep.mubr.f32.mxu0 %v13858_v25  ;;  %v12751_v0 = vpop.permute.xlu0 %4735 }
 0x2a2   : > { %10967 = vmatmul.mubr.msk.f32.vlgmr.msra.gmra.mrb[24].mxu1 %vm443_vm1, %v12272_v13  ;;  %11100 = vmatmul.mubr.msk.f32.vlgmr.msra.gmra.mrb[26].mxu0 %vm443_vm1, %v12715_v17  ;;  %v12759_v33 = vpop.permute.xlu1 %3673 }
 0x2a3   : > { %10972 = vmatpush1.msk.msra.mxu1 %vm1242_vm3, %v1914_v14  ;;  %11106 = vmatpush1.msk.msra.mxu0 %vm1242_vm3, %v12405_v42  ;;  %v6127_v14 = vsel %vm6126_vm0, %v13887_v3, %v13885_v8 }
 0x2a4   : > { %10978 = vmatprep.subr.msk.mxu1 %vm1242_vm3, %v2265_v47  ;;  %11111 = vmatprep.subr.msk.mxu0 %vm1242_vm3, %v12369_v53  ;;  %v13888_v47 = vld [vmem:[#allocation30_spill] sm:$0xff] }
 0x2a5   : > { %8952 = vrot.lane.b32.xlu0 %v12347_v35, %s11596_s26  ;;  %8948 = vrot.lane.b32.xlu1 %v12354_v59, %s11596_s26  ;;  %v12779_v15 = vpop.permute.xlu0 %5443 }
 0x2a6   : > { %2212 = vmatprep.mubr.f32.mxu1 %v13858_v25  ;;  %5864 = vmatprep.mubr.f32.mxu0 %v13858_v25  ;;  %v12783_v48 = vpop.permute.xlu1 %4381 }
 0x2a7   : > { %10973 = vmatmul.mubr.msk.f32.vlgmr.msra.gmra.mrb[26].mxu1 %vm443_vm1, %v12272_v13  ;;  %11107 = vmatmul.mubr.msk.f32.vlgmr.msra.gmra.mrb[24].mxu0 %vm443_vm1, %v12773_v1 }
 0x2a8   : > { %10979 = vmatpush1.msk.msra.mxu1 %vm1242_vm3, %v2264_v38  ;;  %11112 = vmatpush1.msk.msra.mxu0 %vm1242_vm3, %v12354_v59  ;;  %v2619_v38 = vsel %vm2615_vm7, %v13888_v47, %v12161_v20  ;;  %v13889_v20 = vld [vmem:[#allocation12_spill] sm:$0xff] }
 0x2a9   : > { %10984 = vmatprep.subr.msk.mxu1 %vm1242_vm3, %v2269_v60  ;;  %11118 = vmatprep.subr.msk.mxu0 %vm1242_vm3, %v6128_v32  ;;  %v12802_v37 = vpop.permute.xlu0 %6476  ;;  %v2618_v8 = vsel %vm2615_vm7, %v13889_v20, %v13888_v47  ;;  %v13890_v32 = vld [vmem:[#allocation42_spill] sm:$0xff] }
 0x2aa   : > { %13886 = vst [vmem:[#allocation18_spill] sm:$0xff] %v12802_v37  ;;  %8956 = vrot.lane.b32.xlu0 %v8928_v28, %s11596_s26  ;;  %8950 = vrot.lane.b32.xlu1 %v12369_v53, %s11596_s26  ;;  %v12807_v13 = vpop.permute.xlu1 %5089  ;;  %v6132_v28 = vsel %vm6126_vm0, %v12620_v46, %v12571_v12  ;;  %v6131_v3 = vsel %vm6126_vm0, %v13890_v32, %v12620_v46 }
 0x2ab   : > { %2424 = vmatprep.mubr.f32.mxu1 %v13858_v25  ;;  %6006 = vmatprep.mubr.f32.mxu0 %v13858_v25 }
 0x2ac   : > { %10980 = vmatmul.mubr.msk.f32.vlgmr.msra.gmra.mrb[24].mxu1 %vm443_vm1, %v12315_v7  ;;  %11113 = vmatmul.mubr.msk.f32.vlgmr.msra.gmra.mrb[26].mxu0 %vm443_vm1, %v12773_v1 }
 0x2ad   : > { %10985 = vmatpush1.msk.msra.mxu1 %vm1242_vm3, %v2268_v44  ;;  %11119 = vmatpush1.msk.msra.mxu0 %vm1242_vm3, %v6127_v14  ;;  %v12828_v60 = vpop.permute.xlu0 %7174  ;;  %v13891_v44 = vld [vmem:[#allocation47_spill] sm:$0xff] }
 0x2ae   : > { %10991 = vmatprep.subr.msk.mxu1 %vm1242_vm3, %v2619_v38  ;;  %11124 = vmatprep.subr.msk.mxu0 %vm1242_vm3, %v6132_v28  ;;  %v12837_v11 = vpop.permute.xlu1 %6122  ;;  %v2623_v47 = vsel %vm2615_vm7, %v12684_v4, %v13891_v44  ;;  %v13892_v38 = vld [vmem:[#allocation21_spill] sm:$0xff]  ;;  %v13893_v28 = vld [vmem:[#allocation22_spill] sm:$0xff] }
 0x2af   : > { %9298 = vrot.lane.b32.xlu0 %v12286_v29, %s11597_s18  ;;  %8954 = vrot.lane.b32.xlu1 %v12389_v30, %s11596_s26  ;;  %v6482_v46 = vsel %vm6480_vm2, %v13893_v28, %v13892_v38  ;;  %v13896_v44 = vld [vmem:[#allocation45_spill] sm:$0xff]  ;;  %s11600_s26 = smov 17  }
 0x2b0   : > { %2566 = vmatprep.mubr.f32.mxu1 %v13858_v25  ;;  %6218 = vmatprep.mubr.f32.mxu0 %v13858_v25 }
 0x2b1   : > { %10986 = vmatmul.mubr.msk.f32.vlgmr.msra.gmra.mrb[26].mxu1 %vm443_vm1, %v12315_v7  ;;  %11120 = vmatmul.mubr.msk.f32.vlgmr.msra.gmra.mrb[24].mxu0 %vm443_vm1, %v12835_v45  ;;  %v12855_v14 = vpop.permute.xlu0 %7178 }
 0x2b2   : > { %10992 = vmatpush1.msk.msra.mxu1 %vm1242_vm3, %v2618_v8  ;;  %11125 = vmatpush1.msk.msra.mxu0 %vm1242_vm3, %v6131_v3  ;;  %v12865_v20 = vpop.permute.xlu1 %6830  ;;  %v13895_v8 = vld [vmem:[#allocation11_spill] sm:$0xff] }
 0x2b3   : > { %13894 = vst [vmem:[#allocation9_spill] sm:$0xff] %v12865_v20  ;;  %10997 = vmatprep.subr.msk.mxu1 %vm1242_vm3, %v2623_v47  ;;  %11131 = vmatprep.subr.msk.mxu0 %vm1242_vm3, %v6482_v46  ;;  %v6481_v3 = vsel %vm6480_vm2, %v13895_v8, %v13893_v28  ;;  %v2622_v47 = vsel %vm2615_vm7, %v13896_v44, %v12684_v4  ;;  %v13897_v46 = vld [vmem:[#allocation48_spill] sm:$0xff]  ;;  %v13898_v20 = vld [vmem:[#allocation27_spill] sm:$0xff]  ;;  %vm7896_vm7 = vcmask 310272  }
 0x2b4   : > { %9302 = vrot.lane.b32.xlu0 %v12354_v59, %s11597_s18  ;;  %9296 = vrot.lane.b32.xlu1 %v12421_v6, %s11597_s18  ;;  %v2973_v37 = vsel %vm2969_vm8, %v13898_v20, %v12170_v62  ;;  %v6486_v4 = vsel %vm6480_vm2, %v12589_v55, %v12639_v58  ;;  %v12908_v62 = vld [vmem:[%s13761_s8 + $0x3c] sm:$0xf]  ;;  %v13904_v58 = vld [vmem:[#allocation24_spill] sm:$0xff] }
 0x2b5   : > { %2778 = vmatprep.mubr.f32.mxu1 %v13858_v25  ;;  %6360 = vmatprep.mubr.f32.mxu0 %v13858_v25  ;;  %v12875_v7 = vpop.permute.xlu0 %7180 }
 0x2b6   : > { %10993 = vmatmul.mubr.msk.f32.vlgmr.msra.gmra.mrb[24].mxu1 %vm443_vm1, %v13897_v46  ;;  %11126 = vmatmul.mubr.msk.f32.vlgmr.msra.gmra.mrb[26].mxu0 %vm443_vm1, %v12835_v45  ;;  %v7177_v38 = vpop.permute.xlu1 %7176 }
 0x2b7   : > { %10998 = vmatpush1.msk.msra.mxu1 %vm1242_vm3, %v2622_v47  ;;  %11132 = vmatpush1.msk.msra.mxu0 %vm1242_vm3, %v6481_v3  ;;  %v12897_v28 = vsel %vm7188_vm4, %v12828_v60, %v7177_v38  ;;  %v12901_v8 = vsel %vm7188_vm4, %v7177_v38, %v12855_v14  ;;  %v13901_v38 = vld [vmem:[#allocation13_spill] sm:$0xff] }
 0x2b8   : > { %13899 = vst [vmem:[#allocation28_spill] sm:$0xff] %v12897_v28  ;;  %13900 = vst [vmem:[#allocation40_spill] sm:$0xff] %v12901_v8  ;;  %11004 = vmatprep.subr.msk.mxu1 %vm1242_vm3, %v2973_v37  ;;  %11137 = vmatprep.subr.msk.mxu0 %vm1242_vm3, %v6486_v4  ;;  %v2972_v44 = vsel %vm2969_vm8, %v13901_v38, %v13898_v20  ;;  %v13902_v47 = vld [vmem:[#allocation41_spill] sm:$0xff]  ;;  %v13903_v28 = vld [vmem:[#allocation46_spill] sm:$0xff] }
 0x2b9   : > { %9304 = vrot.lane.b32.xlu0 %v12369_v53, %s11597_s18  ;;  %9300 = vrot.lane.b32.xlu1 %v12300_v54, %s11597_s18  ;;  %v7185_v3 = vpop.permute.xlu0 %7184  ;;  %v6485_v4 = vsel %vm6480_vm2, %v13902_v47, %v12589_v55  ;;  %v2977_v8 = vsel %vm2969_vm8, %v12738_v34, %v13903_v28  ;;  %v13905_v20 = vld [vmem:[#allocation23_spill] sm:$0xff] }
 0x2ba   : > { %2920 = vmatprep.mubr.f32.mxu1 %v13858_v25  ;;  %6572 = vmatprep.mubr.f32.mxu0 %v13858_v25  ;;  %v7171_v37 = vpop.permute.xlu1 %7170  ;;  %v6836_v38 = vsel %vm6834_vm5, %v13905_v20, %v13904_v58 }
 0x2bb   : > { %10999 = vmatmul.mubr.msk.f32.vlgmr.msra.gmra.mrb[26].mxu1 %vm443_vm1, %v13897_v46  ;;  %11133 = vmatmul.mubr.msk.f32.vlgmr.msra.gmra.mrb[24].mxu0 %vm443_vm1, %v12908_v62 }
 0x2bc   : > { %11005 = vmatpush1.msk.msra.mxu1 %vm1242_vm3, %v2972_v44  ;;  %11138 = vmatpush1.msk.msra.mxu0 %vm1242_vm3, %v6485_v4  ;;  %v13908_v4 = vld [vmem:[#allocation44_spill] sm:$0xff] }
 0x2bd   : > { %11010 = vmatprep.subr.msk.mxu1 %vm1242_vm3, %v2977_v8  ;;  %11144 = vmatprep.subr.msk.mxu0 %vm1242_vm3, %v6836_v38  ;;  %v12936_v55 = vpop.permute.xlu0 %7526  ;;  %v13907_v8 = vld [vmem:[#allocation10_spill] sm:$0xff]  ;;  %v2976_v38 = vsel %vm2969_vm8, %v13908_v4, %v12738_v34  ;;  %vm8250_vm8 = vcmask 302080  }
 0x2be   : > { %9308 = vrot.lane.b32.xlu0 %v12389_v30, %s11597_s18  ;;  %9294 = vrot.lane.b32.xlu1 %v12405_v42, %s11597_s18  ;;  %v7183_v46 = vpop.permute.xlu1 %7182  ;;  %v6835_v44 = vsel %vm6834_vm5, %v13907_v8, %v13905_v20  ;;  %v6840_v20 = vsel %vm6834_vm5, %v12665_v19, %v12613_v16  ;;  %v12970_v34 = vld [vmem:[%s13761_s8 + $0x40] sm:$0xf] }
 0x2bf   : > { %3132 = vmatprep.mubr.f32.mxu1 %v13858_v25  ;;  %6714 = vmatprep.mubr.f32.mxu0 %v13858_v25  ;;  %v12945_v28 = vsel %vm7188_vm4, %v7183_v46, %v7185_v3 }
 0x2c0   : > { %13906 = vst [vmem:[#allocation26_spill] sm:$0xff] %v12945_v28  ;;  %11006 = vmatmul.mubr.msk.f32.vlgmr.msra.gmra.mrb[24].mxu1 %vm443_vm1, %v12403_v5  ;;  %11139 = vmatmul.mubr.msk.f32.vlgmr.msra.gmra.mrb[26].mxu0 %vm443_vm1, %v12908_v62  ;;  %v13909_v28 = vld [vmem:[#allocation32_spill] sm:$0xff] }
 0x2c1   : > { %11011 = vmatpush1.msk.msra.mxu1 %vm1242_vm3, %v2976_v38  ;;  %11145 = vmatpush1.msk.msra.mxu0 %vm1242_vm3, %v6835_v44  ;;  %v3327_v58 = vsel %vm3323_vm9, %v13909_v28, %v12168_v36  ;;  %v7531_v8 = vpop.permute.xlu0 %7530  ;;  %v13911_v44 = vld [vmem:[#allocation43_spill] sm:$0xff] }
 0x2c2   : > { %11017 = vmatprep.subr.msk.mxu1 %vm1242_vm3, %v3327_v58  ;;  %11150 = vmatprep.subr.msk.mxu0 %vm1242_vm3, %v6840_v20  ;;  %v7187_v4 = vpop.permute.xlu1 %7186  ;;  %v3326_v58 = vsel %vm3323_vm9, %v12003_v49, %v13909_v28  ;;  %v6839_v38 = vsel %vm6834_vm5, %v13911_v44, %v12665_v19  ;;  %v13913_v49 = vld [vmem:[#allocation51_spill] sm:$0xff] }
 0x2c3   : > { %9650 = vrot.lane.b32.xlu0 %v12421_v6, %s11598_s16  ;;  %9306 = vrot.lane.b32.xlu1 %v12347_v35, %s11597_s18  ;;  %v12977_v36 = vsel %vm7188_vm4, %v7185_v3, %v7187_v4  ;;  %v9282_v3 = vld [vmem:[#allocation2 + $0x24] sm:$0xf]  ;;  %v13912_v4 = vld [vmem:[#allocation25_spill] sm:$0xff]  ;;  %v3331_v19 = vsel %vm3323_vm9, %v12708_v50, %v13913_v49 }
 0x2c4   : > { %13910 = vst [vmem:[#allocation20_spill] sm:$0xff] %v12977_v36  ;;  %3274 = vmatprep.mubr.f32.mxu1 %v13858_v25  ;;  %6926 = vmatprep.mubr.f32.mxu0 %v13858_v25  ;;  %v7190_v36 = vsel %vm7188_vm4, %v13912_v4, %v12828_v60 }
 0x2c5   : > { %11012 = vmatmul.mubr.msk.f32.vlgmr.msra.gmra.mrb[26].mxu1 %vm443_vm1, %v12403_v5  ;;  %11146 = vmatmul.mubr.msk.f32.vlgmr.msra.gmra.mrb[24].mxu0 %vm443_vm1, %v12970_v34  ;;  %v7525_v20 = vpop.permute.xlu0 %7524 }
 0x2c6   : > { %11018 = vmatpush1.msk.msra.mxu1 %vm1242_vm3, %v3326_v58  ;;  %11151 = vmatpush1.msk.msra.mxu0 %vm1242_vm3, %v6839_v38  ;;  %v7529_v28 = vpop.permute.xlu1 %7528  ;;  %v3330_v58 = vsel %vm3323_vm9, %v12393_v40, %v12708_v50  ;;  %v7194_v38 = vsel %vm7188_vm4, %v12875_v7, %v7183_v46  ;;  %v13914_v40 = vld [vmem:[#allocation29_spill] sm:$0xff]  ;;  %v13037_v46 = vld [vmem:[%s13761_s8 + $0x44] sm:$0xf]  ;;  %vm8604_vm9 = vcmask 236544  }
 0x2c7   : > { %11023 = vmatprep.subr.msk.mxu1 %vm1242_vm3, %v3331_v19  ;;  %11157 = vmatprep.subr.msk.mxu0 %vm1242_vm3, %v7190_v36  ;;  %v13002_v5 = vsel %vm7542_vm6, %v7529_v28, %v7531_v8  ;;  %v7189_v36 = vsel %vm7188_vm4, %v7171_v37, %v13912_v4  ;;  %v3681_v50 = vsel %vm3677_vm10, %v13914_v40, %v12176_v21  ;;  %v13915_v4 = vld [vmem:[#allocation14_spill] sm:$0xff] }
 0x2c8   : > { %9654 = vrot.lane.b32.xlu0 %v12300_v54, %s11598_s16  ;;  %9310 = vrot.lane.b32.xlu1 %v9282_v3, %s11597_s18  ;;  %v3680_v49 = vsel %vm3677_vm10, %v13915_v4, %v13914_v40  ;;  %v7193_v19 = vsel %vm7188_vm4, %v12855_v14, %v12875_v7  ;;  %v7544_v14 = vsel %vm7542_vm6, %v12936_v55, %v7529_v28  ;;  %v9636_v7 = vld [vmem:[#allocation2 + $0x24] sm:$0xf]  ;;  %v13917_v40 = vld [vmem:[#allocation49_spill] sm:$0xff] }
 0x2c9   : > { %3486 = vmatprep.mubr.f32.mxu1 %v13858_v25  ;;  %7068 = vmatprep.mubr.f32.mxu0 %v13858_v25  ;;  %v7537_v60 = vpop.permute.xlu0 %7536 }
 0x2ca   : > { %11019 = vmatmul.mubr.msk.f32.vlgmr.msra.gmra.mrb[24].mxu1 %vm443_vm1, %v12446_v23  ;;  %11152 = vmatmul.mubr.msk.f32.vlgmr.msra.gmra.mrb[26].mxu0 %vm443_vm1, %v12970_v34  ;;  %v13020_v3 = vpop.permute.xlu1 %7532 }
 0x2cb   : > { %11024 = vmatpush1.msk.msra.mxu1 %vm1242_vm3, %v3330_v58  ;;  %11158 = vmatpush1.msk.msra.mxu0 %vm1242_vm3, %v7189_v36  ;;  %v13029_v37 = vsel %vm7542_vm6, %v7531_v8, %v13020_v3  ;;  %v13916_v58 = vld [vmem:[#allocation50_spill] sm:$0xff] }
 0x2cc   : > { %11030 = vmatprep.subr.msk.mxu1 %vm1242_vm3, %v3681_v50  ;;  %9648 = vrot.lane.b32.xlu0 %v12405_v42, %s11598_s16  ;;  %v3685_v36 = vsel %vm3677_vm10, %v12759_v33, %v13916_v58  ;;  %v3684_v50 = vsel %vm3677_vm10, %v13917_v40, %v12759_v33  ;;  %v7543_v33 = vsel %vm7542_vm6, %v7525_v20, %v12936_v55  ;;  %v13919_v55 = vld [vmem:[#allocation53_spill] sm:$0xff]  ;;  %vm8958_vm10 = vcmask 228352  }
 0x2cd   : > { %9652 = vrot.lane.b32.xlu1 %v12286_v29, %s11598_s16  ;;  %11163 = vmatprep.subr.msk.mxu0 %vm1242_vm3, %v7194_v38  ;;  %v7541_v21 = vpop.permute.xlu0 %7540  ;;  %v4039_v20 = vsel %vm4031_vm11, %v12734_v27, %v13919_v55 }
 0x2ce   : > { %3628 = vmatprep.mubr.f32.mxu1 %v13858_v25  ;;  %7280 = vmatprep.mubr.f32.mxu0 %v13858_v25  ;;  %v7535_v8 = vpop.permute.xlu1 %7534 }
 0x2cf   : > { %11025 = vmatmul.mubr.msk.f32.vlgmr.msra.gmra.mrb[26].mxu1 %vm443_vm1, %v12446_v23  ;;  %11159 = vmatmul.mubr.msk.f32.vlgmr.msra.gmra.mrb[24].mxu0 %vm443_vm1, %v13037_v46 }
 0x2d0   : > { %11031 = vmatpush1.msk.msra.mxu1 %vm1242_vm3, %v3680_v49  ;;  %11164 = vmatpush1.msk.msra.mxu0 %vm1242_vm3, %v7193_v19  ;;  %v13918_v49 = vld [vmem:[#allocation34_spill] sm:$0xff] }
 0x2d1   : > { %11036 = vmatprep.subr.msk.mxu1 %vm1242_vm3, %v3685_v36  ;;  %9660 = vrot.lane.b32.xlu0 %v12347_v35, %s11598_s16  ;;  %v7883_v23 = vpop.permute.xlu0 %7882  ;;  %v4035_v19 = vsel %vm4031_vm11, %v13918_v49, %v12174_v61  ;;  %v4034_v61 = vsel %vm4031_vm11, %v12019_v43, %v13918_v49  ;;  %v7548_v43 = vsel %vm7542_vm6, %v7535_v8, %v7537_v60 }
 0x2d2   : > { %9656 = vrot.lane.b32.xlu1 %v12354_v59, %s11598_s16  ;;  %3840 = vmatprep.mubr.f32.mxu1 %v13858_v25  ;;  %v7539_v38 = vpop.permute.xlu1 %7538 }
 0x2d3   : > { %11032 = vmatmul.mubr.msk.f32.vlgmr.msra.gmra.mrb[24].mxu1 %vm443_vm1, %v12487_v57  ;;  %7422 = vmatprep.mubr.f32.mxu0 %v13858_v25  ;;  %v13074_v4 = vsel %vm7542_vm6, %v7537_v60, %v7539_v38  ;;  %v13077_v28 = vsel %vm7542_vm6, %v7539_v38, %v7541_v21 }
 0x2d4   : > { %11037 = vmatpush1.msk.msra.mxu1 %vm1242_vm3, %v3684_v50  ;;  %11170 = vmatprep.subr.msk.mxu0 %vm1242_vm3, %v7544_v14  ;;  %v4038_v14 = vsel %vm4031_vm11, %v12458_v39, %v12734_v27  ;;  %v13135_v39 = vld [vmem:[%s13761_s8 + $0x48] sm:$0xf]  ;;  %v7547_v27 = vsel %vm7542_vm6, %v13020_v3, %v7535_v8  ;;  %v13922_v3 = vld [vmem:[#allocation52_spill] sm:$0xff]  ;;  %vm9312_vm11 = vcmask 220160  }
 0x2d5   : > { %11043 = vmatprep.subr.msk.mxu1 %vm1242_vm3, %v4035_v19  ;;  %9664 = vrot.lane.b32.xlu0 %v9636_v7, %s11598_s16  ;;  %v13088_v58 = vpop.permute.xlu0 %7886  ;;  %v13920_v7 = vld [vmem:[#allocation31_spill] sm:$0xff] }
 0x2d6   : > { %9658 = vrot.lane.b32.xlu1 %v12369_v53, %s11598_s16  ;;  %3982 = vmatprep.mubr.f32.mxu1 %v13858_v25  ;;  %v7881_v21 = vpop.permute.xlu1 %7880  ;;  %v4389_v38 = vsel %vm4385_vm12, %v13920_v7, %v12182_v41  ;;  %v13921_v50 = vld [vmem:[#allocation15_spill] sm:$0xff] }
 0x2d7   : > { %11165 = vmatmul.mubr.msk.f32.vlgmr.msra.gmra.mrb[26].mxu0 %vm443_vm1, %v13037_v46  ;;  %11038 = vmatmul.mubr.msk.f32.vlgmr.msra.gmra.mrb[26].mxu1 %vm443_vm1, %v12487_v57  ;;  %v4388_v49 = vsel %vm4385_vm12, %v13921_v50, %v13920_v7  ;;  %v7898_v8 = vsel %vm7896_vm7, %v7881_v21, %v7883_v23  ;;  %v13926_v7 = vld [vmem:[#allocation54_spill] sm:$0xff] }
 0x2d8   : > { %11171 = vmatpush1.msk.msra.mxu0 %vm1242_vm3, %v7543_v33  ;;  %11044 = vmatpush1.msk.msra.mxu1 %vm1242_vm3, %v4034_v61  ;;  %v4392_v33 = vsel %vm4385_vm12, %v12452_v10, %v12783_v48  ;;  %v13924_v61 = vld [vmem:[#allocation16_spill] sm:$0xff] }
 0x2d9   : > { %11049 = vmatprep.subr.msk.mxu1 %vm1242_vm3, %v4039_v20  ;;  %10006 = vrot.lane.b32.xlu0 %v12286_v29, %s11599_s23  ;;  %v13109_v36 = vpop.permute.xlu0 %7888  ;;  %v13192_v20 = vld [vmem:[#allocation2 + $0xc] sm:$0xff] }
 0x2da   : > { %9662 = vrot.lane.b32.xlu1 %v12389_v30, %s11598_s16  ;;  %4194 = vmatprep.mubr.f32.mxu1 %v13858_v25  ;;  %v7885_v57 = vpop.permute.xlu1 %7884 }
 0x2db   : > { %11045 = vmatmul.mubr.msk.f32.vlgmr.msra.gmra.mrb[24].mxu1 %vm443_vm1, %v12525_v51  ;;  %7634 = vmatprep.mubr.f32.mxu0 %v13858_v25  ;;  %v13121_v29 = vsel %vm7896_vm7, %v7883_v23, %v7885_v57  ;;  %v13125_v60 = vsel %vm7896_vm7, %v7885_v57, %v13088_v58 }
 0x2dc   : > { %11050 = vmatpush1.msk.msra.mxu1 %vm1242_vm3, %v4038_v14  ;;  %11176 = vmatprep.subr.msk.mxu0 %vm1242_vm3, %v7548_v43  ;;  %v13925_v43 = vld [vmem:[#allocation56_spill] sm:$0xff] }
 0x2dd   : > { %11056 = vmatprep.subr.msk.mxu1 %vm1242_vm3, %v4389_v38  ;;  %10010 = vrot.lane.b32.xlu0 %v12354_v59, %s11599_s23  ;;  %v7893_v40 = vpop.permute.xlu0 %7892  ;;  %v4393_v59 = vsel %vm4385_vm12, %v12783_v48, %v13922_v3  ;;  %v4747_v57 = vsel %vm4739_vm13, %v12751_v0, %v13925_v43  ;;  %v4746_v38 = vsel %vm4739_vm13, %v13926_v7, %v12751_v0  ;;  %v13233_v0 = vld [vmem:[%s13761_s8 + $0x4c] sm:$0xf]  ;;  %vm9666_vm12 = vcmask 154624  }
 0x2de   : > { %10004 = vrot.lane.b32.xlu1 %v12421_v6, %s11599_s23  ;;  %4336 = vmatprep.mubr.f32.mxu1 %v13858_v25  ;;  %v7879_v41 = vpop.permute.xlu1 %7878  ;;  %v5454_v7 = vsel %vm5447_vm15, %v12577_v56, %v12779_v15 }
 0x2df   : > { %11172 = vmatmul.mubr.msk.f32.vlgmr.msra.gmra.mrb[24].mxu0 %vm443_vm1, %v13135_v39  ;;  %11051 = vmatmul.mubr.msk.f32.vlgmr.msra.gmra.mrb[26].mxu1 %vm443_vm1, %v12525_v51 }
 0x2e0   : > { %11177 = vmatpush1.msk.msra.mxu0 %vm1242_vm3, %v7547_v27  ;;  %11057 = vmatpush1.msk.msra.mxu1 %vm1242_vm3, %v4388_v49  ;;  %v9990_v27 = vld [vmem:[#allocation2 + $0x24] sm:$0xf] }
 0x2e1   : > { %11062 = vmatprep.subr.msk.mxu1 %vm1242_vm3, %v4393_v59  ;;  %10012 = vrot.lane.b32.xlu0 %v12369_v53, %s11599_s23  ;;  %v13161_v19 = vpop.permute.xlu0 %8234  ;;  %v13923_v53 = vld [vmem:[#allocation36_spill] sm:$0xff] }
 0x2e2   : > { %10008 = vrot.lane.b32.xlu1 %v12300_v54, %s11599_s23  ;;  %4548 = vmatprep.mubr.f32.mxu1 %v13858_v25  ;;  %v7891_v51 = vpop.permute.xlu1 %7890  ;;  %v4743_v54 = vsel %vm4739_vm13, %v13923_v53, %v12180_v22  ;;  %v4742_v55 = vsel %vm4739_vm13, %v13924_v61, %v13923_v53  ;;  %v7897_v22 = vsel %vm7896_vm7, %v7879_v41, %v7881_v21  ;;  %vm10020_vm13 = vcmask 146432  }
 0x2e3   : > { %11058 = vmatmul.mubr.msk.f32.vlgmr.msra.gmra.mrb[24].mxu1 %vm443_vm1, %v12565_v24  ;;  %11183 = vmatprep.subr.msk.mxu0 %vm1242_vm3, %v7898_v8  ;;  %v13173_v23 = vsel %vm7896_vm7, %v7891_v51, %v7893_v40  ;;  %v13211_v21 = vcombine.high %v13192_v20, %v13192_v20  ;;  %v13929_v8 = vld [vmem:[#allocation55_spill] sm:$0xff] }
 0x2e4   : > { %11063 = vmatpush1.msk.msra.mxu1 %vm1242_vm3, %v4392_v33  ;;  %4690 = vmatprep.mubr.f32.mxu1 %v13858_v25  ;;  %v7901_v33 = vsel %vm7896_vm7, %v13088_v58, %v13109_v36 }
 0x2e5   : > { %11069 = vmatprep.subr.msk.mxu1 %vm1242_vm3, %v4743_v54  ;;  %10016 = vrot.lane.b32.xlu0 %v12389_v30, %s11599_s23  ;;  %v8239_v10 = vpop.permute.xlu0 %8238  ;;  %v5100_v54 = vsel %vm5093_vm14, %v12508_v2, %v12807_v13  ;;  %v10342_v2 = vld [vmem:[#allocation2 + $0x14] sm:$0xff] }
 0x2e6   : > { %10002 = vrot.lane.b32.xlu1 %v12405_v42, %s11599_s23  ;;  %7776 = vmatprep.mubr.f32.mxu0 %v13858_v25  ;;  %v7895_v48 = vpop.permute.xlu1 %7894 }
 0x2e7   : > { %11064 = vmatmul.mubr.msk.f32.vlgmr.msra.gmra.mrb[26].mxu1 %vm443_vm1, %v12565_v24  ;;  %11178 = vmatmul.mubr.msk.f32.vlgmr.msra.gmra.mrb[26].mxu0 %vm443_vm1, %v13135_v39  ;;  %v13197_v30 = vsel %vm7896_vm7, %v7893_v40, %v7895_v48  ;;  %v13927_v40 = vld [vmem:[#allocation33_spill] sm:$0xff] }
 0x2e8   : > { %11070 = vmatpush1.msk.msra.mxu1 %vm1242_vm3, %v4742_v55  ;;  %4902 = vmatprep.mubr.f32.mxu1 %v13858_v25  ;;  %v5097_v41 = vsel %vm5093_vm14, %v13927_v40, %v12188_v9  ;;  %v13928_v9 = vld [vmem:[#allocation17_spill] sm:$0xff]  ;;  %v10344_v55 = vld [vmem:[#allocation2 + $0x24] sm:$0xf] }
 0x2e9   : > { %11075 = vmatprep.subr.msk.mxu1 %vm1242_vm3, %v4747_v57  ;;  %10358 = vrot.lane.b32.xlu0 %v12421_v6, %s11600_s26  ;;  %v8233_v24 = vpop.permute.xlu0 %8232  ;;  %v7902_v6 = vsel %vm7896_vm7, %v13109_v36, %v7891_v51  ;;  %v5096_v3 = vsel %vm5093_vm14, %v13928_v9, %v13927_v40  ;;  %v5101_v51 = vsel %vm5093_vm14, %v12807_v13, %v13929_v8  ;;  %v13361_v9 = vld [vmem:[%s13761_s8 + $0x54] sm:$0xf]  ;;  %v13933_v8 = vld [vmem:[#allocation5_spill] sm:$0xff]  ;;  %vm10374_vm14 = vcmask 138240  }
 0x2ea   : > { %10014 = vrot.lane.b32.xlu1 %v12347_v35, %s11599_s23  ;;  %11184 = vmatpush1.msk.msra.mxu0 %vm1242_vm3, %v7897_v22  ;;  %v8237_v14 = vpop.permute.xlu1 %8236  ;;  %v8251_v48 = vsel %vm8250_vm8, %v8233_v24, %v13161_v19  ;;  %v10354_v24 = vcombine.high %v10342_v2, %v10342_v2 }
 0x2eb   : > { %11071 = vmatmul.mubr.msk.f32.vlgmr.msra.gmra.mrb[24].mxu1 %vm443_vm1, %v12607_v26  ;;  %7988 = vmatprep.mubr.f32.mxu0 %v13858_v25  ;;  %v13223_v35 = vsel %vm8250_vm8, %v8237_v14, %v8239_v10  ;;  %v8252_v58 = vsel %vm8250_vm8, %v13161_v19, %v8237_v14  ;;  %v13931_v19 = vld [vmem:[#allocation57_spill] sm:$0xff] }
 0x2ec   : > { %11076 = vmatpush1.msk.msra.mxu1 %vm1242_vm3, %v4746_v38  ;;  %5044 = vmatprep.mubr.f32.mxu1 %v13858_v25  ;;  %v5455_v57 = vsel %vm5447_vm15, %v12779_v15, %v13931_v19  ;;  %v13319_v38 = vld [vmem:[%s13761_s8 + $0x50] sm:$0xf]  ;;  %v13939_v19 = vld [vmem:[#allocation37_spill] sm:$0xff] }
 0x2ed   : > { %11082 = vmatprep.subr.msk.mxu1 %vm1242_vm3, %v5097_v41  ;;  %10362 = vrot.lane.b32.xlu0 %v13211_v21, %s11600_s26  ;;  %v8245_v50 = vpop.permute.xlu0 %8244 }
 0x2ee   : > { %10018 = vrot.lane.b32.xlu1 %v9990_v27, %s11599_s23  ;;  %11189 = vmatprep.subr.msk.mxu0 %vm1242_vm3, %v7902_v6  ;;  %v8241_v49 = vpop.permute.xlu1 %8240 }
 0x2ef   : > { %11077 = vmatmul.mubr.msk.f32.vlgmr.msra.gmra.mrb[26].mxu1 %vm443_vm1, %v12607_v26  ;;  %11185 = vmatmul.mubr.msk.f32.vlgmr.msra.gmra.mrb[24].mxu0 %vm443_vm1, %v13233_v0  ;;  %v13248_v59 = vsel %vm8250_vm8, %v8239_v10, %v8241_v49  ;;  %v10343_v10 = vld [vmem:[#allocation2 + $0x1c] sm:$0xff] }
 0x2f0   : > { %11083 = vmatpush1.msk.msra.mxu1 %vm1242_vm3, %v5096_v3  ;;  %5256 = vmatprep.mubr.f32.mxu1 %v13858_v25  ;;  %v10355_v27 = vcombine.high %v10343_v10, %v10343_v10 }
 0x2f1   : > { %11088 = vmatprep.subr.msk.mxu1 %vm1242_vm3, %v5101_v51  ;;  %10356 = vrot.lane.b32.xlu0 %v12405_v42, %s11600_s26  ;;  %v8249_v26 = vpop.permute.xlu0 %8248  ;;  %v13930_v42 = vld [vmem:[#allocation38_spill] sm:$0xff]  ;;  %v6134_v51 = vsel %vm6126_vm0, %v12837_v11, %v13933_v8 }
 0x2f2   : > { %10360 = vrot.lane.b32.xlu1 %v13192_v20, %s11600_s26  ;;  %11190 = vmatpush1.msk.msra.mxu0 %vm1242_vm3, %v7901_v33  ;;  %v8243_v53 = vpop.permute.xlu1 %8242  ;;  %v5451_v36 = vsel %vm5447_vm15, %v13930_v42, %v13882_v63  ;;  %v5450_v63 = vsel %vm5447_vm15, %v12047_v18, %v13930_v42 }
 0x2f3   : > { %11084 = vmatmul.mubr.msk.f32.vlgmr.msra.gmra.mrb[24].mxu1 %vm443_vm1, %v12654_v52  ;;  %8130 = vmatprep.mubr.f32.mxu0 %v13858_v25  ;;  %v8255_v6 = vsel %vm8250_vm8, %v8241_v49, %v8243_v53 }
 0x2f4   : > { %11089 = vmatpush1.msk.msra.mxu1 %vm1242_vm3, %v5100_v54  ;;  %5398 = vmatprep.mubr.f32.mxu1 %v13858_v25  ;;  %v13934_v54 = vld [vmem:[#allocation39_spill] sm:$0xff] }
 0x2f5   : > { %11095 = vmatprep.subr.msk.mxu1 %vm1242_vm3, %v5451_v36  ;;  %10368 = vrot.lane.b32.xlu0 %v10343_v10, %s11600_s26  ;;  %v13279_v13 = vpop.permute.xlu0 %8590  ;;  %v13936_v36 = vld [vmem:[#allocation6_spill] sm:$0xff] }
 0x2f6   : > { %10364 = vrot.lane.b32.xlu1 %v10342_v2, %s11600_s26  ;;  %11196 = vmatprep.subr.msk.mxu0 %vm1242_vm3, %v8252_v58  ;;  %v8247_v61 = vpop.permute.xlu1 %8246  ;;  %v6484_v58 = vsel %vm6480_vm2, %v13934_v54, %v13902_v47  ;;  %v13937_v47 = vld [vmem:[#allocation18_spill] sm:$0xff] }
 0x2f7   : > { %11090 = vmatmul.mubr.msk.f32.vlgmr.msra.gmra.mrb[26].mxu1 %vm443_vm1, %v12654_v52  ;;  %11191 = vmatmul.mubr.msk.f32.vlgmr.msra.gmra.mrb[26].mxu0 %vm443_vm1, %v13233_v0  ;;  %v13293_v22 = vsel %vm8250_vm8, %v8245_v50, %v8247_v61  ;;  %v13296_v43 = vsel %vm8250_vm8, %v8247_v61, %v8249_v26  ;;  %v8256_v52 = vsel %vm8250_vm8, %v8243_v53, %v8245_v50  ;;  %v13938_v61 = vld [vmem:[#allocation58_spill] sm:$0xff] }
 0x2f8   : > { %11096 = vmatpush1.msk.msra.mxu1 %vm1242_vm3, %v5450_v63  ;;  %5610 = vmatprep.mubr.f32.mxu1 %v13858_v25  ;;  %v6133_v26 = vsel %vm6126_vm0, %v12571_v12, %v12837_v11  ;;  %v13935_v12 = vld [vmem:[#allocation21_spill] sm:$0xff]  ;;  %v6487_v63 = vsel %vm6480_vm2, %v13938_v61, %v13937_v47 }
 0x2f9   : > { %11101 = vmatprep.subr.msk.mxu1 %vm1242_vm3, %v5455_v57  ;;  %11197 = vmatpush1.msk.msra.mxu0 %vm1242_vm3, %v8251_v48  ;;  %v13305_v18 = vpop.permute.xlu0 %8594  ;;  %v6483_v11 = vsel %vm6480_vm2, %v13935_v12, %v13934_v54  ;;  %v6838_v57 = vsel %vm6834_vm5, %v13939_v19, %v13911_v44 }
 0x2fa   : > { %10366 = vrot.lane.b32.xlu1 %v10354_v24, %s11600_s26  ;;  %10372 = vrot.lane.b32.xlu0 %v10344_v55, %s11600_s26  ;;  %v8589_v14 = vpop.permute.xlu1 %8588  ;;  %v13435_v24 = vld [vmem:[%s13761_s8 + $0x58] sm:$0xf] }
 0x2fb   : > { %11097 = vmatmul.mubr.msk.f32.vlgmr.msra.gmra.mrb[24].mxu1 %vm443_vm1, %v12715_v17  ;;  %8342 = vmatprep.mubr.f32.mxu0 %v13858_v25  ;;  %v8606_v15 = vsel %vm8604_vm9, %v8589_v14, %v13279_v13 }
 0x2fc   : > { %11102 = vmatpush1.msk.msra.mxu1 %vm1242_vm3, %v5454_v7  ;;  %5752 = vmatprep.mubr.f32.mxu1 %v13858_v25 }
 0x2fd   : > { %11108 = vmatprep.subr.msk.mxu1 %vm1242_vm3, %v13211_v21  ;;  %11202 = vmatprep.subr.msk.mxu0 %vm1242_vm3, %v8256_v52  ;;  %v8597_v56 = vpop.permute.xlu0 %8596  ;;  %v10694_v21 = vld [vmem:[%s13762_s9] sm:$0xf]  ;;  %v13940_v52 = vld [vmem:[#allocation24_spill] sm:$0xff] }
 0x2fe   : > { %10370 = vrot.lane.b32.xlu1 %v10355_v27, %s11600_s26  ;;  %11198 = vmatmul.mubr.msk.f32.vlgmr.msra.gmra.mrb[24].mxu0 %vm443_vm1, %v13319_v38  ;;  %v13332_v40 = vpop.permute.xlu1 %8592 }
 0x2ff   : > { %11103 = vmatmul.mubr.msk.f32.vlgmr.msra.gmra.mrb[26].mxu1 %vm443_vm1, %v12715_v17  ;;  %11203 = vmatpush1.msk.msra.mxu0 %vm1242_vm3, %v8255_v6  ;;  %v13942_v6 = vld [vmem:[#allocation9_spill] sm:$0xff] }
 0x300   : > { %11109 = vmatpush1.msk.msra.mxu1 %vm1242_vm3, %v13192_v20  ;;  %5935 = vmatprep.mubr.f32.mxu1 %v13858_v25  ;;  %v13932_v20 = vld [vmem:[#allocation35_spill] sm:$0xff] }
 0x301   : > { %11114 = vmatprep.subr.msk.mxu1 %vm1242_vm3, %v10355_v27  ;;  %11209 = vmatprep.subr.msk.mxu0 %vm1242_vm3, %v8606_v15  ;;  %v13345_v41 = vpop.permute.xlu0 %8600  ;;  %v6130_v50 = vsel %vm6126_vm0, %v13932_v20, %v13890_v32  ;;  %v6129_v3 = vsel %vm6126_vm0, %v13884_v31, %v13932_v20  ;;  %v13941_v27 = vld [vmem:[#allocation7_spill] sm:$0xff] }
 0x302   : > { %8484 = vmatprep.mubr.f32.mxu0 %v13858_v25  ;;  %10697 = vperm.xlu1 %11542, %v10694_v21  }
 0x303   : > { %11110 = vmatmul.mubr.msk.f32.vlgmr.msra.gmra.mrb[24].mxu1 %vm443_vm1, %v12773_v1  ;;  %v8587_v17 = vpop.permute.xlu1 %8586  ;;  %11204 = vmatmul.mubr.msk.f32.vlgmr.msra.gmra.mrb[26].mxu0 %vm443_vm1, %v13319_v38 }
 0x304   : > { %11115 = vmatpush1.msk.msra.mxu1 %vm1242_vm3, %v10343_v10  ;;  %6077 = vmatprep.mubr.f32.mxu1 %v13858_v25  ;;  %v8605_v49 = vsel %vm8604_vm9, %v8587_v17, %v8589_v14  ;;  %v6488_v10 = vsel %vm6480_vm2, %v13937_v47, %v13936_v36  ;;  %v6837_v14 = vsel %vm6834_vm5, %v13940_v52, %v13939_v19  ;;  %v13943_v17 = vld [vmem:[#allocation40_spill] sm:$0xff] }
 0x305   : > { %11121 = vmatprep.subr.msk.mxu1 %vm1242_vm3, %v6130_v50  ;;  %11210 = vmatpush1.msk.msra.mxu0 %vm1242_vm3, %v8605_v49  ;;  %v13945_v49 = vld [vmem:[#allocation20_spill] sm:$0xff] }
 0x306   : > { %8696 = vmatprep.mubr.f32.mxu0 %v13858_v25 }
 0x307   : > { %11116 = vmatmul.mubr.msk.f32.vlgmr.msra.gmra.mrb[26].mxu1 %vm443_vm1, %v12773_v1  ;;  %v8943_v32 = vpop.permute.xlu0 %8942  ;;  %11211 = vmatmul.mubr.msk.f32.vlgmr.msra.gmra.mrb[24].mxu0 %vm443_vm1, %v13361_v9  ;;  %v8609_v1 = vsel %vm8604_vm9, %v13305_v18, %v8597_v56 }
 0x308   : > { %11122 = vmatpush1.msk.msra.mxu1 %vm1242_vm3, %v6129_v3  ;;  %6289 = vmatprep.mubr.f32.mxu1 %v13858_v25  ;;  %v13378_v33 = vpop.permute.xlu1 %8598 }
 0x309   : > { %11127 = vmatprep.subr.msk.mxu1 %vm1242_vm3, %v6134_v51  ;;  %v8610_v31 = vsel %vm8604_vm9, %v8597_v56, %v13378_v33  ;;  %8838 = vmatprep.mubr.f32.mxu0 %v13858_v25  ;;  %v6842_v56 = vsel %vm6834_vm5, %v13942_v6, %v13941_v27 }
 0x30a   : > { %11215 = vmatprep.subr.msk.mxu0 %vm1242_vm3, %v8610_v31 }
 0x30b   : > { %11123 = vmatmul.mubr.msk.f32.vlgmr.msra.gmra.mrb[24].mxu1 %vm443_vm1, %v12835_v45  ;;  %11216 = vmatpush1.msk.msra.mxu0 %vm1242_vm3, %v8609_v1  ;;  %v13393_v53 = vpop.permute.xlu0 %8946 }
 0x30c   : > { %11128 = vmatpush1.msk.msra.mxu1 %vm1242_vm3, %v6133_v26  ;;  %6431 = vmatprep.mubr.f32.mxu1 %v13858_v25  ;;  %v13400_v42 = vpop.permute.xlu1 %8602 }
 0x30d   : > { %11134 = vmatprep.subr.msk.mxu1 %vm1242_vm3, %v6484_v58  ;;  %11217 = vmatmul.mubr.msk.f32.vlgmr.msra.gmra.mrb[26].mxu0 %vm443_vm1, %v13361_v9 }
 0x30e   : > { %9050 = vmatprep.mubr.f32.mxu0 %v13858_v25 }
 0x30f   : > { %11129 = vmatmul.mubr.msk.f32.vlgmr.msra.gmra.mrb[26].mxu1 %vm443_vm1, %v12835_v45 }
 0x310   : > { %11135 = vmatpush1.msk.msra.mxu1 %vm1242_vm3, %v6483_v11  ;;  %6643 = vmatprep.mubr.f32.mxu1 %v13858_v25 }
 0x311   : > { %11140 = vmatprep.subr.msk.mxu1 %vm1242_vm3, %v6488_v10  ;;  %v8941_v2 = vpop.permute.xlu0 %8940 }
 0x312   : > { %v13417_v48 = vpop.permute.xlu1 %8944  ;;  %v8959_v45 = vsel %vm8958_vm10, %v8941_v2, %v8943_v32 }
 0x313   : > { %11136 = vmatmul.mubr.msk.f32.vlgmr.msra.gmra.mrb[24].mxu1 %vm443_vm1, %v12908_v62  ;;  %v8960_v55 = vsel %vm8958_vm10, %v8943_v32, %v13417_v48 }
 0x314   : > { %11141 = vmatpush1.msk.msra.mxu1 %vm1242_vm3, %v6487_v63  ;;  %6785 = vmatprep.mubr.f32.mxu1 %v13858_v25 }
 0x315   : > { %11147 = vmatprep.subr.msk.mxu1 %vm1242_vm3, %v6838_v57  ;;  %11222 = vmatprep.subr.msk.mxu0 %vm1242_vm3, %v8960_v55 }
 0x316   : > { %11223 = vmatpush1.msk.msra.mxu0 %vm1242_vm3, %v8959_v45 }
 0x317   : > { %11142 = vmatmul.mubr.msk.f32.vlgmr.msra.gmra.mrb[26].mxu1 %vm443_vm1, %v12908_v62  ;;  %v13445_v44 = vpop.permute.xlu0 %8952  ;;  %v13447_v7 = vpop.permute.xlu1 %8948  ;;  %11224 = vmatmul.mubr.msk.f32.vlgmr.msra.gmra.mrb[24].mxu0 %vm443_vm1, %v13435_v24  ;;  %v6841_v62 = vsel %vm6834_vm5, %v12613_v16, %v13942_v6  ;;  %v13944_v16 = vld [vmem:[#allocation28_spill] sm:$0xff]  ;;  %v11260_v6 = vld [vmem:[%s13761_s8 + $0x64] sm:$0xf] }
 0x318   : > { %11148 = vmatpush1.msk.msra.mxu1 %vm1242_vm3, %v6837_v14  ;;  %6997 = vmatprep.mubr.f32.mxu1 %v13858_v25  ;;  %v8962_v58 = vsel %vm8958_vm10, %v13393_v53, %v13447_v7 }
 0x319   : > { %11153 = vmatprep.subr.msk.mxu1 %vm1242_vm3, %v6842_v56  ;;  %9192 = vmatprep.mubr.f32.mxu0 %v13858_v25 }
 0x31b   : > { %11149 = vmatmul.mubr.msk.f32.vlgmr.msra.gmra.mrb[24].mxu1 %vm443_vm1, %v12970_v34 }
 0x31c   : > { %11154 = vmatpush1.msk.msra.mxu1 %vm1242_vm3, %v6841_v62  ;;  %7139 = vmatprep.mubr.f32.mxu1 %v13858_v25  ;;  %v13465_v15 = vpop.permute.xlu0 %8956  ;;  %v8951_v21 = vpop.permute.xlu1 %8950 }
 0x31d   : > { %11160 = vmatprep.subr.msk.mxu1 %vm1242_vm3, %v13943_v17  ;;  %v8963_v20 = vsel %vm8958_vm10, %v13447_v7, %v8951_v21  ;;  %v8964_v50 = vsel %vm8958_vm10, %v8951_v21, %v13445_v44 }
 0x31e   : > { %11228 = vmatprep.subr.msk.mxu0 %vm1242_vm3, %v8964_v50 }
 0x31f   : > { %11155 = vmatmul.mubr.msk.f32.vlgmr.msra.gmra.mrb[26].mxu1 %vm443_vm1, %v12970_v34  ;;  %11229 = vmatpush1.msk.msra.mxu0 %vm1242_vm3, %v8963_v20  ;;  %v13946_v34 = vld [vmem:[#allocation26_spill] sm:$0xff] }
 0x320   : > { %11161 = vmatpush1.msk.msra.mxu1 %vm1242_vm3, %v13944_v16  ;;  %7351 = vmatprep.mubr.f32.mxu1 %v13858_v25 }
 0x321   : > { %11166 = vmatprep.subr.msk.mxu1 %vm1242_vm3, %v13945_v49  ;;  %v13482_v3 = vpop.permute.xlu0 %9298  ;;  %v13484_v32 = vpop.permute.xlu1 %8954  ;;  %11230 = vmatmul.mubr.msk.f32.vlgmr.msra.gmra.mrb[26].mxu0 %vm443_vm1, %v13435_v24 }
 0x322   : > { %9404 = vmatprep.mubr.f32.mxu0 %v13858_v25  ;;  %v8966_v12 = vsel %vm8958_vm10, %v13484_v32, %v13465_v15 }
 0x323   : > { %11162 = vmatmul.mubr.msk.f32.vlgmr.msra.gmra.mrb[24].mxu1 %vm443_vm1, %v13037_v46 }
 0x324   : > { %11167 = vmatpush1.msk.msra.mxu1 %vm1242_vm3, %v13946_v34  ;;  %7493 = vmatprep.mubr.f32.mxu1 %v13858_v25 }
 0x325   : > { %11173 = vmatprep.subr.msk.mxu1 %vm1242_vm3, %v13029_v37 }
 0x326   : > { %v13496_v8 = vpop.permute.xlu0 %9302  ;;  %v9297_v51 = vpop.permute.xlu1 %9296 }
 0x327   : > { %11168 = vmatmul.mubr.msk.f32.vlgmr.msra.gmra.mrb[26].mxu1 %vm443_vm1, %v13037_v46  ;;  %v9314_v31 = vsel %vm9312_vm11, %v9297_v51, %v13482_v3 }
 0x328   : > { %11174 = vmatpush1.msk.msra.mxu1 %vm1242_vm3, %v13002_v5  ;;  %7705 = vmatprep.mubr.f32.mxu1 %v13858_v25 }
 0x329   : > { %11179 = vmatprep.subr.msk.mxu1 %vm1242_vm3, %v13077_v28  ;;  %11235 = vmatprep.subr.msk.mxu0 %vm1242_vm3, %v9314_v31 }
 0x32b   : > { %11175 = vmatmul.mubr.msk.f32.vlgmr.msra.gmra.mrb[24].mxu1 %vm443_vm1, %v13135_v39  ;;  %v9305_v37 = vpop.permute.xlu0 %9304  ;;  %v13510_v1 = vpop.permute.xlu1 %9300 }
 0x32c   : > { %11180 = vmatpush1.msk.msra.mxu1 %vm1242_vm3, %v13074_v4  ;;  %7847 = vmatprep.mubr.f32.mxu1 %v13858_v25  ;;  %v13527_v4 = vld [vmem:[%s13761_s8 + $0x5c] sm:$0xf]  ;;  %v9316_v10 = vsel %vm9312_vm11, %v13510_v1, %v13496_v8 }
 0x32d   : > { %11186 = vmatprep.subr.msk.mxu1 %vm1242_vm3, %v13125_v60 }
 0x32f   : > { %11181 = vmatmul.mubr.msk.f32.vlgmr.msra.gmra.mrb[26].mxu1 %vm443_vm1, %v13135_v39 }
 0x330   : > { %11187 = vmatpush1.msk.msra.mxu1 %vm1242_vm3, %v13121_v29  ;;  %8059 = vmatprep.mubr.f32.mxu1 %v13858_v25  ;;  %v13522_v5 = vpop.permute.xlu0 %9308  ;;  %v9295_v46 = vpop.permute.xlu1 %9294 }
 0x331   : > { %11192 = vmatprep.subr.msk.mxu1 %vm1242_vm3, %v13197_v30  ;;  %v9313_v28 = vsel %vm9312_vm11, %v9295_v46, %v9297_v51 }
 0x332   : > { %11236 = vmatpush1.msk.msra.mxu0 %vm1242_vm3, %v9313_v28 }
 0x333   : > { %11188 = vmatmul.mubr.msk.f32.vlgmr.msra.gmra.mrb[24].mxu1 %vm443_vm1, %v13233_v0  ;;  %11237 = vmatmul.mubr.msk.f32.vlgmr.msra.gmra.mrb[24].mxu0 %vm443_vm1, %v13527_v4 }
 0x334   : > { %11193 = vmatpush1.msk.msra.mxu1 %vm1242_vm3, %v13173_v23  ;;  %8201 = vmatprep.mubr.f32.mxu1 %v13858_v25  ;;  %v9317_v23 = vsel %vm9312_vm11, %v13496_v8, %v9305_v37 }
 0x335   : > { %11199 = vmatprep.subr.msk.mxu1 %vm1242_vm3, %v13248_v59  ;;  %v9651_v29 = vpop.permute.xlu0 %9650  ;;  %v13542_v60 = vpop.permute.xlu1 %9306  ;;  %9546 = vmatprep.mubr.f32.mxu0 %v13858_v25 }
 0x336   : > { %v9318_v39 = vsel %vm9312_vm11, %v9305_v37, %v13542_v60  ;;  %v9319_v19 = vsel %vm9312_vm11, %v13542_v60, %v13522_v5 }
 0x337   : > { %11194 = vmatmul.mubr.msk.f32.vlgmr.msra.gmra.mrb[26].mxu1 %vm443_vm1, %v13233_v0  ;;  %11241 = vmatprep.subr.msk.mxu0 %vm1242_vm3, %v9318_v39 }
 0x338   : > { %11200 = vmatpush1.msk.msra.mxu1 %vm1242_vm3, %v13223_v35  ;;  %8413 = vmatprep.mubr.f32.mxu1 %v13858_v25  ;;  %v8608_v35 = vsel %vm8604_vm9, %v13332_v40, %v13305_v18 }
 0x339   : > { %11205 = vmatprep.subr.msk.mxu1 %vm1242_vm3, %v13296_v43  ;;  %11242 = vmatpush1.msk.msra.mxu0 %vm1242_vm3, %v9317_v23  ;;  %v8607_v43 = vsel %vm8604_vm9, %v13279_v13, %v13332_v40  ;;  %v13587_v13 = vld [vmem:[%s13761_s8 + $0x60] sm:$0xf] }
 0x33a   : > { %v13558_v30 = vpop.permute.xlu0 %9654  ;;  %v9311_v59 = vpop.permute.xlu1 %9310  ;;  %11243 = vmatmul.mubr.msk.f32.vlgmr.msra.gmra.mrb[26].mxu0 %vm443_vm1, %v13527_v4 }
 0x33b   : > { %11201 = vmatmul.mubr.msk.f32.vlgmr.msra.gmra.mrb[24].mxu1 %vm443_vm1, %v13319_v38  ;;  %9758 = vmatprep.mubr.f32.mxu0 %v13858_v25  ;;  %v9320_v63 = vsel %vm9312_vm11, %v13522_v5, %v9311_v59 }
 0x33c   : > { %11206 = vmatpush1.msk.msra.mxu1 %vm1242_vm3, %v13293_v22  ;;  %8555 = vmatprep.mubr.f32.mxu1 %v13858_v25  ;;  %v8612_v22 = vsel %vm8604_vm9, %v13345_v41, %v13400_v42 }
 0x33d   : > { %11212 = vmatprep.subr.msk.mxu1 %vm1242_vm3, %v8608_v35 }
 0x33e   : > { %v9649_v0 = vpop.permute.xlu0 %9648 }
 0x33f   : > { %v9667_v26 = vsel %vm9666_vm12, %v9649_v0, %v9651_v29  ;;  %11207 = vmatmul.mubr.msk.f32.vlgmr.msra.gmra.mrb[26].mxu1 %vm443_vm1, %v13319_v38  ;;  %v9653_v54 = vpop.permute.xlu1 %9652  ;;  %v8611_v38 = vsel %vm8604_vm9, %v13378_v33, %v13345_v41  ;;  %v8961_v41 = vsel %vm8958_vm10, %v13417_v48, %v13393_v53  ;;  %v9315_v48 = vsel %vm9312_vm11, %v13482_v3, %v13510_v1  ;;  %v11273_v1 = vld [vmem:[%s13761_s8 + $0x68] sm:$0xf] }
 0x340   : > { %11213 = vmatpush1.msk.msra.mxu1 %vm1242_vm3, %v8607_v43  ;;  %v9668_v18 = vsel %vm9666_vm12, %v9651_v29, %v9653_v54  ;;  %8767 = vmatprep.mubr.f32.mxu1 %v13858_v25  ;;  %v9669_v14 = vsel %vm9666_vm12, %v9653_v54, %v13558_v30 }
 0x341   : > { %11218 = vmatprep.subr.msk.mxu1 %vm1242_vm3, %v8612_v22  ;;  %11248 = vmatprep.subr.msk.mxu0 %vm1242_vm3, %v9668_v18  ;;  %v13947_v22 = vld [vmem:[#allocation3_spill] sm:$0xff] }
 0x342   : > { %11249 = vmatpush1.msk.msra.mxu0 %vm1242_vm3, %v9667_v26  ;;  %v13948_v18 = vsub.s32 0, %v13947_v22 }
 0x343   : > { %v9661_v40 = vpop.permute.xlu0 %9660  ;;  %11214 = vmatmul.mubr.msk.f32.vlgmr.msra.gmra.mrb[24].mxu1 %vm443_vm1, %v13361_v9  ;;  %11250 = vmatmul.mubr.msk.f32.vlgmr.msra.gmra.mrb[24].mxu0 %vm443_vm1, %v13587_v13 }
 0x344   : > { %11219 = vmatpush1.msk.msra.mxu1 %vm1242_vm3, %v8611_v38  ;;  %v9657_v42 = vpop.permute.xlu1 %9656  ;;  %8909 = vmatprep.mubr.f32.mxu1 %v13858_v25 }
 0x345   : > { %11225 = vmatprep.subr.msk.mxu1 %vm1242_vm3, %v8962_v58  ;;  %9900 = vmatprep.mubr.f32.mxu0 %v13858_v25 }
 0x347   : > { %v9665_v33 = vpop.permute.xlu0 %9664  ;;  %11220 = vmatmul.mubr.msk.f32.vlgmr.msra.gmra.mrb[26].mxu1 %vm443_vm1, %v13361_v9  ;;  %v8965_v9 = vsel %vm8958_vm10, %v13445_v44, %v13484_v32 }
 0x348   : > { %11226 = vmatpush1.msk.msra.mxu1 %vm1242_vm3, %v8961_v41  ;;  %v9659_v11 = vpop.permute.xlu1 %9658  ;;  %9121 = vmatprep.mubr.f32.mxu1 %v13858_v25 }
 0x349   : > { %v9671_v36 = vsel %vm9666_vm12, %v9657_v42, %v9659_v11  ;;  %v9672_v47 = vsel %vm9666_vm12, %v9659_v11, %v9661_v40  ;;  %11231 = vmatprep.subr.msk.mxu1 %vm1242_vm3, %v8966_v12 }
 0x34a   : > { %11254 = vmatprep.subr.msk.mxu0 %vm1242_vm3, %v9672_v47 }
 0x34b   : > { %11255 = vmatpush1.msk.msra.mxu0 %vm1242_vm3, %v9671_v36  ;;  %v10007_v53 = vpop.permute.xlu0 %10006  ;;  %11227 = vmatmul.mubr.msk.f32.vlgmr.msra.gmra.mrb[24].mxu1 %vm443_vm1, %v13435_v24  ;;  %v13950_v36 = vsub.s32 2, %v13947_v22 }
 0x34c   : > { %11232 = vmatpush1.msk.msra.mxu1 %vm1242_vm3, %v8965_v9  ;;  %v9663_v2 = vpop.permute.xlu1 %9662  ;;  %9263 = vmatprep.mubr.f32.mxu1 %v13858_v25 }
 0x34d   : > { %11238 = vmatprep.subr.msk.mxu1 %vm1242_vm3, %v9316_v10  ;;  %11256 = vmatmul.mubr.msk.f32.vlgmr.msra.gmra.mrb[26].mxu0 %vm443_vm1, %v13587_v13  ;;  %v9674_v7 = vsel %vm9666_vm12, %v9663_v2, %v9665_v33  ;;  %v9673_v62 = vsel %vm9666_vm12, %v9661_v40, %v9663_v2  ;;  %v13949_v40 = vsub.s32 1, %v13947_v22  ;;  %v13951_v2 = vsub.s32 3, %v13947_v22 }
 0x34e   : > { %10112 = vmatprep.mubr.f32.mxu0 %v13858_v25 }
 0x34f   : > { %v10011_v61 = vpop.permute.xlu0 %10010  ;;  %11233 = vmatmul.mubr.msk.f32.vlgmr.msra.gmra.mrb[26].mxu1 %vm443_vm1, %v13435_v24  ;;  %v9670_v24 = vsel %vm9666_vm12, %v13558_v30, %v9657_v42 }
 0x350   : > { %11239 = vmatpush1.msk.msra.mxu1 %vm1242_vm3, %v9315_v48  ;;  %v10005_v45 = vpop.permute.xlu1 %10004  ;;  %9475 = vmatprep.mubr.f32.mxu1 %v13858_v25 }
 0x351   : > { %v10022_v55 = vsel %vm10020_vm13, %v10005_v45, %v10007_v53  ;;  %11244 = vmatprep.subr.msk.mxu1 %vm1242_vm3, %v9320_v63 }
 0x352   : > { %11261 = vmatprep.subr.msk.mxu0 %vm1242_vm3, %v10022_v55 }
 0x353   : > { %v10013_v57 = vpop.permute.xlu0 %10012  ;;  %11240 = vmatmul.mubr.msk.f32.vlgmr.msra.gmra.mrb[24].mxu1 %vm443_vm1, %v13527_v4 }
 0x354   : > { %11245 = vmatpush1.msk.msra.mxu1 %vm1242_vm3, %v9319_v19  ;;  %v10009_v52 = vpop.permute.xlu1 %10008  ;;  %9617 = vmatprep.mubr.f32.mxu1 %v13858_v25  ;;  %v10025_v50 = vsel %vm10020_vm13, %v10011_v61, %v10013_v57 }
 0x355   : > { %11251 = vmatprep.subr.msk.mxu1 %vm1242_vm3, %v9670_v24  ;;  %v10024_v21 = vsel %vm10020_vm13, %v10009_v52, %v10011_v61  ;;  %v10023_v16 = vsel %vm10020_vm13, %v10007_v53, %v10009_v52  ;;  %v13952_v24 = vsub.s32 4, %v13947_v22 }
 0x357   : > { %v10017_v44 = vpop.permute.xlu0 %10016  ;;  %11246 = vmatmul.mubr.msk.f32.vlgmr.msra.gmra.mrb[26].mxu1 %vm443_vm1, %v13527_v4 }
 0x358   : > { %11252 = vmatpush1.msk.msra.mxu1 %vm1242_vm3, %v9669_v14  ;;  %v10003_v27 = vpop.permute.xlu1 %10002  ;;  %9829 = vmatprep.mubr.f32.mxu1 %v13858_v25 }
 0x359   : > { %v10021_v56 = vsel %vm10020_vm13, %v10003_v27, %v10005_v45  ;;  %11257 = vmatprep.subr.msk.mxu1 %vm1242_vm3, %v9674_v7  ;;  %v13953_v27 = vsub.s32 5, %v13947_v22 }
 0x35a   : > { %11262 = vmatpush1.msk.msra.mxu0 %vm1242_vm3, %v10021_v56 }
 0x35b   : > { %v10359_v15 = vpop.permute.xlu0 %10358  ;;  %11253 = vmatmul.mubr.msk.f32.vlgmr.msra.gmra.mrb[24].mxu1 %vm443_vm1, %v13587_v13  ;;  %11263 = vmatmul.mubr.msk.f32.vlgmr.msra.gmra.mrb[24].mxu0 %vm443_vm1, %v11260_v6 }
 0x35c   : > { %11258 = vmatpush1.msk.msra.mxu1 %vm1242_vm3, %v9673_v62  ;;  %v10015_v17 = vpop.permute.xlu1 %10014  ;;  %9971 = vmatprep.mubr.f32.mxu1 %v13858_v25 }
 0x35d   : > { %v10026_v20 = vsel %vm10020_vm13, %v10013_v57, %v10015_v17  ;;  %11264 = vmatprep.subr.msk.mxu1 %vm1242_vm3, %v10024_v21  ;;  %10254 = vmatprep.mubr.f32.mxu0 %v13858_v25  ;;  %v10027_v34 = vsel %vm10020_vm13, %v10015_v17, %v10017_v44 }
 0x35e   : > { %11267 = vmatprep.subr.msk.mxu0 %vm1242_vm3, %v10026_v20 }
 0x35f   : > { %11268 = vmatpush1.msk.msra.mxu0 %vm1242_vm3, %v10025_v50  ;;  %v10363_v49 = vpop.permute.xlu0 %10362  ;;  %11259 = vmatmul.mubr.msk.f32.vlgmr.msra.gmra.mrb[26].mxu1 %vm443_vm1, %v13587_v13  ;;  %v13954_v50 = vsub.s32 6, %v13947_v22 }
 0x360   : > { %11265 = vmatpush1.msk.msra.mxu1 %vm1242_vm3, %v10023_v16  ;;  %v10019_v3 = vpop.permute.xlu1 %10018  ;;  %10183 = vmatprep.mubr.f32.mxu1 %v13858_v25 }
 0x361   : > { %v10028_v32 = vsel %vm10020_vm13, %v10017_v44, %v10019_v3  ;;  %11269 = vmatmul.mubr.msk.f32.vlgmr.msra.gmra.mrb[26].mxu0 %vm443_vm1, %v11260_v6  ;;  %v13955_v3 = vsub.s32 7, %v13947_v22 }
 0x362   : > { %11270 = vmatprep.subr.msk.mxu1 %vm1242_vm3, %v10028_v32  ;;  %10466 = vmatprep.mubr.f32.mxu0 %v13858_v25 }
 0x363   : > { %v10357_v8 = vpop.permute.xlu0 %10356  ;;  %11266 = vmatmul.mubr.msk.f32.vlgmr.msra.gmra.mrb[24].mxu1 %vm443_vm1, %v11260_v6 }
 0x364   : > { %v10375_v51 = vsel %vm10374_vm14, %v10357_v8, %v10359_v15  ;;  %11271 = vmatpush1.msk.msra.mxu1 %vm1242_vm3, %v10027_v34  ;;  %v10361_v31 = vpop.permute.xlu1 %10360  ;;  %10325 = vmatprep.mubr.f32.mxu1 %v13858_v25  ;;  %v13956_v34 = vld [vmem:[#allocation4_spill] sm:$0xff] }
 0x365   : > { %v10376_v37 = vsel %vm10374_vm14, %v10359_v15, %v10361_v31  ;;  %v10377_v4 = vsel %vm10374_vm14, %v10361_v31, %v10363_v49 }
 0x366   : > { %11274 = vmatprep.subr.msk.mxu0 %vm1242_vm3, %v10376_v37 }
 0x367   : > { %11275 = vmatpush1.msk.msra.mxu0 %vm1242_vm3, %v10375_v51  ;;  %11272 = vmatmul.mubr.msk.f32.vlgmr.msra.gmra.mrb[26].mxu1 %vm443_vm1, %v11260_v6  ;;  %v10369_v28 = vpop.permute.xlu0 %10368 }
 0x368   : > { %11276 = vmatmul.mubr.msk.f32.vlgmr.msra.gmra.mrb[24].mxu0 %vm443_vm1, %v11273_v1  ;;  %v10365_v5 = vpop.permute.xlu1 %10364  ;;  %10537 = vmatprep.mubr.f32.mxu1 %v13858_v25 }
 0x369   : > { %v10378_v46 = vsel %vm10374_vm14, %v10363_v49, %v10365_v5  ;;  %10608 = vmatprep.mubr.f32.mxu0 %v13858_v25 }
 0x36a   : > { %11277 = vmatprep.subr.msk.mxu1 %vm1242_vm3, %v10378_v46 }
 0x36b   : > { %11278 = vmatpush1.msk.msra.mxu1 %vm1242_vm3, %v10377_v4 }
 0x36c   : > { %11279 = vmatmul.mubr.msk.f32.vlgmr.msra.gmra.mrb[24].mxu1 %vm443_vm1, %v11273_v1  ;;  %v10367_v29 = vpop.permute.xlu1 %10366  ;;  %v10373_v23 = vpop.permute.xlu0 %10372 }
 0x36d   : > { %v10379_v60 = vsel %vm10374_vm14, %v10365_v5, %v10367_v29  ;;  %v10380_v39 = vsel %vm10374_vm14, %v10367_v29, %v10369_v28  ;;  %10679 = vmatprep.mubr.f32.mxu1 %v13858_v25  ;;  %v10716_v25 = vld [vmem:[%s13753_s0] sm:$0xff] }
 0x36e   : > { %11280 = vmatprep.subr.msk.mxu0 %vm1242_vm3, %v10380_v39  ;;  %v10721_v13 = vrot.slane %v10716_v25, %v13948_v18  ;;  %v10725_v58 = vrot.slane %v10716_v25, %v13949_v40  ;;  %v10729_v47 = vrot.slane %v10716_v25, %v13950_v36  ;;  %v10733_v48 = vrot.slane %v10716_v25, %v13951_v2 }
 0x36f   : > { %11281 = vmatpush1.msk.msra.mxu0 %vm1242_vm3, %v10379_v60  ;;  %v10737_v52 = vrot.slane %v10716_v25, %v13952_v24  ;;  %v10741_v6 = vrot.slane %v10716_v25, %v13953_v27  ;;  %v10745_v16 = vrot.slane %v10716_v25, %v13954_v50  ;;  %v10749_v32 = vrot.slane %v10716_v25, %v13955_v3 }
 0x370   : > { %11282 = vmatmul.mubr.msk.f32.vlgmr.msra.gmra.mrb[26].mxu0 %vm443_vm1, %v11273_v1  ;;  %v10371_v30 = vpop.permute.xlu1 %10370 }
 0x371   : > { %v10381_v59 = vsel %vm10374_vm14, %v10369_v28, %v10371_v30  ;;  %v10382_v35 = vsel %vm10374_vm14, %v10371_v30, %v10373_v23 }
 0x372   : > { %11283 = vmatprep.subr.msk.mxu1 %vm1242_vm3, %v10382_v35 }
 0x373   : > { %11284 = vmatpush1.msk.msra.mxu1 %vm1242_vm3, %v10381_v59 }
 0x374   : > { %11285 = vmatmul.mubr.msk.f32.vlgmr.msra.gmra.mrb[26].mxu1 %vm443_vm1, %v11273_v1 }
 0x381   : > { %v10698_v0 = vpop.permute.xlu1 %10697 }
 0x43b   : > { %v10468_v43 = vpop.f32.mrb[24].mxu0 }
 0x43c   : > { %v10470_v26 = vpop.f32.mrb[25].mxu0  ;;  %v10700_v54 = vadd.f32 %v10698_v0, %v10468_v43 }
 0x43d   : > { %v10701_v38 = vadd.f32 %v10698_v0, %v10470_v26 }
 0x43e   : > { %v10708_v42 = vmax.f32 %v10700_v54, 0.0 }
 0x43f   : > { %v10709_v41 = vmax.f32 %v10701_v38, 0.0  ;;  %v10539_v33 = vpop.f32.mrb[24].mxu1 }
 0x440   : > { %v10758_v12 = vmul.f32 %v10721_v13, %v10708_v42  ;;  %v10702_v11 = vadd.f32 %v10698_v0, %v10539_v33  ;;  %v10541_v9 = vpop.f32.mrb[25].mxu1 }
 0x441   : > { %v10759_v53 = vmul.f32 %v10725_v58, %v10709_v41  ;;  %v10703_v10 = vadd.f32 %v10698_v0, %v10541_v9 }
 0x442   : > { %v10710_v61 = vmax.f32 %v10702_v11, 0.0 }
 0x443   : > { %v11286_v63 = vpack.c.bf16 %v10759_v53, %v10758_v12  ;;  %v10711_v45 = vmax.f32 %v10703_v10, 0.0  ;;  %v10610_v55 = vpop.f32.mrb[26].mxu0 }
 0x444   : > { %v10760_v19 = vmul.f32 %v10729_v47, %v10710_v61  ;;  %v10704_v57 = vadd.f32 %v10698_v0, %v10610_v55  ;;  %v10612_v14 = vpop.f32.mrb[27].mxu0 }
 0x445   : > { %v10761_v44 = vmul.f32 %v10733_v48, %v10711_v45  ;;  %v10705_v7 = vadd.f32 %v10698_v0, %v10612_v14  ;;  %v10790_v8 = vrot.slane %v11286_v63, %v13956_v34 }
 0x446   : > { %v10712_v56 = vmax.f32 %v10704_v57, 0.0 }
 0x447   : > { %v11287_v62 = vpack.c.bf16 %v10761_v44, %v10760_v19  ;;  %v10713_v15 = vmax.f32 %v10705_v7, 0.0  ;;  %v10681_v21 = vpop.f32.mrb[26].mxu1 }
 0x448   : > { %v10762_v17 = vmul.f32 %v10737_v52, %v10712_v56  ;;  %v10706_v20 = vadd.f32 %v10698_v0, %v10681_v21  ;;  %v10683_v49 = vpop.f32.mrb[27].mxu1 }
 0x449   : > { %v10797_v51 = vrot.slane %v11287_v62, %v13956_v34  ;;  %v10763_v31 = vmul.f32 %v10741_v6, %v10713_v15  ;;  %v10707_v37 = vadd.f32 %v10698_v0, %v10683_v49 }
 0x44a   : > { %v10714_v1 = vmax.f32 %v10706_v20, 0.0 }
 0x44b   : > { %v10798_v5 = vcombine.low %v10790_v8, %v10797_v51  ;;  %v11288_v46 = vpack.c.bf16 %v10763_v31, %v10762_v17  ;;  %v10715_v4 = vmax.f32 %v10707_v37, 0.0 }
 0x44c   : > { %v10764_v28 = vmul.f32 %v10745_v16, %v10714_v1 }
 0x44d   : > { %10818 = vst [vmem:[%s399_s11] sm:$0xff] %v10798_v5  ;;  %v10765_v29 = vmul.f32 %v10749_v32, %v10715_v4  ;;  %v10807_v39 = vrot.slane %v11288_v46, %v13956_v34 }
 0x44f   : > { %v11289_v60 = vpack.c.bf16 %v10765_v29, %v10764_v28 }
 0x451   : > { %v10814_v23 = vrot.slane %v11289_v60, %v13956_v34 }
 0x453   : > { %v10815_v30 = vcombine.low %v10807_v39, %v10814_v23 }
 0x455   : > { %10819 = vst [vmem:[%s399_s11 + $0x8] sm:$0xff] %v10815_v30 }
 0x456 PF: > { %s20_s13 = sadd.s32 1, %s11570_s13  }
 0x457   : > { %p17_p4 = scmp.ge.s32.totalorder %s20_s13, 4  }
 0x459   :  { %19 = sbr.rel (!%p17_p4) target bundleno = 1 (0x1), region = 122 }

</bundles_post_ra>
